<compile_context>
chip_gen: v5e
topology: v5e:2x2
jax: 0.10.0
libtpu: 0.0.40
codegen_flags: <defaults>
</compile_context>

<pallas_src>
import jax
import jax.numpy as jnp
from jax import lax
from jax.experimental import pallas as pl
from jax.experimental.pallas import tpu as pltpu


def _tc_kernel(xpad_ref, wqk_ref, bqk_ref, wp_ref, bp_ref, o_ref, col_ref):
    Bt, Hp, Wp, C = xpad_ref.shape
    H, W = Hp - 6, Wp - 6
    HW = H * W
    M = Bt * HW
    Ch = C // 2

    # Tap offsets in the pad-3 frame:
    #   dilated 3x3 (dilation=3, padding=3): row/col offsets 0, 3, 6
    #   depthwise 3x3 (padding=1):           row/col offsets 2, 3, 4
    taps = ([(3 * kh, 3 * kw) for kh in range(3) for kw in range(3)]
            + [(2 + kh, 2 + kw) for kh in range(3) for kw in range(3)])

    # ---- im2col into VMEM scratch: (M, 18*C) ----
    for b in range(Bt):
        r0 = b * HW
        for t, (ro, co) in enumerate(taps):
            col_ref[r0:r0 + HW, t * C:(t + 1) * C] = (
                xpad_ref[b, ro:ro + H, co:co + W, :].reshape(HW, C))

    # ---- one fused MXU matmul (K = 18*C):
    #      qk[:, :Ch] = diconv(x) @ wq,  qk[:, Ch:] = dwconv(x) @ wk ----
    qk = (jnp.dot(col_ref[...], wqk_ref[...],
                  preferred_element_type=jnp.float32)
          + bqk_ref[...])                                    # (M, C)

    # ---- channel mean / max of cat([a1q, a2k]) == reductions over all C cols ----
    qk3 = qk.reshape(Bt * H, W, C)                           # leading-dim split only
    mean_hw = jnp.sum(qk3, axis=-1) * (1.0 / C)              # (Bt*H, W)
    max_hw = jnp.max(qk3, axis=-1)                           # (Bt*H, W)

    def _softmax_w(v):                                       # softmax over W (dim=-1)
        m = jnp.max(v, axis=-1, keepdims=True)
        e = jnp.exp(v - m)
        return e / jnp.sum(e, axis=-1, keepdims=True)

    avg_sm = _softmax_w(mean_hw)[:, :, None]                 # (Bt*H, W, 1)
    max_sm = _softmax_w(max_hw)[:, :, None]

    n1 = (avg_sm * qk3[:, :, :Ch]).reshape(M, Ch)            # avg * a1q
    n2 = (max_sm * qk3[:, :, Ch:]).reshape(M, Ch)            # max * a2k

    # ---- proj (1x1 conv) on cat([n1, n2]) without materializing the concat ----
    wp = wp_ref[...]                                         # (Cin, Cout)
    proj = (jnp.dot(n1, wp[:Ch, :], preferred_element_type=jnp.float32)
            + jnp.dot(n2, wp[Ch:, :], preferred_element_type=jnp.float32)
            + bp_ref[...])                                   # (M, C)

    # ---- residual multiply (x is the centre of the padded input) ----
    xc = xpad_ref[:, 3:3 + H, 3:3 + W, :].reshape(M, C)
    o_ref[...] = (xc * proj).reshape(Bt, HW, C).astype(o_ref.dtype)


def _prep_weights(params, C):
    """Torch-layout weights -> fused, matmul-friendly layouts (plain JAX glue)."""
    Ch = C // 2
    wq = params['w_q'].T                                      # (C, Ch)
    wk = params['w_k'].T                                      # (C, Ch)

    # dilated conv weight -> (tap, Cin, Cout_conv), then fold wq into it.
    wdi = jnp.transpose(params['w_di'], (2, 3, 1, 0)).reshape(9, C, C)
    wdi_q = jnp.einsum('tio,oh->tih', wdi, wq).reshape(9 * C, Ch)

    # depthwise weight -> per-tap per-channel scale, then fold wk into it.
    wdw = jnp.transpose(params['w_dw'].reshape(C, 3, 3), (1, 2, 0)).reshape(9, C)
    wdw_k = (wdw[:, :, None] * wk[None, :, :]).reshape(9 * C, Ch)

    # block-diagonal fused weight: rows [0:9C) -> cols [0:Ch) (a1q path),
    #                              rows [9C:18C) -> cols [Ch:C) (a2k path).
    wqk = jnp.zeros((18 * C, C), jnp.float32)
    wqk = wqk.at[:9 * C, :Ch].set(wdi_q)
    wqk = wqk.at[9 * C:, Ch:].set(wdw_k)
    bqk = jnp.concatenate([params['b_di'] @ wq,
                           params['b_dw'] @ wk]).reshape(1, C)

    wp = params['w_p'].reshape(C, C).T                        # (Cin, Cout)
    bp = params['b_p'].reshape(1, C)
    return wqk, bqk, wp, bp


def tc_forward(x_nchw, params):
    """Pallas implementation. x_nchw: (B, C, H, W) float32 -> (B, C, H, W)."""
    B, C, H, W = x_nchw.shape
    x = jnp.transpose(x_nchw, (0, 2, 3, 1)).astype(jnp.float32)   # NHWC
    xpad = jnp.pad(x, ((0, 0), (3, 3), (3, 3), (0, 0)))           # single pad-3 halo

    wqk, bqk, wp, bp = _prep_weights(params, C)

    # >= 2 parallel grid blocks when possible (both v7x TCs get work) while
    # batching B // 2 images per block (amortizes per-step overhead on v5e/v6e).
    Bt = B // 2 if (B >= 2 and B % 2 == 0) else 1
    nb = B // Bt
    HW = H * W

    out = pl.pallas_call(
        _tc_kernel,
        out_shape=jax.ShapeDtypeStruct((B, HW, C), jnp.float32),
        grid=(nb,),
        in_specs=[
            pl.BlockSpec((Bt, H + 6, W + 6, C), lambda b: (b, 0, 0, 0)),  # xpad
            pl.BlockSpec((18 * C, C), lambda b: (0, 0)),                  # wqk
            pl.BlockSpec((1, C), lambda b: (0, 0)),                       # bqk
            pl.BlockSpec((C, C), lambda b: (0, 0)),                       # wp
            pl.BlockSpec((1, C), lambda b: (0, 0)),                       # bp
        ],
        out_specs=pl.BlockSpec((Bt, HW, C), lambda b: (b, 0, 0)),
        scratch_shapes=[pltpu.VMEM((Bt * HW, 18 * C), jnp.float32)],      # im2col
        compiler_params=pltpu.CompilerParams(
            dimension_semantics=("parallel",)),
    )(xpad, wqk, bqk, wp, bp)

    return jnp.transpose(out.reshape(B, H, W, C), (0, 3, 1, 2))           # NCHW


def tc_reference(x_nchw, params):
    """Pure-JAX reference mirroring the PyTorch forward (for verification)."""
    C = x_nchw.shape[1]
    a1 = lax.conv_general_dilated(
        x_nchw, params['w_di'], (1, 1), [(3, 3), (3, 3)],
        rhs_dilation=(3, 3),
        dimension_numbers=('NCHW', 'OIHW', 'NCHW')) \
        + params['b_di'][None, :, None, None]
    a2 = lax.conv_general_dilated(
        x_nchw, params['w_dw'], (1, 1), [(1, 1), (1, 1)],
        dimension_numbers=('NCHW', 'OIHW', 'NCHW'),
        feature_group_count=C) \
        + params['b_dw'][None, :, None, None]
    a1q = jnp.einsum('bchw,dc->bdhw', a1, params['w_q'])
    a2k = jnp.einsum('bchw,dc->bdhw', a2, params['w_k'])
    attn = jnp.concatenate([a1q, a2k], axis=1)
    avg = jax.nn.softmax(jnp.mean(attn, axis=1, keepdims=True), axis=-1)
    mx = jax.nn.softmax(jnp.max(attn, axis=1, keepdims=True), axis=-1)
    n_attn = jnp.concatenate([avg * a1q, mx * a2k], axis=1)
    wp = params['w_p'].reshape(C, C)
    proj = jnp.einsum('bchw,dc->bdhw', n_attn, wp) \
        + params['b_p'][None, :, None, None]
    return x_nchw * proj


if __name__ == "__main__":
    B, dim, H, W = 2, 32, 16, 16

    key = jax.random.PRNGKey(0)
    ks = jax.random.split(key, 10)
    s = 0.05
    params = {
        'w_di': jax.random.normal(ks[0], (dim, dim, 3, 3), jnp.float32) * s,
        'b_di': jax.random.normal(ks[1], (dim,), jnp.float32) * s,
        'w_dw': jax.random.normal(ks[2], (dim, 1, 3, 3), jnp.float32) * s,
        'b_dw': jax.random.normal(ks[3], (dim,), jnp.float32) * s,
        'w_q':  jax.random.normal(ks[4], (dim // 2, dim), jnp.float32) * s,
        'w_k':  jax.random.normal(ks[5], (dim // 2, dim), jnp.float32) * s,
        'w_p':  jax.random.normal(ks[6], (dim, dim, 1, 1), jnp.float32) * s,
        'b_p':  jax.random.normal(ks[7], (dim,), jnp.float32) * s,
    }
    x = jax.random.normal(ks[9], (B, dim, H, W), jnp.float32)

    out = jax.block_until_ready(tc_forward(x, params))
    ref = jax.block_until_ready(tc_reference(x, params))

    assert out.shape == x.shape and out.dtype == x.dtype
    assert jnp.allclose(out, ref, atol=1e-4, rtol=1e-4), \
        f"max abs err {jnp.max(jnp.abs(out - ref))}"
    print("KERNEL_OK")
</pallas_src>

<mosaic_0001>
module attributes {stable_mosaic.version = 11 : i64} {
  func.func @_tc_kernel(%arg0: i32, %arg1: memref<1x22x22x32xf32, #tpu.memory_space<vmem>>, %arg2: memref<576x32xf32, #tpu.memory_space<vmem>>, %arg3: memref<1x32xf32, #tpu.memory_space<vmem>>, %arg4: memref<32x32xf32, #tpu.memory_space<vmem>>, %arg5: memref<1x32xf32, #tpu.memory_space<vmem>>, %arg6: memref<1x256x32xf32, #tpu.memory_space<vmem>>, %arg7: memref<256x576xf32, #tpu.memory_space<vmem>>) attributes {dimension_semantics = [#tpu.dimension_semantics<parallel>], iteration_bounds = array<i64: 2>, scalar_prefetch = 0 : i64, scratch_operands = 1 : i64, tpu.core_type = #tpu.core_type<tc>, window_params = [{transform_indices = @transform_0, window_bounds = array<i64: 1, 22, 22, 32>}, {pipeline_mode = #tpu.pipeline_mode<synchronous>, transform_indices = @transform_1, window_bounds = array<i64: 576, 32>}, {pipeline_mode = #tpu.pipeline_mode<synchronous>, transform_indices = @transform_2, window_bounds = array<i64: 1, 32>}, {pipeline_mode = #tpu.pipeline_mode<synchronous>, transform_indices = @transform_3, window_bounds = array<i64: 32, 32>}, {pipeline_mode = #tpu.pipeline_mode<synchronous>, transform_indices = @transform_4, window_bounds = array<i64: 1, 32>}, {transform_indices = @transform_5, window_bounds = array<i64: 1, 256, 32>}]} {
    %c0 = arith.constant 0 : index
    %c0_0 = arith.constant 0 : index
    %c0_1 = arith.constant 0 : index
    %c0_2 = arith.constant 0 : index
    %0 = vector.load %arg1[%c0, %c0_0, %c0_1, %c0_2] : memref<1x22x22x32xf32, #tpu.memory_space<vmem>>, vector<1x16x16x32xf32>
    %1 = vector.shape_cast %0 : vector<1x16x16x32xf32> to vector<16x16x32xf32>
    %2 = vector.shape_cast %1 : vector<16x16x32xf32> to vector<256x32xf32>
    %c0_3 = arith.constant 0 : index
    %c0_4 = arith.constant 0 : index
    %3 = vector.load %arg7[%c0_3, %c0_4] : memref<256x576xf32, #tpu.memory_space<vmem>>, vector<256x32xf32>
    tpu.vector_store %arg7[%c0_3, %c0_4], %2 {strides = array<i32>} : memref<256x576xf32, #tpu.memory_space<vmem>>, vector<256x32xf32>,
    %c0_5 = arith.constant 0 : index
    %c0_6 = arith.constant 0 : index
    %c3 = arith.constant 3 : index
    %c0_7 = arith.constant 0 : index
    %4 = vector.load %arg1[%c0_5, %c0_6, %c3, %c0_7] : memref<1x22x22x32xf32, #tpu.memory_space<vmem>>, vector<1x16x16x32xf32>
    %5 = vector.shape_cast %4 : vector<1x16x16x32xf32> to vector<16x16x32xf32>
    %6 = vector.shape_cast %5 : vector<16x16x32xf32> to vector<256x32xf32>
    %c0_8 = arith.constant 0 : index
    %c32 = arith.constant 32 : index
    %7 = vector.load %arg7[%c0_8, %c32] : memref<256x576xf32, #tpu.memory_space<vmem>>, vector<256x32xf32>
    tpu.vector_store %arg7[%c0_8, %c32], %6 {strides = array<i32>} : memref<256x576xf32, #tpu.memory_space<vmem>>, vector<256x32xf32>,
    %c0_9 = arith.constant 0 : index
    %c0_10 = arith.constant 0 : index
    %c6 = arith.constant 6 : index
    %c0_11 = arith.constant 0 : index
    %8 = vector.load %arg1[%c0_9, %c0_10, %c6, %c0_11] : memref<1x22x22x32xf32, #tpu.memory_space<vmem>>, vector<1x16x16x32xf32>
    %9 = vector.shape_cast %8 : vector<1x16x16x32xf32> to vector<16x16x32xf32>
    %10 = vector.shape_cast %9 : vector<16x16x32xf32> to vector<256x32xf32>
    %c0_12 = arith.constant 0 : index
    %c64 = arith.constant 64 : index
    %11 = vector.load %arg7[%c0_12, %c64] : memref<256x576xf32, #tpu.memory_space<vmem>>, vector<256x32xf32>
    tpu.vector_store %arg7[%c0_12, %c64], %10 {strides = array<i32>} : memref<256x576xf32, #tpu.memory_space<vmem>>, vector<256x32xf32>,
    %c0_13 = arith.constant 0 : index
    %c3_14 = arith.constant 3 : index
    %c0_15 = arith.constant 0 : index
    %c0_16 = arith.constant 0 : index
    %12 = vector.load %arg1[%c0_13, %c3_14, %c0_15, %c0_16] : memref<1x22x22x32xf32, #tpu.memory_space<vmem>>, vector<1x16x16x32xf32>
    %13 = vector.shape_cast %12 : vector<1x16x16x32xf32> to vector<16x16x32xf32>
    %14 = vector.shape_cast %13 : vector<16x16x32xf32> to vector<256x32xf32>
    %c0_17 = arith.constant 0 : index
    %c96 = arith.constant 96 : index
    %15 = vector.load %arg7[%c0_17, %c96] : memref<256x576xf32, #tpu.memory_space<vmem>>, vector<256x32xf32>
    tpu.vector_store %arg7[%c0_17, %c96], %14 {strides = array<i32>} : memref<256x576xf32, #tpu.memory_space<vmem>>, vector<256x32xf32>,
    %c0_18 = arith.constant 0 : index
    %c3_19 = arith.constant 3 : index
    %c3_20 = arith.constant 3 : index
    %c0_21 = arith.constant 0 : index
    %16 = vector.load %arg1[%c0_18, %c3_19, %c3_20, %c0_21] : memref<1x22x22x32xf32, #tpu.memory_space<vmem>>, vector<1x16x16x32xf32>
    %17 = vector.shape_cast %16 : vector<1x16x16x32xf32> to vector<16x16x32xf32>
    %18 = vector.shape_cast %17 : vector<16x16x32xf32> to vector<256x32xf32>
    %c0_22 = arith.constant 0 : index
    %c128 = arith.constant 128 : index
    %19 = vector.load %arg7[%c0_22, %c128] : memref<256x576xf32, #tpu.memory_space<vmem>>, vector<256x32xf32>
    tpu.vector_store %arg7[%c0_22, %c128], %18 {strides = array<i32>} : memref<256x576xf32, #tpu.memory_space<vmem>>, vector<256x32xf32>,
    %c0_23 = arith.constant 0 : index
    %c3_24 = arith.constant 3 : index
    %c6_25 = arith.constant 6 : index
    %c0_26 = arith.constant 0 : index
    %20 = vector.load %arg1[%c0_23, %c3_24, %c6_25, %c0_26] : memref<1x22x22x32xf32, #tpu.memory_space<vmem>>, vector<1x16x16x32xf32>
    %21 = vector.shape_cast %20 : vector<1x16x16x32xf32> to vector<16x16x32xf32>
    %22 = vector.shape_cast %21 : vector<16x16x32xf32> to vector<256x32xf32>
    %c0_27 = arith.constant 0 : index
    %c160 = arith.constant 160 : index
    %23 = vector.load %arg7[%c0_27, %c160] : memref<256x576xf32, #tpu.memory_space<vmem>>, vector<256x32xf32>
    tpu.vector_store %arg7[%c0_27, %c160], %22 {strides = array<i32>} : memref<256x576xf32, #tpu.memory_space<vmem>>, vector<256x32xf32>,
    %c0_28 = arith.constant 0 : index
    %c6_29 = arith.constant 6 : index
    %c0_30 = arith.constant 0 : index
    %c0_31 = arith.constant 0 : index
    %24 = vector.load %arg1[%c0_28, %c6_29, %c0_30, %c0_31] : memref<1x22x22x32xf32, #tpu.memory_space<vmem>>, vector<1x16x16x32xf32>
    %25 = vector.shape_cast %24 : vector<1x16x16x32xf32> to vector<16x16x32xf32>
    %26 = vector.shape_cast %25 : vector<16x16x32xf32> to vector<256x32xf32>
    %c0_32 = arith.constant 0 : index
    %c192 = arith.constant 192 : index
    %27 = vector.load %arg7[%c0_32, %c192] : memref<256x576xf32, #tpu.memory_space<vmem>>, vector<256x32xf32>
    tpu.vector_store %arg7[%c0_32, %c192], %26 {strides = array<i32>} : memref<256x576xf32, #tpu.memory_space<vmem>>, vector<256x32xf32>,
    %c0_33 = arith.constant 0 : index
    %c6_34 = arith.constant 6 : index
    %c3_35 = arith.constant 3 : index
    %c0_36 = arith.constant 0 : index
    %28 = vector.load %arg1[%c0_33, %c6_34, %c3_35, %c0_36] : memref<1x22x22x32xf32, #tpu.memory_space<vmem>>, vector<1x16x16x32xf32>
    %29 = vector.shape_cast %28 : vector<1x16x16x32xf32> to vector<16x16x32xf32>
    %30 = vector.shape_cast %29 : vector<16x16x32xf32> to vector<256x32xf32>
    %c0_37 = arith.constant 0 : index
    %c224 = arith.constant 224 : index
    %31 = vector.load %arg7[%c0_37, %c224] : memref<256x576xf32, #tpu.memory_space<vmem>>, vector<256x32xf32>
    tpu.vector_store %arg7[%c0_37, %c224], %30 {strides = array<i32>} : memref<256x576xf32, #tpu.memory_space<vmem>>, vector<256x32xf32>,
    %c0_38 = arith.constant 0 : index
    %c6_39 = arith.constant 6 : index
    %c6_40 = arith.constant 6 : index
    %c0_41 = arith.constant 0 : index
    %32 = vector.load %arg1[%c0_38, %c6_39, %c6_40, %c0_41] : memref<1x22x22x32xf32, #tpu.memory_space<vmem>>, vector<1x16x16x32xf32>
    %33 = vector.shape_cast %32 : vector<1x16x16x32xf32> to vector<16x16x32xf32>
    %34 = vector.shape_cast %33 : vector<16x16x32xf32> to vector<256x32xf32>
    %c0_42 = arith.constant 0 : index
    %c256 = arith.constant 256 : index
    %35 = vector.load %arg7[%c0_42, %c256] : memref<256x576xf32, #tpu.memory_space<vmem>>, vector<256x32xf32>
    tpu.vector_store %arg7[%c0_42, %c256], %34 {strides = array<i32>} : memref<256x576xf32, #tpu.memory_space<vmem>>, vector<256x32xf32>,
    %c0_43 = arith.constant 0 : index
    %c2 = arith.constant 2 : index
    %c2_44 = arith.constant 2 : index
    %c0_45 = arith.constant 0 : index
    %36 = vector.load %arg1[%c0_43, %c2, %c2_44, %c0_45] : memref<1x22x22x32xf32, #tpu.memory_space<vmem>>, vector<1x16x16x32xf32>
    %37 = vector.shape_cast %36 : vector<1x16x16x32xf32> to vector<16x16x32xf32>
    %38 = vector.shape_cast %37 : vector<16x16x32xf32> to vector<256x32xf32>
    %c0_46 = arith.constant 0 : index
    %c288 = arith.constant 288 : index
    %39 = vector.load %arg7[%c0_46, %c288] : memref<256x576xf32, #tpu.memory_space<vmem>>, vector<256x32xf32>
    tpu.vector_store %arg7[%c0_46, %c288], %38 {strides = array<i32>} : memref<256x576xf32, #tpu.memory_space<vmem>>, vector<256x32xf32>,
    %c0_47 = arith.constant 0 : index
    %c2_48 = arith.constant 2 : index
    %c3_49 = arith.constant 3 : index
    %c0_50 = arith.constant 0 : index
    %40 = vector.load %arg1[%c0_47, %c2_48, %c3_49, %c0_50] : memref<1x22x22x32xf32, #tpu.memory_space<vmem>>, vector<1x16x16x32xf32>
    %41 = vector.shape_cast %40 : vector<1x16x16x32xf32> to vector<16x16x32xf32>
    %42 = vector.shape_cast %41 : vector<16x16x32xf32> to vector<256x32xf32>
    %c0_51 = arith.constant 0 : index
    %c320 = arith.constant 320 : index
    %43 = vector.load %arg7[%c0_51, %c320] : memref<256x576xf32, #tpu.memory_space<vmem>>, vector<256x32xf32>
    tpu.vector_store %arg7[%c0_51, %c320], %42 {strides = array<i32>} : memref<256x576xf32, #tpu.memory_space<vmem>>, vector<256x32xf32>,
    %c0_52 = arith.constant 0 : index
    %c2_53 = arith.constant 2 : index
    %c4 = arith.constant 4 : index
    %c0_54 = arith.constant 0 : index
    %44 = vector.load %arg1[%c0_52, %c2_53, %c4, %c0_54] : memref<1x22x22x32xf32, #tpu.memory_space<vmem>>, vector<1x16x16x32xf32>
    %45 = vector.shape_cast %44 : vector<1x16x16x32xf32> to vector<16x16x32xf32>
    %46 = vector.shape_cast %45 : vector<16x16x32xf32> to vector<256x32xf32>
    %c0_55 = arith.constant 0 : index
    %c352 = arith.constant 352 : index
    %47 = vector.load %arg7[%c0_55, %c352] : memref<256x576xf32, #tpu.memory_space<vmem>>, vector<256x32xf32>
    tpu.vector_store %arg7[%c0_55, %c352], %46 {strides = array<i32>} : memref<256x576xf32, #tpu.memory_space<vmem>>, vector<256x32xf32>,
    %c0_56 = arith.constant 0 : index
    %c3_57 = arith.constant 3 : index
    %c2_58 = arith.constant 2 : index
    %c0_59 = arith.constant 0 : index
    %48 = vector.load %arg1[%c0_56, %c3_57, %c2_58, %c0_59] : memref<1x22x22x32xf32, #tpu.memory_space<vmem>>, vector<1x16x16x32xf32>
    %49 = vector.shape_cast %48 : vector<1x16x16x32xf32> to vector<16x16x32xf32>
    %50 = vector.shape_cast %49 : vector<16x16x32xf32> to vector<256x32xf32>
    %c0_60 = arith.constant 0 : index
    %c384 = arith.constant 384 : index
    %51 = vector.load %arg7[%c0_60, %c384] : memref<256x576xf32, #tpu.memory_space<vmem>>, vector<256x32xf32>
    tpu.vector_store %arg7[%c0_60, %c384], %50 {strides = array<i32>} : memref<256x576xf32, #tpu.memory_space<vmem>>, vector<256x32xf32>,
    %c0_61 = arith.constant 0 : index
    %c3_62 = arith.constant 3 : index
    %c3_63 = arith.constant 3 : index
    %c0_64 = arith.constant 0 : index
    %52 = vector.load %arg1[%c0_61, %c3_62, %c3_63, %c0_64] : memref<1x22x22x32xf32, #tpu.memory_space<vmem>>, vector<1x16x16x32xf32>
    %53 = vector.shape_cast %52 : vector<1x16x16x32xf32> to vector<16x16x32xf32>
    %54 = vector.shape_cast %53 : vector<16x16x32xf32> to vector<256x32xf32>
    %c0_65 = arith.constant 0 : index
    %c416 = arith.constant 416 : index
    %55 = vector.load %arg7[%c0_65, %c416] : memref<256x576xf32, #tpu.memory_space<vmem>>, vector<256x32xf32>
    tpu.vector_store %arg7[%c0_65, %c416], %54 {strides = array<i32>} : memref<256x576xf32, #tpu.memory_space<vmem>>, vector<256x32xf32>,
    %c0_66 = arith.constant 0 : index
    %c3_67 = arith.constant 3 : index
    %c4_68 = arith.constant 4 : index
    %c0_69 = arith.constant 0 : index
    %56 = vector.load %arg1[%c0_66, %c3_67, %c4_68, %c0_69] : memref<1x22x22x32xf32, #tpu.memory_space<vmem>>, vector<1x16x16x32xf32>
    %57 = vector.shape_cast %56 : vector<1x16x16x32xf32> to vector<16x16x32xf32>
    %58 = vector.shape_cast %57 : vector<16x16x32xf32> to vector<256x32xf32>
    %c0_70 = arith.constant 0 : index
    %c448 = arith.constant 448 : index
    %59 = vector.load %arg7[%c0_70, %c448] : memref<256x576xf32, #tpu.memory_space<vmem>>, vector<256x32xf32>
    tpu.vector_store %arg7[%c0_70, %c448], %58 {strides = array<i32>} : memref<256x576xf32, #tpu.memory_space<vmem>>, vector<256x32xf32>,
    %c0_71 = arith.constant 0 : index
    %c4_72 = arith.constant 4 : index
    %c2_73 = arith.constant 2 : index
    %c0_74 = arith.constant 0 : index
    %60 = vector.load %arg1[%c0_71, %c4_72, %c2_73, %c0_74] : memref<1x22x22x32xf32, #tpu.memory_space<vmem>>, vector<1x16x16x32xf32>
    %61 = vector.shape_cast %60 : vector<1x16x16x32xf32> to vector<16x16x32xf32>
    %62 = vector.shape_cast %61 : vector<16x16x32xf32> to vector<256x32xf32>
    %c0_75 = arith.constant 0 : index
    %c480 = arith.constant 480 : index
    %63 = vector.load %arg7[%c0_75, %c480] : memref<256x576xf32, #tpu.memory_space<vmem>>, vector<256x32xf32>
    tpu.vector_store %arg7[%c0_75, %c480], %62 {strides = array<i32>} : memref<256x576xf32, #tpu.memory_space<vmem>>, vector<256x32xf32>,
    %c0_76 = arith.constant 0 : index
    %c4_77 = arith.constant 4 : index
    %c3_78 = arith.constant 3 : index
    %c0_79 = arith.constant 0 : index
    %64 = vector.load %arg1[%c0_76, %c4_77, %c3_78, %c0_79] : memref<1x22x22x32xf32, #tpu.memory_space<vmem>>, vector<1x16x16x32xf32>
    %65 = vector.shape_cast %64 : vector<1x16x16x32xf32> to vector<16x16x32xf32>
    %66 = vector.shape_cast %65 : vector<16x16x32xf32> to vector<256x32xf32>
    %c0_80 = arith.constant 0 : index
    %c512 = arith.constant 512 : index
    %67 = vector.load %arg7[%c0_80, %c512] : memref<256x576xf32, #tpu.memory_space<vmem>>, vector<256x32xf32>
    tpu.vector_store %arg7[%c0_80, %c512], %66 {strides = array<i32>} : memref<256x576xf32, #tpu.memory_space<vmem>>, vector<256x32xf32>,
    %c0_81 = arith.constant 0 : index
    %c4_82 = arith.constant 4 : index
    %c4_83 = arith.constant 4 : index
    %c0_84 = arith.constant 0 : index
    %68 = vector.load %arg1[%c0_81, %c4_82, %c4_83, %c0_84] : memref<1x22x22x32xf32, #tpu.memory_space<vmem>>, vector<1x16x16x32xf32>
    %69 = vector.shape_cast %68 : vector<1x16x16x32xf32> to vector<16x16x32xf32>
    %70 = vector.shape_cast %69 : vector<16x16x32xf32> to vector<256x32xf32>
    %c0_85 = arith.constant 0 : index
    %c544 = arith.constant 544 : index
    %71 = vector.load %arg7[%c0_85, %c544] : memref<256x576xf32, #tpu.memory_space<vmem>>, vector<256x32xf32>
    tpu.vector_store %arg7[%c0_85, %c544], %70 {strides = array<i32>} : memref<256x576xf32, #tpu.memory_space<vmem>>, vector<256x32xf32>,
    %c0_86 = arith.constant 0 : index
    %c0_87 = arith.constant 0 : index
    %72 = vector.load %arg7[%c0_86, %c0_87] : memref<256x576xf32, #tpu.memory_space<vmem>>, vector<256x576xf32>
    %c0_88 = arith.constant 0 : index
    %c0_89 = arith.constant 0 : index
    %73 = vector.load %arg2[%c0_88, %c0_89] : memref<576x32xf32, #tpu.memory_space<vmem>>, vector<576x32xf32>
    %cst = arith.constant dense<0.000000e+00> : vector<256x32xf32>
    %74 = tpu.matmul %72, %73, %cst {dimension_numbers = #tpu.dot_dimension_numbers<[1], [0], [0], [1], [0, 0, 1, 1], [], []>} : vector<256x576xf32>, vector<576x32xf32>, vector<256x32xf32> -> vector<256x32xf32>
    %c0_90 = arith.constant 0 : index
    %c0_91 = arith.constant 0 : index
    %75 = vector.load %arg3[%c0_90, %c0_91] : memref<1x32xf32, #tpu.memory_space<vmem>>, vector<1x32xf32>
    %76 = vector.broadcast %75 : vector<1x32xf32> to vector<256x32xf32>
    %77 = arith.addf %74, %76 : vector<256x32xf32>
    %78 = vector.shape_cast %77 : vector<256x32xf32> to vector<16x16x32xf32>
    %cst_92 = arith.constant dense<0.000000e+00> : vector<16x16xf32>
    %79 = vector.multi_reduction <add>, %78, %cst_92 [2] : vector<16x16x32xf32> to vector<16x16xf32>
    %cst_93 = arith.constant 3.125000e-02 : f32
    %80 = vector.broadcast %cst_93 : f32 to vector<16x16xf32>
    %81 = arith.mulf %79, %80 : vector<16x16xf32>
    %cst_94 = arith.constant dense<0xFF800000> : vector<16x16xf32>
    %82 = vector.multi_reduction <maximumf>, %78, %cst_94 [2] : vector<16x16x32xf32> to vector<16x16xf32>
    %cst_95 = arith.constant dense<0xFF800000> : vector<16xf32>
    %83 = vector.multi_reduction <maximumf>, %81, %cst_95 [1] : vector<16x16xf32> to vector<16xf32>
    %84 = vector.shape_cast %83 : vector<16xf32> to vector<16x1xf32>
    %85 = vector.broadcast %84 : vector<16x1xf32> to vector<16x16xf32>
    %86 = arith.subf %81, %85 : vector<16x16xf32>
    %87 = math.exp %86 : vector<16x16xf32>
    %cst_96 = arith.constant dense<0.000000e+00> : vector<16xf32>
    %88 = vector.multi_reduction <add>, %87, %cst_96 [1] : vector<16x16xf32> to vector<16xf32>
    %89 = vector.shape_cast %88 : vector<16xf32> to vector<16x1xf32>
    %90 = vector.broadcast %89 : vector<16x1xf32> to vector<16x16xf32>
    %91 = arith.divf %87, %90 : vector<16x16xf32>
    %92 = vector.shape_cast %91 : vector<16x16xf32> to vector<16x16x1xf32>
    %cst_97 = arith.constant dense<0xFF800000> : vector<16xf32>
    %93 = vector.multi_reduction <maximumf>, %82, %cst_97 [1] : vector<16x16xf32> to vector<16xf32>
    %94 = vector.shape_cast %93 : vector<16xf32> to vector<16x1xf32>
    %95 = vector.broadcast %94 : vector<16x1xf32> to vector<16x16xf32>
    %96 = arith.subf %82, %95 : vector<16x16xf32>
    %97 = math.exp %96 : vector<16x16xf32>
    %cst_98 = arith.constant dense<0.000000e+00> : vector<16xf32>
    %98 = vector.multi_reduction <add>, %97, %cst_98 [1] : vector<16x16xf32> to vector<16xf32>
    %99 = vector.shape_cast %98 : vector<16xf32> to vector<16x1xf32>
    %100 = vector.broadcast %99 : vector<16x1xf32> to vector<16x16xf32>
    %101 = arith.divf %97, %100 : vector<16x16xf32>
    %102 = vector.shape_cast %101 : vector<16x16xf32> to vector<16x16x1xf32>
    %103 = vector.extract_strided_slice %78 {offsets = [0, 0, 0], sizes = [16, 16, 16], strides = [1, 1, 1]} : vector<16x16x32xf32> to vector<16x16x16xf32>
    %104 = vector.broadcast %92 : vector<16x16x1xf32> to vector<16x16x16xf32>
    %105 = arith.mulf %104, %103 : vector<16x16x16xf32>
    %106 = vector.shape_cast %105 : vector<16x16x16xf32> to vector<256x16xf32>
    %107 = vector.extract_strided_slice %78 {offsets = [0, 0, 16], sizes = [16, 16, 16], strides = [1, 1, 1]} : vector<16x16x32xf32> to vector<16x16x16xf32>
    %108 = vector.broadcast %102 : vector<16x16x1xf32> to vector<16x16x16xf32>
    %109 = arith.mulf %108, %107 : vector<16x16x16xf32>
    %110 = vector.shape_cast %109 : vector<16x16x16xf32> to vector<256x16xf32>
    %c0_99 = arith.constant 0 : index
    %c0_100 = arith.constant 0 : index
    %111 = vector.load %arg4[%c0_99, %c0_100] : memref<32x32xf32, #tpu.memory_space<vmem>>, vector<32x32xf32>
    %112 = vector.extract_strided_slice %111 {offsets = [0, 0], sizes = [16, 32], strides = [1, 1]} : vector<32x32xf32> to vector<16x32xf32>
    %cst_101 = arith.constant dense<0.000000e+00> : vector<256x32xf32>
    %113 = tpu.matmul %106, %112, %cst_101 {dimension_numbers = #tpu.dot_dimension_numbers<[1], [0], [0], [1], [0, 0, 1, 1], [], []>} : vector<256x16xf32>, vector<16x32xf32>, vector<256x32xf32> -> vector<256x32xf32>
    %114 = vector.extract_strided_slice %111 {offsets = [16, 0], sizes = [16, 32], strides = [1, 1]} : vector<32x32xf32> to vector<16x32xf32>
    %cst_102 = arith.constant dense<0.000000e+00> : vector<256x32xf32>
    %115 = tpu.matmul %110, %114, %cst_102 {dimension_numbers = #tpu.dot_dimension_numbers<[1], [0], [0], [1], [0, 0, 1, 1], [], []>} : vector<256x16xf32>, vector<16x32xf32>, vector<256x32xf32> -> vector<256x32xf32>
    %116 = arith.addf %113, %115 : vector<256x32xf32>
    %c0_103 = arith.constant 0 : index
    %c0_104 = arith.constant 0 : index
    %117 = vector.load %arg5[%c0_103, %c0_104] : memref<1x32xf32, #tpu.memory_space<vmem>>, vector<1x32xf32>
    %118 = vector.broadcast %117 : vector<1x32xf32> to vector<256x32xf32>
    %119 = arith.addf %116, %118 : vector<256x32xf32>
    %c0_105 = arith.constant 0 : index
    %c3_106 = arith.constant 3 : index
    %c3_107 = arith.constant 3 : index
    %c0_108 = arith.constant 0 : index
    %120 = vector.load %arg1[%c0_105, %c3_106, %c3_107, %c0_108] : memref<1x22x22x32xf32, #tpu.memory_space<vmem>>, vector<1x16x16x32xf32>
    %121 = vector.shape_cast %120 : vector<1x16x16x32xf32> to vector<256x32xf32>
    %122 = arith.mulf %121, %119 : vector<256x32xf32>
    %123 = vector.shape_cast %122 : vector<256x32xf32> to vector<1x256x32xf32>
    %c0_109 = arith.constant 0 : index
    %c0_110 = arith.constant 0 : index
    %c0_111 = arith.constant 0 : index
    %124 = vector.load %arg6[%c0_109, %c0_110, %c0_111] : memref<1x256x32xf32, #tpu.memory_space<vmem>>, vector<1x256x32xf32>
    tpu.vector_store %arg6[%c0_109, %c0_110, %c0_111], %123 {strides = array<i32>} : memref<1x256x32xf32, #tpu.memory_space<vmem>>, vector<1x256x32xf32>,
    return
  }
  func.func @transform_0(%arg0: i32) -> (i32, i32, i32, i32) {
    %c0_i32 = arith.constant 0 : i32
    %c0_i32_0 = arith.constant 0 : i32
    %c0_i32_1 = arith.constant 0 : i32
    %c0_i32_2 = arith.constant 0 : i32
    return %arg0, %c0_i32, %c0_i32_0, %c0_i32_1 : i32, i32, i32, i32
  }
  func.func @transform_1(%arg0: i32) -> (i32, i32) {
    %c0_i32 = arith.constant 0 : i32
    %c0_i32_0 = arith.constant 0 : i32
    %c0_i32_1 = arith.constant 0 : i32
    return %c0_i32, %c0_i32_0 : i32, i32
  }
  func.func @transform_2(%arg0: i32) -> (i32, i32) {
    %c0_i32 = arith.constant 0 : i32
    %c0_i32_0 = arith.constant 0 : i32
    %c0_i32_1 = arith.constant 0 : i32
    return %c0_i32, %c0_i32_0 : i32, i32
  }
  func.func @transform_3(%arg0: i32) -> (i32, i32) {
    %c0_i32 = arith.constant 0 : i32
    %c0_i32_0 = arith.constant 0 : i32
    %c0_i32_1 = arith.constant 0 : i32
    return %c0_i32, %c0_i32_0 : i32, i32
  }
  func.func @transform_4(%arg0: i32) -> (i32, i32) {
    %c0_i32 = arith.constant 0 : i32
    %c0_i32_0 = arith.constant 0 : i32
    %c0_i32_1 = arith.constant 0 : i32
    return %c0_i32, %c0_i32_0 : i32, i32
  }
  func.func @transform_5(%arg0: i32) -> (i32, i32, i32) {
    %c0_i32 = arith.constant 0 : i32
    %c0_i32_0 = arith.constant 0 : i32
    %c0_i32_1 = arith.constant 0 : i32
    return %arg0, %c0_i32, %c0_i32_0 : i32, i32, i32
  }
}

</mosaic_0001>

<bundles_post_ra>
// kernel: tpu_custom_call.1
= control target key start
LH: loop header
LB: loop body
LE: loop exit
PB: predicated region body
PF: predicated region fallthrough
CT: control target
= control target key end

     0   :  { %s7601_s18 = smov 0   ;;  %s11865_s0 = inlined_call_operand.vmem [shape: f32[2,22,22,32], index: 0, kind: input, shape index: {}]   ;;  %s11866_s1 = inlined_call_operand.vmem [shape: f32[576,32], index: 1, kind: input, shape index: {}]   ;;  %s11867_s2 = inlined_call_operand.vmem [shape: f32[1,32], index: 2, kind: input, shape index: {}]   ;;  %s11868_s3 = inlined_call_operand.vmem [shape: f32[32,32], index: 3, kind: input, shape index: {}]   ;;  %s11869_s4 = inlined_call_operand.vmem [shape: f32[1,32], index: 4, kind: input, shape index: {}]   ;;  %s11870_s5 = inlined_call_operand.vmem [shape: f32[2,256,32], index: 5, kind: output, shape index: {}]  }
   0x1 LB: > { %s6680_s19 = sadd.s32 4294967295, %s7564_s18   ;;  %p6684_p0 = scmp.ge.s32.totalorder %s7564_s18, 1  ;;  %s7564_s18 = sphi %s7601_s18, %s15_s18  }
   0x2   : > { %p187_p1 = scmp.lt.s32.totalorder %s7564_s18, 3 }
   0x4   : > { %p188_p2 = pnand %p6684_p0, %p187_p1 }
   0x6   : > { %191 = sbr.rel (%p188_p2) target bundleno = 3009 (0xbc1), region = 40 }
   0xb   : > { %p215_p3 = scmp.lt.s32.totalorder %s6680_s19, 1  ;;  %s7566_s24 = smov 32   ;;  %vm257_vm0 = vcmask 261120   ;;  %vm450_vm1 = vcmask 523520   ;;  %vm643_vm2 = vcmask 785920   ;;  %vm837_vm3 = vcmask 1048320  }
   0xc   : > { %s7567_s25 = smov 64   ;;  %s7568_s26 = smov 96   ;;  %vm3285_vm4 = vcmask 523264   ;;  %vm4208_vm5 = vcmask 130112   ;;  %vm4255_vm6 = vcmask 1041409   ;;  %vm4257_vm7 = vcmask 1042434  }
   0xd   : > { %s12167_s19 = smov (!%p215_p3, %s6680_s19), 1  ;;  %vm4259_vm8 = vcmask 1043459   ;;  %vm4261_vm9 = vcmask 1044484   ;;  %vm4263_vm10 = vcmask 1045509   ;;  %vm4265_vm11 = vcmask 1046534   ;;  %s7570_s16 = smov 112  }
   0xe   : > { %s7347_s20 = smul.u32 528, %s12167_s19  ;;  %vm4267_vm12 = vcmask 1047559   ;;  %vm4278_vm13 = vcmask 130048   ;;  %s7298_s27 = sshll.u32 %s12167_s19, 8 }
  0x10   : > { %s7615_s23 = scalar_lea.vmem %s11865_s0, %s7347_s20 }
  0x11   : > { %v292_v0 = vld [vmem:[%s7615_s23 + $0x1b] sm:$0xff]  ;;  %v290_v1 = vld [vmem:[%s7615_s23 + $0x3] sm:$0xff]  ;;  %v294_v2 = vld [vmem:[%s7615_s23 + $0x33] sm:$0xff] }
  0x12   : > { %358 = vrot.lane.b32.xlu1 %v292_v0, %s7566_s24  ;;  %354 = vrot.lane.b32.xlu0 %v290_v1, %s7566_s24  ;;  %v293_v3 = vld [vmem:[%s7615_s23 + $0x23] sm:$0xff]  ;;  %v291_v4 = vld [vmem:[%s7615_s23 + $0xb] sm:$0xff] }
  0x13   : > { %362 = vrot.lane.b32.xlu2 %v294_v2, %s7566_s24  ;;  %v295_v5 = vld [vmem:[%s7615_s23 + $0x3b] sm:$0xff]  ;;  %v297_v6 = vld [vmem:[%s7615_s23 + $0x53] sm:$0xff]  ;;  %v296_v7 = vld [vmem:[%s7615_s23 + $0x4b] sm:$0xff] }
  0x14   : > { %v298_v8 = vld [vmem:[%s7615_s23 + $0x63] sm:$0xff]  ;;  %v300_v9 = vld [vmem:[%s7615_s23 + $0x7b] sm:$0xff]  ;;  %v299_v10 = vld [vmem:[%s7615_s23 + $0x6b] sm:$0xff] }
  0x15   : > { %v301_v11 = vld [vmem:[%s7615_s23 + $0x83] sm:$0xff]  ;;  %v303_v12 = vld [vmem:[%s7615_s23 + $0x9b] sm:$0xff]  ;;  %v302_v13 = vld [vmem:[%s7615_s23 + $0x93] sm:$0xff] }
  0x16   : > { %v304_v14 = vld [vmem:[%s7615_s23 + $0xab] sm:$0xff]  ;;  %v306_v15 = vld [vmem:[%s7615_s23 + $0xc3] sm:$0xff]  ;;  %v305_v16 = vld [vmem:[%s7615_s23 + $0xb3] sm:$0xff] }
  0x17   : > { %v307_v17 = vld [vmem:[%s7615_s23 + $0xcb] sm:$0xff]  ;;  %v309_v18 = vld [vmem:[%s7615_s23 + $0xe3] sm:$0xff]  ;;  %v308_v19 = vld [vmem:[%s7615_s23 + $0xdb] sm:$0xff] }
  0x18   : > { %v310_v20 = vld [vmem:[%s7615_s23 + $0xf3] sm:$0xff]  ;;  %v312_v21 = vld [vmem:[%s7615_s23 + $0x10b] sm:$0xff]  ;;  %v311_v22 = vld [vmem:[%s7615_s23 + $0xfb] sm:$0xff] }
  0x19   : > { %v313_v23 = vld [vmem:[%s7615_s23 + $0x113] sm:$0xff]  ;;  %v315_v24 = vld [vmem:[%s7615_s23 + $0x12b] sm:$0xff]  ;;  %v314_v25 = vld [vmem:[%s7615_s23 + $0x123] sm:$0xff] }
  0x1a   : > { %360 = vrot.lane.b32.xlu1 %v293_v3, %s7566_s24  ;;  %356 = vrot.lane.b32.xlu0 %v291_v4, %s7566_s24  ;;  %v316_v26 = vld [vmem:[%s7615_s23 + $0x13b] sm:$0xff]  ;;  %v318_v27 = vld [vmem:[%s7615_s23 + $0x153] sm:$0xff] }
  0x1b   : > { %364 = vrot.lane.b32.xlu2 %v295_v5, %s7566_s24  ;;  %v317_v28 = vld [vmem:[%s7615_s23 + $0x143] sm:$0xff]  ;;  %v319_v29 = vld [vmem:[%s7615_s23 + $0x15b] sm:$0xff]  ;;  %v321_v30 = vld [vmem:[%s7615_s23 + $0x173] sm:$0xff] }
  0x1c   : > { %v320_v31 = vld [vmem:[%s7615_s23 + $0x16b] sm:$0xff]  ;;  %v225_v33 = vld [vmem:[%s7615_s23] sm:$0xff]  ;;  %v227_v34 = vld [vmem:[%s7615_s23 + $0x18] sm:$0xff] }
  0x1d   : > { %v483_v32 = vld [vmem:[%s7615_s23 + $0x6] sm:$0xff]  ;;  %258 = vst.msk [vmem:[#allocation2] sm:$0xff] %vm257_vm0, %v225_v33  ;;  %v485_v35 = vld [vmem:[%s7615_s23 + $0x1e] sm:$0xff]  ;;  %v484_v36 = vld [vmem:[%s7615_s23 + $0xe] sm:$0xff] }
  0x1e   : > { %260 = vst.msk [vmem:[#allocation2 + $0x50] sm:$0xff] %vm257_vm0, %v227_v34  ;;  %v486_v37 = vld [vmem:[%s7615_s23 + $0x26] sm:$0xff]  ;;  %v229_v38 = vld [vmem:[%s7615_s23 + $0x30] sm:$0xff]  ;;  %v488_v41 = vld [vmem:[%s7615_s23 + $0x3e] sm:$0xff] }
  0x1f   : > { %262 = vst.msk [vmem:[#allocation2 + $0xa0] sm:$0xff] %vm257_vm0, %v229_v38  ;;  %v228_v39 = vld [vmem:[%s7615_s23 + $0x20] sm:$0xff]  ;;  %v226_v40 = vld [vmem:[%s7615_s23 + $0x8] sm:$0xff]  ;;  %v487_v42 = vld [vmem:[%s7615_s23 + $0x36] sm:$0xff] }
  0x20   : > { %261 = vst.msk [vmem:[#allocation2 + $0x78] sm:$0xff] %vm257_vm0, %v228_v39  ;;  %v7705_v44 = vld [vmem:[%s7615_s23 + $0x4e] sm:$0xff]  ;;  %v230_v45 = vld [vmem:[%s7615_s23 + $0x38] sm:$0xff]  ;;  %v7722_v48 = vld [vmem:[%s7615_s23 + $0x66] sm:$0xff] }
  0x21   : > { %259 = vst.msk [vmem:[#allocation2 + $0x28] sm:$0xff] %vm257_vm0, %v226_v40  ;;  %v7710_v46 = vld [vmem:[%s7615_s23 + $0x50] sm:$0xff]  ;;  %v7713_v47 = vld [vmem:[%s7615_s23 + $0x48] sm:$0xff]  ;;  %v7736_v52 = vld [vmem:[%s7615_s23 + $0x60] sm:$0xff] }
  0x22   : > { %368 = vrot.lane.b32.xlu1 %v297_v6, %s7566_s24  ;;  %366 = vrot.lane.b32.xlu0 %v296_v7, %s7566_s24  ;;  %263 = vst.msk [vmem:[#allocation2 + $0xc8] sm:$0xff] %vm257_vm0, %v230_v45  ;;  %v7725_v49 = vld [vmem:[%s7615_s23 + $0x56] sm:$0xff]  ;;  %v7733_v51 = vld [vmem:[%s7615_s23 + $0x6e] sm:$0xff] }
  0x23   : > { %370 = vrot.lane.b32.xlu2 %v298_v8, %s7566_s24  ;;  %265 = vst.msk [vmem:[#allocation2 + $0x118] sm:$0xff] %vm257_vm0, %v7710_v46  ;;  %v7741_v53 = vld [vmem:[%s7615_s23 + $0x78] sm:$0xff]  ;;  %v7744_v54 = vld [vmem:[%s7615_s23 + $0x68] sm:$0xff]  ;;  %v7767_v59 = vld [vmem:[%s7615_s23 + $0x80] sm:$0xff] }
  0x24   : > { %264 = vst.msk [vmem:[#allocation2 + $0xf0] sm:$0xff] %vm257_vm0, %v7713_v47  ;;  %v7753_v55 = vld [vmem:[%s7615_s23 + $0x86] sm:$0xff]  ;;  %v7756_v56 = vld [vmem:[%s7615_s23 + $0x7e] sm:$0xff]  ;;  %v7764_v58 = vld [vmem:[%s7615_s23 + $0x96] sm:$0xff] }
  0x25   : > { %266 = vst.msk [vmem:[#allocation2 + $0x140] sm:$0xff] %vm257_vm0, %v7736_v52  ;;  %v7772_v62 = vld [vmem:[%s7615_s23 + $0x98] sm:$0xff]  ;;  %v7779_v63 = vld [vmem:[%s7615_s23 + $0x90] sm:$0xff]  ;;  %v7800_v4 = vld [vmem:[%s7615_s23 + $0xa8] sm:$0xff] }
  0x26   : > { %268 = vst.msk [vmem:[#allocation2 + $0x190] sm:$0xff] %vm257_vm0, %v7741_v53  ;;  %v7782_v0 = vld [vmem:[%s7615_s23 + $0xae] sm:$0xff]  ;;  %v7785_v1 = vld [vmem:[%s7615_s23 + $0x9e] sm:$0xff]  ;;  %v7797_v3 = vld [vmem:[%s7615_s23 + $0xb6] sm:$0xff] }
  0x27   : > { %267 = vst.msk [vmem:[#allocation2 + $0x168] sm:$0xff] %vm257_vm0, %v7744_v54  ;;  %v7805_v7 = vld [vmem:[%s7615_s23 + $0xc0] sm:$0xff]  ;;  %v7812_v8 = vld [vmem:[%s7615_s23 + $0xb0] sm:$0xff]  ;;  %v7904_v34 = vld [vmem:[%s7615_s23 + $0x128] sm:$0xff] }
  0x28   : > { %269 = vst.msk [vmem:[#allocation2 + $0x1b8] sm:$0xff] %vm257_vm0, %v7767_v59  ;;  %v7929_v39 = vld [vmem:[%s7615_s23 + $0x146] sm:$0xff]  ;;  %v7932_v40 = vld [vmem:[%s7615_s23 + $0x138] sm:$0xff] }
  0x29   : > { %271 = vst.msk [vmem:[#allocation2 + $0x208] sm:$0xff] %vm257_vm0, %v7772_v62  ;;  %v7944_v45 = vld [vmem:[%s7615_s23 + $0x140] sm:$0xff] }
  0x2a   : > { %374 = vrot.lane.b32.xlu1 %v300_v9, %s7566_s24  ;;  %372 = vrot.lane.b32.xlu0 %v299_v10, %s7566_s24  ;;  %270 = vst.msk [vmem:[#allocation2 + $0x1e0] sm:$0xff] %vm257_vm0, %v7779_v63  ;;  %v7815_v9 = vld [vmem:[%s7615_s23 + $0xce] sm:$0xff]  ;;  %v7818_v10 = vld [vmem:[%s7615_s23 + $0xc6] sm:$0xff] }
  0x2b   : > { %376 = vrot.lane.b32.xlu2 %v301_v11, %s7566_s24  ;;  %272 = vst.msk [vmem:[#allocation2 + $0x230] sm:$0xff] %vm257_vm0, %v7800_v4 }
  0x2c   : > { %274 = vst.msk [vmem:[#allocation2 + $0x280] sm:$0xff] %vm257_vm0, %v7805_v7 }
  0x2d   : > { %273 = vst.msk [vmem:[#allocation2 + $0x258] sm:$0xff] %vm257_vm0, %v7812_v8 }
  0x2e   : > { %283 = vst.msk [vmem:[#allocation2 + $0x3e8] sm:$0xff] %vm257_vm0, %v7904_v34 }
  0x2f   : > { %284 = vst.msk [vmem:[#allocation2 + $0x410] sm:$0xff] %vm257_vm0, %v7932_v40 }
  0x30   : > { %285 = vst.msk [vmem:[#allocation2 + $0x438] sm:$0xff] %vm257_vm0, %v7944_v45 }
  0x32   : > { %380 = vrot.lane.b32.xlu1 %v303_v12, %s7566_s24  ;;  %378 = vrot.lane.b32.xlu0 %v302_v13, %s7566_s24  ;;  %v7830_v12 = vld [vmem:[%s7615_s23 + $0xde] sm:$0xff]  ;;  %v7833_v13 = vld [vmem:[%s7615_s23 + $0xc8] sm:$0xff] }
  0x33   : > { %382 = vrot.lane.b32.xlu2 %v304_v14, %s7566_s24  ;;  %275 = vst.msk [vmem:[#allocation2 + $0x2a8] sm:$0xff] %vm257_vm0, %v7833_v13 }
  0x3a   : > { %386 = vrot.lane.b32.xlu1 %v306_v15, %s7566_s24  ;;  %384 = vrot.lane.b32.xlu0 %v305_v16, %s7566_s24  ;;  %v7838_v16 = vld [vmem:[%s7615_s23 + $0xe0] sm:$0xff] }
  0x3b   : > { %388 = vrot.lane.b32.xlu2 %v307_v17, %s7566_s24  ;;  %v7845_v17 = vld [vmem:[%s7615_s23 + $0xd8] sm:$0xff]  ;;  %277 = vst.msk [vmem:[#allocation2 + $0x2f8] sm:$0xff] %vm257_vm0, %v7838_v16 }
  0x3c   : > { %276 = vst.msk [vmem:[#allocation2 + $0x2d0] sm:$0xff] %vm257_vm0, %v7845_v17 }
  0x42   : > { %392 = vrot.lane.b32.xlu1 %v309_v18, %s7566_s24  ;;  %390 = vrot.lane.b32.xlu0 %v308_v19, %s7566_s24  ;;  %v7848_v18 = vld [vmem:[%s7615_s23 + $0xf6] sm:$0xff]  ;;  %v7851_v19 = vld [vmem:[%s7615_s23 + $0xe6] sm:$0xff] }
  0x43   : > { %394 = vrot.lane.b32.xlu2 %v310_v20, %s7566_s24 }
  0x4a   : > { %398 = vrot.lane.b32.xlu1 %v312_v21, %s7566_s24  ;;  %396 = vrot.lane.b32.xlu0 %v311_v22, %s7566_s24  ;;  %v7863_v21 = vld [vmem:[%s7615_s23 + $0xfe] sm:$0xff]  ;;  %v7866_v22 = vld [vmem:[%s7615_s23 + $0xf0] sm:$0xff] }
  0x4b   : > { %400 = vrot.lane.b32.xlu2 %v313_v23, %s7566_s24  ;;  %278 = vst.msk [vmem:[#allocation2 + $0x320] sm:$0xff] %vm257_vm0, %v7866_v22 }
  0x52   : > { %404 = vrot.lane.b32.xlu1 %v315_v24, %s7566_s24  ;;  %402 = vrot.lane.b32.xlu0 %v314_v25, %s7566_s24  ;;  %v7871_v25 = vld [vmem:[%s7615_s23 + $0x108] sm:$0xff] }
  0x53   : > { %406 = vrot.lane.b32.xlu2 %v316_v26, %s7566_s24  ;;  %v7878_v26 = vld [vmem:[%s7615_s23 + $0xf8] sm:$0xff]  ;;  %280 = vst.msk [vmem:[#allocation2 + $0x370] sm:$0xff] %vm257_vm0, %v7871_v25 }
  0x54   : > { %279 = vst.msk [vmem:[#allocation2 + $0x348] sm:$0xff] %vm257_vm0, %v7878_v26 }
  0x5a   : > { %410 = vrot.lane.b32.xlu1 %v318_v27, %s7566_s24  ;;  %408 = vrot.lane.b32.xlu0 %v317_v28, %s7566_s24  ;;  %v7881_v27 = vld [vmem:[%s7615_s23 + $0x116] sm:$0xff]  ;;  %v7884_v28 = vld [vmem:[%s7615_s23 + $0x10e] sm:$0xff] }
  0x5b   : > { %412 = vrot.lane.b32.xlu2 %v319_v29, %s7566_s24 }
  0x62   : > { %416 = vrot.lane.b32.xlu1 %v321_v30, %s7566_s24  ;;  %414 = vrot.lane.b32.xlu0 %v320_v31, %s7566_s24  ;;  %v7896_v30 = vld [vmem:[%s7615_s23 + $0x126] sm:$0xff]  ;;  %v7899_v31 = vld [vmem:[%s7615_s23 + $0x110] sm:$0xff] }
  0x63   : > { %547 = vrot.lane.b32.xlu2 %v483_v32, %s7567_s25  ;;  %281 = vst.msk [vmem:[#allocation2 + $0x398] sm:$0xff] %vm257_vm0, %v7899_v31 }
  0x6a   : > { %551 = vrot.lane.b32.xlu1 %v485_v35, %s7567_s25  ;;  %549 = vrot.lane.b32.xlu0 %v484_v36, %s7567_s25  ;;  %v7911_v35 = vld [vmem:[%s7615_s23 + $0x120] sm:$0xff] }
  0x6b   : > { %553 = vrot.lane.b32.xlu2 %v486_v37, %s7567_s25  ;;  %v7914_v36 = vld [vmem:[%s7615_s23 + $0x13e] sm:$0xff]  ;;  %v7917_v37 = vld [vmem:[%s7615_s23 + $0x12e] sm:$0xff]  ;;  %282 = vst.msk [vmem:[#allocation2 + $0x3c0] sm:$0xff] %vm257_vm0, %v7911_v35 }
  0x6d   : > { %v363_v43 = vpop.permute.xlu2 %362 }
  0x6e   : > { %455 = vst.msk [vmem:[#allocation2 + $0xa0] sm:$0xff] %vm450_vm1, %v363_v43  ;;  %v7937_v43 = vld [vmem:[%s7615_s23 + $0x150] sm:$0xff] }
  0x6f   : > { %286 = vst.msk [vmem:[#allocation2 + $0x460] sm:$0xff] %vm257_vm0, %v7937_v43 }
  0x72   : > { %557 = vrot.lane.b32.xlu1 %v488_v41, %s7567_s25  ;;  %555 = vrot.lane.b32.xlu0 %v487_v42, %s7567_s25 }
  0x73   : > { %559 = vrot.lane.b32.xlu2 %v7705_v44, %s7567_s25 }
  0x75   : > { %v365_v50 = vpop.permute.xlu2 %364 }
  0x76   : > { %456 = vst.msk [vmem:[#allocation2 + $0xc8] sm:$0xff] %vm450_vm1, %v365_v50  ;;  %v7947_v50 = vld [vmem:[%s7615_s23 + $0x15e] sm:$0xff] }
  0x7a   : > { %563 = vrot.lane.b32.xlu1 %v7722_v48, %s7567_s25  ;;  %561 = vrot.lane.b32.xlu0 %v7725_v49, %s7567_s25 }
  0x7b   : > { %565 = vrot.lane.b32.xlu2 %v7733_v51, %s7567_s25 }
  0x7d   : > { %v371_v57 = vpop.permute.xlu2 %370 }
  0x7e   : > { %459 = vst.msk [vmem:[#allocation2 + $0x140] sm:$0xff] %vm450_vm1, %v371_v57  ;;  %v7950_v57 = vld [vmem:[%s7615_s23 + $0x156] sm:$0xff] }
  0x82   : > { %569 = vrot.lane.b32.xlu1 %v7753_v55, %s7567_s25  ;;  %567 = vrot.lane.b32.xlu0 %v7756_v56, %s7567_s25 }
  0x83   : > { %571 = vrot.lane.b32.xlu2 %v7764_v58, %s7567_s25 }
  0x84   : > { %v359_v60 = vpop.permute.xlu1 %358  ;;  %v355_v61 = vpop.permute.xlu0 %354 }
  0x85   : > { %453 = vst.msk [vmem:[#allocation2 + $0x50] sm:$0xff] %vm450_vm1, %v359_v60  ;;  %v377_v2 = vpop.permute.xlu2 %376 }
  0x86   : > { %451 = vst.msk [vmem:[#allocation2] sm:$0xff] %vm450_vm1, %v355_v61  ;;  %v7962_v61 = vld [vmem:[%s7615_s23 + $0x16e] sm:$0xff] }
  0x87   : > { %462 = vst.msk [vmem:[#allocation2 + $0x1b8] sm:$0xff] %vm450_vm1, %v377_v2  ;;  %v7965_v2 = vld [vmem:[%s7615_s23 + $0x158] sm:$0xff] }
  0x88   : > { %287 = vst.msk [vmem:[#allocation2 + $0x488] sm:$0xff] %vm257_vm0, %v7965_v2 }
  0x8a   : > { %575 = vrot.lane.b32.xlu1 %v7782_v0, %s7567_s25  ;;  %573 = vrot.lane.b32.xlu0 %v7785_v1, %s7567_s25 }
  0x8b   : > { %577 = vrot.lane.b32.xlu2 %v7797_v3, %s7567_s25 }
  0x8c   : > { %v361_v5 = vpop.permute.xlu1 %360  ;;  %v357_v6 = vpop.permute.xlu0 %356 }
  0x8d   : > { %454 = vst.msk [vmem:[#allocation2 + $0x78] sm:$0xff] %vm450_vm1, %v361_v5  ;;  %v383_v11 = vpop.permute.xlu2 %382 }
  0x8e   : > { %452 = vst.msk [vmem:[#allocation2 + $0x28] sm:$0xff] %vm450_vm1, %v357_v6 }
  0x8f   : > { %465 = vst.msk [vmem:[#allocation2 + $0x230] sm:$0xff] %vm450_vm1, %v383_v11  ;;  %v7970_v11 = vld [vmem:[%s7615_s23 + $0x170] sm:$0xff] }
  0x90   : > { %289 = vst.msk [vmem:[#allocation2 + $0x4d8] sm:$0xff] %vm257_vm0, %v7970_v11 }
  0x92   : > { %581 = vrot.lane.b32.xlu1 %v7815_v9, %s7567_s25  ;;  %579 = vrot.lane.b32.xlu0 %v7818_v10, %s7567_s25 }
  0x93   : > { %583 = vrot.lane.b32.xlu2 %v7830_v12, %s7567_s25 }
  0x94   : > { %v369_v14 = vpop.permute.xlu1 %368  ;;  %v367_v15 = vpop.permute.xlu0 %366 }
  0x95   : > { %458 = vst.msk [vmem:[#allocation2 + $0x118] sm:$0xff] %vm450_vm1, %v369_v14  ;;  %v389_v20 = vpop.permute.xlu2 %388  ;;  %v7977_v14 = vld [vmem:[%s7615_s23 + $0x168] sm:$0xff] }
  0x96   : > { %457 = vst.msk [vmem:[#allocation2 + $0xf0] sm:$0xff] %vm450_vm1, %v367_v15  ;;  %v7980_v15 = vld [vmem:[%s7615_s23 + $0x176] sm:$0xff] }
  0x97   : > { %468 = vst.msk [vmem:[#allocation2 + $0x2a8] sm:$0xff] %vm450_vm1, %v389_v20 }
  0x98   : > { %288 = vst.msk [vmem:[#allocation2 + $0x4b0] sm:$0xff] %vm257_vm0, %v7977_v14 }
  0x9a   : > { %587 = vrot.lane.b32.xlu1 %v7848_v18, %s7567_s25  ;;  %585 = vrot.lane.b32.xlu0 %v7851_v19, %s7567_s25 }
  0x9b   : > { %589 = vrot.lane.b32.xlu2 %v7863_v21, %s7567_s25 }
  0x9c   : > { %v375_v23 = vpop.permute.xlu1 %374  ;;  %v373_v24 = vpop.permute.xlu0 %372 }
  0x9d   : > { %461 = vst.msk [vmem:[#allocation2 + $0x190] sm:$0xff] %vm450_vm1, %v375_v23  ;;  %v395_v29 = vpop.permute.xlu2 %394 }
  0x9e   : > { %460 = vst.msk [vmem:[#allocation2 + $0x168] sm:$0xff] %vm450_vm1, %v373_v24 }
  0x9f   : > { %471 = vst.msk [vmem:[#allocation2 + $0x320] sm:$0xff] %vm450_vm1, %v395_v29 }
  0xa2   : > { %593 = vrot.lane.b32.xlu1 %v7881_v27, %s7567_s25  ;;  %591 = vrot.lane.b32.xlu0 %v7884_v28, %s7567_s25 }
  0xa3   : > { %595 = vrot.lane.b32.xlu2 %v7896_v30, %s7567_s25 }
  0xa4   : > { %v381_v32 = vpop.permute.xlu1 %380  ;;  %v379_v33 = vpop.permute.xlu0 %378 }
  0xa5   : > { %464 = vst.msk [vmem:[#allocation2 + $0x208] sm:$0xff] %vm450_vm1, %v381_v32  ;;  %v401_v38 = vpop.permute.xlu2 %400 }
  0xa6   : > { %463 = vst.msk [vmem:[#allocation2 + $0x1e0] sm:$0xff] %vm450_vm1, %v379_v33 }
  0xa7   : > { %474 = vst.msk [vmem:[#allocation2 + $0x398] sm:$0xff] %vm450_vm1, %v401_v38 }
  0xaa   : > { %599 = vrot.lane.b32.xlu1 %v7914_v36, %s7567_s25  ;;  %597 = vrot.lane.b32.xlu0 %v7917_v37, %s7567_s25 }
  0xab   : > { %601 = vrot.lane.b32.xlu2 %v7929_v39, %s7567_s25 }
  0xac   : > { %v387_v41 = vpop.permute.xlu1 %386  ;;  %v385_v42 = vpop.permute.xlu0 %384 }
  0xad   : > { %467 = vst.msk [vmem:[#allocation2 + $0x280] sm:$0xff] %vm450_vm1, %v387_v41  ;;  %v407_v60 = vpop.permute.xlu2 %406 }
  0xae   : > { %466 = vst.msk [vmem:[#allocation2 + $0x258] sm:$0xff] %vm450_vm1, %v385_v42 }
  0xaf   : > { %477 = vst.msk [vmem:[#allocation2 + $0x410] sm:$0xff] %vm450_vm1, %v407_v60 }
  0xb2   : > { %605 = vrot.lane.b32.xlu1 %v7947_v50, %s7567_s25  ;;  %603 = vrot.lane.b32.xlu0 %v7950_v57, %s7567_s25 }
  0xb3   : > { %607 = vrot.lane.b32.xlu2 %v7962_v61, %s7567_s25 }
  0xb4   : > { %v393_v5 = vpop.permute.xlu1 %392  ;;  %v391_v6 = vpop.permute.xlu0 %390 }
  0xb5   : > { %470 = vst.msk [vmem:[#allocation2 + $0x2f8] sm:$0xff] %vm450_vm1, %v393_v5  ;;  %v413_v20 = vpop.permute.xlu2 %412 }
  0xb6   : > { %469 = vst.msk [vmem:[#allocation2 + $0x2d0] sm:$0xff] %vm450_vm1, %v391_v6 }
  0xb7   : > { %480 = vst.msk [vmem:[#allocation2 + $0x488] sm:$0xff] %vm450_vm1, %v413_v20 }
  0xba   : > { %741 = vrot.lane.b32.xlu1 %v7713_v47, %s7568_s26  ;;  %609 = vrot.lane.b32.xlu0 %v7980_v15, %s7567_s25 }
  0xbb   : > { %743 = vrot.lane.b32.xlu2 %v7710_v46, %s7568_s26 }
  0xbc   : > { %v399_v23 = vpop.permute.xlu1 %398  ;;  %v397_v24 = vpop.permute.xlu0 %396 }
  0xbd   : > { %473 = vst.msk [vmem:[#allocation2 + $0x370] sm:$0xff] %vm450_vm1, %v399_v23  ;;  %v548_v29 = vpop.permute.xlu2 %547 }
  0xbe   : > { %472 = vst.msk [vmem:[#allocation2 + $0x348] sm:$0xff] %vm450_vm1, %v397_v24 }
  0xbf   : > { %644 = vst.msk [vmem:[#allocation2] sm:$0xff] %vm643_vm2, %v548_v29 }
  0xc2   : > { %747 = vrot.lane.b32.xlu1 %v7744_v54, %s7568_s26  ;;  %745 = vrot.lane.b32.xlu0 %v7736_v52, %s7568_s26 }
  0xc3   : > { %749 = vrot.lane.b32.xlu2 %v7741_v53, %s7568_s26 }
  0xc4   : > { %v405_v47 = vpop.permute.xlu1 %404  ;;  %v403_v32 = vpop.permute.xlu0 %402 }
  0xc5   : > { %476 = vst.msk [vmem:[#allocation2 + $0x3e8] sm:$0xff] %vm450_vm1, %v405_v47  ;;  %v554_v46 = vpop.permute.xlu2 %553 }
  0xc6   : > { %475 = vst.msk [vmem:[#allocation2 + $0x3c0] sm:$0xff] %vm450_vm1, %v403_v32 }
  0xc7   : > { %647 = vst.msk [vmem:[#allocation2 + $0x78] sm:$0xff] %vm643_vm2, %v554_v46  ;;  %v3224_v46 = vld [vmem:[%s11866_s1 + $0x78] sm:$0xff] }
  0xc8   : > { %3382 = vmatpush.msra.mxu0 %v3224_v46  ;;  %7299 = vmatpush.msra.mxu3 %v3224_v46  ;;  %v3215_v46 = vld [vmem:[%s11866_s1 + $0x30] sm:$0xff] }
  0xca   : > { %753 = vrot.lane.b32.xlu1 %v7779_v63, %s7568_s26  ;;  %751 = vrot.lane.b32.xlu0 %v7767_v59, %s7568_s26 }
  0xcb   : > { %755 = vrot.lane.b32.xlu2 %v7772_v62, %s7568_s26 }
  0xcc   : > { %v411_v54 = vpop.permute.xlu1 %410  ;;  %v409_v52 = vpop.permute.xlu0 %408 }
  0xcd   : > { %479 = vst.msk [vmem:[#allocation2 + $0x460] sm:$0xff] %vm450_vm1, %v411_v54  ;;  %v560_v53 = vpop.permute.xlu2 %559  ;;  %v3223_v54 = vld [vmem:[%s11866_s1 + $0x70] sm:$0xff] }
  0xce   : > { %478 = vst.msk [vmem:[#allocation2 + $0x438] sm:$0xff] %vm450_vm1, %v409_v52  ;;  %3383 = vmatpush.msra.mxu0 %v3223_v54  ;;  %7300 = vmatpush.msra.mxu3 %v3223_v54  ;;  %v8116_v54 = vld [vmem:[%s7615_s23 + $0x1b0] sm:$0xff] }
  0xcf   : > { %650 = vst.msk [vmem:[#allocation2 + $0xf0] sm:$0xff] %vm643_vm2, %v560_v53  ;;  %v3222_v53 = vld [vmem:[%s11866_s1 + $0x68] sm:$0xff] }
  0xd0   : > { %3384 = vmatpush.msra.mxu0 %v3222_v53  ;;  %7301 = vmatpush.msra.mxu3 %v3222_v53 }
  0xd2   : > { %759 = vrot.lane.b32.xlu1 %v7812_v8, %s7568_s26  ;;  %757 = vrot.lane.b32.xlu0 %v7800_v4, %s7568_s26 }
  0xd3   : > { %761 = vrot.lane.b32.xlu2 %v7805_v7, %s7568_s26 }
  0xd4   : > { %v417_v33 = vpop.permute.xlu1 %416  ;;  %v415_v59 = vpop.permute.xlu0 %414 }
  0xd5   : > { %482 = vst.msk [vmem:[#allocation2 + $0x4d8] sm:$0xff] %vm450_vm1, %v417_v33  ;;  %v566_v38 = vpop.permute.xlu2 %565  ;;  %v3221_v33 = vld [vmem:[%s11866_s1 + $0x60] sm:$0xff] }
  0xd6   : > { %481 = vst.msk [vmem:[#allocation2 + $0x4b0] sm:$0xff] %vm450_vm1, %v415_v59  ;;  %3385 = vmatpush.msra.mxu0 %v3221_v33  ;;  %7302 = vmatpush.msra.mxu3 %v3221_v33  ;;  %v3214_v33 = vld [vmem:[%s11866_s1 + $0x28] sm:$0xff] }
  0xd7   : > { %653 = vst.msk [vmem:[#allocation2 + $0x168] sm:$0xff] %vm643_vm2, %v566_v38 }
  0xda   : > { %765 = vrot.lane.b32.xlu1 %v7845_v17, %s7568_s26  ;;  %763 = vrot.lane.b32.xlu0 %v7833_v13, %s7568_s26 }
  0xdb   : > { %767 = vrot.lane.b32.xlu2 %v7838_v16, %s7568_s26 }
  0xdc   : > { %v552_v41 = vpop.permute.xlu1 %551  ;;  %v550_v42 = vpop.permute.xlu0 %549 }
  0xdd   : > { %646 = vst.msk [vmem:[#allocation2 + $0x50] sm:$0xff] %vm643_vm2, %v552_v41  ;;  %v572_v60 = vpop.permute.xlu2 %571  ;;  %v3220_v41 = vld [vmem:[%s11866_s1 + $0x58] sm:$0xff] }
  0xde   : > { %645 = vst.msk [vmem:[#allocation2 + $0x28] sm:$0xff] %vm643_vm2, %v550_v42  ;;  %v3219_v42 = vld [vmem:[%s11866_s1 + $0x50] sm:$0xff]  ;;  %3386 = vmatpush.msra.mxu0 %v3220_v41  ;;  %7303 = vmatpush.msra.mxu3 %v3220_v41 }
  0xdf   : > { %656 = vst.msk [vmem:[#allocation2 + $0x1e0] sm:$0xff] %vm643_vm2, %v572_v60  ;;  %v8086_v60 = vld [vmem:[%s7615_s23 + $0x188] sm:$0xff] }
  0xe0   : > { %3387 = vmatpush.msra.mxu0 %v3219_v42  ;;  %7304 = vmatpush.msra.mxu3 %v3219_v42 }
  0xe2   : > { %771 = vrot.lane.b32.xlu1 %v7878_v26, %s7568_s26  ;;  %769 = vrot.lane.b32.xlu0 %v7866_v22, %s7568_s26 }
  0xe3   : > { %773 = vrot.lane.b32.xlu2 %v7871_v25, %s7568_s26 }
  0xe4   : > { %v558_v5 = vpop.permute.xlu1 %557  ;;  %v556_v6 = vpop.permute.xlu0 %555 }
  0xe5   : > { %649 = vst.msk [vmem:[#allocation2 + $0xc8] sm:$0xff] %vm643_vm2, %v558_v5  ;;  %v578_v20 = vpop.permute.xlu2 %577  ;;  %v8089_v5 = vld [vmem:[%s7615_s23 + $0x180] sm:$0xff] }
  0xe6   : > { %648 = vst.msk [vmem:[#allocation2 + $0xa0] sm:$0xff] %vm643_vm2, %v556_v6 }
  0xe7   : > { %659 = vst.msk [vmem:[#allocation2 + $0x258] sm:$0xff] %vm643_vm2, %v578_v20  ;;  %v3218_v20 = vld [vmem:[%s11866_s1 + $0x48] sm:$0xff] }
  0xe8   : > { %3388 = vmatpush.msra.mxu0 %v3218_v20  ;;  %7305 = vmatpush.msra.mxu3 %v3218_v20  ;;  %v3211_v20 = vld [vmem:[%s11866_s1 + $0x10] sm:$0xff] }
  0xea   : > { %777 = vrot.lane.b32.xlu1 %v7911_v35, %s7568_s26  ;;  %775 = vrot.lane.b32.xlu0 %v7899_v31, %s7568_s26 }
  0xeb   : > { %779 = vrot.lane.b32.xlu2 %v7904_v34, %s7568_s26 }
  0xec   : > { %v564_v23 = vpop.permute.xlu1 %563  ;;  %v562_v24 = vpop.permute.xlu0 %561 }
  0xed   : > { %652 = vst.msk [vmem:[#allocation2 + $0x140] sm:$0xff] %vm643_vm2, %v564_v23  ;;  %v584_v29 = vpop.permute.xlu2 %583  ;;  %v8100_v23 = vld [vmem:[%s7615_s23 + $0x198] sm:$0xff] }
  0xee   : > { %651 = vst.msk [vmem:[#allocation2 + $0x118] sm:$0xff] %vm643_vm2, %v562_v24  ;;  %v3217_v24 = vld [vmem:[%s11866_s1 + $0x40] sm:$0xff] }
  0xef   : > { %662 = vst.msk [vmem:[#allocation2 + $0x2d0] sm:$0xff] %vm643_vm2, %v584_v29  ;;  %3389 = vmatpush.msra.mxu0 %v3217_v24  ;;  %7306 = vmatpush.msra.mxu3 %v3217_v24 }
  0xf2   : > { %783 = vrot.lane.b32.xlu1 %v7944_v45, %s7568_s26  ;;  %781 = vrot.lane.b32.xlu0 %v7932_v40, %s7568_s26 }
  0xf3   : > { %785 = vrot.lane.b32.xlu2 %v7937_v43, %s7568_s26 }
  0xf4   : > { %v570_v47 = vpop.permute.xlu1 %569  ;;  %v568_v32 = vpop.permute.xlu0 %567 }
  0xf5   : > { %655 = vst.msk [vmem:[#allocation2 + $0x1b8] sm:$0xff] %vm643_vm2, %v570_v47  ;;  %v590_v52 = vpop.permute.xlu2 %589 }
  0xf6   : > { %654 = vst.msk [vmem:[#allocation2 + $0x190] sm:$0xff] %vm643_vm2, %v568_v32  ;;  %v3216_v32 = vld [vmem:[%s11866_s1 + $0x38] sm:$0xff] }
  0xf7   : > { %665 = vst.msk [vmem:[#allocation2 + $0x348] sm:$0xff] %vm643_vm2, %v590_v52  ;;  %v8119_v52 = vld [vmem:[%s7615_s23 + $0x1a0] sm:$0xff]  ;;  %3390 = vmatpush.msra.mxu0 %v3216_v32  ;;  %7307 = vmatpush.msra.mxu3 %v3216_v32 }
  0xf9   : > { %3391 = vmatpush.msra.mxu0 %v3215_v46  ;;  %7308 = vmatpush.msra.mxu3 %v3215_v46 }
  0xfa   : > { %789 = vrot.lane.b32.xlu1 %v7977_v14, %s7568_s26  ;;  %787 = vrot.lane.b32.xlu0 %v7965_v2, %s7568_s26 }
  0xfb   : > { %791 = vrot.lane.b32.xlu2 %v7970_v11, %s7568_s26  ;;  %3392 = vmatpush.msra.mxu0 %v3214_v33 }
  0xfc   : > { %v576_v59 = vpop.permute.xlu1 %575  ;;  %v574_v38 = vpop.permute.xlu0 %573  ;;  %7309 = vmatpush.msra.mxu3 %v3214_v33 }
  0xfd   : > { %658 = vst.msk [vmem:[#allocation2 + $0x230] sm:$0xff] %vm643_vm2, %v576_v59  ;;  %v596_v6 = vpop.permute.xlu2 %595  ;;  %v8130_v59 = vld [vmem:[%s7615_s23 + $0x1b8] sm:$0xff] }
  0xfe   : > { %657 = vst.msk [vmem:[#allocation2 + $0x208] sm:$0xff] %vm643_vm2, %v574_v38  ;;  %v3213_v38 = vld [vmem:[%s11866_s1 + $0x20] sm:$0xff] }
  0xff   : > { %668 = vst.msk [vmem:[#allocation2 + $0x3c0] sm:$0xff] %vm643_vm2, %v596_v6  ;;  %3393 = vmatpush.msra.mxu0 %v3213_v38  ;;  %v3212_v6 = vld [vmem:[%s11866_s1 + $0x18] sm:$0xff]  ;;  %7310 = vmatpush.msra.mxu3 %v3213_v38 }
 0x101   : > { %3394 = vmatpush.msra.mxu0 %v3212_v6  ;;  %7311 = vmatpush.msra.mxu3 %v3212_v6 }
 0x102   : > { %795 = vrot.lane.b32.xlu1 %v8086_v60, %s7568_s26  ;;  %793 = vrot.lane.b32.xlu0 %v8089_v5, %s7568_s26 }
 0x103   : > { %797 = vrot.lane.b32.xlu2 %v8100_v23, %s7568_s26  ;;  %3395 = vmatpush.msra.mxu0 %v3211_v20 }
 0x104   : > { %v582_v29 = vpop.permute.xlu1 %581  ;;  %v580_v47 = vpop.permute.xlu0 %579  ;;  %7312 = vmatpush.msra.mxu3 %v3211_v20 }
 0x105   : > { %661 = vst.msk [vmem:[#allocation2 + $0x2a8] sm:$0xff] %vm643_vm2, %v582_v29  ;;  %v602_v53 = vpop.permute.xlu2 %601  ;;  %v3210_v29 = vld [vmem:[%s11866_s1 + $0x8] sm:$0xff] }
 0x106   : > { %660 = vst.msk [vmem:[#allocation2 + $0x280] sm:$0xff] %vm643_vm2, %v580_v47  ;;  %v3209_v47 = vld [vmem:[%s11866_s1] sm:$0xff]  ;;  %3396 = vmatpush.msra.mxu0 %v3210_v29  ;;  %7313 = vmatpush.msra.mxu3 %v3210_v29 }
 0x107   : > { %671 = vst.msk [vmem:[#allocation2 + $0x438] sm:$0xff] %vm643_vm2, %v602_v53 }
 0x108   : > { %3397 = vmatpush.msra.mxu0 %v3209_v47  ;;  %7314 = vmatpush.msra.mxu3 %v3209_v47 }
 0x10a   : > { %801 = vrot.lane.b32.xlu1 %v8116_v54, %s7568_s26  ;;  %799 = vrot.lane.b32.xlu0 %v8119_v52, %s7568_s26 }
 0x10b   : > { %803 = vrot.lane.b32.xlu2 %v8130_v59, %s7568_s26 }
 0x10c   : > { %v588_v41 = vpop.permute.xlu1 %587  ;;  %v586_v42 = vpop.permute.xlu0 %585 }
 0x10d   : > { %664 = vst.msk [vmem:[#allocation2 + $0x320] sm:$0xff] %vm643_vm2, %v588_v41  ;;  %v608_v24 = vpop.permute.xlu2 %607 }
 0x10e   : > { %663 = vst.msk [vmem:[#allocation2 + $0x2f8] sm:$0xff] %vm643_vm2, %v586_v42 }
 0x10f   : > { %674 = vst.msk [vmem:[#allocation2 + $0x4b0] sm:$0xff] %vm643_vm2, %v608_v24  ;;  %v6779_v24 = vld [vmem:[%s7615_s23 + $0x18e] sm:$0xff] }
 0x112   : > { %1000 = vrot.lane.b32.xlu1 %v7725_v49, %s7566_s24  ;;  %998 = vrot.lane.b32.xlu0 %v7705_v44, %s7566_s24 }
 0x113   : > { %1002 = vrot.lane.b32.xlu2 %v7722_v48, %s7566_s24 }
 0x114   : > { %v594_v32 = vpop.permute.xlu1 %593  ;;  %v592_v46 = vpop.permute.xlu0 %591 }
 0x115   : > { %667 = vst.msk [vmem:[#allocation2 + $0x398] sm:$0xff] %vm643_vm2, %v594_v32  ;;  %v744_v49 = vpop.permute.xlu2 %743 }
 0x116   : > { %666 = vst.msk [vmem:[#allocation2 + $0x370] sm:$0xff] %vm643_vm2, %v592_v46  ;;  %v6783_v46 = vld [vmem:[%s7615_s23 + $0x1be] sm:$0xff] }
 0x117   : > { %839 = vst.msk [vmem:[#allocation2 + $0x28] sm:$0xff] %vm837_vm3, %v744_v49  ;;  %v6782_v49 = vld [vmem:[%s7615_s23 + $0x1b6] sm:$0xff] }
 0x11a   : > { %1006 = vrot.lane.b32.xlu1 %v7756_v56, %s7566_s24  ;;  %1004 = vrot.lane.b32.xlu0 %v7733_v51, %s7566_s24 }
 0x11b   : > { %1008 = vrot.lane.b32.xlu2 %v7753_v55, %s7566_s24 }
 0x11c   : > { %v600_v44 = vpop.permute.xlu1 %599  ;;  %v598_v53 = vpop.permute.xlu0 %597 }
 0x11d   : > { %670 = vst.msk [vmem:[#allocation2 + $0x410] sm:$0xff] %vm643_vm2, %v600_v44  ;;  %v750_v48 = vpop.permute.xlu2 %749 }
 0x11e   : > { %669 = vst.msk [vmem:[#allocation2 + $0x3e8] sm:$0xff] %vm643_vm2, %v598_v53  ;;  %v6721_v53 = vld [vmem:[%s7615_s23 + $0x53] sm:$0xff] }
 0x11f   : > { %842 = vst.msk [vmem:[#allocation2 + $0xa0] sm:$0xff] %vm837_vm3, %v750_v48 }
 0x120   : > { %903 = vst.msk [vmem:[#allocation2 + $0x30] sm:$0xff] %vm257_vm0, %v6721_v53 }
 0x122   : > { %1012 = vrot.lane.b32.xlu1 %v7785_v1, %s7566_s24  ;;  %1010 = vrot.lane.b32.xlu0 %v7764_v58, %s7566_s24 }
 0x123   : > { %1014 = vrot.lane.b32.xlu2 %v7782_v0, %s7566_s24 }
 0x124   : > { %v606_v51 = vpop.permute.xlu1 %605  ;;  %v604_v56 = vpop.permute.xlu0 %603 }
 0x125   : > { %673 = vst.msk [vmem:[#allocation2 + $0x488] sm:$0xff] %vm643_vm2, %v606_v51  ;;  %v756_v55 = vpop.permute.xlu2 %755 }
 0x126   : > { %672 = vst.msk [vmem:[#allocation2 + $0x460] sm:$0xff] %vm643_vm2, %v604_v56  ;;  %v3069_v20 = vld [vmem:[#allocation2 + $0xa0] sm:$0xff] }
 0x127   : > { %845 = vst.msk [vmem:[#allocation2 + $0x118] sm:$0xff] %vm837_vm3, %v756_v55  ;;  %v6720_v55 = vld [vmem:[%s7615_s23 + $0x4b] sm:$0xff] }
 0x128   : > { %902 = vst.msk [vmem:[#allocation2 + $0x8] sm:$0xff] %vm257_vm0, %v6720_v55 }
 0x12a   : > { %1018 = vrot.lane.b32.xlu1 %v7818_v10, %s7566_s24  ;;  %1016 = vrot.lane.b32.xlu0 %v7797_v3, %s7566_s24 }
 0x12b   : > { %1020 = vrot.lane.b32.xlu2 %v7815_v9, %s7566_s24 }
 0x12c   : > { %v742_v1 = vpop.permute.xlu1 %741  ;;  %v610_v58 = vpop.permute.xlu0 %609 }
 0x12d   : > { %838 = vst.msk [vmem:[#allocation2] sm:$0xff] %vm837_vm3, %v742_v1  ;;  %v762_v0 = vpop.permute.xlu2 %761 }
 0x12e   : > { %675 = vst.msk [vmem:[#allocation2 + $0x4d8] sm:$0xff] %vm643_vm2, %v610_v58  ;;  %v6722_v58 = vld [vmem:[%s7615_s23 + $0x63] sm:$0xff] }
 0x12f   : > { %848 = vst.msk [vmem:[#allocation2 + $0x190] sm:$0xff] %vm837_vm3, %v762_v0  ;;  %v6724_v0 = vld [vmem:[%s7615_s23 + $0x7b] sm:$0xff] }
 0x130   : > { %904 = vst.msk [vmem:[#allocation2 + $0x58] sm:$0xff] %vm257_vm0, %v6722_v58  ;;  %v8421_v58 = vld [vmem:[%s7615_s23 + $0x173] sm:$0xff] }
 0x131   : > { %906 = vst.msk [vmem:[#allocation2 + $0xa8] sm:$0xff] %vm257_vm0, %v6724_v0 }
 0x132   : > { %1024 = vrot.lane.b32.xlu1 %v7851_v19, %s7566_s24  ;;  %1022 = vrot.lane.b32.xlu0 %v7830_v12, %s7566_s24  ;;  %v3054_v12 = vld [vmem:[#allocation2 + $0x28] sm:$0xff]  ;;  %927 = vst.msk [vmem:[#allocation2 + $0x3f0] sm:$0xff] %vm257_vm0, %v8421_v58 }
 0x133   : > { %1026 = vrot.lane.b32.xlu2 %v7848_v18, %s7566_s24 }
 0x134   : > { %v748_v10 = vpop.permute.xlu1 %747  ;;  %v746_v3 = vpop.permute.xlu0 %745  ;;  %v3049_v33 = vld [vmem:[#allocation2] sm:$0xff] }
 0x135   : > { %841 = vst.msk [vmem:[#allocation2 + $0x78] sm:$0xff] %vm837_vm3, %v748_v10  ;;  %3398 = vmatmul.f32.vlgmr.msra.gmra.mxu0 %v3049_v33  ;;  %v768_v9 = vpop.permute.xlu2 %767  ;;  %v6723_v33 = vld [vmem:[%s7615_s23 + $0x6b] sm:$0xff] }
 0x136   : > { %840 = vst.msk [vmem:[#allocation2 + $0x50] sm:$0xff] %vm837_vm3, %v746_v3  ;;  %v3084_v3 = vld [vmem:[#allocation2 + $0x118] sm:$0xff] }
 0x137   : > { %851 = vst.msk [vmem:[#allocation2 + $0x208] sm:$0xff] %vm837_vm3, %v768_v9  ;;  %v8276_v9 = vld [vmem:[%s7615_s23 + $0x9b] sm:$0xff] }
 0x138   : > { %905 = vst.msk [vmem:[#allocation2 + $0x80] sm:$0xff] %vm257_vm0, %v6723_v33 }
 0x139   : > { %909 = vst.msk [vmem:[#allocation2 + $0x120] sm:$0xff] %vm257_vm0, %v8276_v9 }
 0x13a   : > { %1030 = vrot.lane.b32.xlu1 %v7884_v28, %s7566_s24  ;;  %1028 = vrot.lane.b32.xlu0 %v7863_v21, %s7566_s24 }
 0x13b   : > { %1032 = vrot.lane.b32.xlu2 %v7881_v27, %s7566_s24 }
 0x13c   : > { %v754_v19 = vpop.permute.xlu1 %753  ;;  %v752_v38 = vpop.permute.xlu0 %751  ;;  %v3064_v42 = vld [vmem:[#allocation2 + $0x78] sm:$0xff] }
 0x13d   : > { %844 = vst.msk [vmem:[#allocation2 + $0xf0] sm:$0xff] %vm837_vm3, %v754_v19  ;;  %3401 = vmatmul.f32.gmra.mxu0 %v3054_v12  ;;  %v774_v18 = vpop.permute.xlu2 %773  ;;  %v3059_v41 = vld [vmem:[#allocation2 + $0x50] sm:$0xff] }
 0x13e   : > { %843 = vst.msk [vmem:[#allocation2 + $0xc8] sm:$0xff] %vm837_vm3, %v752_v38 }
 0x13f   : > { %854 = vst.msk [vmem:[#allocation2 + $0x280] sm:$0xff] %vm837_vm3, %v774_v18  ;;  %v8282_v18 = vld [vmem:[%s7615_s23 + $0x93] sm:$0xff] }
 0x140   : > { %908 = vst.msk [vmem:[#allocation2 + $0xf8] sm:$0xff] %vm257_vm0, %v8282_v18 }
 0x142   : > { %1036 = vrot.lane.b32.xlu1 %v7917_v37, %s7566_s24  ;;  %1034 = vrot.lane.b32.xlu0 %v7896_v30, %s7566_s24 }
 0x143   : > { %1038 = vrot.lane.b32.xlu2 %v7914_v36, %s7566_s24 }
 0x144   : > { %v760_v21 = vpop.permute.xlu1 %759  ;;  %v758_v28 = vpop.permute.xlu0 %757  ;;  %v3079_v56 = vld [vmem:[#allocation2 + $0xf0] sm:$0xff] }
 0x145   : > { %847 = vst.msk [vmem:[#allocation2 + $0x168] sm:$0xff] %vm837_vm3, %v760_v21  ;;  %3404 = vmatmul.f32.gmra.mxu0 %v3059_v41  ;;  %v780_v27 = vpop.permute.xlu2 %779  ;;  %v3074_v32 = vld [vmem:[#allocation2 + $0xc8] sm:$0xff] }
 0x146   : > { %846 = vst.msk [vmem:[#allocation2 + $0x140] sm:$0xff] %vm837_vm3, %v758_v28  ;;  %v8296_v21 = vld [vmem:[%s7615_s23 + $0xab] sm:$0xff]  ;;  %v8299_v28 = vld [vmem:[%s7615_s23 + $0xc3] sm:$0xff] }
 0x147   : > { %857 = vst.msk [vmem:[#allocation2 + $0x2f8] sm:$0xff] %vm837_vm3, %v780_v27 }
 0x148   : > { %910 = vst.msk [vmem:[#allocation2 + $0x148] sm:$0xff] %vm257_vm0, %v8296_v21 }
 0x149   : > { %912 = vst.msk [vmem:[#allocation2 + $0x198] sm:$0xff] %vm257_vm0, %v8299_v28 }
 0x14a   : > { %1042 = vrot.lane.b32.xlu1 %v7950_v57, %s7566_s24  ;;  %1040 = vrot.lane.b32.xlu0 %v7929_v39, %s7566_s24  ;;  %v6778_v39 = vld [vmem:[%s7615_s23 + $0x186] sm:$0xff] }
 0x14b   : > { %1044 = vrot.lane.b32.xlu2 %v7947_v50, %s7566_s24  ;;  %v6780_v50 = vld [vmem:[%s7615_s23 + $0x19e] sm:$0xff] }
 0x14c   : > { %v766_v30 = vpop.permute.xlu1 %765  ;;  %v764_v37 = vpop.permute.xlu0 %763  ;;  %v3094_v27 = vld [vmem:[#allocation2 + $0x168] sm:$0xff] }
 0x14d   : > { %850 = vst.msk [vmem:[#allocation2 + $0x1e0] sm:$0xff] %vm837_vm3, %v766_v30  ;;  %3407 = vmatmul.f32.gmra.mxu0 %v3064_v42  ;;  %v786_v36 = vpop.permute.xlu2 %785  ;;  %v3089_v19 = vld [vmem:[#allocation2 + $0x140] sm:$0xff]  ;;  %v8320_v30 = vld [vmem:[%s7615_s23 + $0xcb] sm:$0xff] }
 0x14e   : > { %849 = vst.msk [vmem:[#allocation2 + $0x1b8] sm:$0xff] %vm837_vm3, %v764_v37  ;;  %v8323_v37 = vld [vmem:[%s7615_s23 + $0xe3] sm:$0xff] }
 0x14f   : > { %860 = vst.msk [vmem:[#allocation2 + $0x370] sm:$0xff] %vm837_vm3, %v786_v36  ;;  %v3099_v36 = vld [vmem:[#allocation2 + $0x190] sm:$0xff] }
 0x150   : > { %913 = vst.msk [vmem:[#allocation2 + $0x1c0] sm:$0xff] %vm257_vm0, %v8320_v30 }
 0x151   : > { %915 = vst.msk [vmem:[#allocation2 + $0x210] sm:$0xff] %vm257_vm0, %v8323_v37 }
 0x152   : > { %1048 = vrot.lane.b32.xlu1 %v7980_v15, %s7566_s24  ;;  %1046 = vrot.lane.b32.xlu0 %v7962_v61, %s7566_s24  ;;  %v6781_v61 = vld [vmem:[%s7615_s23 + $0x1a6] sm:$0xff] }
 0x153   : > { %1050 = vrot.lane.b32.xlu2 %v6778_v39, %s7566_s24 }
 0x154   : > { %v772_v57 = vpop.permute.xlu1 %771  ;;  %v770_v6 = vpop.permute.xlu0 %769 }
 0x155   : > { %853 = vst.msk [vmem:[#allocation2 + $0x258] sm:$0xff] %vm837_vm3, %v772_v57  ;;  %3410 = vmatmul.f32.gmra.mxu0 %v3069_v20  ;;  %v792_v15 = vpop.permute.xlu2 %791  ;;  %v8344_v57 = vld [vmem:[%s7615_s23 + $0xf3] sm:$0xff] }
 0x156   : > { %852 = vst.msk [vmem:[#allocation2 + $0x230] sm:$0xff] %vm837_vm3, %v770_v6  ;;  %v8347_v6 = vld [vmem:[%s7615_s23 + $0x10b] sm:$0xff] }
 0x157   : > { %863 = vst.msk [vmem:[#allocation2 + $0x3e8] sm:$0xff] %vm837_vm3, %v792_v15  ;;  %v8354_v15 = vld [vmem:[%s7615_s23 + $0xfb] sm:$0xff] }
 0x158   : > { %916 = vst.msk [vmem:[#allocation2 + $0x238] sm:$0xff] %vm257_vm0, %v8344_v57 }
 0x159   : > { %918 = vst.msk [vmem:[#allocation2 + $0x288] sm:$0xff] %vm257_vm0, %v8347_v6 }
 0x15a   : > { %1054 = vrot.lane.b32.xlu1 %v6780_v50, %s7566_s24  ;;  %1052 = vrot.lane.b32.xlu0 %v6779_v24, %s7566_s24  ;;  %v3104_v50 = vld [vmem:[#allocation2 + $0x1b8] sm:$0xff]  ;;  %917 = vst.msk [vmem:[#allocation2 + $0x260] sm:$0xff] %vm257_vm0, %v8354_v15 }
 0x15b   : > { %1056 = vrot.lane.b32.xlu2 %v6781_v61, %s7566_s24 }
 0x15c   : > { %v778_v29 = vpop.permute.xlu1 %777  ;;  %v776_v47 = vpop.permute.xlu0 %775  ;;  %v3124_v33 = vld [vmem:[#allocation2 + $0x258] sm:$0xff] }
 0x15d   : > { %856 = vst.msk [vmem:[#allocation2 + $0x2d0] sm:$0xff] %vm837_vm3, %v778_v29  ;;  %3413 = vmatmul.f32.gmra.mxu0 %v3074_v32  ;;  %v798_v44 = vpop.permute.xlu2 %797  ;;  %v8373_v32 = vld [vmem:[%s7615_s23 + $0x12b] sm:$0xff] }
 0x15e   : > { %855 = vst.msk [vmem:[#allocation2 + $0x2a8] sm:$0xff] %vm837_vm3, %v776_v47  ;;  %v3109_v47 = vld [vmem:[#allocation2 + $0x1e0] sm:$0xff]  ;;  %v3119_v55 = vld [vmem:[#allocation2 + $0x230] sm:$0xff] }
 0x15f   : > { %866 = vst.msk [vmem:[#allocation2 + $0x460] sm:$0xff] %vm837_vm3, %v798_v44  ;;  %v3114_v44 = vld [vmem:[#allocation2 + $0x208] sm:$0xff] }
 0x160   : > { %921 = vst.msk [vmem:[#allocation2 + $0x300] sm:$0xff] %vm257_vm0, %v8373_v32 }
 0x162   : > { %1060 = vrot.lane.b32.xlu1 %v6783_v46, %s7566_s24  ;;  %1058 = vrot.lane.b32.xlu0 %v6782_v49, %s7566_s24  ;;  %v8392_v46 = vld [vmem:[%s7615_s23 + $0x13b] sm:$0xff] }
 0x163   : > { %1191 = vrot.lane.b32.xlu2 %v7779_v63, %s7567_s25  ;;  %922 = vst.msk [vmem:[#allocation2 + $0x328] sm:$0xff] %vm257_vm0, %v8392_v46 }
 0x164   : > { %v784_v48 = vpop.permute.xlu1 %783  ;;  %v782_v51 = vpop.permute.xlu0 %781 }
 0x165   : > { %859 = vst.msk [vmem:[#allocation2 + $0x348] sm:$0xff] %vm837_vm3, %v784_v48  ;;  %3416 = vmatmul.f32.gmra.mxu0 %v3079_v56  ;;  %v804_v1 = vpop.permute.xlu2 %803  ;;  %v8397_v48 = vld [vmem:[%s7615_s23 + $0x153] sm:$0xff] }
 0x166   : > { %858 = vst.msk [vmem:[#allocation2 + $0x320] sm:$0xff] %vm837_vm3, %v782_v51 }
 0x167   : > { %869 = vst.msk [vmem:[#allocation2 + $0x4d8] sm:$0xff] %vm837_vm3, %v804_v1 }
 0x168   : > { %924 = vst.msk [vmem:[#allocation2 + $0x378] sm:$0xff] %vm257_vm0, %v8397_v48 }
 0x16a   : > { %1195 = vrot.lane.b32.xlu1 %v7800_v4, %s7567_s25  ;;  %1193 = vrot.lane.b32.xlu0 %v7772_v62, %s7567_s25  ;;  %v6725_v4 = vld [vmem:[%s7615_s23 + $0x83] sm:$0xff] }
 0x16b   : > { %1197 = vrot.lane.b32.xlu2 %v7812_v8, %s7567_s25  ;;  %907 = vst.msk [vmem:[#allocation2 + $0xd0] sm:$0xff] %vm257_vm0, %v6725_v4  ;;  %v8446_v4 = vld [vmem:[%s7615_s23 + $0x19b] sm:$0xff] }
 0x16c   : > { %v790_v63 = vpop.permute.xlu1 %789  ;;  %v788_v10 = vpop.permute.xlu0 %787  ;;  %930 = vst.msk [vmem:[#allocation2 + $0x468] sm:$0xff] %vm257_vm0, %v8446_v4 }
 0x16d   : > { %862 = vst.msk [vmem:[#allocation2 + $0x3c0] sm:$0xff] %vm837_vm3, %v790_v63  ;;  %3419 = vmatmul.f32.gmra.mxu0 %v3084_v3  ;;  %v1003_v62 = vpop.permute.xlu2 %1002  ;;  %v8441_v63 = vld [vmem:[%s7615_s23 + $0x183] sm:$0xff] }
 0x16e   : > { %861 = vst.msk [vmem:[#allocation2 + $0x398] sm:$0xff] %vm837_vm3, %v788_v10 }
 0x16f   : > { %1096 = vst.msk [vmem:[#allocation2 + $0x58] sm:$0xff] %vm450_vm1, %v1003_v62  ;;  %v3204_v62 = vld [vmem:[#allocation2 + $0x4d8] sm:$0xff] }
 0x170   : > { %928 = vst.msk [vmem:[#allocation2 + $0x418] sm:$0xff] %vm257_vm0, %v8441_v63 }
 0x172   : > { %1201 = vrot.lane.b32.xlu1 %v7833_v13, %s7567_s25  ;;  %1199 = vrot.lane.b32.xlu0 %v7805_v7, %s7567_s25  ;;  %v3174_v13 = vld [vmem:[#allocation2 + $0x3e8] sm:$0xff] }
 0x173   : > { %1203 = vrot.lane.b32.xlu2 %v7845_v17, %s7567_s25 }
 0x174   : > { %v796_v12 = vpop.permute.xlu1 %795  ;;  %v794_v8 = vpop.permute.xlu0 %793  ;;  %v3169_v38 = vld [vmem:[#allocation2 + $0x3c0] sm:$0xff] }
 0x175   : > { %865 = vst.msk [vmem:[#allocation2 + $0x438] sm:$0xff] %vm837_vm3, %v796_v12  ;;  %3422 = vmatmul.f32.gmra.mxu0 %v3089_v19  ;;  %3470 = vmatmul.f32.vlgmr.msra.gmra.mxu3 %v3169_v38  ;;  %v1009_v7 = vpop.permute.xlu2 %1008  ;;  %v6813_v12 = vld [vmem:[%s7615_s23 + $0x1e8] sm:$0xff]  ;;  %v6814_v38 = vld [vmem:[%s7615_s23 + $0x1f8] sm:$0xff] }
 0x176   : > { %864 = vst.msk [vmem:[#allocation2 + $0x410] sm:$0xff] %vm837_vm3, %v794_v8  ;;  %v6812_v8 = vld [vmem:[%s7615_s23 + $0x1e0] sm:$0xff] }
 0x177   : > { %1099 = vst.msk [vmem:[#allocation2 + $0xd0] sm:$0xff] %vm450_vm1, %v1009_v7  ;;  %v8465_v7 = vld [vmem:[%s7615_s23 + $0x1a3] sm:$0xff] }
 0x178   : > { %931 = vst.msk [vmem:[#allocation2 + $0x490] sm:$0xff] %vm257_vm0, %v8465_v7 }
 0x17a   : > { %1207 = vrot.lane.b32.xlu1 %v7866_v22, %s7567_s25  ;;  %1205 = vrot.lane.b32.xlu0 %v7838_v16, %s7567_s25  ;;  %v8306_v22 = vld [vmem:[%s7615_s23 + $0xb3] sm:$0xff] }
 0x17b   : > { %1209 = vrot.lane.b32.xlu2 %v7878_v26, %s7567_s25  ;;  %911 = vst.msk [vmem:[#allocation2 + $0x170] sm:$0xff] %vm257_vm0, %v8306_v22 }
 0x17c   : > { %v802_v17 = vpop.permute.xlu1 %801  ;;  %v800_v41 = vpop.permute.xlu0 %799  ;;  %v3184_v24 = vld [vmem:[#allocation2 + $0x438] sm:$0xff] }
 0x17d   : > { %868 = vst.msk [vmem:[#allocation2 + $0x4b0] sm:$0xff] %vm837_vm3, %v802_v17  ;;  %3425 = vmatmul.f32.gmra.mxu0 %v3094_v27  ;;  %3473 = vmatmul.f32.gmra.mxu3 %v3174_v13  ;;  %v1015_v16 = vpop.permute.xlu2 %1014  ;;  %v3179_v39 = vld [vmem:[#allocation2 + $0x410] sm:$0xff]  ;;  %v8470_v27 = vld [vmem:[%s7615_s23 + $0x1bb] sm:$0xff] }
 0x17e   : > { %867 = vst.msk [vmem:[#allocation2 + $0x488] sm:$0xff] %vm837_vm3, %v800_v41  ;;  %v3129_v41 = vld [vmem:[#allocation2 + $0x280] sm:$0xff] }
 0x17f   : > { %1102 = vst.msk [vmem:[#allocation2 + $0x148] sm:$0xff] %vm450_vm1, %v1015_v16  ;;  %v8476_v16 = vld [vmem:[%s7615_s23 + $0x1b3] sm:$0xff] }
 0x180   : > { %933 = vst.msk [vmem:[#allocation2 + $0x4e0] sm:$0xff] %vm257_vm0, %v8470_v27 }
 0x181   : > { %932 = vst.msk [vmem:[#allocation2 + $0x4b8] sm:$0xff] %vm257_vm0, %v8476_v16 }
 0x182   : > { %1213 = vrot.lane.b32.xlu1 %v7899_v31, %s7567_s25  ;;  %1211 = vrot.lane.b32.xlu0 %v7871_v25, %s7567_s25  ;;  %v8330_v31 = vld [vmem:[%s7615_s23 + $0xdb] sm:$0xff] }
 0x183   : > { %1215 = vrot.lane.b32.xlu2 %v7911_v35, %s7567_s25  ;;  %914 = vst.msk [vmem:[#allocation2 + $0x1e8] sm:$0xff] %vm257_vm0, %v8330_v31 }
 0x184   : > { %v1001_v26 = vpop.permute.xlu1 %1000  ;;  %v999_v42 = vpop.permute.xlu0 %998  ;;  %v3199_v1 = vld [vmem:[#allocation2 + $0x4b0] sm:$0xff] }
 0x185   : > { %1095 = vst.msk [vmem:[#allocation2 + $0x30] sm:$0xff] %vm450_vm1, %v1001_v26  ;;  %3428 = vmatmul.f32.gmra.mxu0 %v3099_v36  ;;  %3476 = vmatmul.f32.gmra.mxu3 %v3179_v39  ;;  %v1021_v25 = vpop.permute.xlu2 %1020  ;;  %v3194_v53 = vld [vmem:[#allocation2 + $0x488] sm:$0xff]  ;;  %v6815_v26 = vld [vmem:[%s7615_s23 + $0x200] sm:$0xff] }
 0x186   : > { %1094 = vst.msk [vmem:[#allocation2 + $0x8] sm:$0xff] %vm450_vm1, %v999_v42 }
 0x187   : > { %1105 = vst.msk [vmem:[#allocation2 + $0x1c0] sm:$0xff] %vm450_vm1, %v1021_v25  ;;  %v3134_v25 = vld [vmem:[#allocation2 + $0x2a8] sm:$0xff] }
 0x18a   : > { %1219 = vrot.lane.b32.xlu1 %v7932_v40, %s7567_s25  ;;  %1217 = vrot.lane.b32.xlu0 %v7904_v34, %s7567_s25  ;;  %v8368_v40 = vld [vmem:[%s7615_s23 + $0x113] sm:$0xff] }
 0x18b   : > { %1221 = vrot.lane.b32.xlu2 %v7944_v45, %s7567_s25  ;;  %v3189_v45 = vld [vmem:[#allocation2 + $0x460] sm:$0xff]  ;;  %919 = vst.msk [vmem:[#allocation2 + $0x2b0] sm:$0xff] %vm257_vm0, %v8368_v40 }
 0x18c   : > { %v1007_v35 = vpop.permute.xlu1 %1006  ;;  %v1005_v20 = vpop.permute.xlu0 %1004 }
 0x18d   : > { %1098 = vst.msk [vmem:[#allocation2 + $0xa8] sm:$0xff] %vm450_vm1, %v1007_v35  ;;  %3431 = vmatmul.f32.gmra.mxu0 %v3104_v50  ;;  %3479 = vmatmul.f32.gmra.mxu3 %v3184_v24  ;;  %v1027_v34 = vpop.permute.xlu2 %1026  ;;  %v3139_v50 = vld [vmem:[#allocation2 + $0x2d0] sm:$0xff]  ;;  %v3144_v24 = vld [vmem:[#allocation2 + $0x2f8] sm:$0xff] }
 0x18e   : > { %1097 = vst.msk [vmem:[#allocation2 + $0x80] sm:$0xff] %vm450_vm1, %v1005_v20 }
 0x18f   : > { %1108 = vst.msk [vmem:[#allocation2 + $0x238] sm:$0xff] %vm450_vm1, %v1027_v34  ;;  %v3149_v34 = vld [vmem:[#allocation2 + $0x320] sm:$0xff] }
 0x192   : > { %1225 = vrot.lane.b32.xlu1 %v7965_v2, %s7567_s25  ;;  %1223 = vrot.lane.b32.xlu0 %v7937_v43, %s7567_s25  ;;  %v8380_v43 = vld [vmem:[%s7615_s23 + $0x123] sm:$0xff] }
 0x193   : > { %1227 = vrot.lane.b32.xlu2 %v7977_v14, %s7567_s25  ;;  %920 = vst.msk [vmem:[#allocation2 + $0x2d8] sm:$0xff] %vm257_vm0, %v8380_v43 }
 0x194   : > { %v1013_v61 = vpop.permute.xlu1 %1012  ;;  %v1011_v29 = vpop.permute.xlu0 %1010 }
 0x195   : > { %1101 = vst.msk [vmem:[#allocation2 + $0x120] sm:$0xff] %vm450_vm1, %v1013_v61  ;;  %3434 = vmatmul.f32.gmra.mxu0 %v3109_v47  ;;  %3482 = vmatmul.f32.gmra.mxu3 %v3189_v45  ;;  %v1033_v2 = vpop.permute.xlu2 %1032  ;;  %v3154_v61 = vld [vmem:[#allocation2 + $0x348] sm:$0xff]  ;;  %v3159_v47 = vld [vmem:[#allocation2 + $0x370] sm:$0xff] }
 0x196   : > { %1100 = vst.msk [vmem:[#allocation2 + $0xf8] sm:$0xff] %vm450_vm1, %v1011_v29 }
 0x197   : > { %1111 = vst.msk [vmem:[#allocation2 + $0x2b0] sm:$0xff] %vm450_vm1, %v1033_v2  ;;  %v3164_v2 = vld [vmem:[#allocation2 + $0x398] sm:$0xff] }
 0x19a   : > { %1231 = vrot.lane.b32.xlu1 %v8089_v5, %s7567_s25  ;;  %1229 = vrot.lane.b32.xlu0 %v7970_v11, %s7567_s25  ;;  %v8404_v11 = vld [vmem:[%s7615_s23 + $0x143] sm:$0xff] }
 0x19b   : > { %1233 = vrot.lane.b32.xlu2 %v8086_v60, %s7567_s25  ;;  %923 = vst.msk [vmem:[#allocation2 + $0x350] sm:$0xff] %vm257_vm0, %v8404_v11  ;;  %v8416_v60 = vld [vmem:[%s7615_s23 + $0x15b] sm:$0xff] }
 0x19c   : > { %v1019_v14 = vpop.permute.xlu1 %1018  ;;  %v1017_v49 = vpop.permute.xlu0 %1016  ;;  %925 = vst.msk [vmem:[#allocation2 + $0x3a0] sm:$0xff] %vm257_vm0, %v8416_v60 }
 0x19d   : > { %1104 = vst.msk [vmem:[#allocation2 + $0x198] sm:$0xff] %vm450_vm1, %v1019_v14  ;;  %3437 = vmatmul.f32.gmra.mxu0 %v3114_v44  ;;  %3485 = vmatmul.f32.gmra.mxu3 %v3194_v53  ;;  %v1039_v5 = vpop.permute.xlu2 %1038  ;;  %v3240_v44 = vld [vmem:[%s11866_s1 + $0xf8] sm:$0xff] }
 0x19e   : > { %1103 = vst.msk [vmem:[#allocation2 + $0x170] sm:$0xff] %vm450_vm1, %v1017_v49  ;;  %3495 = vmatpush.msra.mxu1 %v3240_v44  ;;  %7315 = vmatpush.msrb.mxu3 %v3240_v44 }
 0x19f   : > { %1114 = vst.msk [vmem:[#allocation2 + $0x328] sm:$0xff] %vm450_vm1, %v1039_v5  ;;  %v3237_v5 = vld [vmem:[%s11866_s1 + $0xe0] sm:$0xff] }
 0x1a2   : > { %1237 = vrot.lane.b32.xlu1 %v8119_v52, %s7567_s25  ;;  %1235 = vrot.lane.b32.xlu0 %v8100_v23, %s7567_s25  ;;  %v8428_v23 = vld [vmem:[%s7615_s23 + $0x16b] sm:$0xff] }
 0x1a3   : > { %1239 = vrot.lane.b32.xlu2 %v8116_v54, %s7567_s25  ;;  %v6810_v52 = vld [vmem:[%s7615_s23 + $0x1c8] sm:$0xff]  ;;  %926 = vst.msk [vmem:[#allocation2 + $0x3c8] sm:$0xff] %vm257_vm0, %v8428_v23  ;;  %v6811_v54 = vld [vmem:[%s7615_s23 + $0x1d0] sm:$0xff] }
 0x1a4   : > { %v1025_v51 = vpop.permute.xlu1 %1024  ;;  %v1023_v56 = vpop.permute.xlu0 %1022 }
 0x1a5   : > { %1107 = vst.msk [vmem:[#allocation2 + $0x210] sm:$0xff] %vm450_vm1, %v1025_v51  ;;  %3440 = vmatmul.f32.gmra.mxu0 %v3119_v55  ;;  %3488 = vmatmul.f32.gmra.mxu3 %v3199_v1  ;;  %v1045_v0 = vpop.permute.xlu2 %1044  ;;  %v6843_v55 = vld [vmem:[%s7615_s23 + $0x1d3] sm:$0xff]  ;;  %v6842_v1 = vld [vmem:[%s7615_s23 + $0x1cb] sm:$0xff] }
 0x1a6   : > { %1106 = vst.msk [vmem:[#allocation2 + $0x1e8] sm:$0xff] %vm450_vm1, %v1023_v56  ;;  %v3236_v56 = vld [vmem:[%s11866_s1 + $0xd8] sm:$0xff] }
 0x1a7   : > { %1117 = vst.msk [vmem:[#allocation2 + $0x3a0] sm:$0xff] %vm450_vm1, %v1045_v0  ;;  %v6844_v0 = vld [vmem:[%s7615_s23 + $0x1e3] sm:$0xff] }
 0x1aa   : > { %1243 = vrot.lane.b32.xlu1 %v6810_v52, %s7567_s25  ;;  %1241 = vrot.lane.b32.xlu0 %v8130_v59, %s7567_s25  ;;  %v8452_v59 = vld [vmem:[%s7615_s23 + $0x18b] sm:$0xff] }
 0x1ab   : > { %1245 = vrot.lane.b32.xlu2 %v6811_v54, %s7567_s25  ;;  %929 = vst.msk [vmem:[#allocation2 + $0x440] sm:$0xff] %vm257_vm0, %v8452_v59  ;;  %v3234_v52 = vld [vmem:[%s11866_s1 + $0xc8] sm:$0xff]  ;;  %v3233_v54 = vld [vmem:[%s11866_s1 + $0xc0] sm:$0xff] }
 0x1ac   : > { %v1031_v10 = vpop.permute.xlu1 %1030  ;;  %v1029_v3 = vpop.permute.xlu0 %1028 }
 0x1ad   : > { %1110 = vst.msk [vmem:[#allocation2 + $0x288] sm:$0xff] %vm450_vm1, %v1031_v10  ;;  %3443 = vmatmul.f32.gmra.mxu0 %v3124_v33  ;;  %3491 = vmatmul.f32.gmra.mxu3 %v3204_v62  ;;  %v1051_v19 = vpop.permute.xlu2 %1050  ;;  %v6846_v33 = vld [vmem:[%s7615_s23 + $0x1fb] sm:$0xff]  ;;  %v6845_v62 = vld [vmem:[%s7615_s23 + $0x1eb] sm:$0xff] }
 0x1ae   : > { %1109 = vst.msk [vmem:[#allocation2 + $0x260] sm:$0xff] %vm450_vm1, %v1029_v3  ;;  %v3232_v3 = vld [vmem:[%s11866_s1 + $0xb8] sm:$0xff] }
 0x1af   : > { %1120 = vst.msk [vmem:[#allocation2 + $0x418] sm:$0xff] %vm450_vm1, %v1051_v19  ;;  %v3229_v19 = vld [vmem:[%s11866_s1 + $0xa0] sm:$0xff] }
 0x1b2   : > { %1249 = vrot.lane.b32.xlu1 %v6813_v12, %s7567_s25  ;;  %1247 = vrot.lane.b32.xlu0 %v6812_v8, %s7567_s25  ;;  %v3230_v12 = vld [vmem:[%s11866_s1 + $0xa8] sm:$0xff] }
 0x1b3   : > { %1251 = vrot.lane.b32.xlu2 %v6814_v38, %s7567_s25  ;;  %v6847_v8 = vld [vmem:[%s7615_s23 + $0x203] sm:$0xff] }
 0x1b4   : > { %v1037_v13 = vpop.permute.xlu1 %1036  ;;  %v1035_v17 = vpop.permute.xlu0 %1034 }
 0x1b5   : > { %1113 = vst.msk [vmem:[#allocation2 + $0x300] sm:$0xff] %vm450_vm1, %v1037_v13  ;;  %3446 = vmatmul.f32.gmra.mxu0 %v3129_v41  ;;  %v1057_v42 = vpop.permute.xlu2 %1056  ;;  %v3228_v13 = vld [vmem:[%s11866_s1 + $0x98] sm:$0xff] }
 0x1b6   : > { %1112 = vst.msk [vmem:[#allocation2 + $0x2d8] sm:$0xff] %vm450_vm1, %v1035_v17  ;;  %v6881_v17 = vld [vmem:[%s7615_s23 + $0x3a] sm:$0xff]  ;;  %v6880_v41 = vld [vmem:[%s7615_s23 + $0x32] sm:$0xff] }
 0x1b7   : > { %1123 = vst.msk [vmem:[#allocation2 + $0x490] sm:$0xff] %vm450_vm1, %v1057_v42  ;;  %v6882_v42 = vld [vmem:[%s7615_s23 + $0x4a] sm:$0xff] }
 0x1ba   : > { %1383 = vrot.lane.b32.xlu1 %v8282_v18, %s7568_s26  ;;  %1253 = vrot.lane.b32.xlu0 %v6815_v26, %s7567_s25  ;;  %v3226_v26 = vld [vmem:[%s11866_s1 + $0x88] sm:$0xff] }
 0x1bb   : > { %1385 = vrot.lane.b32.xlu2 %v8276_v9, %s7568_s26 }
 0x1bc   : > { %v1043_v36 = vpop.permute.xlu1 %1042  ;;  %v1041_v39 = vpop.permute.xlu0 %1040 }
 0x1bd   : > { %1116 = vst.msk [vmem:[#allocation2 + $0x378] sm:$0xff] %vm450_vm1, %v1043_v36  ;;  %3449 = vmatmul.f32.gmra.mxu0 %v3134_v25  ;;  %v1192_v35 = vpop.permute.xlu2 %1191  ;;  %v3225_v36 = vld [vmem:[%s11866_s1 + $0x80] sm:$0xff] }
 0x1be   : > { %1115 = vst.msk [vmem:[#allocation2 + $0x350] sm:$0xff] %vm450_vm1, %v1041_v39 }
 0x1bf   : > { %1287 = vst.msk [vmem:[#allocation2 + $0x8] sm:$0xff] %vm643_vm2, %v1192_v35  ;;  %v6884_v35 = vld [vmem:[%s7615_s23 + $0x62] sm:$0xff] }
 0x1c2   : > { %1389 = vrot.lane.b32.xlu1 %v8306_v22, %s7568_s26  ;;  %1387 = vrot.lane.b32.xlu0 %v8296_v21, %s7568_s26 }
 0x1c3   : > { %1391 = vrot.lane.b32.xlu2 %v8299_v28, %s7568_s26 }
 0x1c4   : > { %v1049_v18 = vpop.permute.xlu1 %1048  ;;  %v1047_v20 = vpop.permute.xlu0 %1046 }
 0x1c5   : > { %1119 = vst.msk [vmem:[#allocation2 + $0x3f0] sm:$0xff] %vm450_vm1, %v1049_v18  ;;  %3452 = vmatmul.f32.gmra.mxu0 %v3139_v50  ;;  %v1198_v9 = vpop.permute.xlu2 %1197  ;;  %v6883_v18 = vld [vmem:[%s7615_s23 + $0x52] sm:$0xff]  ;;  %v6885_v50 = vld [vmem:[%s7615_s23 + $0x6a] sm:$0xff] }
 0x1c6   : > { %1118 = vst.msk [vmem:[#allocation2 + $0x3c8] sm:$0xff] %vm450_vm1, %v1047_v20 }
 0x1c7   : > { %1290 = vst.msk [vmem:[#allocation2 + $0x80] sm:$0xff] %vm643_vm2, %v1198_v9 }
 0x1ca   : > { %1395 = vrot.lane.b32.xlu1 %v8330_v31, %s7568_s26  ;;  %1393 = vrot.lane.b32.xlu0 %v8320_v30, %s7568_s26 }
 0x1cb   : > { %1397 = vrot.lane.b32.xlu2 %v8323_v37, %s7568_s26 }
 0x1cc   : > { %v1055_v21 = vpop.permute.xlu1 %1054  ;;  %v1053_v22 = vpop.permute.xlu0 %1052 }
 0x1cd   : > { %1122 = vst.msk [vmem:[#allocation2 + $0x468] sm:$0xff] %vm450_vm1, %v1055_v21  ;;  %3455 = vmatmul.f32.gmra.mxu0 %v3144_v24  ;;  %v1204_v28 = vpop.permute.xlu2 %1203  ;;  %v6886_v24 = vld [vmem:[%s7615_s23 + $0x7a] sm:$0xff] }
 0x1ce   : > { %1121 = vst.msk [vmem:[#allocation2 + $0x440] sm:$0xff] %vm450_vm1, %v1053_v22  ;;  %v6887_v22 = vld [vmem:[%s7615_s23 + $0x82] sm:$0xff] }
 0x1cf   : > { %1293 = vst.msk [vmem:[#allocation2 + $0xf8] sm:$0xff] %vm643_vm2, %v1204_v28 }
 0x1d2   : > { %1401 = vrot.lane.b32.xlu1 %v8354_v15, %s7568_s26  ;;  %1399 = vrot.lane.b32.xlu0 %v8344_v57, %s7568_s26 }
 0x1d3   : > { %1403 = vrot.lane.b32.xlu2 %v8347_v6, %s7568_s26 }
 0x1d4   : > { %v1061_v30 = vpop.permute.xlu1 %1060  ;;  %v1059_v31 = vpop.permute.xlu0 %1058 }
 0x1d5   : > { %1125 = vst.msk [vmem:[#allocation2 + $0x4e0] sm:$0xff] %vm450_vm1, %v1061_v30  ;;  %3458 = vmatmul.f32.gmra.mxu0 %v3149_v34  ;;  %v1210_v37 = vpop.permute.xlu2 %1209  ;;  %v6888_v30 = vld [vmem:[%s7615_s23 + $0x92] sm:$0xff] }
 0x1d6   : > { %1124 = vst.msk [vmem:[#allocation2 + $0x4b8] sm:$0xff] %vm450_vm1, %v1059_v31 }
 0x1d7   : > { %1296 = vst.msk [vmem:[#allocation2 + $0x170] sm:$0xff] %vm643_vm2, %v1210_v37  ;;  %v6890_v37 = vld [vmem:[%s7615_s23 + $0xaa] sm:$0xff] }
 0x1da   : > { %1407 = vrot.lane.b32.xlu1 %v8380_v43, %s7568_s26  ;;  %1405 = vrot.lane.b32.xlu0 %v8368_v40, %s7568_s26 }
 0x1db   : > { %1409 = vrot.lane.b32.xlu2 %v8373_v32, %s7568_s26 }
 0x1dc   : > { %v1196_v57 = vpop.permute.xlu1 %1195  ;;  %v1194_v15 = vpop.permute.xlu0 %1193 }
 0x1dd   : > { %1289 = vst.msk [vmem:[#allocation2 + $0x58] sm:$0xff] %vm643_vm2, %v1196_v57  ;;  %3461 = vmatmul.f32.gmra.mxu0 %v3154_v61  ;;  %v1216_v6 = vpop.permute.xlu2 %1215  ;;  %v6889_v57 = vld [vmem:[%s7615_s23 + $0x9a] sm:$0xff]  ;;  %v6891_v61 = vld [vmem:[%s7615_s23 + $0xb2] sm:$0xff] }
 0x1de   : > { %1288 = vst.msk [vmem:[#allocation2 + $0x30] sm:$0xff] %vm643_vm2, %v1194_v15 }
 0x1df   : > { %1299 = vst.msk [vmem:[#allocation2 + $0x1e8] sm:$0xff] %vm643_vm2, %v1216_v6 }
 0x1e2   : > { %1413 = vrot.lane.b32.xlu1 %v8404_v11, %s7568_s26  ;;  %1411 = vrot.lane.b32.xlu0 %v8392_v46, %s7568_s26  ;;  %v3238_v11 = vld [vmem:[%s11866_s1 + $0xe8] sm:$0xff] }
 0x1e3   : > { %1415 = vrot.lane.b32.xlu2 %v8397_v48, %s7568_s26  ;;  %v3239_v48 = vld [vmem:[%s11866_s1 + $0xf0] sm:$0xff] }
 0x1e4   : > { %v1202_v40 = vpop.permute.xlu1 %1201  ;;  %v1200_v29 = vpop.permute.xlu0 %1199  ;;  %3496 = vmatpush.msra.mxu1 %v3239_v48  ;;  %7316 = vmatpush.msrb.mxu3 %v3239_v48  ;;  %v6897_v48 = vld [vmem:[%s7615_s23 + $0xfa] sm:$0xff] }
 0x1e5   : > { %1292 = vst.msk [vmem:[#allocation2 + $0xd0] sm:$0xff] %vm643_vm2, %v1202_v40  ;;  %3464 = vmatmul.f32.gmra.mxu0 %v3159_v47  ;;  %v1222_v45 = vpop.permute.xlu2 %1221  ;;  %v6892_v47 = vld [vmem:[%s7615_s23 + $0xc2] sm:$0xff] }
 0x1e6   : > { %1291 = vst.msk [vmem:[#allocation2 + $0xa8] sm:$0xff] %vm643_vm2, %v1200_v29  ;;  %3497 = vmatpush.msra.mxu1 %v3238_v11  ;;  %7317 = vmatpush.msrb.mxu3 %v3238_v11  ;;  %v6893_v29 = vld [vmem:[%s7615_s23 + $0xca] sm:$0xff] }
 0x1e7   : > { %1302 = vst.msk [vmem:[#allocation2 + $0x260] sm:$0xff] %vm643_vm2, %v1222_v45 }
 0x1e8   : > { %3498 = vmatpush.msra.mxu1 %v3237_v5  ;;  %7318 = vmatpush.msrb.mxu3 %v3237_v5 }
 0x1ea   : > { %1419 = vrot.lane.b32.xlu1 %v8428_v23, %s7568_s26  ;;  %1417 = vrot.lane.b32.xlu0 %v8416_v60, %s7568_s26  ;;  %v3235_v23 = vld [vmem:[%s11866_s1 + $0xd0] sm:$0xff] }
 0x1eb   : > { %1421 = vrot.lane.b32.xlu2 %v8421_v58, %s7568_s26  ;;  %3499 = vmatpush.msra.mxu1 %v3236_v56 }
 0x1ec   : > { %v1208_v32 = vpop.permute.xlu1 %1207  ;;  %v1206_v43 = vpop.permute.xlu0 %1205  ;;  %7319 = vmatpush.msrb.mxu3 %v3236_v56 }
 0x1ed   : > { %1295 = vst.msk [vmem:[#allocation2 + $0x148] sm:$0xff] %vm643_vm2, %v1208_v32  ;;  %3467 = vmatmul.f32.gmra.mxu0 %v3164_v2  ;;  %v1228_v46 = vpop.permute.xlu2 %1227  ;;  %3500 = vmatpush.msra.mxu1 %v3235_v23  ;;  %v6894_v32 = vld [vmem:[%s7615_s23 + $0xda] sm:$0xff] }
 0x1ee   : > { %1294 = vst.msk [vmem:[#allocation2 + $0x120] sm:$0xff] %vm643_vm2, %v1206_v43  ;;  %7320 = vmatpush.msrb.mxu3 %v3235_v23 }
 0x1ef   : > { %1305 = vst.msk [vmem:[#allocation2 + $0x2d8] sm:$0xff] %vm643_vm2, %v1228_v46  ;;  %3501 = vmatpush.msra.mxu1 %v3234_v52 }
 0x1f0   : > { %7321 = vmatpush.msrb.mxu3 %v3234_v52  ;;  %v6902_v52 = vld [vmem:[%s7615_s23 + $0x13a] sm:$0xff] }
 0x1f1   : > { %3502 = vmatpush.msra.mxu1 %v3233_v54 }
 0x1f2   : > { %1425 = vrot.lane.b32.xlu1 %v8452_v59, %s7568_s26  ;;  %1423 = vrot.lane.b32.xlu0 %v8441_v63, %s7568_s26  ;;  %v3231_v59 = vld [vmem:[%s11866_s1 + $0xb0] sm:$0xff] }
 0x1f3   : > { %1427 = vrot.lane.b32.xlu2 %v8446_v4, %s7568_s26  ;;  %7322 = vmatpush.msrb.mxu3 %v3233_v54 }
 0x1f4   : > { %v1214_v14 = vpop.permute.xlu1 %1213  ;;  %v1212_v49 = vpop.permute.xlu0 %1211  ;;  %3503 = vmatpush.msra.mxu1 %v3232_v3 }
 0x1f5   : > { %1298 = vst.msk [vmem:[#allocation2 + $0x1c0] sm:$0xff] %vm643_vm2, %v1214_v14  ;;  %v1234_v53 = vpop.permute.xlu2 %1233  ;;  %7323 = vmatpush.msrb.mxu3 %v3232_v3  ;;  %v6896_v14 = vld [vmem:[%s7615_s23 + $0xf2] sm:$0xff] }
 0x1f6   : > { %1297 = vst.msk [vmem:[#allocation2 + $0x198] sm:$0xff] %vm643_vm2, %v1212_v49  ;;  %3504 = vmatpush.msra.mxu1 %v3231_v59  ;;  %v6895_v49 = vld [vmem:[%s7615_s23 + $0xe2] sm:$0xff] }
 0x1f7   : > { %1308 = vst.msk [vmem:[#allocation2 + $0x350] sm:$0xff] %vm643_vm2, %v1234_v53  ;;  %7324 = vmatpush.msrb.mxu3 %v3231_v59 }
 0x1f8   : > { %3505 = vmatpush.msra.mxu1 %v3230_v12 }
 0x1f9   : > { %7325 = vmatpush.msrb.mxu3 %v3230_v12  ;;  %v6906_v12 = vld [vmem:[%s7615_s23 + $0x16a] sm:$0xff] }
 0x1fa   : > { %1431 = vrot.lane.b32.xlu1 %v8476_v16, %s7568_s26  ;;  %1429 = vrot.lane.b32.xlu0 %v8465_v7, %s7568_s26  ;;  %v3227_v16 = vld [vmem:[%s11866_s1 + $0x90] sm:$0xff] }
 0x1fb   : > { %1433 = vrot.lane.b32.xlu2 %v8470_v27, %s7568_s26  ;;  %3506 = vmatpush.msra.mxu1 %v3229_v19 }
 0x1fc   : > { %v1220_v60 = vpop.permute.xlu1 %1219  ;;  %v1218_v51 = vpop.permute.xlu0 %1217  ;;  %7326 = vmatpush.msrb.mxu3 %v3229_v19 }
 0x1fd   : > { %1301 = vst.msk [vmem:[#allocation2 + $0x238] sm:$0xff] %vm643_vm2, %v1220_v60  ;;  %v1240_v58 = vpop.permute.xlu2 %1239  ;;  %3507 = vmatpush.msra.mxu1 %v3228_v13  ;;  %v6899_v60 = vld [vmem:[%s7615_s23 + $0x112] sm:$0xff] }
 0x1fe   : > { %1300 = vst.msk [vmem:[#allocation2 + $0x210] sm:$0xff] %vm643_vm2, %v1218_v51  ;;  %7327 = vmatpush.msrb.mxu3 %v3228_v13  ;;  %v6898_v51 = vld [vmem:[%s7615_s23 + $0x10a] sm:$0xff]  ;;  %v6907_v13 = vld [vmem:[%s7615_s23 + $0x172] sm:$0xff] }
 0x1ff   : > { %1311 = vst.msk [vmem:[#allocation2 + $0x3c8] sm:$0xff] %vm643_vm2, %v1240_v58  ;;  %3508 = vmatpush.msra.mxu1 %v3227_v16 }
 0x200   : > { %7328 = vmatpush.msrb.mxu3 %v3227_v16 }
 0x201   : > { %3509 = vmatpush.msra.mxu1 %v3226_v26 }
 0x202   : > { %1437 = vrot.lane.b32.xlu1 %v6843_v55, %s7568_s26  ;;  %1435 = vrot.lane.b32.xlu0 %v6842_v1, %s7568_s26  ;;  %v6900_v55 = vld [vmem:[%s7615_s23 + $0x122] sm:$0xff] }
 0x203   : > { %1439 = vrot.lane.b32.xlu2 %v6844_v0, %s7568_s26  ;;  %7329 = vmatpush.msrb.mxu3 %v3226_v26  ;;  %v6901_v0 = vld [vmem:[%s7615_s23 + $0x12a] sm:$0xff] }
 0x204   : > { %v1226_v63 = vpop.permute.xlu1 %1225  ;;  %v1224_v10 = vpop.permute.xlu0 %1223  ;;  %3510 = vmatpush.msra.mxu1 %v3225_v36 }
 0x205   : > { %1304 = vst.msk [vmem:[#allocation2 + $0x2b0] sm:$0xff] %vm643_vm2, %v1226_v63  ;;  %v1246_v4 = vpop.permute.xlu2 %1245  ;;  %7330 = vmatpush.msrb.mxu3 %v3225_v36  ;;  %v6903_v63 = vld [vmem:[%s7615_s23 + $0x142] sm:$0xff]  ;;  %v6910_v36 = vld [vmem:[%s7615_s23 + $0x19a] sm:$0xff] }
 0x206   : > { %1303 = vst.msk [vmem:[#allocation2 + $0x288] sm:$0xff] %vm643_vm2, %v1224_v10 }
 0x207   : > { %1314 = vst.msk [vmem:[#allocation2 + $0x440] sm:$0xff] %vm643_vm2, %v1246_v4  ;;  %v6904_v4 = vld [vmem:[%s7615_s23 + $0x152] sm:$0xff] }
 0x20a   : > { %1443 = vrot.lane.b32.xlu1 %v6846_v33, %s7568_s26  ;;  %1441 = vrot.lane.b32.xlu0 %v6845_v62, %s7568_s26  ;;  %v6905_v62 = vld [vmem:[%s7615_s23 + $0x15a] sm:$0xff] }
 0x20b   : > { %1445 = vrot.lane.b32.xlu2 %v6847_v8, %s7568_s26 }
 0x20c   : > { %v1232_v38 = vpop.permute.xlu1 %1231  ;;  %v1230_v7 = vpop.permute.xlu0 %1229 }
 0x20d   : > { %1307 = vst.msk [vmem:[#allocation2 + $0x328] sm:$0xff] %vm643_vm2, %v1232_v38  ;;  %v1252_v27 = vpop.permute.xlu2 %1251 }
 0x20e   : > { %1306 = vst.msk [vmem:[#allocation2 + $0x300] sm:$0xff] %vm643_vm2, %v1230_v7  ;;  %v6908_v7 = vld [vmem:[%s7615_s23 + $0x182] sm:$0xff] }
 0x20f   : > { %1317 = vst.msk [vmem:[#allocation2 + $0x4b8] sm:$0xff] %vm643_vm2, %v1252_v27 }
 0x212   : > { %1642 = vrot.lane.b32.xlu1 %v6881_v17, %s7566_s24  ;;  %1640 = vrot.lane.b32.xlu0 %v6880_v41, %s7566_s24  ;;  %v6909_v41 = vld [vmem:[%s7615_s23 + $0x18a] sm:$0xff] }
 0x213   : > { %1644 = vrot.lane.b32.xlu2 %v6882_v42, %s7566_s24  ;;  %v6911_v42 = vld [vmem:[%s7615_s23 + $0x1a2] sm:$0xff] }
 0x214   : > { %v1238_v39 = vpop.permute.xlu1 %1237  ;;  %v1236_v25 = vpop.permute.xlu0 %1235 }
 0x215   : > { %1310 = vst.msk [vmem:[#allocation2 + $0x3a0] sm:$0xff] %vm643_vm2, %v1238_v39  ;;  %v1386_v20 = vpop.permute.xlu2 %1385 }
 0x216   : > { %1309 = vst.msk [vmem:[#allocation2 + $0x378] sm:$0xff] %vm643_vm2, %v1236_v25  ;;  %v6849_v25 = vld [vmem:[%s7615_s23 + $0x9e] sm:$0xff] }
 0x217   : > { %1480 = vst.msk [vmem:[#allocation2 + $0x30] sm:$0xff] %vm837_vm3, %v1386_v20 }
 0x218   : > { %1544 = vst.msk [vmem:[#allocation2 + $0x38] sm:$0xff] %vm257_vm0, %v6849_v25  ;;  %v6865_v25 = vld [vmem:[%s7615_s23 + $0x15e] sm:$0xff] }
 0x219   : > { %1560 = vst.msk [vmem:[#allocation2 + $0x2b8] sm:$0xff] %vm257_vm0, %v6865_v25 }
 0x21a   : > { %1648 = vrot.lane.b32.xlu1 %v6884_v35, %s7566_s24  ;;  %1646 = vrot.lane.b32.xlu0 %v6883_v18, %s7566_s24  ;;  %v6912_v35 = vld [vmem:[%s7615_s23 + $0x33] sm:$0xff] }
 0x21b   : > { %1650 = vrot.lane.b32.xlu2 %v6885_v50, %s7566_s24 }
 0x21c   : > { %v1244_v9 = vpop.permute.xlu1 %1243  ;;  %v1242_v21 = vpop.permute.xlu0 %1241 }
 0x21d   : > { %1313 = vst.msk [vmem:[#allocation2 + $0x418] sm:$0xff] %vm643_vm2, %v1244_v9  ;;  %v1392_v28 = vpop.permute.xlu2 %1391  ;;  %v6848_v9 = vld [vmem:[%s7615_s23 + $0x96] sm:$0xff] }
 0x21e   : > { %1312 = vst.msk [vmem:[#allocation2 + $0x3f0] sm:$0xff] %vm643_vm2, %v1242_v21  ;;  %v3055_v53 = vld [vmem:[#allocation2 + $0x30] sm:$0xff] }
 0x21f   : > { %1483 = vst.msk [vmem:[#allocation2 + $0xa8] sm:$0xff] %vm837_vm3, %v1392_v28  ;;  %v8732_v21 = vld [vmem:[%s7615_s23 + $0x4b] sm:$0xff] }
 0x220   : > { %1543 = vst.msk [vmem:[#allocation2 + $0x10] sm:$0xff] %vm257_vm0, %v6848_v9  ;;  %v6850_v28 = vld [vmem:[%s7615_s23 + $0xae] sm:$0xff]  ;;  %v6867_v9 = vld [vmem:[%s7615_s23 + $0x176] sm:$0xff] }
 0x221   : > { %1545 = vst.msk [vmem:[#allocation2 + $0x60] sm:$0xff] %vm257_vm0, %v6850_v28  ;;  %v8875_v28 = vld [vmem:[%s7615_s23 + $0x113] sm:$0xff] }
 0x222   : > { %1654 = vrot.lane.b32.xlu1 %v6887_v22, %s7566_s24  ;;  %1652 = vrot.lane.b32.xlu0 %v6886_v24, %s7566_s24  ;;  %v6913_v22 = vld [vmem:[%s7615_s23 + $0x3b] sm:$0xff]  ;;  %1562 = vst.msk [vmem:[#allocation2 + $0x308] sm:$0xff] %vm257_vm0, %v6867_v9 }
 0x223   : > { %1656 = vrot.lane.b32.xlu2 %v6888_v30, %s7566_s24  ;;  %v8742_v30 = vld [vmem:[%s7615_s23 + $0x53] sm:$0xff] }
 0x224   : > { %v1250_v31 = vpop.permute.xlu1 %1249  ;;  %v1248_v34 = vpop.permute.xlu0 %1247 }
 0x225   : > { %1316 = vst.msk [vmem:[#allocation2 + $0x490] sm:$0xff] %vm643_vm2, %v1250_v31  ;;  %v1398_v15 = vpop.permute.xlu2 %1397  ;;  %v6852_v31 = vld [vmem:[%s7615_s23 + $0xc6] sm:$0xff] }
 0x226   : > { %1315 = vst.msk [vmem:[#allocation2 + $0x468] sm:$0xff] %vm643_vm2, %v1248_v34  ;;  %v3070_v38 = vld [vmem:[#allocation2 + $0xa8] sm:$0xff] }
 0x227   : > { %1486 = vst.msk [vmem:[#allocation2 + $0x120] sm:$0xff] %vm837_vm3, %v1398_v15  ;;  %v6851_v15 = vld [vmem:[%s7615_s23 + $0xb6] sm:$0xff] }
 0x228   : > { %1547 = vst.msk [vmem:[#allocation2 + $0xb0] sm:$0xff] %vm257_vm0, %v6852_v31 }
 0x229   : > { %1546 = vst.msk [vmem:[#allocation2 + $0x88] sm:$0xff] %vm257_vm0, %v6851_v15 }
 0x22a   : > { %1660 = vrot.lane.b32.xlu1 %v6890_v37, %s7566_s24  ;;  %1658 = vrot.lane.b32.xlu0 %v6889_v57, %s7566_s24 }
 0x22b   : > { %1662 = vrot.lane.b32.xlu2 %v6891_v61, %s7566_s24  ;;  %v8753_v61 = vld [vmem:[%s7615_s23 + $0x6b] sm:$0xff] }
 0x22c   : > { %v1384_v6 = vpop.permute.xlu1 %1383  ;;  %v1254_v40 = vpop.permute.xlu0 %1253 }
 0x22d   : > { %1479 = vst.msk [vmem:[#allocation2 + $0x8] sm:$0xff] %vm837_vm3, %v1384_v6  ;;  %v1404_v45 = vpop.permute.xlu2 %1403  ;;  %v8756_v6 = vld [vmem:[%s7615_s23 + $0x63] sm:$0xff] }
 0x22e   : > { %1318 = vst.msk [vmem:[#allocation2 + $0x4e0] sm:$0xff] %vm643_vm2, %v1254_v40  ;;  %v3085_v57 = vld [vmem:[#allocation2 + $0x120] sm:$0xff] }
 0x22f   : > { %1489 = vst.msk [vmem:[#allocation2 + $0x198] sm:$0xff] %vm837_vm3, %v1404_v45  ;;  %v6855_v45 = vld [vmem:[%s7615_s23 + $0xe6] sm:$0xff] }
 0x230   : > { %1550 = vst.msk [vmem:[#allocation2 + $0x128] sm:$0xff] %vm257_vm0, %v6855_v45  ;;  %v6870_v45 = vld [vmem:[%s7615_s23 + $0x19e] sm:$0xff] }
 0x231   : > { %1565 = vst.msk [vmem:[#allocation2 + $0x380] sm:$0xff] %vm257_vm0, %v6870_v45  ;;  %v8993_v45 = vld [vmem:[%s7615_s23 + $0x64] sm:$0xff] }
 0x232   : > { %1666 = vrot.lane.b32.xlu1 %v6893_v29, %s7566_s24  ;;  %1664 = vrot.lane.b32.xlu0 %v6892_v47, %s7566_s24  ;;  %v6853_v29 = vld [vmem:[%s7615_s23 + $0xce] sm:$0xff]  ;;  %v8766_v47 = vld [vmem:[%s7615_s23 + $0x7b] sm:$0xff] }
 0x233   : > { %1668 = vrot.lane.b32.xlu2 %v6894_v32, %s7566_s24  ;;  %1548 = vst.msk [vmem:[#allocation2 + $0xd8] sm:$0xff] %vm257_vm0, %v6853_v29 }
 0x234   : > { %v1390_v43 = vpop.permute.xlu1 %1389  ;;  %v1388_v2 = vpop.permute.xlu0 %1387  ;;  %v3050_v46 = vld [vmem:[#allocation2 + $0x8] sm:$0xff] }
 0x235   : > { %1482 = vst.msk [vmem:[#allocation2 + $0x80] sm:$0xff] %vm837_vm3, %v1390_v43  ;;  %3511 = vmatmul.f32.vlgmr.msra.gmra.mxu1 %v3050_v46  ;;  %v1410_v44 = vpop.permute.xlu2 %1409 }
 0x236   : > { %1481 = vst.msk [vmem:[#allocation2 + $0x58] sm:$0xff] %vm837_vm3, %v1388_v2 }
 0x237   : > { %1492 = vst.msk [vmem:[#allocation2 + $0x210] sm:$0xff] %vm837_vm3, %v1410_v44  ;;  %v8780_v44 = vld [vmem:[%s7615_s23 + $0x83] sm:$0xff] }
 0x23a   : > { %1672 = vrot.lane.b32.xlu1 %v6896_v14, %s7566_s24  ;;  %1670 = vrot.lane.b32.xlu0 %v6895_v49, %s7566_s24  ;;  %v6854_v14 = vld [vmem:[%s7615_s23 + $0xde] sm:$0xff]  ;;  %v8777_v49 = vld [vmem:[%s7615_s23 + $0x93] sm:$0xff] }
 0x23b   : > { %1674 = vrot.lane.b32.xlu2 %v6897_v48, %s7566_s24  ;;  %1549 = vst.msk [vmem:[#allocation2 + $0x100] sm:$0xff] %vm257_vm0, %v6854_v14  ;;  %v8909_v14 = vld [vmem:[%s7615_s23 + $0x153] sm:$0xff] }
 0x23c   : > { %v1396_v11 = vpop.permute.xlu1 %1395  ;;  %v1394_v5 = vpop.permute.xlu0 %1393  ;;  %v3065_v33 = vld [vmem:[#allocation2 + $0x80] sm:$0xff] }
 0x23d   : > { %1485 = vst.msk [vmem:[#allocation2 + $0xf8] sm:$0xff] %vm837_vm3, %v1396_v11  ;;  %3514 = vmatmul.f32.gmra.mxu1 %v3055_v53  ;;  %v1416_v56 = vpop.permute.xlu2 %1415  ;;  %v3060_v23 = vld [vmem:[#allocation2 + $0x58] sm:$0xff] }
 0x23e   : > { %1484 = vst.msk [vmem:[#allocation2 + $0xd0] sm:$0xff] %vm837_vm3, %v1394_v5  ;;  %v6856_v11 = vld [vmem:[%s7615_s23 + $0xf6] sm:$0xff] }
 0x23f   : > { %1495 = vst.msk [vmem:[#allocation2 + $0x288] sm:$0xff] %vm837_vm3, %v1416_v56  ;;  %v8790_v5 = vld [vmem:[%s7615_s23 + $0x9b] sm:$0xff] }
 0x240   : > { %1551 = vst.msk [vmem:[#allocation2 + $0x150] sm:$0xff] %vm257_vm0, %v6856_v11 }
 0x242   : > { %1678 = vrot.lane.b32.xlu1 %v6899_v60, %s7566_s24  ;;  %1676 = vrot.lane.b32.xlu0 %v6898_v51, %s7566_s24  ;;  %v6858_v60 = vld [vmem:[%s7615_s23 + $0x10e] sm:$0xff] }
 0x243   : > { %1680 = vrot.lane.b32.xlu2 %v6900_v55, %s7566_s24  ;;  %1553 = vst.msk [vmem:[#allocation2 + $0x1a0] sm:$0xff] %vm257_vm0, %v6858_v60 }
 0x244   : > { %v1402_v1 = vpop.permute.xlu1 %1401  ;;  %v1400_v58 = vpop.permute.xlu0 %1399  ;;  %v3080_v50 = vld [vmem:[#allocation2 + $0xf8] sm:$0xff] }
 0x245   : > { %1488 = vst.msk [vmem:[#allocation2 + $0x170] sm:$0xff] %vm837_vm3, %v1402_v1  ;;  %3517 = vmatmul.f32.gmra.mxu1 %v3060_v23  ;;  %v1422_v54 = vpop.permute.xlu2 %1421  ;;  %v3075_v26 = vld [vmem:[#allocation2 + $0xd0] sm:$0xff]  ;;  %v6857_v1 = vld [vmem:[%s7615_s23 + $0xfe] sm:$0xff] }
 0x246   : > { %1487 = vst.msk [vmem:[#allocation2 + $0x148] sm:$0xff] %vm837_vm3, %v1400_v58  ;;  %v8801_v58 = vld [vmem:[%s7615_s23 + $0xb3] sm:$0xff]  ;;  %v8804_v23 = vld [vmem:[%s7615_s23 + $0xab] sm:$0xff] }
 0x247   : > { %1498 = vst.msk [vmem:[#allocation2 + $0x300] sm:$0xff] %vm837_vm3, %v1422_v54  ;;  %v8814_v54 = vld [vmem:[%s7615_s23 + $0xc3] sm:$0xff] }
 0x248   : > { %1552 = vst.msk [vmem:[#allocation2 + $0x178] sm:$0xff] %vm257_vm0, %v6857_v1  ;;  %v8920_v1 = vld [vmem:[%s7615_s23 + $0x16b] sm:$0xff] }
 0x249   : > { %v3130_v25 = vld [vmem:[#allocation2 + $0x288] sm:$0xff] }
 0x24a   : > { %1684 = vrot.lane.b32.xlu1 %v6902_v52, %s7566_s24  ;;  %1682 = vrot.lane.b32.xlu0 %v6901_v0, %s7566_s24  ;;  %v6859_v0 = vld [vmem:[%s7615_s23 + $0x116] sm:$0xff] }
 0x24b   : > { %1686 = vrot.lane.b32.xlu2 %v6903_v63, %s7566_s24  ;;  %1554 = vst.msk [vmem:[#allocation2 + $0x1c8] sm:$0xff] %vm257_vm0, %v6859_v0  ;;  %v6861_v63 = vld [vmem:[%s7615_s23 + $0x12e] sm:$0xff] }
 0x24c   : > { %v1408_v10 = vpop.permute.xlu1 %1407  ;;  %v1406_v3 = vpop.permute.xlu0 %1405  ;;  %v3095_v55 = vld [vmem:[#allocation2 + $0x170] sm:$0xff]  ;;  %1556 = vst.msk [vmem:[#allocation2 + $0x218] sm:$0xff] %vm257_vm0, %v6861_v63 }
 0x24d   : > { %1491 = vst.msk [vmem:[#allocation2 + $0x1e8] sm:$0xff] %vm837_vm3, %v1408_v10  ;;  %3520 = vmatmul.f32.gmra.mxu1 %v3065_v33  ;;  %v1428_v59 = vpop.permute.xlu2 %1427  ;;  %v3090_v2 = vld [vmem:[#allocation2 + $0x148] sm:$0xff]  ;;  %v3100_v33 = vld [vmem:[#allocation2 + $0x198] sm:$0xff] }
 0x24e   : > { %1490 = vst.msk [vmem:[#allocation2 + $0x1c0] sm:$0xff] %vm837_vm3, %v1406_v3  ;;  %v8933_v63 = vld [vmem:[%s7615_s23 + $0x173] sm:$0xff] }
 0x24f   : > { %1501 = vst.msk [vmem:[#allocation2 + $0x378] sm:$0xff] %vm837_vm3, %v1428_v59  ;;  %v8825_v59 = vld [vmem:[%s7615_s23 + $0xdb] sm:$0xff] }
 0x252   : > { %1690 = vrot.lane.b32.xlu1 %v6905_v62, %s7566_s24  ;;  %1688 = vrot.lane.b32.xlu0 %v6904_v4, %s7566_s24  ;;  %v6860_v4 = vld [vmem:[%s7615_s23 + $0x126] sm:$0xff] }
 0x253   : > { %1692 = vrot.lane.b32.xlu2 %v6906_v12, %s7566_s24  ;;  %v8828_v12 = vld [vmem:[%s7615_s23 + $0xcb] sm:$0xff]  ;;  %1555 = vst.msk [vmem:[#allocation2 + $0x1f0] sm:$0xff] %vm257_vm0, %v6860_v4 }
 0x254   : > { %v1414_v8 = vpop.permute.xlu1 %1413  ;;  %v1412_v19 = vpop.permute.xlu0 %1411 }
 0x255   : > { %1494 = vst.msk [vmem:[#allocation2 + $0x260] sm:$0xff] %vm837_vm3, %v1414_v8  ;;  %3523 = vmatmul.f32.gmra.mxu1 %v3070_v38  ;;  %v1434_v17 = vpop.permute.xlu2 %1433  ;;  %v8838_v38 = vld [vmem:[%s7615_s23 + $0xe3] sm:$0xff] }
 0x256   : > { %1493 = vst.msk [vmem:[#allocation2 + $0x238] sm:$0xff] %vm837_vm3, %v1412_v19  ;;  %v6862_v19 = vld [vmem:[%s7615_s23 + $0x13e] sm:$0xff] }
 0x257   : > { %1504 = vst.msk [vmem:[#allocation2 + $0x3f0] sm:$0xff] %vm837_vm3, %v1434_v17 }
 0x258   : > { %1557 = vst.msk [vmem:[#allocation2 + $0x240] sm:$0xff] %vm257_vm0, %v6862_v19  ;;  %v6875_v19 = vld [vmem:[%s7615_s23 + $0x1d6] sm:$0xff] }
 0x259   : > { %1570 = vst.msk [vmem:[#allocation2 + $0x448] sm:$0xff] %vm257_vm0, %v6875_v19 }
 0x25a   : > { %1696 = vrot.lane.b32.xlu1 %v6908_v7, %s7566_s24  ;;  %1694 = vrot.lane.b32.xlu0 %v6907_v13, %s7566_s24  ;;  %v6864_v7 = vld [vmem:[%s7615_s23 + $0x156] sm:$0xff] }
 0x25b   : > { %1698 = vrot.lane.b32.xlu2 %v6909_v41, %s7566_s24  ;;  %v3105_v41 = vld [vmem:[#allocation2 + $0x1c0] sm:$0xff]  ;;  %1559 = vst.msk [vmem:[#allocation2 + $0x290] sm:$0xff] %vm257_vm0, %v6864_v7  ;;  %v8944_v7 = vld [vmem:[%s7615_s23 + $0x18b] sm:$0xff] }
 0x25c   : > { %v1420_v27 = vpop.permute.xlu1 %1419  ;;  %v1418_v16 = vpop.permute.xlu0 %1417 }
 0x25d   : > { %1497 = vst.msk [vmem:[#allocation2 + $0x2d8] sm:$0xff] %vm837_vm3, %v1420_v27  ;;  %3526 = vmatmul.f32.gmra.mxu1 %v3075_v26  ;;  %v1440_v39 = vpop.permute.xlu2 %1439  ;;  %v8849_v26 = vld [vmem:[%s7615_s23 + $0xfb] sm:$0xff] }
 0x25e   : > { %1496 = vst.msk [vmem:[#allocation2 + $0x2b0] sm:$0xff] %vm837_vm3, %v1418_v16  ;;  %v3175_v48 = vld [vmem:[#allocation2 + $0x3f0] sm:$0xff]  ;;  %v6863_v16 = vld [vmem:[%s7615_s23 + $0x146] sm:$0xff]  ;;  %v3120_v60 = vld [vmem:[#allocation2 + $0x238] sm:$0xff] }
 0x25f   : > { %1507 = vst.msk [vmem:[#allocation2 + $0x468] sm:$0xff] %vm837_vm3, %v1440_v39  ;;  %v8861_v39 = vld [vmem:[%s7615_s23 + $0x10b] sm:$0xff] }
 0x260   : > { %1558 = vst.msk [vmem:[#allocation2 + $0x268] sm:$0xff] %vm257_vm0, %v6863_v16 }
 0x262   : > { %1702 = vrot.lane.b32.xlu1 %v6911_v42, %s7566_s24  ;;  %1700 = vrot.lane.b32.xlu0 %v6910_v36, %s7566_s24  ;;  %v8852_v42 = vld [vmem:[%s7615_s23 + $0xf3] sm:$0xff] }
 0x263   : > { %1832 = vrot.lane.b32.xlu2 %v6912_v35, %s7567_s25 }
 0x264   : > { %v1426_v18 = vpop.permute.xlu1 %1425  ;;  %v1424_v20 = vpop.permute.xlu0 %1423 }
 0x265   : > { %1500 = vst.msk [vmem:[#allocation2 + $0x350] sm:$0xff] %vm837_vm3, %v1426_v18  ;;  %3529 = vmatmul.f32.gmra.mxu1 %v3080_v50  ;;  %v1446_v24 = vpop.permute.xlu2 %1445 }
 0x266   : > { %1499 = vst.msk [vmem:[#allocation2 + $0x328] sm:$0xff] %vm837_vm3, %v1424_v20  ;;  %v3110_v20 = vld [vmem:[#allocation2 + $0x1e8] sm:$0xff] }
 0x267   : > { %1510 = vst.msk [vmem:[#allocation2 + $0x4e0] sm:$0xff] %vm837_vm3, %v1446_v24  ;;  %v3190_v50 = vld [vmem:[#allocation2 + $0x468] sm:$0xff] }
 0x268   : > { %v8872_v24 = vld [vmem:[%s7615_s23 + $0x123] sm:$0xff] }
 0x26a   : > { %1836 = vrot.lane.b32.xlu1 %v8732_v21, %s7567_s25  ;;  %1834 = vrot.lane.b32.xlu0 %v6913_v22, %s7567_s25  ;;  %v6866_v22 = vld [vmem:[%s7615_s23 + $0x16e] sm:$0xff] }
 0x26b   : > { %1838 = vrot.lane.b32.xlu2 %v8742_v30, %s7567_s25  ;;  %1561 = vst.msk [vmem:[#allocation2 + $0x2e0] sm:$0xff] %vm257_vm0, %v6866_v22  ;;  %v6945_v22 = vld [vmem:[%s7615_s23 + $0x3c] sm:$0xff] }
 0x26c   : > { %v1432_v34 = vpop.permute.xlu1 %1431  ;;  %v1430_v37 = vpop.permute.xlu0 %1429 }
 0x26d   : > { %1503 = vst.msk [vmem:[#allocation2 + $0x3c8] sm:$0xff] %vm837_vm3, %v1432_v34  ;;  %3532 = vmatmul.f32.gmra.mxu1 %v3085_v57  ;;  %v1645_v40 = vpop.permute.xlu2 %1644  ;;  %v8885_v34 = vld [vmem:[%s7615_s23 + $0x12b] sm:$0xff] }
 0x26e   : > { %1502 = vst.msk [vmem:[#allocation2 + $0x3a0] sm:$0xff] %vm837_vm3, %v1430_v37  ;;  %v6868_v37 = vld [vmem:[%s7615_s23 + $0x186] sm:$0xff] }
 0x26f   : > { %1738 = vst.msk [vmem:[#allocation2 + $0x60] sm:$0xff] %vm450_vm1, %v1645_v40  ;;  %v3115_v40 = vld [vmem:[#allocation2 + $0x210] sm:$0xff]  ;;  %v3205_v4 = vld [vmem:[#allocation2 + $0x4e0] sm:$0xff]  ;;  %v3150_v19 = vld [vmem:[#allocation2 + $0x328] sm:$0xff] }
 0x270   : > { %1563 = vst.msk [vmem:[#allocation2 + $0x330] sm:$0xff] %vm257_vm0, %v6868_v37 }
 0x272   : > { %1842 = vrot.lane.b32.xlu1 %v8753_v61, %s7567_s25  ;;  %1840 = vrot.lane.b32.xlu0 %v8756_v6, %s7567_s25 }
 0x273   : > { %1844 = vrot.lane.b32.xlu2 %v8766_v47, %s7567_s25 }
 0x274   : > { %v1438_v32 = vpop.permute.xlu1 %1437  ;;  %v1436_v43 = vpop.permute.xlu0 %1435  ;;  %v3170_v46 = vld [vmem:[#allocation2 + $0x3c8] sm:$0xff] }
 0x275   : > { %1506 = vst.msk [vmem:[#allocation2 + $0x440] sm:$0xff] %vm837_vm3, %v1438_v32  ;;  %3535 = vmatmul.f32.gmra.mxu1 %v3090_v2  ;;  %3583 = vmatmul.f32.vlgmr.msrb.gmra.mxu3 %v3170_v46  ;;  %v1651_v53 = vpop.permute.xlu2 %1650  ;;  %v6869_v32 = vld [vmem:[%s7615_s23 + $0x18e] sm:$0xff]  ;;  %v8899_v2 = vld [vmem:[%s7615_s23 + $0x13b] sm:$0xff] }
 0x276   : > { %1505 = vst.msk [vmem:[#allocation2 + $0x418] sm:$0xff] %vm837_vm3, %v1436_v43  ;;  %v8896_v43 = vld [vmem:[%s7615_s23 + $0x143] sm:$0xff] }
 0x277   : > { %1741 = vst.msk [vmem:[#allocation2 + $0xd8] sm:$0xff] %vm450_vm1, %v1651_v53  ;;  %v6871_v53 = vld [vmem:[%s7615_s23 + $0x1a6] sm:$0xff] }
 0x278   : > { %1564 = vst.msk [vmem:[#allocation2 + $0x358] sm:$0xff] %vm257_vm0, %v6869_v32 }
 0x279   : > { %1566 = vst.msk [vmem:[#allocation2 + $0x3a8] sm:$0xff] %vm257_vm0, %v6871_v53  ;;  %v3140_v53 = vld [vmem:[#allocation2 + $0x2d8] sm:$0xff] }
 0x27a   : > { %1848 = vrot.lane.b32.xlu1 %v8777_v49, %s7567_s25  ;;  %1846 = vrot.lane.b32.xlu0 %v8780_v44, %s7567_s25 }
 0x27b   : > { %1850 = vrot.lane.b32.xlu2 %v8790_v5, %s7567_s25 }
 0x27c   : > { %v1444_v51 = vpop.permute.xlu1 %1443  ;;  %v1442_v56 = vpop.permute.xlu0 %1441  ;;  %v3185_v27 = vld [vmem:[#allocation2 + $0x440] sm:$0xff] }
 0x27d   : > { %1509 = vst.msk [vmem:[#allocation2 + $0x4b8] sm:$0xff] %vm837_vm3, %v1444_v51  ;;  %3538 = vmatmul.f32.gmra.mxu1 %v3095_v55  ;;  %3586 = vmatmul.f32.gmra.mxu3 %v3175_v48  ;;  %v1657_v52 = vpop.permute.xlu2 %1656  ;;  %v3180_v62 = vld [vmem:[#allocation2 + $0x418] sm:$0xff] }
 0x27e   : > { %1508 = vst.msk [vmem:[#allocation2 + $0x490] sm:$0xff] %vm837_vm3, %v1442_v56  ;;  %v6873_v56 = vld [vmem:[%s7615_s23 + $0x1be] sm:$0xff]  ;;  %v6872_v55 = vld [vmem:[%s7615_s23 + $0x1b6] sm:$0xff] }
 0x27f   : > { %1744 = vst.msk [vmem:[#allocation2 + $0x150] sm:$0xff] %vm450_vm1, %v1657_v52  ;;  %v8923_v52 = vld [vmem:[%s7615_s23 + $0x15b] sm:$0xff] }
 0x280   : > { %1568 = vst.msk [vmem:[#allocation2 + $0x3f8] sm:$0xff] %vm257_vm0, %v6873_v56 }
 0x281   : > { %1567 = vst.msk [vmem:[#allocation2 + $0x3d0] sm:$0xff] %vm257_vm0, %v6872_v55 }
 0x282   : > { %1854 = vrot.lane.b32.xlu1 %v8801_v58, %s7567_s25  ;;  %1852 = vrot.lane.b32.xlu0 %v8804_v23, %s7567_s25 }
 0x283   : > { %1856 = vrot.lane.b32.xlu2 %v8814_v54, %s7567_s25 }
 0x284   : > { %v1643_v10 = vpop.permute.xlu1 %1642  ;;  %v1641_v3 = vpop.permute.xlu0 %1640  ;;  %v3200_v51 = vld [vmem:[#allocation2 + $0x4b8] sm:$0xff] }
 0x285   : > { %1737 = vst.msk [vmem:[#allocation2 + $0x38] sm:$0xff] %vm450_vm1, %v1643_v10  ;;  %3541 = vmatmul.f32.gmra.mxu1 %v3100_v33  ;;  %3589 = vmatmul.f32.gmra.mxu3 %v3180_v62  ;;  %v1663_v8 = vpop.permute.xlu2 %1662  ;;  %v3195_v29 = vld [vmem:[#allocation2 + $0x490] sm:$0xff]  ;;  %v3125_v62 = vld [vmem:[#allocation2 + $0x260] sm:$0xff] }
 0x286   : > { %1736 = vst.msk [vmem:[#allocation2 + $0x10] sm:$0xff] %vm450_vm1, %v1641_v3  ;;  %v6874_v10 = vld [vmem:[%s7615_s23 + $0x1ce] sm:$0xff] }
 0x287   : > { %1747 = vst.msk [vmem:[#allocation2 + $0x1c8] sm:$0xff] %vm450_vm1, %v1663_v8  ;;  %v6876_v8 = vld [vmem:[%s7615_s23 + $0x1e6] sm:$0xff] }
 0x288   : > { %1569 = vst.msk [vmem:[#allocation2 + $0x420] sm:$0xff] %vm257_vm0, %v6874_v10  ;;  %v9018_v10 = vld [vmem:[%s7615_s23 + $0x9c] sm:$0xff] }
 0x289   : > { %1571 = vst.msk [vmem:[#allocation2 + $0x470] sm:$0xff] %vm257_vm0, %v6876_v8 }
 0x28a   : > { %1860 = vrot.lane.b32.xlu1 %v8825_v59, %s7567_s25  ;;  %1858 = vrot.lane.b32.xlu0 %v8828_v12, %s7567_s25 }
 0x28b   : > { %1862 = vrot.lane.b32.xlu2 %v8838_v38, %s7567_s25 }
 0x28c   : > { %v1649_v13 = vpop.permute.xlu1 %1648  ;;  %v1647_v17 = vpop.permute.xlu0 %1646 }
 0x28d   : > { %1740 = vst.msk [vmem:[#allocation2 + $0xb0] sm:$0xff] %vm450_vm1, %v1649_v13  ;;  %3544 = vmatmul.f32.gmra.mxu1 %v3105_v41  ;;  %3592 = vmatmul.f32.gmra.mxu3 %v3185_v27  ;;  %v1669_v36 = vpop.permute.xlu2 %1668  ;;  %v8947_v13 = vld [vmem:[%s7615_s23 + $0x183] sm:$0xff]  ;;  %v8957_v41 = vld [vmem:[%s7615_s23 + $0x19b] sm:$0xff]  ;;  %v6877_v27 = vld [vmem:[%s7615_s23 + $0x1ee] sm:$0xff] }
 0x28e   : > { %1739 = vst.msk [vmem:[#allocation2 + $0x88] sm:$0xff] %vm450_vm1, %v1647_v17 }
 0x28f   : > { %1750 = vst.msk [vmem:[#allocation2 + $0x240] sm:$0xff] %vm450_vm1, %v1669_v36 }
 0x290   : > { %1572 = vst.msk [vmem:[#allocation2 + $0x498] sm:$0xff] %vm257_vm0, %v6877_v27  ;;  %v9039_v27 = vld [vmem:[%s7615_s23 + $0xb4] sm:$0xff] }
 0x292   : > { %1866 = vrot.lane.b32.xlu1 %v8849_v26, %s7567_s25  ;;  %1864 = vrot.lane.b32.xlu0 %v8852_v42, %s7567_s25 }
 0x293   : > { %1868 = vrot.lane.b32.xlu2 %v8861_v39, %s7567_s25 }
 0x294   : > { %v1655_v35 = vpop.permute.xlu1 %1654  ;;  %v1653_v18 = vpop.permute.xlu0 %1652 }
 0x295   : > { %1743 = vst.msk [vmem:[#allocation2 + $0x128] sm:$0xff] %vm450_vm1, %v1655_v35  ;;  %3547 = vmatmul.f32.gmra.mxu1 %v3110_v20  ;;  %3595 = vmatmul.f32.gmra.mxu3 %v3190_v50  ;;  %v1675_v31 = vpop.permute.xlu2 %1674  ;;  %v6879_v35 = vld [vmem:[%s7615_s23 + $0x206] sm:$0xff]  ;;  %v6944_v20 = vld [vmem:[%s7615_s23 + $0x34] sm:$0xff] }
 0x296   : > { %1742 = vst.msk [vmem:[#allocation2 + $0x100] sm:$0xff] %vm450_vm1, %v1653_v18  ;;  %v6878_v18 = vld [vmem:[%s7615_s23 + $0x1fe] sm:$0xff] }
 0x297   : > { %1753 = vst.msk [vmem:[#allocation2 + $0x2b8] sm:$0xff] %vm450_vm1, %v1675_v31  ;;  %v8969_v50 = vld [vmem:[%s7615_s23 + $0x1a3] sm:$0xff] }
 0x298   : > { %1574 = vst.msk [vmem:[#allocation2 + $0x4e8] sm:$0xff] %vm257_vm0, %v6879_v35 }
 0x299   : > { %1573 = vst.msk [vmem:[#allocation2 + $0x4c0] sm:$0xff] %vm257_vm0, %v6878_v18  ;;  %v3155_v18 = vld [vmem:[#allocation2 + $0x350] sm:$0xff] }
 0x29a   : > { %1872 = vrot.lane.b32.xlu1 %v8872_v24, %s7567_s25  ;;  %1870 = vrot.lane.b32.xlu0 %v8875_v28, %s7567_s25 }
 0x29b   : > { %1874 = vrot.lane.b32.xlu2 %v8885_v34, %s7567_s25 }
 0x29c   : > { %v1661_v57 = vpop.permute.xlu1 %1660  ;;  %v1659_v15 = vpop.permute.xlu0 %1658 }
 0x29d   : > { %1746 = vst.msk [vmem:[#allocation2 + $0x1a0] sm:$0xff] %vm450_vm1, %v1661_v57  ;;  %3550 = vmatmul.f32.gmra.mxu1 %v3115_v40  ;;  %3598 = vmatmul.f32.gmra.mxu3 %v3195_v29  ;;  %v1681_v46 = vpop.permute.xlu2 %1680  ;;  %v3135_v57 = vld [vmem:[#allocation2 + $0x2b0] sm:$0xff] }
 0x29e   : > { %1745 = vst.msk [vmem:[#allocation2 + $0x178] sm:$0xff] %vm450_vm1, %v1659_v15  ;;  %v8982_v15 = vld [vmem:[%s7615_s23 + $0x54] sm:$0xff]  ;;  %v8985_v40 = vld [vmem:[%s7615_s23 + $0x4c] sm:$0xff] }
 0x29f   : > { %1756 = vst.msk [vmem:[#allocation2 + $0x330] sm:$0xff] %vm450_vm1, %v1681_v46 }
 0x2a2   : > { %1878 = vrot.lane.b32.xlu1 %v8896_v43, %s7567_s25  ;;  %1876 = vrot.lane.b32.xlu0 %v8899_v2, %s7567_s25 }
 0x2a3   : > { %1880 = vrot.lane.b32.xlu2 %v8909_v14, %s7567_s25 }
 0x2a4   : > { %v1667_v48 = vpop.permute.xlu1 %1666  ;;  %v1665_v11 = vpop.permute.xlu0 %1664 }
 0x2a5   : > { %1749 = vst.msk [vmem:[#allocation2 + $0x218] sm:$0xff] %vm450_vm1, %v1667_v48  ;;  %3553 = vmatmul.f32.gmra.mxu1 %v3120_v60  ;;  %3601 = vmatmul.f32.gmra.mxu3 %v3200_v51  ;;  %v1687_v0 = vpop.permute.xlu2 %1686  ;;  %v9000_v48 = vld [vmem:[%s7615_s23 + $0x7c] sm:$0xff]  ;;  %v9011_v51 = vld [vmem:[%s7615_s23 + $0x84] sm:$0xff] }
 0x2a6   : > { %1748 = vst.msk [vmem:[#allocation2 + $0x1f0] sm:$0xff] %vm450_vm1, %v1665_v11  ;;  %v9003_v11 = vld [vmem:[%s7615_s23 + $0x6c] sm:$0xff] }
 0x2a7   : > { %1759 = vst.msk [vmem:[#allocation2 + $0x3a8] sm:$0xff] %vm450_vm1, %v1687_v0  ;;  %v3145_v0 = vld [vmem:[#allocation2 + $0x300] sm:$0xff] }
 0x2aa   : > { %1884 = vrot.lane.b32.xlu1 %v8920_v1, %s7567_s25  ;;  %1882 = vrot.lane.b32.xlu0 %v8923_v52, %s7567_s25 }
 0x2ab   : > { %1886 = vrot.lane.b32.xlu2 %v8933_v63, %s7567_s25 }
 0x2ac   : > { %v1673_v3 = vpop.permute.xlu1 %1672  ;;  %v1671_v33 = vpop.permute.xlu0 %1670 }
 0x2ad   : > { %1752 = vst.msk [vmem:[#allocation2 + $0x290] sm:$0xff] %vm450_vm1, %v1673_v3  ;;  %3556 = vmatmul.f32.gmra.mxu1 %v3125_v62  ;;  %3604 = vmatmul.f32.gmra.mxu3 %v3205_v4  ;;  %v1693_v17 = vpop.permute.xlu2 %1692  ;;  %v9021_v3 = vld [vmem:[%s7615_s23 + $0x94] sm:$0xff]  ;;  %v9029_v62 = vld [vmem:[%s7615_s23 + $0xac] sm:$0xff] }
 0x2ae   : > { %1751 = vst.msk [vmem:[#allocation2 + $0x268] sm:$0xff] %vm450_vm1, %v1671_v33 }
 0x2af   : > { %1762 = vst.msk [vmem:[#allocation2 + $0x420] sm:$0xff] %vm450_vm1, %v1693_v17  ;;  %v9036_v17 = vld [vmem:[%s7615_s23 + $0xc4] sm:$0xff] }
 0x2b2   : > { %1890 = vrot.lane.b32.xlu1 %v8944_v7, %s7567_s25  ;;  %1888 = vrot.lane.b32.xlu0 %v8947_v13, %s7567_s25 }
 0x2b3   : > { %1892 = vrot.lane.b32.xlu2 %v8957_v41, %s7567_s25 }
 0x2b4   : > { %v1679_v16 = vpop.permute.xlu1 %1678  ;;  %v1677_v36 = vpop.permute.xlu0 %1676 }
 0x2b5   : > { %1755 = vst.msk [vmem:[#allocation2 + $0x308] sm:$0xff] %vm450_vm1, %v1679_v16  ;;  %3559 = vmatmul.f32.gmra.mxu1 %v3130_v25  ;;  %v1699_v9 = vpop.permute.xlu2 %1698 }
 0x2b6   : > { %1754 = vst.msk [vmem:[#allocation2 + $0x2e0] sm:$0xff] %vm450_vm1, %v1677_v36  ;;  %v9047_v36 = vld [vmem:[%s7615_s23 + $0xcc] sm:$0xff] }
 0x2b7   : > { %1765 = vst.msk [vmem:[#allocation2 + $0x498] sm:$0xff] %vm450_vm1, %v1699_v9  ;;  %v9057_v9 = vld [vmem:[%s7615_s23 + $0xdc] sm:$0xff] }
 0x2ba   : > { %2024 = vrot.lane.b32.xlu1 %v6944_v20, %s7568_s26  ;;  %1894 = vrot.lane.b32.xlu0 %v8969_v50, %s7567_s25  ;;  %v9054_v20 = vld [vmem:[%s7615_s23 + $0xe4] sm:$0xff] }
 0x2bb   : > { %2026 = vrot.lane.b32.xlu2 %v6945_v22, %s7568_s26 }
 0x2bc   : > { %v1685_v31 = vpop.permute.xlu1 %1684  ;;  %v1683_v37 = vpop.permute.xlu0 %1682 }
 0x2bd   : > { %1758 = vst.msk [vmem:[#allocation2 + $0x380] sm:$0xff] %vm450_vm1, %v1685_v31  ;;  %3562 = vmatmul.f32.gmra.mxu1 %v3135_v57  ;;  %v1833_v29 = vpop.permute.xlu2 %1832  ;;  %v9065_v31 = vld [vmem:[%s7615_s23 + $0xf4] sm:$0xff] }
 0x2be   : > { %1757 = vst.msk [vmem:[#allocation2 + $0x358] sm:$0xff] %vm450_vm1, %v1683_v37 }
 0x2bf   : > { %1928 = vst.msk [vmem:[#allocation2 + $0x10] sm:$0xff] %vm643_vm2, %v1833_v29  ;;  %v3160_v29 = vld [vmem:[#allocation2 + $0x378] sm:$0xff] }
 0x2c2   : > { %2030 = vrot.lane.b32.xlu1 %v8982_v15, %s7568_s26  ;;  %2028 = vrot.lane.b32.xlu0 %v8985_v40, %s7568_s26 }
 0x2c3   : > { %2032 = vrot.lane.b32.xlu2 %v8993_v45, %s7568_s26 }
 0x2c4   : > { %v1691_v32 = vpop.permute.xlu1 %1690  ;;  %v1689_v46 = vpop.permute.xlu0 %1688 }
 0x2c5   : > { %1761 = vst.msk [vmem:[#allocation2 + $0x3f8] sm:$0xff] %vm450_vm1, %v1691_v32  ;;  %3565 = vmatmul.f32.gmra.mxu1 %v3140_v53  ;;  %v1839_v60 = vpop.permute.xlu2 %1838  ;;  %v9072_v32 = vld [vmem:[%s7615_s23 + $0x10c] sm:$0xff] }
 0x2c6   : > { %1760 = vst.msk [vmem:[#allocation2 + $0x3d0] sm:$0xff] %vm450_vm1, %v1689_v46  ;;  %v9075_v46 = vld [vmem:[%s7615_s23 + $0xfc] sm:$0xff] }
 0x2c7   : > { %1931 = vst.msk [vmem:[#allocation2 + $0x88] sm:$0xff] %vm643_vm2, %v1839_v60  ;;  %v9083_v60 = vld [vmem:[%s7615_s23 + $0x114] sm:$0xff] }
 0x2ca   : > { %2036 = vrot.lane.b32.xlu1 %v9000_v48, %s7568_s26  ;;  %2034 = vrot.lane.b32.xlu0 %v9003_v11, %s7568_s26 }
 0x2cb   : > { %2038 = vrot.lane.b32.xlu2 %v9011_v51, %s7568_s26 }
 0x2cc   : > { %v1697_v56 = vpop.permute.xlu1 %1696  ;;  %v1695_v55 = vpop.permute.xlu0 %1694 }
 0x2cd   : > { %1764 = vst.msk [vmem:[#allocation2 + $0x470] sm:$0xff] %vm450_vm1, %v1697_v56  ;;  %3568 = vmatmul.f32.gmra.mxu1 %v3145_v0  ;;  %v1845_v33 = vpop.permute.xlu2 %1844  ;;  %v3165_v0 = vld [vmem:[#allocation2 + $0x3a0] sm:$0xff] }
 0x2ce   : > { %1763 = vst.msk [vmem:[#allocation2 + $0x448] sm:$0xff] %vm450_vm1, %v1695_v55 }
 0x2cf   : > { %1934 = vst.msk [vmem:[#allocation2 + $0x100] sm:$0xff] %vm643_vm2, %v1845_v33  ;;  %v9090_v33 = vld [vmem:[%s7615_s23 + $0x12c] sm:$0xff] }
 0x2d2   : > { %2042 = vrot.lane.b32.xlu1 %v9018_v10, %s7568_s26  ;;  %2040 = vrot.lane.b32.xlu0 %v9021_v3, %s7568_s26 }
 0x2d3   : > { %2044 = vrot.lane.b32.xlu2 %v9029_v62, %s7568_s26 }
 0x2d4   : > { %v1703_v4 = vpop.permute.xlu1 %1702  ;;  %v1701_v8 = vpop.permute.xlu0 %1700 }
 0x2d5   : > { %1767 = vst.msk [vmem:[#allocation2 + $0x4e8] sm:$0xff] %vm450_vm1, %v1703_v4  ;;  %3571 = vmatmul.f32.gmra.mxu1 %v3150_v19  ;;  %v1851_v16 = vpop.permute.xlu2 %1850  ;;  %v9093_v4 = vld [vmem:[%s7615_s23 + $0x124] sm:$0xff]  ;;  %v9101_v19 = vld [vmem:[%s7615_s23 + $0x13c] sm:$0xff] }
 0x2d6   : > { %1766 = vst.msk [vmem:[#allocation2 + $0x4c0] sm:$0xff] %vm450_vm1, %v1701_v8 }
 0x2d7   : > { %1937 = vst.msk [vmem:[#allocation2 + $0x178] sm:$0xff] %vm643_vm2, %v1851_v16 }
 0x2da   : > { %2048 = vrot.lane.b32.xlu1 %v9036_v17, %s7568_s26  ;;  %2046 = vrot.lane.b32.xlu0 %v9039_v27, %s7568_s26 }
 0x2db   : > { %2050 = vrot.lane.b32.xlu2 %v9047_v36, %s7568_s26 }
 0x2dc   : > { %v1837_v25 = vpop.permute.xlu1 %1836  ;;  %v1835_v35 = vpop.permute.xlu0 %1834 }
 0x2dd   : > { %1930 = vst.msk [vmem:[#allocation2 + $0x60] sm:$0xff] %vm643_vm2, %v1837_v25  ;;  %3574 = vmatmul.f32.gmra.mxu1 %v3155_v18  ;;  %v1857_v22 = vpop.permute.xlu2 %1856  ;;  %v9111_v18 = vld [vmem:[%s7615_s23 + $0x154] sm:$0xff] }
 0x2de   : > { %1929 = vst.msk [vmem:[#allocation2 + $0x38] sm:$0xff] %vm643_vm2, %v1835_v35  ;;  %v3256_v35 = vld [vmem:[%s11866_s1 + $0x178] sm:$0xff] }
 0x2df   : > { %1940 = vst.msk [vmem:[#allocation2 + $0x1f0] sm:$0xff] %vm643_vm2, %v1857_v22  ;;  %v9114_v22 = vld [vmem:[%s7615_s23 + $0x144] sm:$0xff]  ;;  %3608 = vmatpush.msra.mxu2 %v3256_v35  ;;  %7331 = vmatpush.msra.mxu3 %v3256_v35 }
 0x2e2   : > { %2054 = vrot.lane.b32.xlu1 %v9054_v20, %s7568_s26  ;;  %2052 = vrot.lane.b32.xlu0 %v9057_v9, %s7568_s26 }
 0x2e3   : > { %2056 = vrot.lane.b32.xlu2 %v9065_v31, %s7568_s26 }
 0x2e4   : > { %v1843_v37 = vpop.permute.xlu1 %1842  ;;  %v1841_v57 = vpop.permute.xlu0 %1840 }
 0x2e5   : > { %1933 = vst.msk [vmem:[#allocation2 + $0xd8] sm:$0xff] %vm643_vm2, %v1843_v37  ;;  %3577 = vmatmul.f32.gmra.mxu1 %v3160_v29  ;;  %v1863_v53 = vpop.permute.xlu2 %1862  ;;  %v3254_v29 = vld [vmem:[%s11866_s1 + $0x168] sm:$0xff] }
 0x2e6   : > { %1932 = vst.msk [vmem:[#allocation2 + $0xb0] sm:$0xff] %vm643_vm2, %v1841_v57  ;;  %v3255_v57 = vld [vmem:[%s11866_s1 + $0x170] sm:$0xff] }
 0x2e7   : > { %1943 = vst.msk [vmem:[#allocation2 + $0x268] sm:$0xff] %vm643_vm2, %v1863_v53  ;;  %3609 = vmatpush.msra.mxu2 %v3255_v57  ;;  %7332 = vmatpush.msra.mxu3 %v3255_v57  ;;  %v9128_v53 = vld [vmem:[%s7615_s23 + $0x15c] sm:$0xff]  ;;  %v3250_v57 = vld [vmem:[%s11866_s1 + $0x148] sm:$0xff] }
 0x2e9   : > { %3610 = vmatpush.msra.mxu2 %v3254_v29  ;;  %7333 = vmatpush.msra.mxu3 %v3254_v29  ;;  %v9158_v29 = vld [vmem:[%s7615_s23 + $0x184] sm:$0xff] }
 0x2ea   : > { %2060 = vrot.lane.b32.xlu1 %v9072_v32, %s7568_s26  ;;  %2058 = vrot.lane.b32.xlu0 %v9075_v46, %s7568_s26 }
 0x2eb   : > { %2062 = vrot.lane.b32.xlu2 %v9083_v60, %s7568_s26 }
 0x2ec   : > { %v1849_v56 = vpop.permute.xlu1 %1848  ;;  %v1847_v55 = vpop.permute.xlu0 %1846 }
 0x2ed   : > { %1936 = vst.msk [vmem:[#allocation2 + $0x150] sm:$0xff] %vm643_vm2, %v1849_v56  ;;  %3580 = vmatmul.f32.gmra.mxu1 %v3165_v0  ;;  %v1869_v8 = vpop.permute.xlu2 %1868  ;;  %v3253_v56 = vld [vmem:[%s11866_s1 + $0x160] sm:$0xff] }
 0x2ee   : > { %1935 = vst.msk [vmem:[#allocation2 + $0x128] sm:$0xff] %vm643_vm2, %v1847_v55  ;;  %3611 = vmatpush.msra.mxu2 %v3253_v56  ;;  %7334 = vmatpush.msra.mxu3 %v3253_v56  ;;  %v3249_v56 = vld [vmem:[%s11866_s1 + $0x140] sm:$0xff] }
 0x2ef   : > { %1946 = vst.msk [vmem:[#allocation2 + $0x2e0] sm:$0xff] %vm643_vm2, %v1869_v8  ;;  %v3252_v8 = vld [vmem:[%s11866_s1 + $0x158] sm:$0xff] }
 0x2f0   : > { %3612 = vmatpush.msra.mxu2 %v3252_v8  ;;  %7335 = vmatpush.msra.mxu3 %v3252_v8  ;;  %v3248_v8 = vld [vmem:[%s11866_s1 + $0x138] sm:$0xff] }
 0x2f2   : > { %2066 = vrot.lane.b32.xlu1 %v9090_v33, %s7568_s26  ;;  %2064 = vrot.lane.b32.xlu0 %v9093_v4, %s7568_s26 }
 0x2f3   : > { %2068 = vrot.lane.b32.xlu2 %v9101_v19, %s7568_s26 }
 0x2f4   : > { %v1855_v16 = vpop.permute.xlu1 %1854  ;;  %v1853_v25 = vpop.permute.xlu0 %1852 }
 0x2f5   : > { %1939 = vst.msk [vmem:[#allocation2 + $0x1c8] sm:$0xff] %vm643_vm2, %v1855_v16  ;;  %v1875_v37 = vpop.permute.xlu2 %1874  ;;  %v9141_v16 = vld [vmem:[%s7615_s23 + $0x174] sm:$0xff] }
 0x2f6   : > { %1938 = vst.msk [vmem:[#allocation2 + $0x1a0] sm:$0xff] %vm643_vm2, %v1853_v25  ;;  %v9144_v25 = vld [vmem:[%s7615_s23 + $0x16c] sm:$0xff] }
 0x2f7   : > { %1949 = vst.msk [vmem:[#allocation2 + $0x358] sm:$0xff] %vm643_vm2, %v1875_v37  ;;  %v3251_v37 = vld [vmem:[%s11866_s1 + $0x150] sm:$0xff] }
 0x2f8   : > { %11981 = vst [vmem:[#allocation3_spill] sm:$0xff] %v9141_v16  ;;  %3613 = vmatpush.msra.mxu2 %v3251_v37  ;;  %7336 = vmatpush.msra.mxu3 %v3251_v37  ;;  %v9174_v37 = vld [vmem:[%s7615_s23 + $0x18c] sm:$0xff] }
 0x2fa   : > { %2072 = vrot.lane.b32.xlu1 %v9111_v18, %s7568_s26  ;;  %2070 = vrot.lane.b32.xlu0 %v9114_v22, %s7568_s26 }
 0x2fb   : > { %2074 = vrot.lane.b32.xlu2 %v9128_v53, %s7568_s26  ;;  %3614 = vmatpush.msra.mxu2 %v3250_v57 }
 0x2fc   : > { %v1861_v55 = vpop.permute.xlu1 %1860  ;;  %v1859_v0 = vpop.permute.xlu0 %1858  ;;  %7337 = vmatpush.msra.mxu3 %v3250_v57 }
 0x2fd   : > { %1942 = vst.msk [vmem:[#allocation2 + $0x240] sm:$0xff] %vm643_vm2, %v1861_v55  ;;  %v1881_v35 = vpop.permute.xlu2 %1880  ;;  %3615 = vmatpush.msra.mxu2 %v3249_v56 }
 0x2fe   : > { %1941 = vst.msk [vmem:[#allocation2 + $0x218] sm:$0xff] %vm643_vm2, %v1859_v0  ;;  %7338 = vmatpush.msra.mxu3 %v3249_v56  ;;  %v3247_v56 = vld [vmem:[%s11866_s1 + $0x130] sm:$0xff] }
 0x2ff   : > { %1952 = vst.msk [vmem:[#allocation2 + $0x3d0] sm:$0xff] %vm643_vm2, %v1881_v35  ;;  %v9171_v35 = vld [vmem:[%s7615_s23 + $0x19c] sm:$0xff]  ;;  %3616 = vmatpush.msra.mxu2 %v3248_v8 }
 0x300   : > { %11982 = vst [vmem:[#allocation4_spill] sm:$0xff] %v9171_v35  ;;  %7339 = vmatpush.msra.mxu3 %v3248_v8  ;;  %v3245_v8 = vld [vmem:[%s11866_s1 + $0x120] sm:$0xff] }
 0x301   : > { %3617 = vmatpush.msra.mxu2 %v3247_v56 }
 0x302   : > { %2078 = vrot.lane.b32.xlu1 %v9141_v16, %s7568_s26  ;;  %2076 = vrot.lane.b32.xlu0 %v9144_v25, %s7568_s26 }
 0x303   : > { %2080 = vrot.lane.b32.xlu2 %v9158_v29, %s7568_s26  ;;  %7340 = vmatpush.msra.mxu3 %v3247_v56  ;;  %v3244_v56 = vld [vmem:[%s11866_s1 + $0x118] sm:$0xff] }
 0x304   : > { %v1867_v55 = vpop.permute.xlu1 %1866  ;;  %v1865_v0 = vpop.permute.xlu0 %1864 }
 0x305   : > { %1945 = vst.msk [vmem:[#allocation2 + $0x2b8] sm:$0xff] %vm643_vm2, %v1867_v55  ;;  %v1887_v57 = vpop.permute.xlu2 %1886  ;;  %v3246_v55 = vld [vmem:[%s11866_s1 + $0x128] sm:$0xff] }
 0x306   : > { %1944 = vst.msk [vmem:[#allocation2 + $0x290] sm:$0xff] %vm643_vm2, %v1865_v0  ;;  %3618 = vmatpush.msra.mxu2 %v3246_v55  ;;  %v9188_v0 = vld [vmem:[%s7615_s23 + $0x1a4] sm:$0xff]  ;;  %7341 = vmatpush.msra.mxu3 %v3246_v55  ;;  %v3243_v55 = vld [vmem:[%s11866_s1 + $0x110] sm:$0xff] }
 0x307   : > { %1955 = vst.msk [vmem:[#allocation2 + $0x448] sm:$0xff] %vm643_vm2, %v1887_v57 }
 0x308   : > { %3619 = vmatpush.msra.mxu2 %v3245_v8  ;;  %7342 = vmatpush.msra.mxu3 %v3245_v8  ;;  %v3241_v8 = vld [vmem:[%s11866_s1 + $0x100] sm:$0xff] }
 0x30a   : > { %2084 = vrot.lane.b32.xlu1 %v9171_v35, %s7568_s26  ;;  %2082 = vrot.lane.b32.xlu0 %v9174_v37, %s7568_s26 }
 0x30b   : > { %2086 = vrot.lane.b32.xlu2 %v9188_v0, %s7568_s26  ;;  %3620 = vmatpush.msra.mxu2 %v3244_v56 }
 0x30c   : > { %v1873_v57 = vpop.permute.xlu1 %1872  ;;  %v1871_v16 = vpop.permute.xlu0 %1870  ;;  %7343 = vmatpush.msra.mxu3 %v3244_v56 }
 0x30d   : > { %1948 = vst.msk [vmem:[#allocation2 + $0x330] sm:$0xff] %vm643_vm2, %v1873_v57  ;;  %v1893_v35 = vpop.permute.xlu2 %1892  ;;  %3621 = vmatpush.msra.mxu2 %v3243_v55 }
 0x30e   : > { %1947 = vst.msk [vmem:[#allocation2 + $0x308] sm:$0xff] %vm643_vm2, %v1871_v16  ;;  %v3242_v16 = vld [vmem:[%s11866_s1 + $0x108] sm:$0xff]  ;;  %7344 = vmatpush.msra.mxu3 %v3243_v55 }
 0x30f   : > { %1958 = vst.msk [vmem:[#allocation2 + $0x4c0] sm:$0xff] %vm643_vm2, %v1893_v35  ;;  %3622 = vmatpush.msra.mxu2 %v3242_v16 }
 0x310   : > { %7345 = vmatpush.msra.mxu3 %v3242_v16 }
 0x311   : > { %3623 = vmatpush.msra.mxu2 %v3241_v8 }
 0x312   : > { %2282 = vrot.lane.b32.xlu1 %v8742_v30, %s7566_s24  ;;  %2280 = vrot.lane.b32.xlu0 %v8732_v21, %s7566_s24 }
 0x313   : > { %7346 = vmatpush.msra.mxu3 %v3241_v8  ;;  %2284 = vrot.lane.b32.xlu2 %v8756_v6, %s7566_s24 }
 0x314   : > { %v1879_v57 = vpop.permute.xlu1 %1878  ;;  %v1877_v35 = vpop.permute.xlu0 %1876 }
 0x315   : > { %1951 = vst.msk [vmem:[#allocation2 + $0x3a8] sm:$0xff] %vm643_vm2, %v1879_v57  ;;  %v2027_v30 = vpop.permute.xlu2 %2026 }
 0x316   : > { %1950 = vst.msk [vmem:[#allocation2 + $0x380] sm:$0xff] %vm643_vm2, %v1877_v35 }
 0x317   : > { %2121 = vst.msk [vmem:[#allocation2 + $0x38] sm:$0xff] %vm837_vm3, %v2027_v30 }
 0x31a   : > { %2288 = vrot.lane.b32.xlu1 %v8766_v47, %s7566_s24  ;;  %2286 = vrot.lane.b32.xlu0 %v8753_v61, %s7566_s24 }
 0x31b   : > { %2290 = vrot.lane.b32.xlu2 %v8780_v44, %s7566_s24 }
 0x31c   : > { %v1885_v21 = vpop.permute.xlu1 %1884  ;;  %v1883_v56 = vpop.permute.xlu0 %1882 }
 0x31d   : > { %1954 = vst.msk [vmem:[#allocation2 + $0x420] sm:$0xff] %vm643_vm2, %v1885_v21  ;;  %v2033_v55 = vpop.permute.xlu2 %2032  ;;  %v7038_v21 = vld [vmem:[%s7615_s23 + $0x1b3] sm:$0xff] }
 0x31e   : > { %1953 = vst.msk [vmem:[#allocation2 + $0x3f8] sm:$0xff] %vm643_vm2, %v1883_v56 }
 0x31f   : > { %2124 = vst.msk [vmem:[#allocation2 + $0xb0] sm:$0xff] %vm837_vm3, %v2033_v55 }
 0x322   : > { %2294 = vrot.lane.b32.xlu1 %v8790_v5, %s7566_s24  ;;  %2292 = vrot.lane.b32.xlu0 %v8777_v49, %s7566_s24 }
 0x323   : > { %2296 = vrot.lane.b32.xlu2 %v8804_v23, %s7566_s24 }
 0x324   : > { %v1891_v6 = vpop.permute.xlu1 %1890  ;;  %v1889_v61 = vpop.permute.xlu0 %1888 }
 0x325   : > { %1957 = vst.msk [vmem:[#allocation2 + $0x498] sm:$0xff] %vm643_vm2, %v1891_v6  ;;  %v2039_v47 = vpop.permute.xlu2 %2038 }
 0x326   : > { %1956 = vst.msk [vmem:[#allocation2 + $0x470] sm:$0xff] %vm643_vm2, %v1889_v61  ;;  %v3071_v35 = vld [vmem:[#allocation2 + $0xb0] sm:$0xff] }
 0x327   : > { %2127 = vst.msk [vmem:[#allocation2 + $0x128] sm:$0xff] %vm837_vm3, %v2039_v47  ;;  %v6976_v61 = vld [vmem:[%s7615_s23 + $0x4a] sm:$0xff]  ;;  %v9318_v47 = vld [vmem:[%s7615_s23 + $0x62] sm:$0xff] }
 0x328   : > { %2184 = vst.msk [vmem:[#allocation2 + $0x18] sm:$0xff] %vm257_vm0, %v6976_v61  ;;  %v9486_v61 = vld [vmem:[%s7615_s23 + $0x15a] sm:$0xff] }
 0x329   : > { %2186 = vst.msk [vmem:[#allocation2 + $0x68] sm:$0xff] %vm257_vm0, %v9318_v47 }
 0x32a   : > { %2300 = vrot.lane.b32.xlu1 %v8814_v54, %s7566_s24  ;;  %2298 = vrot.lane.b32.xlu0 %v8801_v58, %s7566_s24  ;;  %2207 = vst.msk [vmem:[#allocation2 + $0x3b0] sm:$0xff] %vm257_vm0, %v9486_v61 }
 0x32b   : > { %2302 = vrot.lane.b32.xlu2 %v8828_v12, %s7566_s24 }
 0x32c   : > { %v2025_v44 = vpop.permute.xlu1 %2024  ;;  %v1895_v49 = vpop.permute.xlu0 %1894 }
 0x32d   : > { %2120 = vst.msk [vmem:[#allocation2 + $0x10] sm:$0xff] %vm837_vm3, %v2025_v44  ;;  %v2045_v5 = vpop.permute.xlu2 %2044  ;;  %v9321_v44 = vld [vmem:[%s7615_s23 + $0x7a] sm:$0xff] }
 0x32e   : > { %1959 = vst.msk [vmem:[#allocation2 + $0x4e8] sm:$0xff] %vm643_vm2, %v1895_v49 }
 0x32f   : > { %2130 = vst.msk [vmem:[#allocation2 + $0x1a0] sm:$0xff] %vm837_vm3, %v2045_v5  ;;  %v3086_v5 = vld [vmem:[#allocation2 + $0x128] sm:$0xff] }
 0x330   : > { %2188 = vst.msk [vmem:[#allocation2 + $0xb8] sm:$0xff] %vm257_vm0, %v9321_v44 }
 0x332   : > { %2306 = vrot.lane.b32.xlu1 %v8838_v38, %s7566_s24  ;;  %2304 = vrot.lane.b32.xlu0 %v8825_v59, %s7566_s24  ;;  %v3056_v59 = vld [vmem:[#allocation2 + $0x38] sm:$0xff] }
 0x333   : > { %2308 = vrot.lane.b32.xlu2 %v8852_v42, %s7566_s24 }
 0x334   : > { %v2031_v23 = vpop.permute.xlu1 %2030  ;;  %v2029_v58 = vpop.permute.xlu0 %2028  ;;  %v3051_v54 = vld [vmem:[#allocation2 + $0x10] sm:$0xff] }
 0x335   : > { %2123 = vst.msk [vmem:[#allocation2 + $0x88] sm:$0xff] %vm837_vm3, %v2031_v23  ;;  %3624 = vmatmul.f32.vlgmr.msra.gmra.mxu2 %v3051_v54  ;;  %v2051_v12 = vpop.permute.xlu2 %2050  ;;  %v9328_v23 = vld [vmem:[%s7615_s23 + $0x6a] sm:$0xff] }
 0x336   : > { %2122 = vst.msk [vmem:[#allocation2 + $0x60] sm:$0xff] %vm837_vm3, %v2029_v58  ;;  %v9345_v58 = vld [vmem:[%s7615_s23 + $0x9a] sm:$0xff] }
 0x337   : > { %2133 = vst.msk [vmem:[#allocation2 + $0x218] sm:$0xff] %vm837_vm3, %v2051_v12 }
 0x338   : > { %2187 = vst.msk [vmem:[#allocation2 + $0x90] sm:$0xff] %vm257_vm0, %v9328_v23 }
 0x339   : > { %2191 = vst.msk [vmem:[#allocation2 + $0x130] sm:$0xff] %vm257_vm0, %v9345_v58 }
 0x33a   : > { %2312 = vrot.lane.b32.xlu1 %v8861_v39, %s7566_s24  ;;  %2310 = vrot.lane.b32.xlu0 %v8849_v26, %s7566_s24 }
 0x33b   : > { %2314 = vrot.lane.b32.xlu2 %v8875_v28, %s7566_s24 }
 0x33c   : > { %v2037_v38 = vpop.permute.xlu1 %2036  ;;  %v2035_v16 = vpop.permute.xlu0 %2034  ;;  %v3066_v57 = vld [vmem:[#allocation2 + $0x88] sm:$0xff] }
 0x33d   : > { %2126 = vst.msk [vmem:[#allocation2 + $0x100] sm:$0xff] %vm837_vm3, %v2037_v38  ;;  %3627 = vmatmul.f32.gmra.mxu2 %v3056_v59  ;;  %v2057_v42 = vpop.permute.xlu2 %2056  ;;  %v3061_v8 = vld [vmem:[#allocation2 + $0x60] sm:$0xff] }
 0x33e   : > { %2125 = vst.msk [vmem:[#allocation2 + $0xd8] sm:$0xff] %vm837_vm3, %v2035_v16  ;;  %v9366_v16 = vld [vmem:[%s7615_s23 + $0xaa] sm:$0xff] }
 0x33f   : > { %2136 = vst.msk [vmem:[#allocation2 + $0x290] sm:$0xff] %vm837_vm3, %v2057_v42  ;;  %v9369_v42 = vld [vmem:[%s7615_s23 + $0xc2] sm:$0xff] }
 0x340   : > { %2192 = vst.msk [vmem:[#allocation2 + $0x158] sm:$0xff] %vm257_vm0, %v9366_v16 }
 0x341   : > { %2194 = vst.msk [vmem:[#allocation2 + $0x1a8] sm:$0xff] %vm257_vm0, %v9369_v42 }
 0x342   : > { %2318 = vrot.lane.b32.xlu1 %v8885_v34, %s7566_s24  ;;  %2316 = vrot.lane.b32.xlu0 %v8872_v24, %s7566_s24 }
 0x343   : > { %2320 = vrot.lane.b32.xlu2 %v8899_v2, %s7566_s24 }
 0x344   : > { %v2043_v26 = vpop.permute.xlu1 %2042  ;;  %v2041_v39 = vpop.permute.xlu0 %2040  ;;  %v3081_v6 = vld [vmem:[#allocation2 + $0x100] sm:$0xff] }
 0x345   : > { %2129 = vst.msk [vmem:[#allocation2 + $0x178] sm:$0xff] %vm837_vm3, %v2043_v26  ;;  %3630 = vmatmul.f32.gmra.mxu2 %v3061_v8  ;;  %v2063_v28 = vpop.permute.xlu2 %2062  ;;  %v3076_v30 = vld [vmem:[#allocation2 + $0xd8] sm:$0xff]  ;;  %v9390_v8 = vld [vmem:[%s7615_s23 + $0xca] sm:$0xff] }
 0x346   : > { %2128 = vst.msk [vmem:[#allocation2 + $0x150] sm:$0xff] %vm837_vm3, %v2041_v39 }
 0x347   : > { %2139 = vst.msk [vmem:[#allocation2 + $0x308] sm:$0xff] %vm837_vm3, %v2063_v28  ;;  %v9393_v28 = vld [vmem:[%s7615_s23 + $0xe2] sm:$0xff] }
 0x348   : > { %2195 = vst.msk [vmem:[#allocation2 + $0x1d0] sm:$0xff] %vm257_vm0, %v9390_v8 }
 0x349   : > { %2197 = vst.msk [vmem:[#allocation2 + $0x220] sm:$0xff] %vm257_vm0, %v9393_v28 }
 0x34a   : > { %2324 = vrot.lane.b32.xlu1 %v8909_v14, %s7566_s24  ;;  %2322 = vrot.lane.b32.xlu0 %v8896_v43, %s7566_s24 }
 0x34b   : > { %2326 = vrot.lane.b32.xlu2 %v8923_v52, %s7566_s24 }
 0x34c   : > { %v2049_v24 = vpop.permute.xlu1 %2048  ;;  %v2047_v34 = vpop.permute.xlu0 %2046  ;;  %v3096_v39 = vld [vmem:[#allocation2 + $0x178] sm:$0xff] }
 0x34d   : > { %2132 = vst.msk [vmem:[#allocation2 + $0x1f0] sm:$0xff] %vm837_vm3, %v2049_v24  ;;  %3633 = vmatmul.f32.gmra.mxu2 %v3066_v57  ;;  %v2069_v2 = vpop.permute.xlu2 %2068  ;;  %v3091_v12 = vld [vmem:[#allocation2 + $0x150] sm:$0xff] }
 0x34e   : > { %2131 = vst.msk [vmem:[#allocation2 + $0x1c8] sm:$0xff] %vm837_vm3, %v2047_v34  ;;  %v3101_v34 = vld [vmem:[#allocation2 + $0x1a0] sm:$0xff] }
 0x34f   : > { %2142 = vst.msk [vmem:[#allocation2 + $0x380] sm:$0xff] %vm837_vm3, %v2069_v2  ;;  %v9414_v2 = vld [vmem:[%s7615_s23 + $0xf2] sm:$0xff] }
 0x350   : > { %2198 = vst.msk [vmem:[#allocation2 + $0x248] sm:$0xff] %vm257_vm0, %v9414_v2 }
 0x352   : > { %2330 = vrot.lane.b32.xlu1 %v8933_v63, %s7566_s24  ;;  %2328 = vrot.lane.b32.xlu0 %v8920_v1, %s7566_s24 }
 0x353   : > { %2332 = vrot.lane.b32.xlu2 %v8947_v13, %s7566_s24  ;;  %v7039_v13 = vld [vmem:[%s7615_s23 + $0x1bb] sm:$0xff] }
 0x354   : > { %v2055_v43 = vpop.permute.xlu1 %2054  ;;  %v2053_v14 = vpop.permute.xlu0 %2052 }
 0x355   : > { %2135 = vst.msk [vmem:[#allocation2 + $0x268] sm:$0xff] %vm837_vm3, %v2055_v43  ;;  %3636 = vmatmul.f32.gmra.mxu2 %v3071_v35  ;;  %v2075_v52 = vpop.permute.xlu2 %2074  ;;  %v9417_v43 = vld [vmem:[%s7615_s23 + $0x10a] sm:$0xff] }
 0x356   : > { %2134 = vst.msk [vmem:[#allocation2 + $0x240] sm:$0xff] %vm837_vm3, %v2053_v14  ;;  %v3106_v35 = vld [vmem:[#allocation2 + $0x1c8] sm:$0xff] }
 0x357   : > { %2145 = vst.msk [vmem:[#allocation2 + $0x3f8] sm:$0xff] %vm837_vm3, %v2075_v52 }
 0x358   : > { %2200 = vst.msk [vmem:[#allocation2 + $0x298] sm:$0xff] %vm257_vm0, %v9417_v43 }
 0x35a   : > { %2336 = vrot.lane.b32.xlu1 %v8957_v41, %s7566_s24  ;;  %2334 = vrot.lane.b32.xlu0 %v8944_v7, %s7566_s24  ;;  %v6977_v7 = vld [vmem:[%s7615_s23 + $0x52] sm:$0xff] }
 0x35b   : > { %2338 = vrot.lane.b32.xlu2 %v8969_v50, %s7566_s24  ;;  %2185 = vst.msk [vmem:[#allocation2 + $0x40] sm:$0xff] %vm257_vm0, %v6977_v7  ;;  %v9467_v7 = vld [vmem:[%s7615_s23 + $0x152] sm:$0xff] }
 0x35c   : > { %v2061_v1 = vpop.permute.xlu1 %2060  ;;  %v2059_v63 = vpop.permute.xlu0 %2058  ;;  %2206 = vst.msk [vmem:[#allocation2 + $0x388] sm:$0xff] %vm257_vm0, %v9467_v7 }
 0x35d   : > { %2138 = vst.msk [vmem:[#allocation2 + $0x2e0] sm:$0xff] %vm837_vm3, %v2061_v1  ;;  %3639 = vmatmul.f32.gmra.mxu2 %v3076_v30  ;;  %v2081_v56 = vpop.permute.xlu2 %2080  ;;  %v9438_v1 = vld [vmem:[%s7615_s23 + $0x112] sm:$0xff] }
 0x35e   : > { %2137 = vst.msk [vmem:[#allocation2 + $0x2b8] sm:$0xff] %vm837_vm3, %v2059_v63  ;;  %v3176_v38 = vld [vmem:[#allocation2 + $0x3f8] sm:$0xff]  ;;  %v9441_v63 = vld [vmem:[%s7615_s23 + $0x12a] sm:$0xff] }
 0x35f   : > { %2148 = vst.msk [vmem:[#allocation2 + $0x470] sm:$0xff] %vm837_vm3, %v2081_v56  ;;  %v9462_v56 = vld [vmem:[%s7615_s23 + $0x13a] sm:$0xff] }
 0x360   : > { %2201 = vst.msk [vmem:[#allocation2 + $0x2c0] sm:$0xff] %vm257_vm0, %v9438_v1 }
 0x361   : > { %2203 = vst.msk [vmem:[#allocation2 + $0x310] sm:$0xff] %vm257_vm0, %v9441_v63 }
 0x362   : > { %2342 = vrot.lane.b32.xlu1 %v7039_v13, %s7566_s24  ;;  %2340 = vrot.lane.b32.xlu0 %v7038_v21, %s7566_s24  ;;  %v3111_v13 = vld [vmem:[#allocation2 + $0x1f0] sm:$0xff]  ;;  %2204 = vst.msk [vmem:[#allocation2 + $0x338] sm:$0xff] %vm257_vm0, %v9462_v56 }
 0x363   : > { %2472 = vrot.lane.b32.xlu2 %v8985_v40, %s7567_s25 }
 0x364   : > { %v2067_v41 = vpop.permute.xlu1 %2066  ;;  %v2065_v55 = vpop.permute.xlu0 %2064 }
 0x365   : > { %2141 = vst.msk [vmem:[#allocation2 + $0x358] sm:$0xff] %vm837_vm3, %v2067_v41  ;;  %3642 = vmatmul.f32.gmra.mxu2 %v3081_v6  ;;  %v2087_v50 = vpop.permute.xlu2 %2086 }
 0x366   : > { %2140 = vst.msk [vmem:[#allocation2 + $0x330] sm:$0xff] %vm837_vm3, %v2065_v55  ;;  %v3191_v21 = vld [vmem:[#allocation2 + $0x470] sm:$0xff]  ;;  %v3116_v55 = vld [vmem:[#allocation2 + $0x218] sm:$0xff] }
 0x367   : > { %2151 = vst.msk [vmem:[#allocation2 + $0x4e8] sm:$0xff] %vm837_vm3, %v2087_v50  ;;  %v9489_v50 = vld [vmem:[%s7615_s23 + $0x172] sm:$0xff] }
 0x368   : > { %2209 = vst.msk [vmem:[#allocation2 + $0x400] sm:$0xff] %vm257_vm0, %v9489_v50 }
 0x36a   : > { %2476 = vrot.lane.b32.xlu1 %v8993_v45, %s7567_s25  ;;  %2474 = vrot.lane.b32.xlu0 %v8982_v15, %s7567_s25  ;;  %v9342_v45 = vld [vmem:[%s7615_s23 + $0x82] sm:$0xff] }
 0x36b   : > { %2478 = vrot.lane.b32.xlu2 %v9003_v11, %s7567_s25  ;;  %2189 = vst.msk [vmem:[#allocation2 + $0xe0] sm:$0xff] %vm257_vm0, %v9342_v45 }
 0x36c   : > { %v2073_v40 = vpop.permute.xlu1 %2072  ;;  %v2071_v49 = vpop.permute.xlu0 %2070 }
 0x36d   : > { %2144 = vst.msk [vmem:[#allocation2 + $0x3d0] sm:$0xff] %vm837_vm3, %v2073_v40  ;;  %3645 = vmatmul.f32.gmra.mxu2 %v3086_v5  ;;  %v2285_v15 = vpop.permute.xlu2 %2284 }
 0x36e   : > { %2143 = vst.msk [vmem:[#allocation2 + $0x3a8] sm:$0xff] %vm837_vm3, %v2071_v49  ;;  %v3121_v49 = vld [vmem:[#allocation2 + $0x240] sm:$0xff] }
 0x36f   : > { %2378 = vst.msk [vmem:[#allocation2 + $0x68] sm:$0xff] %vm450_vm1, %v2285_v15  ;;  %v11983_v15 = vld [vmem:[#allocation3_spill] sm:$0xff] }
 0x372   : > { %2482 = vrot.lane.b32.xlu1 %v9011_v51, %s7567_s25  ;;  %2480 = vrot.lane.b32.xlu0 %v9000_v48, %s7567_s25  ;;  %v9352_v51 = vld [vmem:[%s7615_s23 + $0x92] sm:$0xff] }
 0x373   : > { %2484 = vrot.lane.b32.xlu2 %v9021_v3, %s7567_s25  ;;  %2190 = vst.msk [vmem:[#allocation2 + $0x108] sm:$0xff] %vm257_vm0, %v9352_v51 }
 0x374   : > { %v2079_v11 = vpop.permute.xlu1 %2078  ;;  %v2077_v54 = vpop.permute.xlu0 %2076  ;;  %v3171_v59 = vld [vmem:[#allocation2 + $0x3d0] sm:$0xff] }
 0x375   : > { %2147 = vst.msk [vmem:[#allocation2 + $0x448] sm:$0xff] %vm837_vm3, %v2079_v11  ;;  %3648 = vmatmul.f32.gmra.mxu2 %v3091_v12  ;;  %3696 = vmatmul.f32.vlgmr.msra.gmra.mxu3 %v3171_v59  ;;  %v2291_v48 = vpop.permute.xlu2 %2290  ;;  %v9510_v11 = vld [vmem:[%s7615_s23 + $0x182] sm:$0xff] }
 0x376   : > { %2146 = vst.msk [vmem:[#allocation2 + $0x420] sm:$0xff] %vm837_vm3, %v2077_v54  ;;  %v9513_v54 = vld [vmem:[%s7615_s23 + $0x19a] sm:$0xff]  ;;  %v3126_v59 = vld [vmem:[#allocation2 + $0x268] sm:$0xff] }
 0x377   : > { %2381 = vst.msk [vmem:[#allocation2 + $0xe0] sm:$0xff] %vm450_vm1, %v2291_v48  ;;  %v3206_v48 = vld [vmem:[#allocation2 + $0x4e8] sm:$0xff] }
 0x378   : > { %2210 = vst.msk [vmem:[#allocation2 + $0x428] sm:$0xff] %vm257_vm0, %v9510_v11 }
 0x379   : > { %2212 = vst.msk [vmem:[#allocation2 + $0x478] sm:$0xff] %vm257_vm0, %v9513_v54 }
 0x37a   : > { %2488 = vrot.lane.b32.xlu1 %v9029_v62, %s7567_s25  ;;  %2486 = vrot.lane.b32.xlu0 %v9018_v10, %s7567_s25  ;;  %v9376_v62 = vld [vmem:[%s7615_s23 + $0xb2] sm:$0xff] }
 0x37b   : > { %2490 = vrot.lane.b32.xlu2 %v9039_v27, %s7567_s25  ;;  %2193 = vst.msk [vmem:[#allocation2 + $0x180] sm:$0xff] %vm257_vm0, %v9376_v62 }
 0x37c   : > { %v2085_v3 = vpop.permute.xlu1 %2084  ;;  %v2083_v26 = vpop.permute.xlu0 %2082  ;;  %v3186_v52 = vld [vmem:[#allocation2 + $0x448] sm:$0xff] }
 0x37d   : > { %2150 = vst.msk [vmem:[#allocation2 + $0x4c0] sm:$0xff] %vm837_vm3, %v2085_v3  ;;  %3651 = vmatmul.f32.gmra.mxu2 %v3096_v39  ;;  %3699 = vmatmul.f32.gmra.mxu3 %v3176_v38  ;;  %v2297_v10 = vpop.permute.xlu2 %2296  ;;  %v3181_v57 = vld [vmem:[#allocation2 + $0x420] sm:$0xff]  ;;  %v3280_v38 = vld [vmem:[%s11866_s1 + $0x238] sm:$0xff] }
 0x37e   : > { %2149 = vst.msk [vmem:[#allocation2 + $0x498] sm:$0xff] %vm837_vm3, %v2083_v26  ;;  %3842 = vmatpush.msrb.mxu0 %v3280_v38  ;;  %v11984_v26 = vld [vmem:[#allocation4_spill] sm:$0xff]  ;;  %v9540_v39 = vld [vmem:[%s7615_s23 + $0x1ba] sm:$0xff] }
 0x37f   : > { %2384 = vst.msk [vmem:[#allocation2 + $0x158] sm:$0xff] %vm450_vm1, %v2297_v10  ;;  %v9543_v10 = vld [vmem:[%s7615_s23 + $0x1b4] sm:$0xff] }
 0x380   : > { %2215 = vst.msk [vmem:[#allocation2 + $0x4f0] sm:$0xff] %vm257_vm0, %v9540_v39 }
 0x382   : > { %2494 = vrot.lane.b32.xlu1 %v9047_v36, %s7567_s25  ;;  %2492 = vrot.lane.b32.xlu0 %v9036_v17, %s7567_s25  ;;  %v9400_v36 = vld [vmem:[%s7615_s23 + $0xda] sm:$0xff] }
 0x383   : > { %2496 = vrot.lane.b32.xlu2 %v9057_v9, %s7567_s25  ;;  %2196 = vst.msk [vmem:[#allocation2 + $0x1f8] sm:$0xff] %vm257_vm0, %v9400_v36 }
 0x384   : > { %v2283_v27 = vpop.permute.xlu1 %2282  ;;  %v2281_v24 = vpop.permute.xlu0 %2280  ;;  %v3201_v5 = vld [vmem:[#allocation2 + $0x4c0] sm:$0xff] }
 0x385   : > { %2377 = vst.msk [vmem:[#allocation2 + $0x40] sm:$0xff] %vm450_vm1, %v2283_v27  ;;  %3654 = vmatmul.f32.gmra.mxu2 %v3101_v34  ;;  %3702 = vmatmul.f32.gmra.mxu3 %v3181_v57  ;;  %v2303_v17 = vpop.permute.xlu2 %2302  ;;  %v3196_v6 = vld [vmem:[#allocation2 + $0x498] sm:$0xff]  ;;  %v3131_v34 = vld [vmem:[#allocation2 + $0x290] sm:$0xff] }
 0x386   : > { %2376 = vst.msk [vmem:[#allocation2 + $0x18] sm:$0xff] %vm450_vm1, %v2281_v24  ;;  %v9550_v57 = vld [vmem:[%s7615_s23 + $0x1b2] sm:$0xff] }
 0x387   : > { %2387 = vst.msk [vmem:[#allocation2 + $0x1d0] sm:$0xff] %vm450_vm1, %v2303_v17 }
 0x388   : > { %2214 = vst.msk [vmem:[#allocation2 + $0x4c8] sm:$0xff] %vm257_vm0, %v9550_v57 }
 0x38a   : > { %2500 = vrot.lane.b32.xlu1 %v9065_v31, %s7567_s25  ;;  %2498 = vrot.lane.b32.xlu0 %v9054_v20, %s7567_s25  ;;  %v9424_v31 = vld [vmem:[%s7615_s23 + $0xfa] sm:$0xff] }
 0x38b   : > { %2502 = vrot.lane.b32.xlu2 %v9075_v46, %s7567_s25  ;;  %2199 = vst.msk [vmem:[#allocation2 + $0x270] sm:$0xff] %vm257_vm0, %v9424_v31 }
 0x38c   : > { %v2289_v9 = vpop.permute.xlu1 %2288  ;;  %v2287_v14 = vpop.permute.xlu0 %2286 }
 0x38d   : > { %2380 = vst.msk [vmem:[#allocation2 + $0xb8] sm:$0xff] %vm450_vm1, %v2289_v9  ;;  %3657 = vmatmul.f32.gmra.mxu2 %v3106_v35  ;;  %3705 = vmatmul.f32.gmra.mxu3 %v3186_v52  ;;  %v2309_v20 = vpop.permute.xlu2 %2308  ;;  %v3136_v35 = vld [vmem:[#allocation2 + $0x2b8] sm:$0xff] }
 0x38e   : > { %2379 = vst.msk [vmem:[#allocation2 + $0x90] sm:$0xff] %vm450_vm1, %v2287_v14 }
 0x38f   : > { %2390 = vst.msk [vmem:[#allocation2 + $0x248] sm:$0xff] %vm450_vm1, %v2309_v20 }
 0x392   : > { %2506 = vrot.lane.b32.xlu1 %v9083_v60, %s7567_s25  ;;  %2504 = vrot.lane.b32.xlu0 %v9072_v32, %s7567_s25  ;;  %v9448_v60 = vld [vmem:[%s7615_s23 + $0x122] sm:$0xff] }
 0x393   : > { %2508 = vrot.lane.b32.xlu2 %v9093_v4, %s7567_s25  ;;  %2202 = vst.msk [vmem:[#allocation2 + $0x2e8] sm:$0xff] %vm257_vm0, %v9448_v60 }
 0x394   : > { %v2295_v46 = vpop.permute.xlu1 %2294  ;;  %v2293_v30 = vpop.permute.xlu0 %2292 }
 0x395   : > { %2383 = vst.msk [vmem:[#allocation2 + $0x130] sm:$0xff] %vm450_vm1, %v2295_v46  ;;  %3660 = vmatmul.f32.gmra.mxu2 %v3111_v13  ;;  %3708 = vmatmul.f32.gmra.mxu3 %v3191_v21  ;;  %v2315_v32 = vpop.permute.xlu2 %2314  ;;  %v3141_v46 = vld [vmem:[#allocation2 + $0x2e0] sm:$0xff]  ;;  %v3146_v13 = vld [vmem:[#allocation2 + $0x308] sm:$0xff]  ;;  %v3151_v21 = vld [vmem:[#allocation2 + $0x330] sm:$0xff] }
 0x396   : > { %2382 = vst.msk [vmem:[#allocation2 + $0x108] sm:$0xff] %vm450_vm1, %v2293_v30 }
 0x397   : > { %2393 = vst.msk [vmem:[#allocation2 + $0x2c0] sm:$0xff] %vm450_vm1, %v2315_v32  ;;  %v3156_v32 = vld [vmem:[#allocation2 + $0x358] sm:$0xff] }
 0x39a   : > { %2512 = vrot.lane.b32.xlu1 %v9101_v19, %s7567_s25  ;;  %2510 = vrot.lane.b32.xlu0 %v9090_v33, %s7567_s25  ;;  %v9472_v19 = vld [vmem:[%s7615_s23 + $0x142] sm:$0xff] }
 0x39b   : > { %2514 = vrot.lane.b32.xlu2 %v9114_v22, %s7567_s25  ;;  %2205 = vst.msk [vmem:[#allocation2 + $0x360] sm:$0xff] %vm257_vm0, %v9472_v19 }
 0x39c   : > { %v2301_v4 = vpop.permute.xlu1 %2300  ;;  %v2299_v41 = vpop.permute.xlu0 %2298 }
 0x39d   : > { %2386 = vst.msk [vmem:[#allocation2 + $0x1a8] sm:$0xff] %vm450_vm1, %v2301_v4  ;;  %3663 = vmatmul.f32.gmra.mxu2 %v3116_v55  ;;  %3711 = vmatmul.f32.gmra.mxu3 %v3196_v6  ;;  %v2321_v33 = vpop.permute.xlu2 %2320  ;;  %v9602_v4 = vpop.f32.mrf.mxu3  ;;  %v3161_v55 = vld [vmem:[#allocation2 + $0x380] sm:$0xff] }
 0x39e   : > { %2385 = vst.msk [vmem:[#allocation2 + $0x180] sm:$0xff] %vm450_vm1, %v2299_v41 }
 0x39f   : > { %2396 = vst.msk [vmem:[#allocation2 + $0x338] sm:$0xff] %vm450_vm1, %v2321_v33  ;;  %v3166_v33 = vld [vmem:[#allocation2 + $0x3a8] sm:$0xff] }
 0x3a2   : > { %2518 = vrot.lane.b32.xlu1 %v9128_v53, %s7567_s25  ;;  %2516 = vrot.lane.b32.xlu0 %v9111_v18, %s7567_s25  ;;  %v9496_v53 = vld [vmem:[%s7615_s23 + $0x16a] sm:$0xff] }
 0x3a3   : > { %2520 = vrot.lane.b32.xlu2 %v9144_v25, %s7567_s25  ;;  %2208 = vst.msk [vmem:[#allocation2 + $0x3d8] sm:$0xff] %vm257_vm0, %v9496_v53 }
 0x3a4   : > { %v2307_v22 = vpop.permute.xlu1 %2306  ;;  %v2305_v40 = vpop.permute.xlu0 %2304 }
 0x3a5   : > { %2389 = vst.msk [vmem:[#allocation2 + $0x220] sm:$0xff] %vm450_vm1, %v2307_v22  ;;  %3666 = vmatmul.f32.gmra.mxu2 %v3121_v49  ;;  %3714 = vmatmul.f32.gmra.mxu3 %v3201_v5  ;;  %v2327_v18 = vpop.permute.xlu2 %2326  ;;  %v3270_v49 = vld [vmem:[%s11866_s1 + $0x1e8] sm:$0xff] }
 0x3a6   : > { %2388 = vst.msk [vmem:[#allocation2 + $0x1f8] sm:$0xff] %vm450_vm1, %v2305_v40  ;;  %v3272_v40 = vld [vmem:[%s11866_s1 + $0x1f8] sm:$0xff] }
 0x3a7   : > { %2399 = vst.msk [vmem:[#allocation2 + $0x3b0] sm:$0xff] %vm450_vm1, %v2327_v18  ;;  %3721 = vmatpush.msrb.mxu3 %v3272_v40 }
 0x3aa   : > { %2524 = vrot.lane.b32.xlu1 %v9158_v29, %s7567_s25  ;;  %2522 = vrot.lane.b32.xlu0 %v11983_v15, %s7567_s25  ;;  %v9520_v29 = vld [vmem:[%s7615_s23 + $0x18a] sm:$0xff]  ;;  %v3269_v15 = vld [vmem:[%s11866_s1 + $0x1e0] sm:$0xff] }
 0x3ab   : > { %2526 = vrot.lane.b32.xlu2 %v9174_v37, %s7567_s25  ;;  %2211 = vst.msk [vmem:[#allocation2 + $0x450] sm:$0xff] %vm257_vm0, %v9520_v29  ;;  %v9537_v37 = vld [vmem:[%s7615_s23 + $0x1a2] sm:$0xff] }
 0x3ac   : > { %v2313_v25 = vpop.permute.xlu1 %2312  ;;  %v2311_v12 = vpop.permute.xlu0 %2310  ;;  %2213 = vst.msk [vmem:[#allocation2 + $0x4a0] sm:$0xff] %vm257_vm0, %v9537_v37 }
 0x3ad   : > { %2392 = vst.msk [vmem:[#allocation2 + $0x298] sm:$0xff] %vm450_vm1, %v2313_v25  ;;  %3669 = vmatmul.f32.gmra.mxu2 %v3126_v59  ;;  %3717 = vmatmul.f32.gmra.mxu3 %v3206_v48  ;;  %v2333_v3 = vpop.permute.xlu2 %2332 }
 0x3ae   : > { %2391 = vst.msk [vmem:[#allocation2 + $0x270] sm:$0xff] %vm450_vm1, %v2311_v12  ;;  %v3266_v12 = vld [vmem:[%s11866_s1 + $0x1c8] sm:$0xff] }
 0x3af   : > { %2402 = vst.msk [vmem:[#allocation2 + $0x428] sm:$0xff] %vm450_vm1, %v2333_v3  ;;  %v7102_v3 = vld [vmem:[%s7615_s23 + $0x1ca] sm:$0xff] }
 0x3b2   : > { %2530 = vrot.lane.b32.xlu1 %v9188_v0, %s7567_s25  ;;  %2528 = vrot.lane.b32.xlu0 %v11984_v26, %s7567_s25  ;;  %v7071_v0 = vld [vmem:[%s7615_s23 + $0x1bc] sm:$0xff]  ;;  %v3263_v26 = vld [vmem:[%s11866_s1 + $0x1b0] sm:$0xff] }
 0x3b3   : > { %2532 = vrot.lane.b32.xlu2 %v9543_v10, %s7567_s25 }
 0x3b4   : > { %v2319_v27 = vpop.permute.xlu1 %2318  ;;  %v2317_v24 = vpop.permute.xlu0 %2316 }
 0x3b5   : > { %2395 = vst.msk [vmem:[#allocation2 + $0x310] sm:$0xff] %vm450_vm1, %v2319_v27  ;;  %3672 = vmatmul.f32.gmra.mxu2 %v3131_v34  ;;  %v2339_v17 = vpop.permute.xlu2 %2338  ;;  %v3262_v27 = vld [vmem:[%s11866_s1 + $0x1a8] sm:$0xff] }
 0x3b6   : > { %2394 = vst.msk [vmem:[#allocation2 + $0x2e8] sm:$0xff] %vm450_vm1, %v2317_v24 }
 0x3b7   : > { %2405 = vst.msk [vmem:[#allocation2 + $0x4a0] sm:$0xff] %vm450_vm1, %v2339_v17 }
 0x3ba   : > { %2665 = vrot.lane.b32.xlu1 %v9318_v47, %s7568_s26  ;;  %2534 = vrot.lane.b32.xlu0 %v7071_v0, %s7567_s25  ;;  %v3260_v0 = vld [vmem:[%s11866_s1 + $0x198] sm:$0xff] }
 0x3bb   : > { %2667 = vrot.lane.b32.xlu2 %v9328_v23, %s7568_s26  ;;  %v3279_v23 = vld [vmem:[%s11866_s1 + $0x230] sm:$0xff] }
 0x3bc   : > { %v2325_v9 = vpop.permute.xlu1 %2324  ;;  %v2323_v14 = vpop.permute.xlu0 %2322  ;;  %3843 = vmatpush.msrb.mxu0 %v3279_v23 }
 0x3bd   : > { %2398 = vst.msk [vmem:[#allocation2 + $0x388] sm:$0xff] %vm450_vm1, %v2325_v9  ;;  %3675 = vmatmul.f32.gmra.mxu2 %v3136_v35  ;;  %v2473_v52 = vpop.permute.xlu2 %2472  ;;  %v7136_v9 = vld [vmem:[%s7615_s23 + $0x64] sm:$0xff]  ;;  %v3259_v35 = vld [vmem:[%s11866_s1 + $0x190] sm:$0xff] }
 0x3be   : > { %2397 = vst.msk [vmem:[#allocation2 + $0x360] sm:$0xff] %vm450_vm1, %v2323_v14  ;;  %v7137_v14 = vld [vmem:[%s7615_s23 + $0x6c] sm:$0xff] }
 0x3bf   : > { %2568 = vst.msk [vmem:[#allocation2 + $0x18] sm:$0xff] %vm643_vm2, %v2473_v52 }
 0x3c2   : > { %2669 = vrot.lane.b32.xlu0 %v9321_v44, %s7568_s26  ;;  %2671 = vrot.lane.b32.xlu1 %v9342_v45, %s7568_s26 }
 0x3c3   : > { %2673 = vrot.lane.b32.xlu2 %v9352_v51, %s7568_s26 }
 0x3c4   : > { %v2331_v47 = vpop.permute.xlu1 %2330  ;;  %v2329_v20 = vpop.permute.xlu0 %2328 }
 0x3c5   : > { %2401 = vst.msk [vmem:[#allocation2 + $0x400] sm:$0xff] %vm450_vm1, %v2331_v47  ;;  %3678 = vmatmul.f32.gmra.mxu2 %v3141_v46  ;;  %v2479_v44 = vpop.permute.xlu2 %2478  ;;  %v7103_v47 = vld [vmem:[%s7615_s23 + $0x1d2] sm:$0xff] }
 0x3c6   : > { %2400 = vst.msk [vmem:[#allocation2 + $0x3d8] sm:$0xff] %vm450_vm1, %v2329_v20  ;;  %v3258_v20 = vld [vmem:[%s11866_s1 + $0x188] sm:$0xff] }
 0x3c7   : > { %2571 = vst.msk [vmem:[#allocation2 + $0x90] sm:$0xff] %vm643_vm2, %v2479_v44  ;;  %v3257_v44 = vld [vmem:[%s11866_s1 + $0x180] sm:$0xff] }
 0x3ca   : > { %2675 = vrot.lane.b32.xlu0 %v9345_v58, %s7568_s26  ;;  %2677 = vrot.lane.b32.xlu1 %v9366_v16, %s7568_s26 }
 0x3cb   : > { %2679 = vrot.lane.b32.xlu2 %v9376_v62, %s7568_s26 }
 0x3cc   : > { %v2337_v45 = vpop.permute.xlu1 %2336  ;;  %v2335_v30 = vpop.permute.xlu0 %2334 }
 0x3cd   : > { %2404 = vst.msk [vmem:[#allocation2 + $0x478] sm:$0xff] %vm450_vm1, %v2337_v45  ;;  %3681 = vmatmul.f32.gmra.mxu2 %v3146_v13  ;;  %v2485_v51 = vpop.permute.xlu2 %2484  ;;  %v7139_v45 = vld [vmem:[%s7615_s23 + $0x84] sm:$0xff] }
 0x3ce   : > { %2403 = vst.msk [vmem:[#allocation2 + $0x450] sm:$0xff] %vm450_vm1, %v2335_v30  ;;  %v7140_v30 = vld [vmem:[%s7615_s23 + $0x94] sm:$0xff] }
 0x3cf   : > { %2574 = vst.msk [vmem:[#allocation2 + $0x108] sm:$0xff] %vm643_vm2, %v2485_v51 }
 0x3d2   : > { %2681 = vrot.lane.b32.xlu0 %v9369_v42, %s7568_s26  ;;  %2683 = vrot.lane.b32.xlu1 %v9390_v8, %s7568_s26 }
 0x3d3   : > { %2685 = vrot.lane.b32.xlu2 %v9400_v36, %s7568_s26  ;;  %v3278_v36 = vld [vmem:[%s11866_s1 + $0x228] sm:$0xff] }
 0x3d4   : > { %v2343_v58 = vpop.permute.xlu1 %2342  ;;  %v2341_v16 = vpop.permute.xlu0 %2340  ;;  %3844 = vmatpush.msrb.mxu0 %v3278_v36 }
 0x3d5   : > { %2407 = vst.msk [vmem:[#allocation2 + $0x4f0] sm:$0xff] %vm450_vm1, %v2343_v58  ;;  %3684 = vmatmul.f32.gmra.mxu2 %v3151_v21  ;;  %v2491_v62 = vpop.permute.xlu2 %2490  ;;  %v7138_v58 = vld [vmem:[%s7615_s23 + $0x7c] sm:$0xff] }
 0x3d6   : > { %2406 = vst.msk [vmem:[#allocation2 + $0x4c8] sm:$0xff] %vm450_vm1, %v2341_v16  ;;  %v9744_v16 = vpop.f32.mrf.mxu0 }
 0x3d7   : > { %2577 = vst.msk [vmem:[#allocation2 + $0x180] sm:$0xff] %vm643_vm2, %v2491_v62 }
 0x3da   : > { %2687 = vrot.lane.b32.xlu0 %v9393_v28, %s7568_s26  ;;  %2689 = vrot.lane.b32.xlu1 %v9414_v2, %s7568_s26 }
 0x3db   : > { %2691 = vrot.lane.b32.xlu2 %v9424_v31, %s7568_s26  ;;  %v9620_v31 = vpop.f32.mrf.mxu3 }
 0x3dc   : > { %v2477_v42 = vpop.permute.xlu1 %2476  ;;  %v2475_v8 = vpop.permute.xlu0 %2474 }
 0x3dd   : > { %2570 = vst.msk [vmem:[#allocation2 + $0x68] sm:$0xff] %vm643_vm2, %v2477_v42  ;;  %3687 = vmatmul.f32.gmra.mxu2 %v3156_v32  ;;  %v2497_v28 = vpop.permute.xlu2 %2496  ;;  %v7142_v42 = vld [vmem:[%s7615_s23 + $0xac] sm:$0xff] }
 0x3de   : > { %2569 = vst.msk [vmem:[#allocation2 + $0x40] sm:$0xff] %vm643_vm2, %v2475_v8 }
 0x3df   : > { %2580 = vst.msk [vmem:[#allocation2 + $0x1f8] sm:$0xff] %vm643_vm2, %v2497_v28 }
 0x3e2   : > { %2693 = vrot.lane.b32.xlu0 %v9417_v43, %s7568_s26  ;;  %2695 = vrot.lane.b32.xlu1 %v9438_v1, %s7568_s26 }
 0x3e3   : > { %2697 = vrot.lane.b32.xlu2 %v9448_v60, %s7568_s26  ;;  %v9631_v22 = vpop.f32.mrf.mxu3 }
 0x3e4   : > { %v2483_v2 = vpop.permute.xlu1 %2482  ;;  %v2481_v41 = vpop.permute.xlu0 %2480 }
 0x3e5   : > { %2573 = vst.msk [vmem:[#allocation2 + $0xe0] sm:$0xff] %vm643_vm2, %v2483_v2  ;;  %3690 = vmatmul.f32.gmra.mxu2 %v3161_v55  ;;  %v2503_v6 = vpop.permute.xlu2 %2502  ;;  %v9754_v2 = vpop.f32.mrf.mxu0  ;;  %v7143_v55 = vld [vmem:[%s7615_s23 + $0xb4] sm:$0xff] }
 0x3e6   : > { %2572 = vst.msk [vmem:[#allocation2 + $0xb8] sm:$0xff] %vm643_vm2, %v2481_v41  ;;  %v3275_v41 = vld [vmem:[%s11866_s1 + $0x210] sm:$0xff] }
 0x3e7   : > { %2583 = vst.msk [vmem:[#allocation2 + $0x270] sm:$0xff] %vm643_vm2, %v2503_v6 }
 0x3ea   : > { %2699 = vrot.lane.b32.xlu0 %v9441_v63, %s7568_s26  ;;  %2701 = vrot.lane.b32.xlu1 %v9462_v56, %s7568_s26 }
 0x3eb   : > { %2703 = vrot.lane.b32.xlu2 %v9472_v19, %s7568_s26  ;;  %v3277_v19 = vld [vmem:[%s11866_s1 + $0x220] sm:$0xff]  ;;  %v9659_v5 = vpop.f32.mrf.mxu3 }
 0x3ec   : > { %v2489_v43 = vpop.permute.xlu1 %2488  ;;  %v2487_v1 = vpop.permute.xlu0 %2486  ;;  %3845 = vmatpush.msrb.mxu0 %v3277_v19 }
 0x3ed   : > { %2576 = vst.msk [vmem:[#allocation2 + $0x158] sm:$0xff] %vm643_vm2, %v2489_v43  ;;  %3693 = vmatmul.f32.gmra.mxu2 %v3166_v33  ;;  %v2509_v60 = vpop.permute.xlu2 %2508 }
 0x3ee   : > { %2575 = vst.msk [vmem:[#allocation2 + $0x130] sm:$0xff] %vm643_vm2, %v2487_v1 }
 0x3ef   : > { %2586 = vst.msk [vmem:[#allocation2 + $0x2e8] sm:$0xff] %vm643_vm2, %v2509_v60  ;;  %v9768_v60 = vpop.f32.mrf.mxu0 }
 0x3f2   : > { %2705 = vrot.lane.b32.xlu0 %v9467_v7, %s7568_s26  ;;  %2707 = vrot.lane.b32.xlu1 %v9486_v61, %s7568_s26  ;;  %v3271_v7 = vld [vmem:[%s11866_s1 + $0x1f0] sm:$0xff] }
 0x3f3   : > { %2709 = vrot.lane.b32.xlu2 %v9496_v53, %s7568_s26  ;;  %3722 = vmatpush.msrb.mxu3 %v3271_v7  ;;  %v9685_v38 = vpop.f32.mrf.mxu3 }
 0x3f4   : > { %v2495_v63 = vpop.permute.xlu1 %2494  ;;  %v2493_v56 = vpop.permute.xlu0 %2492  ;;  %11985 = vst [vmem:[#allocation3_spill] sm:$0xff] %v9685_v38 }
 0x3f5   : > { %2579 = vst.msk [vmem:[#allocation2 + $0x1d0] sm:$0xff] %vm643_vm2, %v2495_v63  ;;  %v2515_v61 = vpop.permute.xlu2 %2514  ;;  %3723 = vmatpush.msrb.mxu3 %v3270_v49  ;;  %v7141_v63 = vld [vmem:[%s7615_s23 + $0x9c] sm:$0xff] }
 0x3f6   : > { %2578 = vst.msk [vmem:[#allocation2 + $0x1a8] sm:$0xff] %vm643_vm2, %v2493_v56 }
 0x3f7   : > { %2589 = vst.msk [vmem:[#allocation2 + $0x360] sm:$0xff] %vm643_vm2, %v2515_v61  ;;  %3724 = vmatpush.msrb.mxu3 %v3269_v15  ;;  %v9777_v49 = vpop.f32.mrf.mxu0 }
 0x3fa   : > { %2711 = vrot.lane.b32.xlu0 %v9489_v50, %s7568_s26  ;;  %2713 = vrot.lane.b32.xlu1 %v9510_v11, %s7568_s26  ;;  %v3268_v50 = vld [vmem:[%s11866_s1 + $0x1d8] sm:$0xff]  ;;  %v3267_v11 = vld [vmem:[%s11866_s1 + $0x1d0] sm:$0xff] }
 0x3fb   : > { %2715 = vrot.lane.b32.xlu2 %v9520_v29, %s7568_s26  ;;  %3725 = vmatpush.msrb.mxu3 %v3268_v50  ;;  %v3265_v29 = vld [vmem:[%s11866_s1 + $0x1c0] sm:$0xff]  ;;  %v9716_v17 = vpop.f32.mrf.mxu3 }
 0x3fc   : > { %v2501_v53 = vpop.permute.xlu1 %2500  ;;  %v2499_v18 = vpop.permute.xlu0 %2498  ;;  %11986 = vst [vmem:[#allocation4_spill] sm:$0xff] %v9716_v17 }
 0x3fd   : > { %2582 = vst.msk [vmem:[#allocation2 + $0x248] sm:$0xff] %vm643_vm2, %v2501_v53  ;;  %v2521_v25 = vpop.permute.xlu2 %2520  ;;  %3726 = vmatpush.msrb.mxu3 %v3267_v11  ;;  %v7145_v53 = vld [vmem:[%s7615_s23 + $0xcc] sm:$0xff] }
 0x3fe   : > { %2581 = vst.msk [vmem:[#allocation2 + $0x220] sm:$0xff] %vm643_vm2, %v2499_v18 }
 0x3ff   : > { %2592 = vst.msk [vmem:[#allocation2 + $0x3d8] sm:$0xff] %vm643_vm2, %v2521_v25  ;;  %3727 = vmatpush.msrb.mxu3 %v3266_v12  ;;  %v3274_v25 = vld [vmem:[%s11866_s1 + $0x208] sm:$0xff] }
 0x401   : > { %3728 = vmatpush.msrb.mxu3 %v3265_v29  ;;  %v9792_v29 = vpop.f32.mrf.mxu0 }
 0x402   : > { %2717 = vrot.lane.b32.xlu0 %v9513_v54, %s7568_s26  ;;  %2719 = vrot.lane.b32.xlu1 %v9537_v37, %s7568_s26  ;;  %v3264_v54 = vld [vmem:[%s11866_s1 + $0x1b8] sm:$0xff] }
 0x403   : > { %2721 = vrot.lane.b32.xlu2 %v9550_v57, %s7568_s26  ;;  %3729 = vmatpush.msrb.mxu3 %v3264_v54  ;;  %v3261_v57 = vld [vmem:[%s11866_s1 + $0x1a0] sm:$0xff]  ;;  %v9738_v13 = vpop.f32.mrf.mxu3 }
 0x404   : > { %v2507_v59 = vpop.permute.xlu1 %2506  ;;  %v2505_v48 = vpop.permute.xlu0 %2504  ;;  %11987 = vst [vmem:[#allocation5_spill] sm:$0xff] %v9738_v13 }
 0x405   : > { %2585 = vst.msk [vmem:[#allocation2 + $0x2c0] sm:$0xff] %vm643_vm2, %v2507_v59  ;;  %v2527_v37 = vpop.permute.xlu2 %2526  ;;  %3730 = vmatpush.msrb.mxu3 %v3263_v26  ;;  %v7146_v59 = vld [vmem:[%s7615_s23 + $0xdc] sm:$0xff] }
 0x406   : > { %2584 = vst.msk [vmem:[#allocation2 + $0x298] sm:$0xff] %vm643_vm2, %v2505_v48 }
 0x407   : > { %2595 = vst.msk [vmem:[#allocation2 + $0x450] sm:$0xff] %vm643_vm2, %v2527_v37  ;;  %3731 = vmatpush.msrb.mxu3 %v3262_v27  ;;  %v7144_v27 = vld [vmem:[%s7615_s23 + $0xc4] sm:$0xff] }
 0x409   : > { %3732 = vmatpush.msrb.mxu3 %v3261_v57 }
 0x40a   : > { %2723 = vrot.lane.b32.xlu0 %v9540_v39, %s7568_s26  ;;  %2725 = vrot.lane.b32.xlu1 %v7102_v3, %s7568_s26  ;;  %v3276_v39 = vld [vmem:[%s11866_s1 + $0x218] sm:$0xff] }
 0x40b   : > { %3846 = vmatpush.msrb.mxu0 %v3276_v39  ;;  %3733 = vmatpush.msrb.mxu3 %v3260_v0  ;;  %v9752_v32 = vpop.f32.mrf.mxu3  ;;  %v9801_v0 = vpop.f32.mrf.mxu0 }
 0x40c   : > { %v2513_v24 = vpop.permute.xlu1 %2512  ;;  %v2511_v34 = vpop.permute.xlu0 %2510  ;;  %2727 = vrot.lane.b32.xlu2 %v7103_v47, %s7568_s26  ;;  %11988 = vst [vmem:[#allocation6_spill] sm:$0xff] %v9752_v32  ;;  %s11650_s26 = scalar_lea.vmem %s11870_s5, %s7298_s27 }
 0x40d   : > { %2588 = vst.msk [vmem:[#allocation2 + $0x338] sm:$0xff] %vm643_vm2, %v2513_v24  ;;  %v2533_v52 = vpop.permute.xlu2 %2532  ;;  %3734 = vmatpush.msrb.mxu3 %v3259_v35  ;;  %3847 = vmatpush.msrb.mxu0 %v3275_v41 }
 0x40e   : > { %2587 = vst.msk [vmem:[#allocation2 + $0x310] sm:$0xff] %vm643_vm2, %v2511_v34 }
 0x40f   : > { %2598 = vst.msk [vmem:[#allocation2 + $0x4c8] sm:$0xff] %vm643_vm2, %v2533_v52  ;;  %3735 = vmatpush.msrb.mxu3 %v3258_v20  ;;  %3848 = vmatpush.msrb.mxu0 %v3274_v25 }
 0x411   : > { %3736 = vmatpush.msrb.mxu3 %v3257_v44 }
 0x412   : > { %2921 = vrot.lane.b32.xlu0 %v7136_v9, %s7566_s24  ;;  %2923 = vrot.lane.b32.xlu1 %v7137_v14, %s7566_s24  ;;  %v7148_v9 = vld [vmem:[%s7615_s23 + $0xf4] sm:$0xff] }
 0x413   : > { %v9764_v43 = vpop.f32.mrf.mxu3  ;;  %v9817_v44 = vpop.f32.mrf.mxu0 }
 0x414   : > { %v2519_v46 = vpop.permute.xlu1 %2518  ;;  %v2517_v23 = vpop.permute.xlu0 %2516  ;;  %2925 = vrot.lane.b32.xlu2 %v7138_v58, %s7566_s24 }
 0x415   : > { %2591 = vst.msk [vmem:[#allocation2 + $0x3b0] sm:$0xff] %vm643_vm2, %v2519_v46  ;;  %v2668_v51 = vpop.permute.xlu2 %2667  ;;  %v3273_v46 = vld [vmem:[%s11866_s1 + $0x200] sm:$0xff] }
 0x416   : > { %2590 = vst.msk [vmem:[#allocation2 + $0x388] sm:$0xff] %vm643_vm2, %v2517_v23  ;;  %v7149_v23 = vld [vmem:[%s7615_s23 + $0xfc] sm:$0xff]  ;;  %3849 = vmatpush.msrb.mxu0 %v3273_v46  ;;  %v7155_v46 = vld [vmem:[%s7615_s23 + $0x144] sm:$0xff] }
 0x417   : > { %2762 = vst.msk [vmem:[#allocation2 + $0x40] sm:$0xff] %vm837_vm3, %v2668_v51 }
 0x41a   : > { %2927 = vrot.lane.b32.xlu0 %v7139_v45, %s7566_s24  ;;  %2929 = vrot.lane.b32.xlu1 %v7140_v30, %s7566_s24 }
 0x41b   : > { %v9773_v61 = vpop.f32.mrf.mxu3 }
 0x41c   : > { %v2525_v21 = vpop.permute.xlu1 %2524  ;;  %v2523_v62 = vpop.permute.xlu0 %2522  ;;  %2931 = vrot.lane.b32.xlu2 %v7141_v63, %s7566_s24 }
 0x41d   : > { %2594 = vst.msk [vmem:[#allocation2 + $0x428] sm:$0xff] %vm643_vm2, %v2525_v21  ;;  %v2674_v8 = vpop.permute.xlu2 %2673 }
 0x41e   : > { %2593 = vst.msk [vmem:[#allocation2 + $0x400] sm:$0xff] %vm643_vm2, %v2523_v62  ;;  %v3057_v15 = vld [vmem:[#allocation2 + $0x40] sm:$0xff] }
 0x41f   : > { %2765 = vst.msk [vmem:[#allocation2 + $0xb8] sm:$0xff] %vm837_vm3, %v2674_v8  ;;  %v7147_v62 = vld [vmem:[%s7615_s23 + $0xe4] sm:$0xff]  ;;  %v9828_v8 = vpop.f32.mrf.mxu0 }
 0x422   : > { %2933 = vrot.lane.b32.xlu0 %v7142_v42, %s7566_s24  ;;  %2935 = vrot.lane.b32.xlu1 %v7143_v55, %s7566_s24  ;;  %v7104_v42 = vld [vmem:[%s7615_s23 + $0x63] sm:$0xff] }
 0x423   : > { %v9787_v12 = vpop.f32.mrf.mxu3  ;;  %2825 = vst.msk [vmem:[#allocation2 + $0x20] sm:$0xff] %vm257_vm0, %v7104_v42 }
 0x424   : > { %v2531_v36 = vpop.permute.xlu1 %2530  ;;  %v2529_v28 = vpop.permute.xlu0 %2528  ;;  %2937 = vrot.lane.b32.xlu2 %v7144_v27, %s7566_s24 }
 0x425   : > { %2597 = vst.msk [vmem:[#allocation2 + $0x4a0] sm:$0xff] %vm643_vm2, %v2531_v36  ;;  %v2680_v6 = vpop.permute.xlu2 %2679 }
 0x426   : > { %2596 = vst.msk [vmem:[#allocation2 + $0x478] sm:$0xff] %vm643_vm2, %v2529_v28  ;;  %v3072_v47 = vld [vmem:[#allocation2 + $0xb8] sm:$0xff] }
 0x427   : > { %2768 = vst.msk [vmem:[#allocation2 + $0x130] sm:$0xff] %vm837_vm3, %v2680_v6  ;;  %v7151_v6 = vld [vmem:[%s7615_s23 + $0x114] sm:$0xff]  ;;  %v9839_v63 = vpop.f32.mrf.mxu0 }
 0x42a   : > { %2939 = vrot.lane.b32.xlu0 %v7145_v53, %s7566_s24  ;;  %2941 = vrot.lane.b32.xlu1 %v7146_v59, %s7566_s24  ;;  %v7152_v53 = vld [vmem:[%s7615_s23 + $0x124] sm:$0xff] }
 0x42b   : > { %v9796_v37 = vpop.f32.mrf.mxu3 }
 0x42c   : > { %v2666_v1 = vpop.permute.xlu1 %2665  ;;  %v2535_v33 = vpop.permute.xlu0 %2534  ;;  %11989 = vst [vmem:[#allocation7_spill] sm:$0xff] %v9796_v37  ;;  %2943 = vrot.lane.b32.xlu2 %v7147_v62, %s7566_s24 }
 0x42d   : > { %2761 = vst.msk [vmem:[#allocation2 + $0x18] sm:$0xff] %vm837_vm3, %v2666_v1  ;;  %v2686_v56 = vpop.permute.xlu2 %2685  ;;  %v7105_v1 = vld [vmem:[%s7615_s23 + $0x6b] sm:$0xff] }
 0x42e   : > { %2599 = vst.msk [vmem:[#allocation2 + $0x4f0] sm:$0xff] %vm643_vm2, %v2535_v33 }
 0x42f   : > { %2771 = vst.msk [vmem:[#allocation2 + $0x1a8] sm:$0xff] %vm837_vm3, %v2686_v56 }
 0x430   : > { %2826 = vst.msk [vmem:[#allocation2 + $0x48] sm:$0xff] %vm257_vm0, %v7105_v1 }
 0x432   : > { %2945 = vrot.lane.b32.xlu0 %v7148_v9, %s7566_s24  ;;  %2947 = vrot.lane.b32.xlu1 %v7149_v23, %s7566_s24  ;;  %v7109_v23 = vld [vmem:[%s7615_s23 + $0x9b] sm:$0xff] }
 0x433   : > { %v9808_v35 = vpop.f32.mrf.mxu3  ;;  %2830 = vst.msk [vmem:[#allocation2 + $0xe8] sm:$0xff] %vm257_vm0, %v7109_v23  ;;  %v7160_v23 = vld [vmem:[%s7615_s23 + $0x184] sm:$0xff] }
 0x434   : > { %v2670_v19 = vpop.permute.xlu0 %2669  ;;  %v3052_v40 = vld [vmem:[#allocation2 + $0x18] sm:$0xff]  ;;  %v2672_v7 = vpop.permute.xlu1 %2671  ;;  %11990 = vst [vmem:[#allocation8_spill] sm:$0xff] %v9808_v35 }
 0x435   : > { %2763 = vst.msk [vmem:[#allocation2 + $0x68] sm:$0xff] %vm837_vm3, %v2670_v19  ;;  %3737 = vmatmul.f32.vlgmr.msrb.gmra.mxu3 %v3052_v40  ;;  %v2692_v18 = vpop.permute.xlu2 %2691  ;;  %v3087_v19 = vld [vmem:[#allocation2 + $0x130] sm:$0xff] }
 0x436   : > { %2764 = vst.msk [vmem:[#allocation2 + $0x90] sm:$0xff] %vm837_vm3, %v2672_v7 }
 0x437   : > { %2774 = vst.msk [vmem:[#allocation2 + $0x220] sm:$0xff] %vm837_vm3, %v2692_v18  ;;  %v7106_v18 = vld [vmem:[%s7615_s23 + $0x7b] sm:$0xff] }
 0x438   : > { %2827 = vst.msk [vmem:[#allocation2 + $0x70] sm:$0xff] %vm257_vm0, %v7106_v18 }
 0x43a   : > { %2951 = vrot.lane.b32.xlu0 %v7151_v6, %s7566_s24  ;;  %2953 = vrot.lane.b32.xlu1 %v7152_v53, %s7566_s24 }
 0x43b   : > { %v9820_v21 = vpop.f32.mrf.mxu3 }
 0x43c   : > { %v2676_v50 = vpop.permute.xlu0 %2675  ;;  %v2678_v11 = vpop.permute.xlu1 %2677  ;;  %v3062_v3 = vld [vmem:[#allocation2 + $0x68] sm:$0xff]  ;;  %11991 = vst [vmem:[#allocation9_spill] sm:$0xff] %v9820_v21  ;;  %v7124_v21 = vld [vmem:[%s7615_s23 + $0x153] sm:$0xff] }
 0x43d   : > { %2766 = vst.msk [vmem:[#allocation2 + $0xe0] sm:$0xff] %vm837_vm3, %v2676_v50  ;;  %3740 = vmatmul.f32.gmra.mxu3 %v3057_v15  ;;  %v2698_v48 = vpop.permute.xlu2 %2697  ;;  %v3067_v57 = vld [vmem:[#allocation2 + $0x90] sm:$0xff] }
 0x43e   : > { %2767 = vst.msk [vmem:[#allocation2 + $0x108] sm:$0xff] %vm837_vm3, %v2678_v11  ;;  %v3117_v18 = vld [vmem:[#allocation2 + $0x220] sm:$0xff] }
 0x43f   : > { %2777 = vst.msk [vmem:[#allocation2 + $0x298] sm:$0xff] %vm837_vm3, %v2698_v48  ;;  %v7150_v48 = vld [vmem:[%s7615_s23 + $0x10c] sm:$0xff] }
 0x440   : > { %2949 = vrot.lane.b32.xlu2 %v7150_v48, %s7566_s24  ;;  %2845 = vst.msk [vmem:[#allocation2 + $0x340] sm:$0xff] %vm257_vm0, %v7124_v21 }
 0x442   : > { %2959 = vrot.lane.b32.xlu1 %v7155_v46, %s7566_s24 }
 0x443   : > { %v9836_v33 = vpop.f32.mrf.mxu3 }
 0x444   : > { %v2682_v54 = vpop.permute.xlu0 %2681  ;;  %v2684_v26 = vpop.permute.xlu1 %2683  ;;  %v3077_v51 = vld [vmem:[#allocation2 + $0xe0] sm:$0xff]  ;;  %11992 = vst [vmem:[#allocation10_spill] sm:$0xff] %v9836_v33 }
 0x445   : > { %2769 = vst.msk [vmem:[#allocation2 + $0x158] sm:$0xff] %vm837_vm3, %v2682_v54  ;;  %3743 = vmatmul.f32.gmra.mxu3 %v3062_v3  ;;  %v2704_v24 = vpop.permute.xlu2 %2703  ;;  %v3082_v41 = vld [vmem:[#allocation2 + $0x108] sm:$0xff]  ;;  %v9853_v3 = vpop.f32.mrf.mxu0 }
 0x446   : > { %2770 = vst.msk [vmem:[#allocation2 + $0x180] sm:$0xff] %vm837_vm3, %v2684_v26  ;;  %v7107_v54 = vld [vmem:[%s7615_s23 + $0x83] sm:$0xff] }
 0x447   : > { %2780 = vst.msk [vmem:[#allocation2 + $0x310] sm:$0xff] %vm837_vm3, %v2704_v24 }
 0x448   : > { %2828 = vst.msk [vmem:[#allocation2 + $0x98] sm:$0xff] %vm257_vm0, %v7107_v54 }
 0x44b   : > { %v9848_v15 = vpop.f32.mrf.mxu3 }
 0x44c   : > { %v2688_v34 = vpop.permute.xlu0 %2687  ;;  %v2690_v39 = vpop.permute.xlu1 %2689  ;;  %11993 = vst [vmem:[#allocation11_spill] sm:$0xff] %v9848_v15  ;;  %v3092_v11 = vld [vmem:[#allocation2 + $0x158] sm:$0xff] }
 0x44d   : > { %2772 = vst.msk [vmem:[#allocation2 + $0x1d0] sm:$0xff] %vm837_vm3, %v2688_v34  ;;  %3746 = vmatmul.f32.gmra.mxu3 %v3067_v57  ;;  %v2710_v14 = vpop.permute.xlu2 %2709  ;;  %v3097_v24 = vld [vmem:[#allocation2 + $0x180] sm:$0xff]  ;;  %v9867_v9 = vpop.f32.mrf.mxu0 }
 0x44e   : > { %2773 = vst.msk [vmem:[#allocation2 + $0x1f8] sm:$0xff] %vm837_vm3, %v2690_v39  ;;  %v7154_v57 = vld [vmem:[%s7615_s23 + $0x13c] sm:$0xff]  ;;  %v7108_v39 = vld [vmem:[%s7615_s23 + $0x93] sm:$0xff] }
 0x44f   : > { %2783 = vst.msk [vmem:[#allocation2 + $0x388] sm:$0xff] %vm837_vm3, %v2710_v14  ;;  %2957 = vrot.lane.b32.xlu0 %v7154_v57, %s7566_s24  ;;  %v7156_v57 = vld [vmem:[%s7615_s23 + $0x154] sm:$0xff] }
 0x450   : > { %2829 = vst.msk [vmem:[#allocation2 + $0xc0] sm:$0xff] %vm257_vm0, %v7108_v39  ;;  %v7113_v39 = vld [vmem:[%s7615_s23 + $0xcb] sm:$0xff] }
 0x451   : > { %2834 = vst.msk [vmem:[#allocation2 + $0x188] sm:$0xff] %vm257_vm0, %v7113_v39 }
 0x453   : > { %v9859_v26 = vpop.f32.mrf.mxu3 }
 0x454   : > { %v2694_v52 = vpop.permute.xlu0 %2693  ;;  %v2696_v20 = vpop.permute.xlu1 %2695 }
 0x455   : > { %2775 = vst.msk [vmem:[#allocation2 + $0x248] sm:$0xff] %vm837_vm3, %v2694_v52  ;;  %3749 = vmatmul.f32.gmra.mxu3 %v3072_v47  ;;  %v2716_v45 = vpop.permute.xlu2 %2715  ;;  %v3102_v47 = vld [vmem:[#allocation2 + $0x1a8] sm:$0xff]  ;;  %v3112_v1 = vld [vmem:[#allocation2 + $0x1f8] sm:$0xff] }
 0x456   : > { %2776 = vst.msk [vmem:[#allocation2 + $0x270] sm:$0xff] %vm837_vm3, %v2696_v20 }
 0x457   : > { %2786 = vst.msk [vmem:[#allocation2 + $0x400] sm:$0xff] %vm837_vm3, %v2716_v45  ;;  %v9877_v45 = vpop.f32.mrf.mxu0 }
 0x45b   : > { %v9869_v14 = vpop.f32.mrf.mxu3 }
 0x45c   : > { %v2700_v30 = vpop.permute.xlu0 %2699  ;;  %v2702_v58 = vpop.permute.xlu1 %2701 }
 0x45d   : > { %2778 = vst.msk [vmem:[#allocation2 + $0x2c0] sm:$0xff] %vm837_vm3, %v2700_v30  ;;  %3752 = vmatmul.f32.gmra.mxu3 %v3077_v51  ;;  %v2722_v36 = vpop.permute.xlu2 %2721  ;;  %v3107_v30 = vld [vmem:[#allocation2 + $0x1d0] sm:$0xff] }
 0x45e   : > { %2779 = vst.msk [vmem:[#allocation2 + $0x2e8] sm:$0xff] %vm837_vm3, %v2702_v58  ;;  %v3177_v13 = vld [vmem:[#allocation2 + $0x400] sm:$0xff] }
 0x45f   : > { %2789 = vst.msk [vmem:[#allocation2 + $0x478] sm:$0xff] %vm837_vm3, %v2722_v36  ;;  %v7153_v36 = vld [vmem:[%s7615_s23 + $0x12c] sm:$0xff]  ;;  %v9889_v6 = vpop.f32.mrf.mxu0 }
 0x460   : > { %2955 = vrot.lane.b32.xlu2 %v7153_v36, %s7566_s24 }
 0x464   : > { %v2706_v28 = vpop.permute.xlu0 %2705  ;;  %v2708_v55 = vpop.permute.xlu1 %2707 }
 0x465   : > { %2781 = vst.msk [vmem:[#allocation2 + $0x338] sm:$0xff] %vm837_vm3, %v2706_v28  ;;  %3755 = vmatmul.f32.gmra.mxu3 %v3082_v41  ;;  %v7110_v28 = vld [vmem:[%s7615_s23 + $0xab] sm:$0xff]  ;;  %v9883_v41 = vpop.f32.mrf.mxu3 }
 0x466   : > { %2782 = vst.msk [vmem:[#allocation2 + $0x360] sm:$0xff] %vm837_vm3, %v2708_v55  ;;  %v2728_v7 = vpop.permute.xlu2 %2727 }
 0x467   : > { %2792 = vst.msk [vmem:[#allocation2 + $0x4f0] sm:$0xff] %vm837_vm3, %v2728_v7  ;;  %v7111_v7 = vld [vmem:[%s7615_s23 + $0xb3] sm:$0xff] }
 0x468   : > { %2831 = vst.msk [vmem:[#allocation2 + $0x110] sm:$0xff] %vm257_vm0, %v7110_v28  ;;  %2961 = vrot.lane.b32.xlu2 %v7156_v57, %s7566_s24 }
 0x469   : > { %2832 = vst.msk [vmem:[#allocation2 + $0x138] sm:$0xff] %vm257_vm0, %v7111_v7 }
 0x46c   : > { %v2712_v56 = vpop.permute.xlu0 %2711  ;;  %v2714_v40 = vpop.permute.xlu1 %2713 }
 0x46d   : > { %2784 = vst.msk [vmem:[#allocation2 + $0x3b0] sm:$0xff] %vm837_vm3, %v2712_v56  ;;  %3758 = vmatmul.f32.gmra.mxu3 %v3087_v19  ;;  %v9893_v19 = vpop.f32.mrf.mxu3 }
 0x46e   : > { %2785 = vst.msk [vmem:[#allocation2 + $0x3d8] sm:$0xff] %vm837_vm3, %v2714_v40  ;;  %v2926_v59 = vpop.permute.xlu2 %2925  ;;  %v7157_v40 = vld [vmem:[%s7615_s23 + $0x15c] sm:$0xff] }
 0x46f   : > { %3019 = vst.msk [vmem:[#allocation2 + $0x70] sm:$0xff] %vm450_vm1, %v2926_v59  ;;  %2963 = vrot.lane.b32.xlu0 %v7157_v40, %s7566_s24  ;;  %v7112_v59 = vld [vmem:[%s7615_s23 + $0xc3] sm:$0xff] }
 0x470   : > { %11994 = vst [vmem:[#allocation12_spill] sm:$0xff] %v9893_v19  ;;  %v7162_v40 = vld [vmem:[%s7615_s23 + $0x19c] sm:$0xff] }
 0x471   : > { %2833 = vst.msk [vmem:[#allocation2 + $0x160] sm:$0xff] %vm257_vm0, %v7112_v59  ;;  %v7116_v59 = vld [vmem:[%s7615_s23 + $0xf3] sm:$0xff] }
 0x472   : > { %2837 = vst.msk [vmem:[#allocation2 + $0x200] sm:$0xff] %vm257_vm0, %v7116_v59 }
 0x474   : > { %v2718_v50 = vpop.permute.xlu0 %2717  ;;  %v2720_v25 = vpop.permute.xlu1 %2719 }
 0x475   : > { %2787 = vst.msk [vmem:[#allocation2 + $0x428] sm:$0xff] %vm837_vm3, %v2718_v50  ;;  %3761 = vmatmul.f32.gmra.mxu3 %v3092_v11  ;;  %v9901_v11 = vpop.f32.mrf.mxu0  ;;  %v9905_v48 = vpop.f32.mrf.mxu3  ;;  %v3172_v32 = vld [vmem:[#allocation2 + $0x3d8] sm:$0xff] }
 0x476   : > { %2788 = vst.msk [vmem:[#allocation2 + $0x450] sm:$0xff] %vm837_vm3, %v2720_v25  ;;  %v2932_v42 = vpop.permute.xlu2 %2931  ;;  %v3063_v53 = vld [vmem:[#allocation2 + $0x70] sm:$0xff] }
 0x477   : > { %3022 = vst.msk [vmem:[#allocation2 + $0xe8] sm:$0xff] %vm450_vm1, %v2932_v42  ;;  %v7158_v25 = vld [vmem:[%s7615_s23 + $0x16c] sm:$0xff]  ;;  %2969 = vrot.lane.b32.xlu0 %v7160_v23, %s7566_s24  ;;  %v3132_v42 = vld [vmem:[#allocation2 + $0x298] sm:$0xff] }
 0x478   : > { %11995 = vst [vmem:[#allocation13_spill] sm:$0xff] %v9905_v48  ;;  %2965 = vrot.lane.b32.xlu1 %v7158_v25, %s7566_s24  ;;  %v7163_v25 = vld [vmem:[%s7615_s23 + $0x1a4] sm:$0xff]  ;;  %v7166_v23 = vld [vmem:[%s7615_s23 + $0x1cc] sm:$0xff] }
 0x47c   : > { %v2724_v27 = vpop.permute.xlu0 %2723  ;;  %v2726_v34 = vpop.permute.xlu1 %2725 }
 0x47d   : > { %2790 = vst.msk [vmem:[#allocation2 + $0x4a0] sm:$0xff] %vm837_vm3, %v2724_v27  ;;  %3764 = vmatmul.f32.gmra.mxu3 %v3097_v24  ;;  %v3122_v27 = vld [vmem:[#allocation2 + $0x248] sm:$0xff] }
 0x47e   : > { %2791 = vst.msk [vmem:[#allocation2 + $0x4c8] sm:$0xff] %vm837_vm3, %v2726_v34  ;;  %v2938_v24 = vpop.permute.xlu2 %2937  ;;  %v9911_v34 = vpop.f32.mrf.mxu0 }
 0x47f   : > { %3025 = vst.msk [vmem:[#allocation2 + $0x160] sm:$0xff] %vm450_vm1, %v2938_v24  ;;  %2975 = vrot.lane.b32.xlu0 %v7163_v25, %s7566_s24  ;;  %v3142_v24 = vld [vmem:[#allocation2 + $0x2e8] sm:$0xff] }
 0x484   : > { %v2922_v52 = vpop.permute.xlu0 %2921  ;;  %v2924_v20 = vpop.permute.xlu1 %2923 }
 0x485   : > { %3017 = vst.msk [vmem:[#allocation2 + $0x20] sm:$0xff] %vm450_vm1, %v2922_v52  ;;  %3767 = vmatmul.f32.gmra.mxu3 %v3102_v47  ;;  %v9917_v47 = vpop.f32.mrf.mxu3 }
 0x486   : > { %3018 = vst.msk [vmem:[#allocation2 + $0x48] sm:$0xff] %vm450_vm1, %v2924_v20  ;;  %v3127_v20 = vld [vmem:[#allocation2 + $0x270] sm:$0xff] }
 0x487   : > { %11996 = vst [vmem:[#allocation14_spill] sm:$0xff] %v9917_v47  ;;  %2981 = vrot.lane.b32.xlu0 %v7166_v23, %s7566_s24 }
 0x48c   : > { %v3053_v51 = vld [vmem:[#allocation2 + $0x20] sm:$0xff]  ;;  %v2928_v58 = vpop.permute.xlu0 %2927  ;;  %v2930_v62 = vpop.permute.xlu1 %2929 }
 0x48d   : > { %3770 = vmatmul.f32.gmra.mxu3 %v3107_v30  ;;  %7168 = vmatmul.msk.f32.vlgmr.msrb.gmra.mxu0 %vm3285_vm4, %v3053_v51  ;;  %3020 = vst.msk [vmem:[#allocation2 + $0x98] sm:$0xff] %vm450_vm1, %v2928_v58  ;;  %v3058_v55 = vld [vmem:[#allocation2 + $0x48] sm:$0xff]  ;;  %v7114_v30 = vld [vmem:[%s7615_s23 + $0xdb] sm:$0xff]  ;;  %v9924_v58 = vpop.f32.mrf.mxu0  ;;  %v9931_v28 = vpop.f32.mrf.mxu3 }
 0x48e   : > { %3021 = vst.msk [vmem:[#allocation2 + $0xc0] sm:$0xff] %vm450_vm1, %v2930_v62  ;;  %v7159_v51 = vld [vmem:[%s7615_s23 + $0x174] sm:$0xff]  ;;  %v3078_v62 = vld [vmem:[#allocation2 + $0xe8] sm:$0xff] }
 0x48f   : > { %2835 = vst.msk [vmem:[#allocation2 + $0x1b0] sm:$0xff] %vm257_vm0, %v7114_v30  ;;  %2967 = vrot.lane.b32.xlu2 %v7159_v51, %s7566_s24  ;;  %v3093_v30 = vld [vmem:[#allocation2 + $0x160] sm:$0xff] }
 0x490   : > { %11997 = vst [vmem:[#allocation15_spill] sm:$0xff] %v9931_v28 }
 0x494   : > { %v2934_v56 = vpop.permute.xlu0 %2933  ;;  %v2936_v50 = vpop.permute.xlu1 %2935  ;;  %v3068_v54 = vld [vmem:[#allocation2 + $0x98] sm:$0xff] }
 0x495   : > { %3773 = vmatmul.f32.gmra.mxu3 %v3112_v1  ;;  %7169 = vmatmul.msk.f32.gmra.mxu0 %vm3285_vm4, %v3058_v55  ;;  %3023 = vst.msk [vmem:[#allocation2 + $0x110] sm:$0xff] %vm450_vm1, %v2934_v56  ;;  %v3073_v52 = vld [vmem:[#allocation2 + $0xc0] sm:$0xff]  ;;  %v7161_v55 = vld [vmem:[%s7615_s23 + $0x18c] sm:$0xff]  ;;  %v2944_v56 = vpop.permute.xlu2 %2943 }
 0x496   : > { %3024 = vst.msk [vmem:[#allocation2 + $0x138] sm:$0xff] %vm450_vm1, %v2936_v50  ;;  %v7115_v1 = vld [vmem:[%s7615_s23 + $0xe3] sm:$0xff]  ;;  %2971 = vrot.lane.b32.xlu1 %v7161_v55, %s7566_s24  ;;  %v9943_v50 = vpop.f32.mrf.mxu3 }
 0x497   : > { %2836 = vst.msk [vmem:[#allocation2 + $0x1d8] sm:$0xff] %vm257_vm0, %v7115_v1  ;;  %2973 = vrot.lane.b32.xlu2 %v7162_v40, %s7566_s24  ;;  %v3152_v40 = vld [vmem:[#allocation2 + $0x338] sm:$0xff] }
 0x498   : > { %3028 = vst.msk [vmem:[#allocation2 + $0x1d8] sm:$0xff] %vm450_vm1, %v2944_v56  ;;  %v9974_v56 = vpop.f32.mrf.mxu1 }
 0x499   : > { %11998 = vst [vmem:[#allocation16_spill] sm:$0xff] %v9943_v50 }
 0x49c   : > { %v2940_v46 = vpop.permute.xlu0 %2939  ;;  %v2942_v36 = vpop.permute.xlu1 %2941  ;;  %v3083_v7 = vld [vmem:[#allocation2 + $0x110] sm:$0xff] }
 0x49d   : > { %3776 = vmatmul.f32.gmra.mxu3 %v3117_v18  ;;  %7170 = vmatmul.msk.f32.gmra.mxu0 %vm3285_vm4, %v3063_v53  ;;  %3026 = vst.msk [vmem:[#allocation2 + $0x188] sm:$0xff] %vm450_vm1, %v2940_v46  ;;  %v9940_v53 = vpop.f32.mrf.mxu0  ;;  %v3137_v18 = vld [vmem:[#allocation2 + $0x2c0] sm:$0xff] }
 0x49e   : > { %3027 = vst.msk [vmem:[#allocation2 + $0x1b0] sm:$0xff] %vm450_vm1, %v2942_v36  ;;  %2977 = vrot.lane.b32.xlu1 %v9543_v10, %s7566_s24  ;;  %v3147_v10 = vld [vmem:[#allocation2 + $0x310] sm:$0xff] }
 0x49f   : > { %v7167_v36 = vld [vmem:[%s7615_s23 + $0x1d4] sm:$0xff] }
 0x4a4   : > { %v2946_v57 = vpop.permute.xlu0 %2945  ;;  %v2948_v46 = vpop.permute.xlu1 %2947  ;;  %v3098_v1 = vld [vmem:[#allocation2 + $0x188] sm:$0xff] }
 0x4a5   : > { %3779 = vmatmul.f32.gmra.mxu3 %v3122_v27  ;;  %7171 = vmatmul.msk.f32.gmra.mxu0 %vm3285_vm4, %v3068_v54  ;;  %v7165_v54 = vld [vmem:[%s7615_s23 + $0x1bc] sm:$0xff]  ;;  %3029 = vst.msk [vmem:[#allocation2 + $0x200] sm:$0xff] %vm450_vm1, %v2946_v57  ;;  %v9955_v39 = vpop.f32.mrf.mxu0  ;;  %v9987_v57 = vpop.f32.mrf.mxu1 }
 0x4a6   : > { %v3088_v27 = vld [vmem:[#allocation2 + $0x138] sm:$0xff]  ;;  %2979 = vrot.lane.b32.xlu2 %v7165_v54, %s7566_s24  ;;  %2983 = vrot.lane.b32.xlu1 %v7167_v36, %s7566_s24  ;;  %v3103_v54 = vld [vmem:[#allocation2 + $0x1b0] sm:$0xff] }
 0x4ac   : > { %v2952_v25 = vpop.permute.xlu0 %2951  ;;  %v2954_v23 = vpop.permute.xlu1 %2953 }
 0x4ad   : > { %3782 = vmatmul.f32.gmra.mxu3 %v3127_v20  ;;  %7172 = vmatmul.msk.f32.gmra.mxu0 %vm3285_vm4, %v3073_v52  ;;  %v7117_v20 = vld [vmem:[%s7615_s23 + $0xfb] sm:$0xff]  ;;  %v9965_v51 = vpop.f32.mrf.mxu0  ;;  %v9999_v36 = vpop.f32.mrf.mxu1 }
 0x4ae   : > { %2838 = vst.msk [vmem:[#allocation2 + $0x228] sm:$0xff] %vm257_vm0, %v7117_v20 }
 0x4af   : > { %3030 = vst.msk [vmem:[#allocation2 + $0x228] sm:$0xff] %vm450_vm1, %v2948_v46  ;;  %v7120_v46 = vld [vmem:[%s7615_s23 + $0x123] sm:$0xff] }
 0x4b0   : > { %2841 = vst.msk [vmem:[#allocation2 + $0x2a0] sm:$0xff] %vm257_vm0, %v7120_v46 }
 0x4b1   : > { %3033 = vst.msk [vmem:[#allocation2 + $0x2a0] sm:$0xff] %vm450_vm1, %v2954_v23 }
 0x4b4   : > { %v2960_v28 = vpop.permute.xlu1 %2959 }
 0x4b5   : > { %3785 = vmatmul.f32.gmra.mxu3 %v3132_v42  ;;  %7173 = vmatmul.msk.f32.gmra.mxu0 %vm3285_vm4, %v3078_v62  ;;  %v7118_v62 = vld [vmem:[%s7615_s23 + $0x10b] sm:$0xff]  ;;  %v2950_v42 = vpop.permute.xlu2 %2949  ;;  %v9980_v59 = vpop.f32.mrf.mxu0 }
 0x4b6   : > { %2839 = vst.msk [vmem:[#allocation2 + $0x250] sm:$0xff] %vm257_vm0, %v7118_v62  ;;  %v3162_v62 = vld [vmem:[#allocation2 + $0x388] sm:$0xff]  ;;  %v10011_v23 = vpop.f32.mrf.mxu1 }
 0x4b7   : > { %3031 = vst.msk [vmem:[#allocation2 + $0x250] sm:$0xff] %vm450_vm1, %v2950_v42 }
 0x4b8   : > { %v9957_v52 = vpop.f32.mrf.mxu3  ;;  %v3133_v19 = vld [vmem:[#allocation2 + $0x2a0] sm:$0xff] }
 0x4bd   : > { %3788 = vmatmul.f32.gmra.mxu3 %v3137_v18  ;;  %7174 = vmatmul.msk.f32.gmra.mxu0 %vm3285_vm4, %v3083_v7  ;;  %v9977_v7 = vpop.f32.mrf.mxu2  ;;  %v7119_v18 = vld [vmem:[%s7615_s23 + $0x113] sm:$0xff] }
 0x4be   : > { %2840 = vst.msk [vmem:[#allocation2 + $0x278] sm:$0xff] %vm257_vm0, %v7119_v18  ;;  %v7121_v18 = vld [vmem:[%s7615_s23 + $0x12b] sm:$0xff]  ;;  %v10024_v33 = vpop.f32.mrf.mxu1 }
 0x4bf   : > { %3032 = vst.msk [vmem:[#allocation2 + $0x278] sm:$0xff] %vm450_vm1, %v2952_v25  ;;  %v2956_v25 = vpop.permute.xlu2 %2955 }
 0x4c0   : > { %v9969_v55 = vpop.f32.mrf.mxu3  ;;  %2842 = vst.msk [vmem:[#allocation2 + $0x2c8] sm:$0xff] %vm257_vm0, %v7121_v18 }
 0x4c1   : > { %3034 = vst.msk [vmem:[#allocation2 + $0x2c8] sm:$0xff] %vm450_vm1, %v2956_v25  ;;  %v2958_v50 = vpop.permute.xlu0 %2957  ;;  %v3123_v25 = vld [vmem:[#allocation2 + $0x250] sm:$0xff] }
 0x4c5   : > { %3791 = vmatmul.f32.gmra.mxu3 %v3142_v24  ;;  %7175 = vmatmul.msk.f32.gmra.mxu0 %vm3285_vm4, %v3088_v27  ;;  %v3157_v24 = vld [vmem:[#allocation2 + $0x360] sm:$0xff]  ;;  %v9989_v20 = vpop.f32.mrf.mxu2 }
 0x4c6   : > { %v10047_v17 = vpop.f32.mrf.mxu1 }
 0x4c8   : > { %v9984_v27 = vpop.f32.mrf.mxu3 }
 0x4cd   : > { %3794 = vmatmul.f32.gmra.mxu3 %v3147_v10  ;;  %7176 = vmatmul.msk.f32.gmra.mxu0 %vm3285_vm4, %v3093_v30  ;;  %v3108_v30 = vld [vmem:[#allocation2 + $0x1d8] sm:$0xff]  ;;  %v9994_v10 = vpop.f32.mrf.mxu0 }
 0x4d0   : > { %v9997_v42 = vpop.f32.mrf.mxu3 }
 0x4d5   : > { %3797 = vmatmul.f32.gmra.mxu3 %v3152_v40  ;;  %7177 = vmatmul.msk.f32.gmra.mxu0 %vm3285_vm4, %v3098_v1  ;;  %v10001_v1 = vpop.f32.mrf.mxu2  ;;  %v3113_v40 = vld [vmem:[#allocation2 + $0x200] sm:$0xff] }
 0x4d8   : > { %v10009_v46 = vpop.f32.mrf.mxu3 }
 0x4dd   : > { %3800 = vmatmul.f32.gmra.mxu3 %v3157_v24  ;;  %7178 = vmatmul.msk.f32.gmra.mxu0 %vm3285_vm4, %v3103_v54  ;;  %v3167_v54 = vld [vmem:[#allocation2 + $0x3b0] sm:$0xff]  ;;  %v10007_v24 = vpop.f32.mrf.mxu0  ;;  %v10014_v15 = vpop.f32.mrf.mxu2 }
 0x4e0   : > { %v10021_v18 = vpop.f32.mrf.mxu3 }
 0x4e5   : > { %3803 = vmatmul.f32.gmra.mxu3 %v3162_v62  ;;  %7179 = vmatmul.msk.f32.gmra.mxu0 %vm3285_vm4, %v3108_v30  ;;  %v3118_v30 = vld [vmem:[#allocation2 + $0x228] sm:$0xff]  ;;  %v7122_v62 = vld [vmem:[%s7615_s23 + $0x13b] sm:$0xff] }
 0x4e6   : > { %2843 = vst.msk [vmem:[#allocation2 + $0x2f0] sm:$0xff] %vm257_vm0, %v7122_v62  ;;  %v3128_v62 = vld [vmem:[#allocation2 + $0x278] sm:$0xff] }
 0x4e7   : > { %3035 = vst.msk [vmem:[#allocation2 + $0x2f0] sm:$0xff] %vm450_vm1, %v2958_v50  ;;  %v10034_v50 = vld [vmem:[%s11867_s2] ss:$0 sm:$0xff] }
 0x4e8   : > { %v3400_v47 = vadd.f32 %v10034_v50, %v9744_v16  ;;  %v3403_v21 = vadd.f32 %v10034_v50, %v9754_v2  ;;  %v10067_v2 = vpop.f32.mrf.mxu1 }
 0x4ed   : > { %3806 = vmatmul.f32.gmra.mxu3 %v3167_v54  ;;  %7180 = vmatmul.msk.f32.gmra.mxu0 %vm3285_vm4, %v3113_v40  ;;  %v10019_v40 = vpop.f32.mrf.mxu0  ;;  %v7123_v54 = vld [vmem:[%s7615_s23 + $0x143] sm:$0xff] }
 0x4ee   : > { %2844 = vst.msk [vmem:[#allocation2 + $0x318] sm:$0xff] %vm257_vm0, %v7123_v54  ;;  %v10041_v54 = vpop.f32.mrf.mxu3 }
 0x4ef   : > { %3036 = vst.msk [vmem:[#allocation2 + $0x318] sm:$0xff] %vm450_vm1, %v2960_v28  ;;  %v2962_v28 = vpop.permute.xlu2 %2961 }
 0x4f0   : > { %3037 = vst.msk [vmem:[#allocation2 + $0x340] sm:$0xff] %vm450_vm1, %v2962_v28  ;;  %v3138_v28 = vld [vmem:[#allocation2 + $0x2c8] sm:$0xff] }
 0x4f5   : > { %3809 = vmatmul.f32.gmra.mxu3 %v3172_v32  ;;  %7181 = vmatmul.msk.f32.gmra.mxu0 %vm3285_vm4, %v3118_v30  ;;  %v10029_v32 = vpop.f32.mrf.mxu2  ;;  %v10036_v30 = vpop.f32.mrf.mxu0 }
 0x4fd   : > { %3812 = vmatmul.f32.gmra.mxu3 %v3177_v13  ;;  %7182 = vmatmul.msk.f32.gmra.mxu0 %vm3285_vm4, %v3123_v25  ;;  %v3182_v13 = vld [vmem:[#allocation2 + $0x428] sm:$0xff]  ;;  %v3513_v25 = vadd.f32 %v9974_v56, %v3400_v47  ;;  %v10050_v16 = vpop.f32.mrf.mxu2  ;;  %v7125_v47 = vld [vmem:[%s7615_s23 + $0x15b] sm:$0xff]  ;;  %v3187_v56 = vld [vmem:[#allocation2 + $0x450] sm:$0xff] }
 0x4fe   : > { %2846 = vst.msk [vmem:[#allocation2 + $0x368] sm:$0xff] %vm257_vm0, %v7125_v47  ;;  %v3192_v47 = vld [vmem:[#allocation2 + $0x478] sm:$0xff] }
 0x4ff   : > { %v3626_v48 = vadd.f32 %v9977_v7, %v3513_v25 }
 0x501   : > { %v3739_v35 = vadd.f32 %v9957_v52, %v3626_v48  ;;  %v10064_v52 = vpop.f32.mrf.mxu3 }
 0x505   : > { %3815 = vmatmul.f32.gmra.mxu3 %v3182_v13  ;;  %7183 = vmatmul.msk.f32.gmra.mxu0 %vm3285_vm4, %v3128_v62  ;;  %v2964_v62 = vpop.permute.xlu0 %2963  ;;  %v3516_v13 = vadd.f32 %v9987_v57, %v3403_v21  ;;  %v10070_v7 = vpop.f32.mrf.mxu2  ;;  %v7126_v21 = vld [vmem:[%s7615_s23 + $0x16b] sm:$0xff] }
 0x506   : > { %3038 = vst.msk [vmem:[#allocation2 + $0x368] sm:$0xff] %vm450_vm1, %v2964_v62 }
 0x507   : > { %2847 = vst.msk [vmem:[#allocation2 + $0x390] sm:$0xff] %vm257_vm0, %v7126_v21 }
 0x509   : > { %v10084_v62 = vpop.f32.mrf.mxu3 }
 0x50a   : > { %v3851_v38 = vpop.f32.mrf.mxu0 }
 0x50b   : > { %v10055_v37 = vadd.f32 %v3851_v38, %v3739_v35  ;;  %v3629_v38 = vadd.f32 %v9989_v20, %v3516_v13 }
 0x50d   : > { %11999 = vst [vmem:[#allocation17_spill] sm:$0xff] %v10055_v37  ;;  %3818 = vmatmul.f32.gmra.mxu3 %v3187_v56  ;;  %7184 = vmatmul.msk.f32.gmra.mxu0 %vm3285_vm4, %v3133_v19  ;;  %v3947_v48 = vsel %vm257_vm0, %v10055_v37, 0.0  ;;  %v3742_v35 = vadd.f32 %v9969_v55, %v3629_v38  ;;  %v3406_v19 = vadd.f32 %v10034_v50, %v9768_v60  ;;  %v2966_v56 = vpop.permute.xlu1 %2965  ;;  %v10094_v21 = vpop.f32.mrf.mxu2 }
 0x50e   : > { %3948 = vadd.xlane.f32.xlu2 %v3947_v48  ;;  %3039 = vst.msk [vmem:[#allocation2 + $0x390] sm:$0xff] %vm450_vm1, %v2966_v56  ;;  %v10087_v48 = vpop.f32.mrf.mxu1 }
 0x50f   : > { %v3519_v20 = vadd.f32 %v9999_v36, %v3406_v19  ;;  %v3409_v36 = vadd.f32 %v10034_v50, %v9777_v49  ;;  %v2968_v19 = vpop.permute.xlu2 %2967 }
 0x511   : > { %v3632_v60 = vadd.f32 %v10001_v1, %v3519_v20  ;;  %v3522_v1 = vadd.f32 %v10011_v23, %v3409_v36  ;;  %v10104_v20 = vpop.f32.mrf.mxu3  ;;  %v3412_v23 = vadd.f32 %v10034_v50, %v9792_v29  ;;  %v3202_v36 = vld [vmem:[#allocation2 + $0x4c8] sm:$0xff] }
 0x512   : > { %v3854_v57 = vpop.f32.mrf.mxu0 }
 0x513   : > { %v10074_v25 = vadd.f32 %v3854_v57, %v3742_v35  ;;  %v3745_v13 = vadd.f32 %v9984_v27, %v3632_v60  ;;  %v3143_v35 = vld [vmem:[#allocation2 + $0x2f0] sm:$0xff]  ;;  %v3635_v49 = vadd.f32 %v10014_v15, %v3522_v1  ;;  %v3148_v60 = vld [vmem:[#allocation2 + $0x318] sm:$0xff]  ;;  %v3525_v15 = vadd.f32 %v10024_v33, %v3412_v23 }
 0x514   : > { %v3415_v33 = vadd.f32 %v10034_v50, %v9801_v0 }
 0x515   : > { %12000 = vst [vmem:[#allocation18_spill] sm:$0xff] %v10074_v25  ;;  %3821 = vmatmul.f32.gmra.mxu3 %v3192_v47  ;;  %7185 = vmatmul.msk.f32.gmra.mxu0 %vm3285_vm4, %v3138_v28  ;;  %v3950_v55 = vsel %vm257_vm0, %v10074_v25, 0.0  ;;  %v7127_v28 = vld [vmem:[%s7615_s23 + $0x173] sm:$0xff]  ;;  %v3197_v47 = vld [vmem:[#allocation2 + $0x4a0] sm:$0xff]  ;;  %v3748_v56 = vadd.f32 %v9997_v42, %v3635_v49  ;;  %v10119_v29 = vpop.f32.mrf.mxu2  ;;  %v2972_v23 = vpop.permute.xlu1 %2971 }
 0x516   : > { %3951 = vadd.xlane.f32.xlu0 %v3950_v55  ;;  %2848 = vst.msk [vmem:[#allocation2 + $0x3b8] sm:$0xff] %vm257_vm0, %v7127_v28  ;;  %v2970_v28 = vpop.permute.xlu0 %2969 }
 0x517   : > { %3040 = vst.msk [vmem:[#allocation2 + $0x3b8] sm:$0xff] %vm450_vm1, %v2968_v19  ;;  %v3638_v19 = vadd.f32 %v10029_v32, %v3525_v15 }
 0x51a   : > { %v3857_v38 = vpop.f32.mrf.mxu0 }
 0x51b   : > { %v10091_v57 = vadd.f32 %v3857_v38, %v3745_v13  ;;  %v7128_v38 = vld [vmem:[%s7615_s23 + $0x183] sm:$0xff] }
 0x51c   : > { %2849 = vst.msk [vmem:[#allocation2 + $0x3e0] sm:$0xff] %vm257_vm0, %v7128_v38  ;;  %v3528_v38 = vadd.f32 %v10047_v17, %v3415_v33  ;;  %v3418_v17 = vadd.f32 %v10034_v50, %v9817_v44 }
 0x51d   : > { %12001 = vst [vmem:[#allocation19_spill] sm:$0xff] %v10091_v57  ;;  %3824 = vmatmul.f32.gmra.mxu3 %v3197_v47  ;;  %7186 = vmatmul.msk.f32.gmra.mxu0 %vm3285_vm4, %v3143_v35  ;;  %v3953_v27 = vsel %vm257_vm0, %v10091_v57, 0.0  ;;  %v10111_v35 = vpop.f32.mrf.mxu1  ;;  %v3751_v47 = vadd.f32 %v10009_v46, %v3638_v19 }
 0x51e   : > { %3954 = vadd.xlane.f32.xlu1 %v3953_v27  ;;  %3041 = vst.msk [vmem:[#allocation2 + $0x3e0] sm:$0xff] %vm450_vm1, %v2970_v28  ;;  %v3153_v27 = vld [vmem:[#allocation2 + $0x340] sm:$0xff]  ;;  %v3641_v32 = vadd.f32 %v10050_v16, %v3528_v38  ;;  %v3163_v38 = vld [vmem:[#allocation2 + $0x390] sm:$0xff] }
 0x520   : > { %v3754_v28 = vadd.f32 %v10021_v18, %v3641_v32  ;;  %v7131_v32 = vld [vmem:[%s7615_s23 + $0x1a3] sm:$0xff] }
 0x521   : > { %2852 = vst.msk [vmem:[#allocation2 + $0x458] sm:$0xff] %vm257_vm0, %v7131_v32 }
 0x522   : > { %v3860_v55 = vpop.f32.mrf.mxu0 }
 0x523   : > { %v10108_v13 = vadd.f32 %v3860_v55, %v3748_v56  ;;  %v7129_v56 = vld [vmem:[%s7615_s23 + $0x18b] sm:$0xff]  ;;  %v10128_v55 = vpop.f32.mrf.mxu3 }
 0x524   : > { %2850 = vst.msk [vmem:[#allocation2 + $0x408] sm:$0xff] %vm257_vm0, %v7129_v56 }
 0x525   : > { %12002 = vst [vmem:[#allocation20_spill] sm:$0xff] %v10108_v13  ;;  %3827 = vmatmul.f32.gmra.mxu3 %v3202_v36  ;;  %7187 = vmatmul.msk.f32.gmra.mxu0 %vm3285_vm4, %v3148_v60  ;;  %v3956_v42 = vsel %vm257_vm0, %v10108_v13, 0.0  ;;  %v3207_v60 = vld [vmem:[#allocation2 + $0x4f0] sm:$0xff]  ;;  %v3539_v0 = vpop.f32.mrf.mxu1  ;;  %v10137_v36 = vpop.f32.mrf.mxu2  ;;  %v3173_v32 = vld [vmem:[#allocation2 + $0x3e0] sm:$0xff] }
 0x526   : > { %3957 = vadd.xlane.f32.xlu2 %v3956_v42  ;;  %3042 = vst.msk [vmem:[#allocation2 + $0x408] sm:$0xff] %vm450_vm1, %v2972_v23  ;;  %v3158_v42 = vld [vmem:[#allocation2 + $0x368] sm:$0xff] }
 0x52a   : > { %v3863_v1 = vpop.f32.mrf.mxu0 }
 0x52b   : > { %v10125_v49 = vadd.f32 %v3863_v1, %v3751_v47  ;;  %v7130_v47 = vld [vmem:[%s7615_s23 + $0x19b] sm:$0xff]  ;;  %v2974_v1 = vpop.permute.xlu2 %2973  ;;  %v10151_v18 = vpop.f32.mrf.mxu3 }
 0x52c   : > { %2851 = vst.msk [vmem:[#allocation2 + $0x430] sm:$0xff] %vm257_vm0, %v7130_v47 }
 0x52d   : > { %12003 = vst [vmem:[#allocation21_spill] sm:$0xff] %v10125_v49  ;;  %3830 = vmatmul.f32.gmra.mxu3 %v3207_v60  ;;  %7188 = vmatmul.msk.f32.gmra.mxu0 %vm3285_vm4, %v3153_v27  ;;  %v3959_v46 = vsel %vm257_vm0, %v10125_v49, 0.0  ;;  %v3531_v27 = vadd.f32 %v10067_v2, %v3418_v17  ;;  %v3542_v33 = vpop.f32.mrf.mxu1  ;;  %v10155_v60 = vpop.f32.mrf.mxu2  ;;  %v3421_v2 = vadd.f32 %v10034_v50, %v9828_v8 }
 0x52e   : > { %3960 = vadd.xlane.f32.xlu2 %v3959_v46  ;;  %3043 = vst.msk [vmem:[#allocation2 + $0x430] sm:$0xff] %vm450_vm1, %v2974_v1  ;;  %v3168_v1 = vld [vmem:[#allocation2 + $0x3b8] sm:$0xff] }
 0x52f   : > { %v3644_v44 = vadd.f32 %v10070_v7, %v3531_v27 }
 0x531   : > { %v3757_v56 = vadd.f32 %v10041_v54, %v3644_v44  ;;  %v2978_v44 = vpop.permute.xlu1 %2977 }
 0x532   : > { %v3866_v15 = vpop.f32.mrf.mxu0 }
 0x533   : > { %v10142_v19 = vadd.f32 %v3866_v15, %v3754_v28  ;;  %v2976_v28 = vpop.permute.xlu0 %2975  ;;  %v3534_v15 = vadd.f32 %v10087_v48, %v3421_v2  ;;  %v10169_v8 = vpop.f32.mrf.mxu3  ;;  %v3424_v48 = vadd.f32 %v10034_v50, %v9839_v63 }
 0x534   : > { %3044 = vst.msk [vmem:[#allocation2 + $0x458] sm:$0xff] %vm450_vm1, %v2976_v28  ;;  %v3427_v28 = vadd.f32 %v10034_v50, %v9853_v3 }
 0x535   : > { %12004 = vst [vmem:[#allocation22_spill] sm:$0xff] %v10142_v19  ;;  %7189 = vmatmul.msk.f32.gmra.mxu0 %vm3285_vm4, %v3158_v42  ;;  %v3962_v16 = vsel %vm257_vm0, %v10142_v19, 0.0  ;;  %v3647_v7 = vadd.f32 %v10094_v21, %v3534_v15  ;;  %v3545_v17 = vpop.f32.mrf.mxu1  ;;  %v3537_v21 = vadd.f32 %v10111_v35, %v3424_v48  ;;  %v7133_v15 = vld [vmem:[%s7615_s23 + $0x1bb] sm:$0xff]  ;;  %v3178_v48 = vld [vmem:[#allocation2 + $0x408] sm:$0xff] }
 0x536   : > { %3963 = vadd.xlane.f32.xlu0 %v3962_v16  ;;  %v7132_v16 = vld [vmem:[%s7615_s23 + $0x1b3] sm:$0xff]  ;;  %2854 = vst.msk [vmem:[#allocation2 + $0x4a8] sm:$0xff] %vm257_vm0, %v7133_v15  ;;  %v3433_v15 = vadd.f32 %v10034_v50, %v9877_v45 }
 0x537   : > { %v3760_v42 = vadd.f32 %v10064_v52, %v3647_v7  ;;  %2853 = vst.msk [vmem:[#allocation2 + $0x480] sm:$0xff] %vm257_vm0, %v7132_v16  ;;  %v3650_v63 = vadd.f32 %v10119_v29, %v3537_v21  ;;  %v3430_v16 = vadd.f32 %v10034_v50, %v9867_v9 }
 0x538   : > { %3045 = vst.msk [vmem:[#allocation2 + $0x480] sm:$0xff] %vm450_vm1, %v2978_v44 }
 0x53a   : > { %v3869_v23 = vpop.f32.mrf.mxu0 }
 0x53b   : > { %v10159_v46 = vadd.f32 %v3869_v23, %v3757_v56  ;;  %v3658_v56 = vpop.f32.mrf.mxu2  ;;  %v3763_v23 = vadd.f32 %v10084_v62, %v3650_v63  ;;  %v2982_v21 = vpop.permute.xlu0 %2981  ;;  %v3543_v63 = vadd.f32 %v3542_v33, %v3430_v16  ;;  %v3188_v16 = vld [vmem:[#allocation2 + $0x458] sm:$0xff] }
 0x53d   : > { %12005 = vst [vmem:[#allocation23_spill] sm:$0xff] %v10159_v46  ;;  %7190 = vmatmul.msk.f32.gmra.mxu0 %vm3285_vm4, %v3163_v38  ;;  %v3965_v54 = vsel %vm257_vm0, %v10159_v46, 0.0  ;;  %v10185_v38 = vpop.f32.mrf.mxu3  ;;  %v3548_v7 = vpop.f32.mrf.mxu1  ;;  %v3656_v9 = vadd.f32 %v10155_v60, %v3543_v63 }
 0x53e   : > { %3966 = vadd.xlane.f32.xlu1 %v3965_v54  ;;  %v2980_v54 = vpop.permute.xlu2 %2979 }
 0x53f   : > { %3046 = vst.msk [vmem:[#allocation2 + $0x4a8] sm:$0xff] %vm450_vm1, %v2980_v54  ;;  %v7135_v54 = vld [vmem:[%s7615_s23 + $0x1d3] sm:$0xff] }
 0x540   : > { %2856 = vst.msk [vmem:[#allocation2 + $0x4f8] sm:$0xff] %vm257_vm0, %v7135_v54 }
 0x542   : > { %v3872_v47 = vpop.f32.mrf.mxu0 }
 0x543   : > { %v10174_v27 = vadd.f32 %v3872_v47, %v3760_v42  ;;  %v3540_v42 = vadd.f32 %v3539_v0, %v3427_v28  ;;  %v3661_v29 = vpop.f32.mrf.mxu2  ;;  %v7134_v0 = vld [vmem:[%s7615_s23 + $0x1cb] sm:$0xff] }
 0x544   : > { %2855 = vst.msk [vmem:[#allocation2 + $0x4d0] sm:$0xff] %vm257_vm0, %v7134_v0  ;;  %v3183_v28 = vld [vmem:[#allocation2 + $0x430] sm:$0xff]  ;;  %v3436_v0 = vadd.f32 %v10034_v50, %v9889_v6 }
 0x545   : > { %12006 = vst [vmem:[#allocation24_spill] sm:$0xff] %v10174_v27  ;;  %7191 = vmatmul.msk.f32.gmra.mxu0 %vm3285_vm4, %v3168_v1  ;;  %v3968_v52 = vsel %vm257_vm0, %v10174_v27, 0.0  ;;  %v3653_v3 = vadd.f32 %v10137_v36, %v3540_v42  ;;  %v3551_v36 = vpop.f32.mrf.mxu1  ;;  %v2984_v42 = vpop.permute.xlu1 %2983 }
 0x546   : > { %3969 = vadd.xlane.f32.xlu2 %v3968_v52  ;;  %v10204_v52 = vpop.f32.mrf.mxu3  ;;  %3047 = vst.msk [vmem:[#allocation2 + $0x4d0] sm:$0xff] %vm450_vm1, %v2982_v21  ;;  %v3549_v21 = vadd.f32 %v3548_v7, %v3436_v0 }
 0x547   : > { %v3766_v47 = vadd.f32 %v10104_v20, %v3653_v3  ;;  %3048 = vst.msk [vmem:[#allocation2 + $0x4f8] sm:$0xff] %vm450_vm1, %v2984_v42 }
 0x54a   : > { %v3875_v2 = vpop.f32.mrf.mxu0 }
 0x54b   : > { %v10189_v35 = vadd.f32 %v3875_v2, %v3763_v23  ;;  %v3664_v23 = vpop.f32.mrf.mxu2  ;;  %v3769_v2 = vadd.f32 %v10128_v55, %v3656_v9 }
 0x54d   : > { %12007 = vst [vmem:[#allocation25_spill] sm:$0xff] %v10189_v35  ;;  %7192 = vmatmul.msk.f32.gmra.mxu0 %vm3285_vm4, %v3173_v32  ;;  %v3971_v62 = vsel %vm257_vm0, %v10189_v35, 0.0 }
 0x54e   : > { %3972 = vadd.xlane.f32.xlu0 %v3971_v62  ;;  %v3546_v62 = vadd.f32 %v3545_v17, %v3433_v15  ;;  %v3783_v55 = vpop.f32.mrf.mxu3 }
 0x550   : > { %v3659_v3 = vadd.f32 %v3658_v56, %v3546_v62 }
 0x552   : > { %v3878_v1 = vpop.f32.mrf.mxu0  ;;  %v3772_v45 = vadd.f32 %v10151_v18, %v3659_v3  ;;  %v3442_v3 = vadd.f32 %v10034_v50, %v9911_v34 }
 0x553   : > { %v10201_v44 = vadd.f32 %v3878_v1, %v3766_v47  ;;  %v3554_v47 = vpop.f32.mrf.mxu1  ;;  %v3667_v1 = vpop.f32.mrf.mxu2 }
 0x555   : > { %12008 = vst [vmem:[#allocation26_spill] sm:$0xff] %v10201_v44  ;;  %7193 = vmatmul.msk.f32.gmra.mxu0 %vm3285_vm4, %v3178_v48  ;;  %v3974_v20 = vsel %vm257_vm0, %v10201_v44, 0.0 }
 0x556   : > { %3975 = vadd.xlane.f32.xlu1 %v3974_v20  ;;  %v3662_v20 = vadd.f32 %v3661_v29, %v3549_v21  ;;  %v3786_v56 = vpop.f32.mrf.mxu3  ;;  %v3203_v21 = vld [vmem:[#allocation2 + $0x4d0] sm:$0xff] }
 0x558   : > { %v3775_v9 = vadd.f32 %v10169_v8, %v3662_v20 }
 0x55a   : > { %v3881_v32 = vpop.f32.mrf.mxu0 }
 0x55b   : > { %v10215_v33 = vadd.f32 %v3881_v32, %v3769_v2  ;;  %v3557_v18 = vpop.f32.mrf.mxu1  ;;  %v3193_v32 = vld [vmem:[#allocation2 + $0x480] sm:$0xff]  ;;  %v3670_v15 = vpop.f32.mrf.mxu2 }
 0x55d   : > { %12009 = vst [vmem:[#allocation27_spill] sm:$0xff] %v10215_v33  ;;  %7194 = vmatmul.msk.f32.gmra.mxu0 %vm3285_vm4, %v3183_v28  ;;  %v3977_v60 = vsel %vm257_vm0, %v10215_v33, 0.0  ;;  %v3439_v28 = vadd.f32 %v10034_v50, %v9901_v11 }
 0x55e   : > { %3978 = vadd.xlane.f32.xlu2 %v3977_v60  ;;  %v3789_v8 = vpop.f32.mrf.mxu3  ;;  %v3198_v60 = vld [vmem:[#allocation2 + $0x4a8] sm:$0xff] }
 0x55f   : > { %v3552_v7 = vadd.f32 %v3551_v36, %v3439_v28 }
 0x561   : > { %v3665_v29 = vadd.f32 %v3664_v23, %v3552_v7  ;;  %v3208_v7 = vld [vmem:[#allocation2 + $0x4f8] sm:$0xff] }
 0x562   : > { %v3884_v48 = vpop.f32.mrf.mxu0 }
 0x563   : > { %v10226_v17 = vadd.f32 %v3884_v48, %v3772_v45  ;;  %v3778_v42 = vadd.f32 %v10185_v38, %v3665_v29  ;;  %v3560_v45 = vpop.f32.mrf.mxu1  ;;  %v3555_v48 = vadd.f32 %v3554_v47, %v3442_v3 }
 0x565   : > { %12010 = vst [vmem:[#allocation28_spill] sm:$0xff] %v10226_v17  ;;  %7195 = vmatmul.msk.f32.gmra.mxu0 %vm3285_vm4, %v3188_v16  ;;  %v3980_v63 = vsel %vm257_vm0, %v10226_v17, 0.0  ;;  %v3673_v16 = vpop.f32.mrf.mxu2  ;;  %v3668_v23 = vadd.f32 %v3667_v1, %v3555_v48  ;;  %v3451_v48 = vadd.f32 %v10034_v50, %v9955_v39 }
 0x566   : > { %3981 = vadd.xlane.f32.xlu0 %v3980_v63  ;;  %v3445_v63 = vadd.f32 %v10034_v50, %v9924_v58  ;;  %v3792_v20 = vpop.f32.mrf.mxu3 }
 0x567   : > { %v3781_v38 = vadd.f32 %v10204_v52, %v3668_v23 }
 0x56a   : > { %v3887_v2 = vpop.f32.mrf.mxu0 }
 0x56b   : > { %v10234_v6 = vadd.f32 %v3887_v2, %v3775_v9  ;;  %v3558_v9 = vadd.f32 %v3557_v18, %v3445_v63  ;;  %v3563_v2 = vpop.f32.mrf.mxu1 }
 0x56d   : > { %12011 = vst [vmem:[#allocation29_spill] sm:$0xff] %v10234_v6  ;;  %7196 = vmatmul.msk.f32.gmra.mxu0 %vm3285_vm4, %v3193_v32  ;;  %v3983_v54 = vsel %vm257_vm0, %v10234_v6, 0.0  ;;  %v3671_v32 = vadd.f32 %v3670_v15, %v3558_v9  ;;  %v3676_v1 = vpop.f32.mrf.mxu2 }
 0x56e   : > { %3984 = vadd.xlane.f32.xlu1 %v3983_v54  ;;  %v3448_v54 = vadd.f32 %v10034_v50, %v9940_v53  ;;  %v3564_v53 = vadd.f32 %v3563_v2, %v3451_v48 }
 0x56f   : > { %v3784_v28 = vadd.f32 %v3783_v55, %v3671_v32 }
 0x570   : > { %v3561_v29 = vadd.f32 %v3560_v45, %v3448_v54  ;;  %v3677_v23 = vadd.f32 %v3676_v1, %v3564_v53 }
 0x572   : > { %v3890_v62 = vpop.f32.mrf.mxu0 }
 0x573   : > { %v10242_v11 = vadd.f32 %v3890_v62, %v3778_v42  ;;  %v3795_v42 = vpop.f32.mrf.mxu3  ;;  %v3674_v62 = vadd.f32 %v3673_v16, %v3561_v29 }
 0x575   : > { %12012 = vst [vmem:[#allocation30_spill] sm:$0xff] %v10242_v11  ;;  %7197 = vmatmul.msk.f32.gmra.mxu0 %vm3285_vm4, %v3198_v60  ;;  %v3986_v36 = vsel %vm257_vm0, %v10242_v11, 0.0  ;;  %v3566_v60 = vpop.f32.mrf.mxu1  ;;  %v3787_v15 = vadd.f32 %v3786_v56, %v3674_v62  ;;  %v3679_v3 = vpop.f32.mrf.mxu2  ;;  %v3454_v56 = vadd.f32 %v10034_v50, %v9965_v51 }
 0x576   : > { %3987 = vadd.xlane.f32.xlu2 %v3986_v36 }
 0x57a   : > { %v3893_v0 = vpop.f32.mrf.mxu0 }
 0x57b   : > { %v10250_v34 = vadd.f32 %v3893_v0, %v3781_v38  ;;  %v3798_v38 = vpop.f32.mrf.mxu3  ;;  %v3790_v0 = vadd.f32 %v3789_v8, %v3677_v23  ;;  %v3457_v8 = vadd.f32 %v10034_v50, %v9980_v59 }
 0x57d   : > { %12013 = vst [vmem:[#allocation31_spill] sm:$0xff] %v10250_v34  ;;  %7198 = vmatmul.msk.f32.gmra.mxu0 %vm3285_vm4, %v3203_v21  ;;  %v3989_v47 = vsel %vm257_vm0, %v10250_v34, 0.0  ;;  %v3569_v21 = vpop.f32.mrf.mxu1  ;;  %v3682_v9 = vpop.f32.mrf.mxu2 }
 0x57e   : > { %3990 = vadd.xlane.f32.xlu0 %v3989_v47  ;;  %v3567_v47 = vadd.f32 %v3566_v60, %v3454_v56  ;;  %v3570_v54 = vadd.f32 %v3569_v21, %v3457_v8 }
 0x580   : > { %v3680_v2 = vadd.f32 %v3679_v3, %v3567_v47 }
 0x582   : > { %v3896_v52 = vpop.f32.mrf.mxu0  ;;  %v3793_v32 = vadd.f32 %v3792_v20, %v3680_v2  ;;  %v3460_v20 = vadd.f32 %v10034_v50, %v9994_v10 }
 0x583   : > { %v10257_v58 = vadd.f32 %v3896_v52, %v3784_v28  ;;  %v3801_v28 = vpop.f32.mrf.mxu3 }
 0x585   : > { %12014 = vst [vmem:[#allocation32_spill] sm:$0xff] %v10257_v58  ;;  %7199 = vmatmul.msk.f32.gmra.mxu0 %vm3285_vm4, %v3208_v7  ;;  %v3992_v18 = vsel %vm257_vm0, %v10257_v58, 0.0  ;;  %v3572_v7 = vpop.f32.mrf.mxu1  ;;  %v3685_v29 = vpop.f32.mrf.mxu2 }
 0x586   : > { %3993 = vadd.xlane.f32.xlu1 %v3992_v18  ;;  %v3683_v18 = vadd.f32 %v3682_v9, %v3570_v54 }
 0x588   : > { %v3796_v62 = vadd.f32 %v3795_v42, %v3683_v18  ;;  %v3463_v42 = vadd.f32 %v10034_v50, %v10007_v24 }
 0x58a   : > { %v3899_v55 = vpop.f32.mrf.mxu0 }
 0x58b   : > { %v10264_v36 = vadd.f32 %v3899_v55, %v3787_v15  ;;  %v3804_v3 = vpop.f32.mrf.mxu3  ;;  %v3573_v55 = vadd.f32 %v3572_v7, %v3460_v20 }
 0x58d   : > { %12015 = vst [vmem:[#allocation33_spill] sm:$0xff] %v10264_v36  ;;  %v3995_v45 = vsel %vm257_vm0, %v10264_v36, 0.0  ;;  %v3575_v48 = vpop.f32.mrf.mxu1  ;;  %v3686_v53 = vadd.f32 %v3685_v29, %v3573_v55 }
 0x58e   : > { %3996 = vadd.xlane.f32.xlu2 %v3995_v45  ;;  %v3688_v45 = vpop.f32.mrf.mxu2 }
 0x58f   : > { %v3799_v23 = vadd.f32 %v3798_v38, %v3686_v53  ;;  %v3466_v38 = vadd.f32 %v10034_v50, %v10019_v40 }
 0x592   : > { %v3902_v63 = vpop.f32.mrf.mxu0 }
 0x593   : > { %v10270_v16 = vadd.f32 %v3902_v63, %v3790_v0  ;;  %v3576_v63 = vadd.f32 %v3575_v48, %v3463_v42  ;;  %v3807_v56 = vpop.f32.mrf.mxu3 }
 0x595   : > { %12016 = vst [vmem:[#allocation34_spill] sm:$0xff] %v10270_v16  ;;  %v3998_v39 = vsel %vm257_vm0, %v10270_v16, 0.0  ;;  %v3689_v9 = vadd.f32 %v3688_v45, %v3576_v63  ;;  %v3578_v47 = vpop.f32.mrf.mxu1 }
 0x596   : > { %3999 = vadd.xlane.f32.xlu0 %v3998_v39  ;;  %v3691_v2 = vpop.f32.mrf.mxu2  ;;  %v3579_v8 = vadd.f32 %v3578_v47, %v3466_v38 }
 0x597   : > { %v3802_v39 = vadd.f32 %v3801_v28, %v3689_v9  ;;  %v3469_v28 = vadd.f32 %v10034_v50, %v10036_v30 }
 0x598   : > { %v3692_v7 = vadd.f32 %v3691_v2, %v3579_v8 }
 0x59a   : > { %v3905_v52 = vpop.f32.mrf.mxu0 }
 0x59b   : > { %v10276_v1 = vadd.f32 %v3905_v52, %v3793_v32  ;;  %v3810_v54 = vpop.f32.mrf.mxu3 }
 0x59d   : > { %12017 = vst [vmem:[#allocation35_spill] sm:$0xff] %v10276_v1  ;;  %v4001_v51 = vsel %vm257_vm0, %v10276_v1, 0.0  ;;  %v3581_v29 = vpop.f32.mrf.mxu1 }
 0x59e   : > { %4002 = vadd.xlane.f32.xlu1 %v4001_v51  ;;  %v3805_v51 = vadd.f32 %v3804_v3, %v3692_v7  ;;  %v3582_v20 = vadd.f32 %v3581_v29, %v3469_v28  ;;  %v3472_v3 = vadd.f32 %v10034_v50, %v9602_v4 }
 0x5a2   : > { %v3908_v60 = vpop.f32.mrf.mxu0 }
 0x5a3   : > { %v10282_v15 = vadd.f32 %v3908_v60, %v3796_v62  ;;  %v3694_v60 = vpop.f32.mrf.mxu2  ;;  %v3813_v48 = vpop.f32.mrf.mxu3 }
 0x5a4   : > { %v3695_v55 = vadd.f32 %v3694_v60, %v3582_v20 }
 0x5a5   : > { %12018 = vst [vmem:[#allocation36_spill] sm:$0xff] %v10282_v15  ;;  %v4004_v59 = vsel %vm257_vm0, %v10282_v15, 0.0 }
 0x5a6   : > { %4005 = vadd.xlane.f32.xlu2 %v4004_v59  ;;  %v3808_v59 = vadd.f32 %v3807_v56, %v3695_v55 }
 0x5aa   : > { %v3911_v0 = vpop.f32.mrf.mxu0 }
 0x5ab   : > { %v10288_v21 = vadd.f32 %v3911_v0, %v3799_v23  ;;  %v3585_v23 = vadd.f32 %v9764_v43, %v3472_v3  ;;  %v3816_v9 = vpop.f32.mrf.mxu3 }
 0x5ad   : > { %12019 = vst [vmem:[#allocation37_spill] sm:$0xff] %v10288_v21  ;;  %v4007_v10 = vsel %vm257_vm0, %v10288_v21, 0.0  ;;  %v3698_v0 = vadd.f32 %v9859_v26, %v3585_v23  ;;  %v3478_v26 = vadd.f32 %v10034_v50, %v9631_v22 }
 0x5ae   : > { %4008 = vadd.xlane.f32.xlu0 %v4007_v10  ;;  %v3475_v10 = vadd.f32 %v10034_v50, %v9620_v31 }
 0x5af   : > { %v3811_v42 = vadd.f32 %v3810_v54, %v3698_v0  ;;  %v3591_v31 = vadd.f32 %v9787_v12, %v3478_v26  ;;  %v12027_v12 = vld [vmem:[#allocation12_spill] sm:$0xff] }
 0x5b0   : > { %v3588_v4 = vadd.f32 %v9773_v61, %v3475_v10 }
 0x5b1   : > { %v3704_v61 = vadd.f32 %v9883_v41, %v3591_v31  ;;  %v12036_v31 = vld [vmem:[#allocation5_spill] sm:$0xff] }
 0x5b2   : > { %v3914_v32 = vpop.f32.mrf.mxu0  ;;  %v3701_v43 = vadd.f32 %v9869_v14, %v3588_v4  ;;  %v3481_v14 = vadd.f32 %v10034_v50, %v9659_v5 }
 0x5b3   : > { %v10294_v52 = vadd.f32 %v3914_v32, %v3802_v39  ;;  %v3819_v8 = vpop.f32.mrf.mxu3 }
 0x5b4   : > { %v3814_v39 = vadd.f32 %v3813_v48, %v3701_v43  ;;  %v12035_v43 = vld [vmem:[#allocation14_spill] sm:$0xff] }
 0x5b5   : > { %12020 = vst [vmem:[#allocation38_spill] sm:$0xff] %v10294_v52  ;;  %v4010_v24 = vsel %vm257_vm0, %v10294_v52, 0.0 }
 0x5b6   : > { %4011 = vadd.xlane.f32.xlu1 %v4010_v24  ;;  %v3817_v24 = vadd.f32 %v3816_v9, %v3704_v61  ;;  %v12034_v9 = vld [vmem:[#allocation9_spill] sm:$0xff] }
 0x5ba   : > { %v3917_v18 = vpop.f32.mrf.mxu0 }
 0x5bb   : > { %v10300_v62 = vadd.f32 %v3917_v18, %v3805_v51  ;;  %v12026_v51 = vld [vmem:[#allocation7_spill] sm:$0xff]  ;;  %v3822_v28 = vpop.f32.mrf.mxu3 }
 0x5bc   : > { %v3594_v22 = vadd.f32 %v12026_v51, %v3481_v14  ;;  %v12039_v51 = vld [vmem:[#allocation15_spill] sm:$0xff] }
 0x5bd   : > { %12021 = vst [vmem:[#allocation39_spill] sm:$0xff] %v10300_v62  ;;  %v4013_v40 = vsel %vm257_vm0, %v10300_v62, 0.0 }
 0x5be   : > { %4014 = vadd.xlane.f32.xlu2 %v4013_v40  ;;  %v3707_v18 = vadd.f32 %v12027_v12, %v3594_v22  ;;  %v12028_v40 = vld [vmem:[#allocation3_spill] sm:$0xff] }
 0x5bf   : > { %v3484_v41 = vadd.f32 %v10034_v50, %v12028_v40 }
 0x5c0   : > { %v3820_v60 = vadd.f32 %v3819_v8, %v3707_v18  ;;  %v12040_v18 = vld [vmem:[#allocation6_spill] sm:$0xff] }
 0x5c2   : > { %v3920_v53 = vpop.f32.mrf.mxu0 }
 0x5c3   : > { %v10306_v45 = vadd.f32 %v3920_v53, %v3808_v59  ;;  %v12030_v59 = vld [vmem:[#allocation8_spill] sm:$0xff]  ;;  %v12031_v53 = vld [vmem:[#allocation13_spill] sm:$0xff] }
 0x5c4   : > { %v3597_v5 = vadd.f32 %v12030_v59, %v3484_v41  ;;  %v4075_v59 = vsel %vm257_vm0, %v10055_v37, -inf }
 0x5c5   : > { %12022 = vst [vmem:[#allocation40_spill] sm:$0xff] %v10306_v45  ;;  %v4016_v30 = vsel %vm257_vm0, %v10306_v45, 0.0 }
 0x5c6   : > { %4017 = vadd.xlane.f32.xlu0 %v4016_v30  ;;  %v3710_v3 = vadd.f32 %v12031_v53, %v3597_v5  ;;  %v3825_v30 = vpop.f32.mrf.mxu3 }
 0x5c8   : > { %v3823_v23 = vadd.f32 %v3822_v28, %v3710_v3  ;;  %v3493_v28 = vadd.f32 %v10034_v50, %v12040_v18  ;;  %v4117_v18 = vsel %vm257_vm0, %v10250_v34, -inf }
 0x5ca   : > { %v3923_v63 = vpop.f32.mrf.mxu0 }
 0x5cb   : > { %v10314_v56 = vadd.f32 %v3923_v63, %v3811_v42  ;;  %v12032_v42 = vld [vmem:[#allocation4_spill] sm:$0xff] }
 0x5cc   : > { %v3487_v63 = vadd.f32 %v10034_v50, %v12032_v42 }
 0x5cd   : > { %12023 = vst [vmem:[#allocation41_spill] sm:$0xff] %v10314_v56  ;;  %v4019_v47 = vsel %vm257_vm0, %v10314_v56, 0.0 }
 0x5ce   : > { %4020 = vadd.xlane.f32.xlu1 %v4019_v47  ;;  %v3600_v4 = vadd.f32 %v12034_v9, %v3487_v63  ;;  %v3828_v61 = vpop.f32.mrf.mxu3  ;;  %v4087_v63 = vsel %vm257_vm0, %v10125_v49, -inf  ;;  %v4093_v9 = vsel %vm257_vm0, %v10159_v46, -inf }
 0x5d2   : > { %v3926_v2 = vpop.f32.mrf.mxu0 }
 0x5d3   : > { %v10322_v32 = vadd.f32 %v3926_v2, %v3814_v39  ;;  %v3713_v39 = vadd.f32 %v12035_v43, %v3600_v4  ;;  %v4081_v4 = vsel %vm257_vm0, %v10091_v57, -inf  ;;  %v4102_v43 = vsel %vm257_vm0, %v10201_v44, -inf }
 0x5d5   : > { %12024 = vst [vmem:[#allocation42_spill] sm:$0xff] %v10322_v32  ;;  %v4022_v38 = vsel %vm257_vm0, %v10322_v32, 0.0  ;;  %v3826_v2 = vadd.f32 %v3825_v30, %v3713_v39  ;;  %v4090_v39 = vsel %vm257_vm0, %v10142_v19, -inf }
 0x5d6   : > { %4023 = vadd.xlane.f32.xlu2 %v4022_v38  ;;  %v3490_v38 = vadd.f32 %v10034_v50, %v12036_v31  ;;  %v3831_v5 = vpop.f32.mrf.mxu3  ;;  %v4078_v50 = vsel %vm257_vm0, %v10074_v25, -inf  ;;  %v4099_v31 = vsel %vm257_vm0, %v10189_v35, -inf }
 0x5da   : > { %v3929_v7 = vpop.f32.mrf.mxu0 }
 0x5db   : > { %v10330_v54 = vadd.f32 %v3929_v7, %v3817_v24  ;;  %v12038_v24 = vld [vmem:[#allocation10_spill] sm:$0xff] }
 0x5dc   : > { %v3603_v7 = vadd.f32 %v12038_v24, %v3490_v38  ;;  %v3949_v38 = vpop.xlane.xlu2 %3948  ;;  %v4120_v24 = vsel %vm257_vm0, %v10257_v58, -inf }
 0x5dd   : > { %12025 = vst [vmem:[#allocation43_spill] sm:$0xff] %v10330_v54  ;;  %v4025_v29 = vsel %vm257_vm0, %v10330_v54, 0.0 }
 0x5de   : > { %4026 = vadd.xlane.f32.xlu0 %v4025_v29  ;;  %v3716_v22 = vadd.f32 %v12039_v51, %v3603_v7  ;;  %v4108_v7 = vsel %vm257_vm0, %v10226_v17, -inf  ;;  %v3952_v51 = vpop.xlane.xlu0 %3951 }
 0x5e0   : > { %v3829_v29 = vadd.f32 %v3828_v61, %v3716_v22  ;;  %v4114_v61 = vsel %vm257_vm0, %v10242_v11, -inf  ;;  %v3955_v22 = vpop.xlane.xlu1 %3954 }
 0x5e2   : > { %v3932_v20 = vpop.f32.mrf.mxu0 }
 0x5e3   : > { %v10338_v55 = vadd.f32 %v3932_v20, %v3820_v60  ;;  %v12042_v20 = vld [vmem:[#allocation11_spill] sm:$0xff] }
 0x5e4   : > { %v3606_v40 = vadd.f32 %v12042_v20, %v3493_v28 }
 0x5e5   : > { %12029 = vst [vmem:[#allocation7_spill] sm:$0xff] %v10338_v55  ;;  %v4028_v48 = vsel %vm257_vm0, %v10338_v55, 0.0 }
 0x5e6   : > { %4029 = vadd.xlane.f32.xlu1 %v4028_v48  ;;  %v12043_v48 = vld [vmem:[#allocation16_spill] sm:$0xff]  ;;  %v3964_v28 = vpop.xlane.xlu0 %3963 }
 0x5e7   : > { %v3719_v53 = vadd.f32 %v12043_v48, %v3606_v40 }
 0x5e8   : > { %v3967_v40 = vpop.xlane.xlu1 %3966 }
 0x5e9   : > { %v3832_v3 = vadd.f32 %v3831_v5, %v3719_v53  ;;  %v4126_v5 = vsel %vm257_vm0, %v10270_v16, -inf }
 0x5ea   : > { %v3935_v0 = vpop.f32.mrf.mxu0 }
 0x5eb   : > { %v10346_v10 = vadd.f32 %v3935_v0, %v3823_v23  ;;  %v4084_v0 = vsel %vm257_vm0, %v10108_v13, -inf }
 0x5ed   : > { %12033 = vst [vmem:[#allocation12_spill] sm:$0xff] %v10346_v10  ;;  %v4031_v47 = vsel %vm257_vm0, %v10346_v10, 0.0 }
 0x5ee   : > { %4032 = vadd.xlane.f32.xlu2 %v4031_v47  ;;  %v4096_v47 = vsel %vm257_vm0, %v10174_v27, -inf  ;;  %v3973_v48 = vpop.xlane.xlu0 %3972 }
 0x5f2   : > { %v3938_v26 = vpop.f32.mrf.mxu0 }
 0x5f3   : > { %v10354_v8 = vadd.f32 %v3938_v26, %v3826_v2  ;;  %v4105_v2 = vsel %vm257_vm0, %v10215_v33, -inf  ;;  %v4111_v26 = vsel %vm257_vm0, %v10234_v6, -inf }
 0x5f5   : > { %12037 = vst [vmem:[#allocation3_spill] sm:$0xff] %v10354_v8  ;;  %v4034_v14 = vsel %vm257_vm0, %v10354_v8, 0.0 }
 0x5f6   : > { %4035 = vadd.xlane.f32.xlu0 %v4034_v14  ;;  %v3958_v14 = vpop.xlane.xlu2 %3957 }
 0x5fa   : > { %v3941_v12 = vpop.f32.mrf.mxu0 }
 0x5fb   : > { %v10362_v60 = vadd.f32 %v3941_v12, %v3829_v29  ;;  %v4123_v29 = vsel %vm257_vm0, %v10264_v36, -inf  ;;  %v4129_v12 = vsel %vm257_vm0, %v10276_v1, -inf }
 0x5fd   : > { %12041 = vst [vmem:[#allocation8_spill] sm:$0xff] %v10362_v60  ;;  %v4037_v41 = vsel %vm257_vm0, %v10362_v60, 0.0 }
 0x5fe   : > { %4038 = vadd.xlane.f32.xlu1 %v4037_v41  ;;  %4076 = vmax.xlane.f32.xlu0 %v4075_v59  ;;  %v3961_v20 = vpop.xlane.xlu2 %3960  ;;  %v4132_v41 = vsel %vm257_vm0, %v10282_v15, -inf  ;;  %v4138_v59 = vsel %vm257_vm0, %v10294_v52, -inf }
 0x602   : > { %v3944_v23 = vpop.f32.mrf.mxu0 }
 0x603   : > { %v10370_v30 = vadd.f32 %v3944_v23, %v3832_v3  ;;  %v3976_v3 = vpop.xlane.xlu1 %3975  ;;  %v4141_v23 = vsel %vm257_vm0, %v10300_v62, -inf }
 0x605   : > { %12044 = vst [vmem:[#allocation13_spill] sm:$0xff] %v10370_v30  ;;  %v4040_v42 = vsel %vm257_vm0, %v10370_v30, 0.0 }
 0x606   : > { %4079 = vmax.xlane.f32.xlu1 %v4078_v50  ;;  %4085 = vmax.xlane.f32.xlu0 %v4084_v0  ;;  %v3970_v53 = vpop.xlane.xlu2 %3969  ;;  %v4147_v50 = vsel %vm257_vm0, %v10314_v56, -inf  ;;  %v4135_v0 = vsel %vm257_vm0, %v10288_v21, -inf }
 0x607   : > { %4041 = vadd.xlane.f32.xlu2 %v4040_v42  ;;  %v3982_v42 = vpop.xlane.xlu0 %3981 }
 0x60e   : > { %4088 = vmax.xlane.f32.xlu1 %v4087_v63  ;;  %4094 = vmax.xlane.f32.xlu0 %v4093_v9  ;;  %v4203_v63 = vlaneseq  ;;  %v3979_v9 = vpop.xlane.xlu2 %3978 }
 0x60f   : > { %4082 = vmax.xlane.f32.xlu2 %v4081_v4  ;;  %v3985_v4 = vpop.xlane.xlu1 %3984 }
 0x616   : > { %4097 = vmax.xlane.f32.xlu1 %v4096_v47  ;;  %4103 = vmax.xlane.f32.xlu0 %v4102_v43  ;;  %v4150_v47 = vsel %vm257_vm0, %v10322_v32, -inf  ;;  %v4156_v43 = vsel %vm257_vm0, %v10338_v55, -inf }
 0x617   : > { %4091 = vmax.xlane.f32.xlu2 %v4090_v39  ;;  %v10424_v39 = vand.u32 127, %v4203_v63 }
 0x61e   : > { %4106 = vmax.xlane.f32.xlu1 %v4105_v2  ;;  %4112 = vmax.xlane.f32.xlu0 %v4111_v26  ;;  %v4144_v2 = vsel %vm257_vm0, %v10306_v45, -inf  ;;  %v10429_v26 = vadd.s32 4294967288, %v10424_v39 }
 0x61f   : > { %4100 = vmax.xlane.f32.xlu2 %v4099_v31  ;;  %v10431_v31 = vmul.f32 0.03125, %v3952_v51 }
 0x626   : > { %4115 = vmax.xlane.f32.xlu1 %v4114_v61  ;;  %4121 = vmax.xlane.f32.xlu0 %v4120_v24  ;;  %v10433_v61 = vmul.f32 0.03125, %v3958_v14  ;;  %v10435_v24 = vmul.f32 0.03125, %v3964_v28  ;;  %v10447_v14 = vmul.f32 0.03125, %v3970_v53  ;;  %v4153_v53 = vsel %vm257_vm0, %v10330_v54, -inf }
 0x627   : > { %4109 = vmax.xlane.f32.xlu2 %v4108_v7  ;;  %v3991_v7 = vpop.xlane.xlu0 %3990 }
 0x628   : > { %v4211_v51 = vperm.slane %v10433_v61, %v10429_v26  ;;  %v4214_v28 = vperm.slane %v10435_v24, %v10429_v26 }
 0x62e   : > { %4124 = vmax.xlane.f32.xlu1 %v4123_v29  ;;  %4130 = vmax.xlane.f32.xlu0 %v4129_v12  ;;  %v10437_v29 = vmul.f32 0.03125, %v3955_v22  ;;  %v3988_v12 = vpop.xlane.xlu2 %3987  ;;  %v10451_v22 = vmul.f32 0.03125, %v3976_v3 }
 0x62f   : > { %4118 = vmax.xlane.f32.xlu2 %v4117_v18  ;;  %v10439_v18 = vmul.f32 0.03125, %v3949_v38  ;;  %v4159_v38 = vsel %vm257_vm0, %v10346_v10, -inf }
 0x631   : > { %v4205_v3 = vperm.slane %v10439_v18, %v10424_v39 }
 0x636   : > { %4133 = vmax.xlane.f32.xlu1 %v4132_v41  ;;  %4139 = vmax.xlane.f32.xlu0 %v4138_v59  ;;  %v10441_v41 = vmul.f32 0.03125, %v3961_v20  ;;  %v4207_v59 = vperm.slane %v10431_v31, %v10429_v26  ;;  %v4165_v20 = vsel %vm257_vm0, %v10362_v60, -inf  ;;  %v4220_v60 = vperm.slane %v10451_v22, %v10429_v26 }
 0x637   : > { %4127 = vmax.xlane.f32.xlu2 %v4126_v5  ;;  %v3994_v5 = vpop.xlane.xlu1 %3993 }
 0x638   : > { %v4213_v63 = vperm.slane %v10441_v41, %v10424_v39 }
 0x63e   : > { %4142 = vmax.xlane.f32.xlu1 %v4141_v23  ;;  %4148 = vmax.xlane.f32.xlu0 %v4147_v50  ;;  %v4210_v23 = vperm.slane %v10437_v29, %v10424_v39  ;;  %v10459_v50 = vmul.f32 0.03125, %v3967_v40 }
 0x63f   : > { %4136 = vmax.xlane.f32.xlu2 %v4135_v0  ;;  %v10461_v0 = vmul.f32 0.03125, %v3982_v42  ;;  %v4217_v42 = vperm.slane %v10447_v14, %v10429_v26 }
 0x640   : > { %v4212_v40 = vsel %vm4208_vm5, %v4211_v51, %v4210_v23  ;;  %v4216_v51 = vperm.slane %v10459_v50, %v10424_v39  ;;  %v10490_v23 = vmul.f32 0.03125, %v3991_v7 }
 0x646   : > { %4151 = vmax.xlane.f32.xlu1 %v4150_v47  ;;  %4157 = vmax.xlane.f32.xlu0 %v4156_v43  ;;  %v10469_v47 = vmul.f32 0.03125, %v3973_v48  ;;  %v10471_v43 = vmul.f32 0.03125, %v3988_v12  ;;  %v10483_v48 = vmul.f32 0.03125, %v3985_v4  ;;  %v4000_v12 = vpop.xlane.xlu0 %3999 }
 0x647   : > { %4145 = vmax.xlane.f32.xlu2 %v4144_v2  ;;  %v10476_v2 = vmul.f32 0.03125, %v3979_v9  ;;  %v4223_v9 = vperm.slane %v10461_v0, %v10429_v26 }
 0x648   : > { %v4226_v4 = vperm.slane %v10471_v43, %v10429_v26 }
 0x64e   : > { %4160 = vmax.xlane.f32.xlu1 %v4159_v38  ;;  %4166 = vmax.xlane.f32.xlu0 %v4165_v20  ;;  %v10478_v38 = vmul.f32 0.03125, %v3994_v5  ;;  %v4215_v20 = vsel %vm4208_vm5, %v4214_v28, %v4213_v63  ;;  %v3997_v5 = vpop.xlane.xlu2 %3996  ;;  %v4219_v28 = vperm.slane %v10469_v47, %v10424_v39  ;;  %v4222_v63 = vperm.slane %v10476_v2, %v10424_v39 }
 0x64f   : > { %4154 = vmax.xlane.f32.xlu2 %v4153_v53  ;;  %v4209_v53 = vsel %vm4208_vm5, %v4207_v59, %v4205_v3  ;;  %v4218_v3 = vsel %vm4208_vm5, %v4217_v42, %v4216_v51  ;;  %v4003_v42 = vpop.xlane.xlu1 %4002 }
 0x650   : > { %v4256_v10 = vsel %vm4255_vm6, %v4212_v40, %v4209_v53  ;;  %v4229_v7 = vperm.slane %v10478_v38, %v10429_v26  ;;  %v4221_v55 = vsel %vm4208_vm5, %v4220_v60, %v4219_v28  ;;  %v4225_v40 = vperm.slane %v10483_v48, %v10424_v39 }
 0x651   : > { %v4258_v59 = vsel %vm4257_vm7, %v4215_v20, %v4256_v10  ;;  %v4168_v53 = vsel %vm257_vm0, %v10370_v30, -inf  ;;  %v4224_v54 = vsel %vm4208_vm5, %v4223_v9, %v4222_v63  ;;  %v4228_v10 = vperm.slane %v10490_v23, %v10424_v39  ;;  %v4009_v9 = vpop.xlane.xlu0 %4008 }
 0x652   : > { %v4162_v20 = vsel %vm257_vm0, %v10354_v8, -inf  ;;  %v4260_v60 = vsel %vm4259_vm8, %v4218_v3, %v4258_v59  ;;  %v4227_v51 = vsel %vm4208_vm5, %v4226_v4, %v4225_v40 }
 0x653   : > { %v4230_v28 = vsel %vm4208_vm5, %v4229_v7, %v4228_v10  ;;  %v4262_v30 = vsel %vm4261_vm9, %v4221_v55, %v4260_v60 }
 0x654   : > { %v4264_v63 = vsel %vm4263_vm10, %v4224_v54, %v4262_v30  ;;  %v10525_v54 = vmul.f32 0.03125, %v4000_v12  ;;  %v10527_v30 = vmul.f32 0.03125, %v4003_v42 }
 0x656   : > { %4169 = vmax.xlane.f32.xlu1 %v4168_v53  ;;  %v4006_v32 = vpop.xlane.xlu2 %4005  ;;  %v4266_v53 = vsel %vm4265_vm11, %v4227_v51, %v4264_v63  ;;  %v10531_v63 = vmul.f32 0.03125, %v4009_v9  ;;  %v4232_v9 = vperm.slane %v10525_v54, %v10429_v26 }
 0x657   : > { %4163 = vmax.xlane.f32.xlu2 %v4162_v20  ;;  %v4268_v8 = vsel %vm4267_vm12, %v4230_v28, %v4266_v53  ;;  %v4012_v56 = vpop.xlane.xlu1 %4011  ;;  %v10521_v20 = vmul.f32 0.03125, %v4006_v32 }
 0x658   : > { %v4279_v59 = vsel %vm4278_vm13, %v4268_v8, -inf  ;;  %v10523_v60 = vmul.f32 0.03125, %v4012_v56 }
 0x659   : > { %v4018_v4 = vpop.xlane.xlu0 %4017  ;;  %v4235_v32 = vperm.slane %v10521_v20, %v10429_v26 }
 0x65a   : > { %v10529_v51 = vmul.f32 0.03125, %v4018_v4  ;;  %v4238_v12 = vperm.slane %v10523_v60, %v10429_v26 }
 0x65e   : > { %v4015_v3 = vpop.xlane.xlu2 %4014 }
 0x65f   : > { %4280 = vmax.xlane.f32.xlu2 %v4279_v59  ;;  %v4021_v40 = vpop.xlane.xlu1 %4020  ;;  %v10535_v59 = vmul.f32 0.03125, %v3997_v5  ;;  %v10539_v45 = vmul.f32 0.03125, %v4015_v3  ;;  %v4234_v5 = vperm.slane %v10527_v30, %v10424_v39 }
 0x660   : > { %v10545_v42 = vmul.f32 0.03125, %v4021_v40 }
 0x661   : > { %v4027_v7 = vpop.xlane.xlu0 %4026  ;;  %v4231_v52 = vperm.slane %v10535_v59, %v10424_v39  ;;  %v4236_v21 = vsel %vm4208_vm5, %v4235_v32, %v4234_v5  ;;  %v4240_v15 = vperm.slane %v10539_v45, %v10424_v39 }
 0x662   : > { %v10555_v3 = vmul.f32 0.03125, %v4027_v7  ;;  %v4243_v16 = vperm.slane %v10545_v42, %v10424_v39 }
 0x663   : > { %v4233_v36 = vsel %vm4208_vm5, %v4232_v9, %v4231_v52 }
 0x664   : > { %v4246_v32 = vperm.slane %v10555_v3, %v10424_v39  ;;  %v4269_v34 = vsel %vm4255_vm6, %v4236_v21, %v4233_v36 }
 0x666   : > { %v4024_v10 = vpop.xlane.xlu2 %4023 }
 0x667   : > { %v4030_v55 = vpop.xlane.xlu1 %4029  ;;  %v10533_v8 = vmul.f32 0.03125, %v4024_v10  ;;  %v4241_v10 = vperm.slane %v10529_v51, %v10429_v26 }
 0x668   : > { %v10541_v56 = vmul.f32 0.03125, %v4030_v55  ;;  %v4237_v55 = vperm.slane %v10531_v63, %v10424_v39 }
 0x669   : > { %v4036_v28 = vpop.xlane.xlu0 %4035  ;;  %v4244_v40 = vperm.slane %v10533_v8, %v10429_v26  ;;  %v4242_v58 = vsel %vm4208_vm5, %v4241_v10, %v4240_v15 }
 0x66a   : > { %v10547_v4 = vmul.f32 0.03125, %v4036_v28  ;;  %v4247_v7 = vperm.slane %v10541_v56, %v10429_v26  ;;  %v4239_v1 = vsel %vm4208_vm5, %v4238_v12, %v4237_v55 }
 0x66b   : > { %v4245_v11 = vsel %vm4208_vm5, %v4244_v40, %v4243_v16  ;;  %v4270_v6 = vsel %vm4257_vm7, %v4239_v1, %v4269_v34 }
 0x66c   : > { %v4248_v17 = vsel %vm4208_vm5, %v4247_v7, %v4246_v32  ;;  %v4271_v15 = vsel %vm4259_vm8, %v4242_v58, %v4270_v6 }
 0x66d   : > { %v4272_v16 = vsel %vm4261_vm9, %v4245_v11, %v4271_v15 }
 0x66e   : > { %v4033_v53 = vpop.xlane.xlu2 %4032  ;;  %v4273_v21 = vsel %vm4263_vm10, %v4248_v17, %v4272_v16 }
 0x66f   : > { %v10561_v62 = vmul.f32 0.03125, %v4033_v53  ;;  %v4250_v53 = vperm.slane %v10547_v4, %v10429_v26 }
 0x671   : > { %v4039_v28 = vpop.xlane.xlu1 %4038  ;;  %v4249_v12 = vperm.slane %v10561_v62, %v10424_v39 }
 0x672   : > { %v10579_v5 = vmul.f32 0.03125, %v4039_v28  ;;  %v10603_v28 = vpop.xlane.xlu0 %4076 }
 0x673   : > { %v4251_v9 = vsel %vm4208_vm5, %v4250_v53, %v4249_v12 }
 0x674   : > { %v4252_v10 = vperm.slane %v10579_v5, %v10424_v39  ;;  %v4274_v1 = vsel %vm4265_vm11, %v4251_v9, %v4273_v21  ;;  %v7569_v21 = vmov 0  }
 0x675   : > { %7363 = vset.pattern.permute.xlu0 %v7569_v21  ;;  %7362 = vset.pattern.permute.xlu2 %v7569_v21 }
 0x676   : > { %7361 = vset.pattern.permute.xlu1 %v7569_v21 }
 0x67a   : > { %v4042_v55 = vpop.xlane.xlu2 %4041  ;;  %v10609_v11 = vpop.xlane.xlu0 %4085 }
 0x67b   : > { %v10587_v52 = vmul.f32 0.03125, %v4042_v55 }
 0x67d   : > { %v4253_v36 = vperm.slane %v10587_v52, %v10429_v26 }
 0x67f   : > { %v4254_v34 = vsel %vm4208_vm5, %v4253_v36, %v4252_v10 }
 0x680   : > { %v4275_v40 = vsel %vm4267_vm12, %v4254_v34, %v4274_v1 }
 0x681   : > { %v4282_v6 = vsel %vm4278_vm13, %v4275_v40, -inf }
 0x682   : > { %4283 = vmax.xlane.f32.xlu0 %v4282_v6  ;;  %v10601_v58 = vpop.xlane.xlu2 %4082  ;;  %v10613_v32 = vpop.xlane.xlu0 %4094 }
 0x68a   : > { %v10605_v7 = vpop.xlane.xlu2 %4091  ;;  %v10617_v55 = vpop.xlane.xlu0 %4103 }
 0x692   : > { %v10607_v53 = vpop.xlane.xlu2 %4100  ;;  %v10621_v9 = vpop.xlane.xlu0 %4112 }
 0x69a   : > { %v10611_v17 = vpop.xlane.xlu2 %4109  ;;  %v10627_v16 = vpop.xlane.xlu0 %4121 }
 0x6a2   : > { %v10615_v12 = vpop.xlane.xlu2 %4118  ;;  %v10631_v1 = vpop.xlane.xlu0 %4130 }
 0x6aa   : > { %v10619_v15 = vpop.xlane.xlu2 %4127  ;;  %v10635_v6 = vpop.xlane.xlu0 %4139 }
 0x6ab   : > { %12048 = vst [vmem:[#allocation5_spill] sm:$0xff] %v10635_v6 }
 0x6b2   : > { %v10623_v10 = vpop.xlane.xlu2 %4136  ;;  %v10646_v13 = vpop.xlane.xlu0 %4148 }
 0x6ba   : > { %v10625_v36 = vpop.xlane.xlu2 %4145 }
 0x6bb   : > { %12045 = vst [vmem:[#allocation4_spill] sm:$0xff] %v10625_v36 }
 0x6c2   : > { %v10629_v34 = vpop.xlane.xlu2 %4154 }
 0x6c3   : > { %12046 = vst [vmem:[#allocation9_spill] sm:$0xff] %v10629_v34 }
 0x6ca   : > { %v10633_v40 = vpop.xlane.xlu2 %4163 }
 0x6cb   : > { %12047 = vst [vmem:[#allocation14_spill] sm:$0xff] %v10633_v40 }
 0x6d2   : > { %v10637_v33 = vpop.xlane.xlu2 %4280 }
 0x6d3   : > { %v4287_v44 = vperm.slane %v10637_v33, 0  ;;  %v4288_v35 = vperm.slane %v10637_v33, 1  ;;  %v4291_v19 = vperm.slane %v10637_v33, 4  ;;  %v4289_v49 = vperm.slane %v10637_v33, 2 }
 0x6d5   : > { %v4319_v27 = vsub.f32 %v10439_v18, %v4287_v44  ;;  %v4320_v46 = vsub.f32 %v10431_v31, %v4287_v44  ;;  %v4321_v21 = vsub.f32 %v10437_v29, %v4288_v35  ;;  %v4328_v40 = vsub.f32 %v10451_v22, %v4291_v19 }
 0x6d6   : > { %v4323_v34 = vsub.f32 %v10441_v41, %v4289_v49  ;;  %v4322_v18 = vsub.f32 %v10433_v61, %v4288_v35  ;;  %v11941_v44 = vperm.slane %v10637_v33, 6  ;;  %v4290_v29 = vperm.slane %v10637_v33, 3  ;;  %v10660_v41 = vpop.xlane.xlu0 %4157 }
 0x6d7   : > { %v4351_v57 = vmul.f32 1.442695, %v4319_v27  ;;  %v4353_v25 = vmul.f32 1.442695, %v4320_v46  ;;  %v4355_v37 = vmul.f32 1.442695, %v4321_v21  ;;  %v4324_v35 = vsub.f32 %v10435_v24, %v4289_v49 }
 0x6d8   : > { %v4369_v31 = vmul.f32 1.442695, %v4328_v40  ;;  %v4359_v36 = vmul.f32 1.442695, %v4323_v34  ;;  %v4357_v27 = vmul.f32 1.442695, %v4322_v18  ;;  %v4327_v49 = vsub.f32 %v10469_v47, %v4291_v19 }
 0x6d9   : > { %7366 = vpow2.f32 %v4355_v37  ;;  %v4294_v61 = vperm.slane %v10637_v33, 7  ;;  %v4361_v21 = vmul.f32 1.442695, %v4324_v35 }
 0x6da   : > { %7368 = vpow2.f32 %v4353_v25  ;;  %v4331_v25 = vsub.f32 %v10483_v48, %v11941_v44  ;;  %v10674_v48 = vpop.xlane.xlu1 %4079 }
 0x6db   : > { %7370 = vpow2.f32 %v4351_v57  ;;  %v4325_v57 = vsub.f32 %v10459_v50, %v4290_v29 }
 0x6dc   : > { %7372 = vpow2.f32 %v4369_v31  ;;  %v4375_v22 = vmul.f32 1.442695, %v4331_v25  ;;  %v4326_v31 = vsub.f32 %v10447_v14, %v4290_v29  ;;  %v4292_v25 = vperm.slane %v10637_v33, 5 }
 0x6dd   : > { %7374 = vpow2.f32 %v4359_v36  ;;  %v4363_v34 = vmul.f32 1.442695, %v4325_v57  ;;  %v4334_v36 = vsub.f32 %v10478_v38, %v4294_v61  ;;  %v4367_v57 = vmul.f32 1.442695, %v4327_v49 }
 0x6de   : > { %7376 = vpow2.f32 %v4357_v27  ;;  %v10683_v24 = vpop.xlane.xlu0 %4166  ;;  %v4365_v38 = vmul.f32 1.442695, %v4326_v31  ;;  %v4330_v14 = vsub.f32 %v10461_v0, %v4292_v25  ;;  %v4329_v29 = vsub.f32 %v10476_v2, %v4292_v25 }
 0x6df   : > { %v10653_v6 = vpop.eup %7366  ;;  %7378 = vpow2.f32 %v4375_v22  ;;  %v4381_v27 = vmul.f32 1.442695, %v4334_v36  ;;  %v4333_v2 = vsub.f32 %v10490_v23, %v4294_v61 }
 0x6e0   : > { %12049 = vst [vmem:[#allocation10_spill] sm:$0xff] %v10653_v6  ;;  %v10655_v46 = vpop.eup %7368  ;;  %4454 = vperm.xlu0 %7363, %v10653_v6   ;;  %7380 = vpow2.f32 %v4363_v34  ;;  %v4371_v31 = vmul.f32 1.442695, %v4329_v29 }
 0x6e1   : > { %v10658_v37 = vpop.eup %7370  ;;  %4451 = vperm.xlu2 %7362, %v10655_v46   ;;  %7382 = vpow2.f32 %v4361_v21  ;;  %v4373_v21 = vmul.f32 1.442695, %v4330_v14  ;;  %v4379_v6 = vmul.f32 1.442695, %v4333_v2 }
 0x6e2   : > { %4448 = vperm.xlu1 %7361, %v10658_v37   ;;  %v10670_v40 = vpop.eup %7372  ;;  %7384 = vpow2.f32 %v4381_v27  ;;  %v10695_v47 = vpop.xlane.xlu1 %4088 }
 0x6e3   : > { %12050 = vst [vmem:[#allocation15_spill] sm:$0xff] %v10670_v40  ;;  %v10672_v18 = vpop.eup %7374  ;;  %7386 = vpow2.f32 %v4367_v57 }
 0x6e4   : > { %v10677_v50 = vpop.eup %7376  ;;  %7388 = vpow2.f32 %v4365_v38 }
 0x6e5   : > { %v10687_v35 = vpop.eup %7378  ;;  %7390 = vpow2.f32 %v4373_v21 }
 0x6e6   : > { %12051 = vst [vmem:[#allocation6_spill] sm:$0xff] %v10687_v35  ;;  %v10689_v44 = vpop.eup %7380  ;;  %7392 = vpow2.f32 %v4371_v31 }
 0x6e7   : > { %12052 = vst [vmem:[#allocation11_spill] sm:$0xff] %v10689_v44  ;;  %v10692_v19 = vpop.eup %7382 }
 0x6e8   : > { %4475 = vperm.xlu0 %7363, %v10670_v40   ;;  %12053 = vst [vmem:[#allocation16_spill] sm:$0xff] %v10692_v19  ;;  %v10704_v49 = vpop.eup %7384 }
 0x6e9   : > { %4460 = vperm.xlu2 %7362, %v10672_v18   ;;  %12054 = vst [vmem:[#allocation44_spill] sm:$0xff] %v10704_v49  ;;  %v10706_v27 = vpop.eup %7386 }
 0x6ea   : > { %4457 = vperm.xlu1 %7361, %v10677_v50   ;;  %12055 = vst [vmem:[#allocation45_spill] sm:$0xff] %v10706_v27  ;;  %v10710_v57 = vpop.eup %7388  ;;  %v10718_v14 = vpop.xlane.xlu1 %4097 }
 0x6eb   : > { %12056 = vst [vmem:[#allocation46_spill] sm:$0xff] %v10710_v57  ;;  %v10722_v40 = vpop.eup %7390 }
 0x6ec   : > { %12058 = vst [vmem:[#allocation47_spill] sm:$0xff] %v10722_v40  ;;  %v10725_v21 = vpop.eup %7392 }
 0x6ed   : > { %12059 = vst [vmem:[#allocation48_spill] sm:$0xff] %v10725_v21 }
 0x6f0   : > { %4484 = vperm.xlu0 %7363, %v10687_v35  }
 0x6f1   : > { %4466 = vperm.xlu2 %7362, %v10689_v44  }
 0x6f2   : > { %4463 = vperm.xlu1 %7361, %v10692_v19   ;;  %v10735_v31 = vpop.xlane.xlu1 %4106 }
 0x6f5   : > { %v10700_v22 = vpop.xlane.xlu0 %4283 }
 0x6f6   : > { %v4296_v34 = vperm.slane %v10700_v22, 1  ;;  %v4297_v0 = vperm.slane %v10700_v22, 2  ;;  %v4299_v23 = vperm.slane %v10700_v22, 4 }
 0x6f8   : > { %v4337_v36 = vsub.f32 %v10527_v30, %v4296_v34  ;;  %4493 = vperm.xlu0 %7363, %v10704_v49   ;;  %v12057_v30 = vperm.slane %v10637_v33, 6  ;;  %v4340_v29 = vsub.f32 %v10523_v60, %v4297_v0  ;;  %v4295_v49 = vperm.slane %v10700_v22, 0 }
 0x6f9   : > { %4472 = vperm.xlu2 %7362, %v10706_v27  }
 0x6fa   : > { %v4387_v25 = vmul.f32 1.442695, %v4337_v36  ;;  %4469 = vperm.xlu1 %7361, %v10710_v57   ;;  %v4332_v38 = vsub.f32 %v10471_v43, %v12057_v30  ;;  %v4393_v61 = vmul.f32 1.442695, %v4340_v29  ;;  %v4336_v43 = vsub.f32 %v10525_v54, %v4295_v49 }
 0x6fb   : > { %v4335_v60 = vsub.f32 %v10535_v59, %v4295_v49  ;;  %v4343_v36 = vsub.f32 %v10545_v42, %v4299_v23  ;;  %v4338_v42 = vsub.f32 %v10521_v20, %v4296_v34  ;;  %v4298_v49 = vperm.slane %v10700_v22, 3 }
 0x6fc   : > { %7394 = vpow2.f32 %v4387_v25  ;;  %v4377_v35 = vmul.f32 1.442695, %v4332_v38  ;;  %v4385_v2 = vmul.f32 1.442695, %v4336_v43  ;;  %v4300_v38 = vperm.slane %v10700_v22, 5 }
 0x6fd   : > { %7396 = vpow2.f32 %v4379_v6  ;;  %v4383_v25 = vmul.f32 1.442695, %v4335_v60  ;;  %v4399_v54 = vmul.f32 1.442695, %v4343_v36  ;;  %v4339_v6 = vsub.f32 %v10531_v63, %v4297_v0  ;;  %v10753_v36 = vpop.xlane.xlu1 %4115 }
 0x6fe   : > { %7398 = vpow2.f32 %v4377_v35  ;;  %v4346_v35 = vsub.f32 %v10541_v56, %v4300_v38  ;;  %v4389_v43 = vmul.f32 1.442695, %v4338_v42  ;;  %v4302_v63 = vperm.slane %v10700_v22, 7 }
 0x6ff   : > { %7400 = vpow2.f32 %v4393_v61  ;;  %v4391_v61 = vmul.f32 1.442695, %v4339_v6  ;;  %v4342_v56 = vsub.f32 %v10529_v51, %v4298_v49  ;;  %v4341_v34 = vsub.f32 %v10539_v45, %v4298_v49 }
 0x700   : > { %7402 = vpow2.f32 %v4385_v2  ;;  %v4405_v0 = vmul.f32 1.442695, %v4346_v35  ;;  %v4345_v45 = vsub.f32 %v10555_v3, %v4300_v38  ;;  %v4301_v49 = vperm.slane %v10700_v22, 6 }
 0x701   : > { %4481 = vperm.xlu2 %7362, %v10722_v40   ;;  %7404 = vpow2.f32 %v4383_v25  ;;  %v4349_v25 = vsub.f32 %v10579_v5, %v4302_v63  ;;  %v4395_v6 = vmul.f32 1.442695, %v4341_v34  ;;  %v4344_v5 = vsub.f32 %v10533_v8, %v4299_v23 }
 0x702   : > { %v10728_v33 = vpop.eup %7394  ;;  %4478 = vperm.xlu1 %7361, %v10725_v21   ;;  %7406 = vpow2.f32 %v4399_v54  ;;  %v4397_v54 = vmul.f32 1.442695, %v4342_v56  ;;  %v4348_v38 = vsub.f32 %v10547_v4, %v4301_v49  ;;  %v4347_v8 = vsub.f32 %v10561_v62, %v4301_v49 }
 0x703   : > { %12060 = vst [vmem:[#allocation49_spill] sm:$0xff] %v10728_v33  ;;  %4502 = vperm.xlu0 %7363, %v10728_v33   ;;  %v10737_v30 = vpop.eup %7396  ;;  %7408 = vpow2.f32 %v4391_v61  ;;  %v4411_v35 = vmul.f32 1.442695, %v4349_v25  ;;  %v4350_v4 = vsub.f32 %v10587_v52, %v4302_v63 }
 0x704   : > { %12061 = vst [vmem:[#allocation50_spill] sm:$0xff] %v10737_v30  ;;  %v10740_v29 = vpop.eup %7398  ;;  %7410 = vpow2.f32 %v4389_v43  ;;  %v4403_v43 = vmul.f32 1.442695, %v4345_v45  ;;  %v4409_v23 = vmul.f32 1.442695, %v4348_v38 }
 0x705   : > { %12062 = vst [vmem:[#allocation51_spill] sm:$0xff] %v10740_v29  ;;  %v10743_v59 = vpop.eup %7400  ;;  %7412 = vpow2.f32 %v4405_v0  ;;  %v10773_v61 = vpop.xlane.xlu1 %4124  ;;  %v4401_v0 = vmul.f32 1.442695, %v4344_v5  ;;  %v4407_v25 = vmul.f32 1.442695, %v4347_v8  ;;  %v4938_v8 = vperm.slane %v10601_v58, %v10424_v39 }
 0x706   : > { %12063 = vst [vmem:[#allocation52_spill] sm:$0xff] %v10743_v59  ;;  %v10751_v60 = vpop.eup %7402  ;;  %7414 = vpow2.f32 %v4397_v54 }
 0x707   : > { %12064 = vst [vmem:[#allocation53_spill] sm:$0xff] %v10751_v60  ;;  %v10756_v2 = vpop.eup %7404  ;;  %7416 = vpow2.f32 %v4395_v6 }
 0x708   : > { %12065 = vst [vmem:[#allocation54_spill] sm:$0xff] %v10756_v2  ;;  %v10759_v20 = vpop.eup %7406  ;;  %7418 = vpow2.f32 %v4411_v35  ;;  %v4413_v35 = vmul.f32 1.442695, %v4350_v4  ;;  %v4939_v4 = vperm.slane %v10609_v11, %v10429_v26 }
 0x709   : > { %4490 = vperm.xlu2 %7362, %v10737_v30   ;;  %12066 = vst [vmem:[#allocation55_spill] sm:$0xff] %v10759_v20  ;;  %v10766_v42 = vpop.eup %7408  ;;  %7420 = vpow2.f32 %v4403_v43 }
 0x70a   : > { %4487 = vperm.xlu1 %7361, %v10740_v29   ;;  %12067 = vst [vmem:[#allocation56_spill] sm:$0xff] %v10766_v42  ;;  %7422 = vpow2.f32 %v4401_v0 }
 0x70b   : > { %4511 = vperm.xlu0 %7363, %v10743_v59   ;;  %v10768_v59 = vpop.eup %7410  ;;  %7424 = vpow2.f32 %v4409_v23  ;;  %v4942_v23 = vperm.slane %v10605_v7, %v10429_v26 }
 0x70c   : > { %12068 = vst [vmem:[#allocation57_spill] sm:$0xff] %v10768_v59  ;;  %v10771_v51 = vpop.eup %7412  ;;  %7426 = vpow2.f32 %v4407_v25  ;;  %v4936_v25 = vperm.slane %v10674_v48, %v10429_v26 }
 0x70d   : > { %12069 = vst [vmem:[#allocation58_spill] sm:$0xff] %v10771_v51  ;;  %v10780_v56 = vpop.eup %7414  ;;  %v10791_v22 = vpop.xlane.xlu1 %4133  ;;  %7428 = vpow2.f32 %v4413_v35  ;;  %v4941_v35 = vperm.slane %v10695_v47, %v10424_v39 }
 0x70e   : > { %12070 = vst [vmem:[#allocation59_spill] sm:$0xff] %v10780_v56  ;;  %v10782_v34 = vpop.eup %7416 }
 0x70f   : > { %12071 = vst [vmem:[#allocation60_spill] sm:$0xff] %v10782_v34  ;;  %v10785_v3 = vpop.eup %7418 }
 0x710   : > { %12072 = vst [vmem:[#allocation61_spill] sm:$0xff] %v10785_v3  ;;  %v10793_v54 = vpop.eup %7420 }
 0x711   : > { %4499 = vperm.xlu2 %7362, %v10751_v60   ;;  %12073 = vst [vmem:[#allocation62_spill] sm:$0xff] %v10793_v54  ;;  %v10795_v6 = vpop.eup %7422 }
 0x712   : > { %4496 = vperm.xlu1 %7361, %v10756_v2   ;;  %12074 = vst [vmem:[#allocation63_spill] sm:$0xff] %v10795_v6  ;;  %v10802_v45 = vpop.eup %7424 }
 0x713   : > { %4520 = vperm.xlu0 %7363, %v10759_v20   ;;  %12075 = vst [vmem:[#allocation64_spill] sm:$0xff] %v10802_v45  ;;  %v10804_v5 = vpop.eup %7426  ;;  %v4944_v20 = vperm.slane %v10613_v32, %v10424_v39 }
 0x714   : > { %12076 = vst [vmem:[#allocation65_spill] sm:$0xff] %v10804_v5  ;;  %v10810_v43 = vpop.eup %7428 }
 0x715   : > { %v10800_v62 = vpop.xlane.xlu1 %4142  ;;  %12077 = vst [vmem:[#allocation66_spill] sm:$0xff] %v10810_v43 }
 0x719   : > { %4508 = vperm.xlu2 %7362, %v10766_v42  }
 0x71a   : > { %4505 = vperm.xlu1 %7361, %v10768_v59  }
 0x71b   : > { %4529 = vperm.xlu0 %7363, %v10771_v51   ;;  %v4947_v51 = vperm.slane %v10607_v53, %v10424_v39 }
 0x71d   : > { %v10808_v49 = vpop.xlane.xlu1 %4151 }
 0x721   : > { %4517 = vperm.xlu2 %7362, %v10780_v56   ;;  %v4951_v56 = vperm.slane %v10611_v17, %v10429_v26 }
 0x722   : > { %4514 = vperm.xlu1 %7361, %v10782_v34  }
 0x723   : > { %4538 = vperm.xlu0 %7363, %v10785_v3   ;;  %v4940_v3 = vsel %vm4208_vm5, %v4939_v4, %v4938_v8  ;;  %v4948_v8 = vperm.slane %v10617_v55, %v10429_v26 }
 0x725   : > { %v10813_v52 = vpop.xlane.xlu1 %4160 }
 0x729   : > { %4526 = vperm.xlu2 %7362, %v10793_v54  }
 0x72a   : > { %4523 = vperm.xlu1 %7361, %v10795_v6  }
 0x72d   : > { %v10817_v0 = vpop.xlane.xlu1 %4169 }
 0x731   : > { %4535 = vperm.xlu2 %7362, %v10802_v45   ;;  %v4945_v45 = vperm.slane %v10718_v14, %v10429_v26 }
 0x732   : > { %4532 = vperm.xlu1 %7361, %v10804_v5   ;;  %v4943_v5 = vsel %vm4208_vm5, %v4942_v23, %v4941_v35  ;;  %v4950_v35 = vperm.slane %v10735_v31, %v10424_v39 }
 0x733   : > { %v4946_v4 = vsel %vm4208_vm5, %v4945_v45, %v4944_v20 }
 0x734   : > { %v4952_v59 = vsel %vm4208_vm5, %v4951_v56, %v4950_v35 }
 0x73a   : > { %4541 = vperm.xlu1 %7361, %v10810_v43   ;;  %v4935_v43 = vperm.slane %v10603_v28, %v10424_v39 }
 0x73b   : > { %v10815_v63 = vpop.permute.xlu2 %4451 }
 0x73c   : > { %v4937_v6 = vsel %vm4208_vm5, %v4936_v25, %v4935_v43  ;;  %v4949_v43 = vsel %vm4208_vm5, %v4948_v8, %v4947_v51  ;;  %v4954_v25 = vperm.slane %v10753_v36, %v10429_v26  ;;  %v4544_v57 = vperm.slane %v10815_v63, %v10429_v26 }
 0x73d   : > { %v4983_v34 = vsel %vm4255_vm6, %v4940_v3, %v4937_v6  ;;  %v4956_v3 = vperm.slane %v10615_v12, %v10424_v39  ;;  %v4953_v6 = vperm.slane %v10621_v9, %v10424_v39 }
 0x73e   : > { %v4984_v23 = vsel %vm4257_vm7, %v4943_v5, %v4983_v34  ;;  %v4957_v34 = vperm.slane %v10627_v16, %v10429_v26 }
 0x73f   : > { %v4985_v20 = vsel %vm4259_vm8, %v4946_v4, %v4984_v23  ;;  %v4955_v8 = vsel %vm4208_vm5, %v4954_v25, %v4953_v6  ;;  %v4963_v25 = vperm.slane %v10791_v22, %v10429_v26 }
 0x740   : > { %v4986_v5 = vsel %vm4261_vm9, %v4949_v43, %v4985_v20  ;;  %v4958_v56 = vsel %vm4208_vm5, %v4957_v34, %v4956_v3  ;;  %v4959_v20 = vperm.slane %v10773_v61, %v10424_v39 }
 0x741   : > { %v4987_v33 = vsel %vm4263_vm10, %v4952_v59, %v4986_v5  ;;  %v4960_v59 = vperm.slane %v10619_v15, %v10429_v26 }
 0x742   : > { %v4988_v35 = vsel %vm4265_vm11, %v4955_v8, %v4987_v33  ;;  %v4962_v33 = vperm.slane %v10631_v1, %v10424_v39 }
 0x743   : > { %v10819_v38 = vpop.permute.xlu2 %4460  ;;  %v4989_v60 = vsel %vm4267_vm12, %v4958_v56, %v4988_v35  ;;  %v12078_v35 = vld [vmem:[#allocation5_spill] sm:$0xff] }
 0x744   : > { %v4999_v4 = vsel %vm4278_vm13, %v4989_v60, -inf  ;;  %v4965_v60 = vperm.slane %v10623_v10, %v10424_v39  ;;  %v4549_v21 = vperm.slane %v10819_v38, %v10424_v39 }
 0x74b   : > { %v4467_v42 = vpop.permute.xlu2 %4466 }
 0x752   : > { %v4455_v45 = vpop.permute.xlu0 %4454 }
 0x753   : > { %v4473_v2 = vpop.permute.xlu2 %4472  ;;  %v4546_v34 = vperm.slane %v4455_v45, %v10424_v39  ;;  %v4552_v45 = vperm.slane %v4467_v42, %v10424_v39 }
 0x754   : > { %v4449_v54 = vpop.permute.xlu1 %4448 }
 0x755   : > { %v4543_v5 = vperm.slane %v4449_v54, %v10424_v39 }
 0x757   : > { %v4545_v19 = vsel %vm4208_vm5, %v4544_v57, %v4543_v5 }
 0x75a   : > { %v4476_v30 = vpop.permute.xlu0 %4475 }
 0x75b   : > { %v4482_v29 = vpop.permute.xlu2 %4481  ;;  %v4556_v63 = vperm.slane %v4476_v30, %v10429_v26  ;;  %v4555_v30 = vperm.slane %v4473_v2, %v10424_v39 }
 0x75c   : > { %v4458_v51 = vpop.permute.xlu1 %4457 }
 0x75d   : > { %v4547_v3 = vperm.slane %v4458_v51, %v10429_v26  ;;  %v4964_v51 = vsel %vm4208_vm5, %v4963_v25, %v4962_v33  ;;  %v12079_v33 = vld [vmem:[#allocation4_spill] sm:$0xff] }
 0x75e   : > { %v4969_v44 = vperm.slane %v12079_v33, %v10429_v26 }
 0x75f   : > { %v4548_v54 = vsel %vm4208_vm5, %v4547_v3, %v4546_v34  ;;  %v4971_v34 = vperm.slane %v10646_v13, %v10424_v39 }
 0x760   : > { %v4591_v42 = vsel %vm4255_vm6, %v4548_v54, %v4545_v19 }
 0x762   : > { %v4485_v43 = vpop.permute.xlu0 %4484 }
 0x763   : > { %v4491_v27 = vpop.permute.xlu2 %4490 }
 0x764   : > { %5000 = vmax.xlane.f32.xlu1 %v4999_v4  ;;  %v4464_v23 = vpop.permute.xlu1 %4463  ;;  %v4966_v4 = vperm.slane %v12078_v35, %v10429_v26 }
 0x765   : > { %v4550_v6 = vperm.slane %v4464_v23, %v10429_v26  ;;  %v4961_v23 = vsel %vm4208_vm5, %v4960_v59, %v4959_v20 }
 0x766   : > { %v4990_v20 = vsel %vm4255_vm6, %v4964_v51, %v4961_v23 }
 0x767   : > { %v4551_v25 = vsel %vm4208_vm5, %v4550_v6, %v4549_v21  ;;  %v4972_v21 = vperm.slane %v10808_v49, %v10429_v26  ;;  %v4559_v6 = vperm.slane %v4482_v29, %v10429_v26 }
 0x768   : > { %v4592_v57 = vsel %vm4257_vm7, %v4551_v25, %v4591_v42  ;;  %v4557_v25 = vsel %vm4208_vm5, %v4556_v63, %v4555_v30  ;;  %v4980_v30 = vperm.slane %v10683_v24, %v10424_v39 }
 0x76a   : > { %v4494_v3 = vpop.permute.xlu0 %4493 }
 0x76c   : > { %v4470_v40 = vpop.permute.xlu1 %4469 }
 0x76d   : > { %v4553_v8 = vperm.slane %v4470_v40, %v10429_v26  ;;  %v4967_v40 = vsel %vm4208_vm5, %v4966_v4, %v4965_v60  ;;  %v4968_v60 = vperm.slane %v10800_v62, %v10424_v39  ;;  %v4565_v4 = vperm.slane %v4494_v3, %v10429_v26 }
 0x76e   : > { %v4991_v5 = vsel %vm4257_vm7, %v4967_v40, %v4990_v20  ;;  %v4561_v40 = vperm.slane %v4485_v43, %v10424_v39  ;;  %v4564_v20 = vperm.slane %v4491_v27, %v10424_v39  ;;  %v4977_v3 = vperm.slane %v10813_v52, %v10424_v39 }
 0x76f   : > { %v4554_v38 = vsel %vm4208_vm5, %v4553_v8, %v4552_v45  ;;  %v4970_v8 = vsel %vm4208_vm5, %v4969_v44, %v4968_v60  ;;  %v12081_v45 = vld [vmem:[#allocation14_spill] sm:$0xff]  ;;  %v4975_v44 = vperm.slane %v10660_v41, %v10429_v26  ;;  %v4500_v60 = vpop.permute.xlu2 %4499 }
 0x770   : > { %v4593_v19 = vsel %vm4259_vm8, %v4554_v38, %v4592_v57  ;;  %v4978_v54 = vperm.slane %v12081_v45, %v10429_v26  ;;  %v4973_v38 = vsel %vm4208_vm5, %v4972_v21, %v4971_v34  ;;  %v4981_v21 = vperm.slane %v10817_v0, %v10429_v26 }
 0x771   : > { %v4594_v42 = vsel %vm4261_vm9, %v4557_v25, %v4593_v19  ;;  %v4566_v57 = vsel %vm4208_vm5, %v4565_v4, %v4564_v20 }
 0x772   : > { %v4982_v4 = vsel %vm4208_vm5, %v4981_v21, %v4980_v30 }
 0x774   : > { %v4479_v56 = vpop.permute.xlu1 %4478 }
 0x775   : > { %v4558_v59 = vperm.slane %v4479_v56, %v10424_v39  ;;  %v12080_v56 = vld [vmem:[#allocation9_spill] sm:$0xff]  ;;  %v4503_v19 = vpop.permute.xlu0 %4502 }
 0x776   : > { %v4974_v51 = vperm.slane %v12080_v56, %v10424_v39  ;;  %v4570_v21 = vperm.slane %v4503_v19, %v10424_v39 }
 0x777   : > { %v4560_v29 = vsel %vm4208_vm5, %v4559_v6, %v4558_v59  ;;  %v4992_v59 = vsel %vm4259_vm8, %v4970_v8, %v4991_v5  ;;  %v4979_v5 = vsel %vm4208_vm5, %v4978_v54, %v4977_v3 }
 0x778   : > { %v4595_v43 = vsel %vm4263_vm10, %v4560_v29, %v4594_v42  ;;  %v4976_v6 = vsel %vm4208_vm5, %v4975_v44, %v4974_v51  ;;  %v4993_v29 = vsel %vm4261_vm9, %v4973_v38, %v4992_v59 }
 0x779   : > { %v4994_v51 = vsel %vm4263_vm10, %v4976_v6, %v4993_v29 }
 0x77a   : > { %v4995_v25 = vsel %vm4265_vm11, %v4979_v5, %v4994_v51 }
 0x77c   : > { %v4488_v23 = vpop.permute.xlu1 %4487 }
 0x77d   : > { %v4562_v2 = vperm.slane %v4488_v23, %v10429_v26  ;;  %v4512_v44 = vpop.permute.xlu0 %4511 }
 0x77e   : > { %v4574_v30 = vperm.slane %v4512_v44, %v10429_v26 }
 0x77f   : > { %v4563_v63 = vsel %vm4208_vm5, %v4562_v2, %v4561_v40  ;;  %v4996_v40 = vsel %vm4267_vm12, %v4982_v4, %v4995_v25  ;;  %v4509_v2 = vpop.permute.xlu2 %4508 }
 0x780   : > { %v4596_v27 = vsel %vm4265_vm11, %v4563_v63, %v4595_v43  ;;  %v5002_v54 = vsel %vm4278_vm13, %v4996_v40, -inf  ;;  %v4573_v25 = vperm.slane %v4509_v2, %v10424_v39 }
 0x781   : > { %v4597_v34 = vsel %vm4267_vm12, %v4566_v57, %v4596_v27  ;;  %v4568_v27 = vperm.slane %v4500_v60, %v10429_v26 }
 0x782   : > { %v4607_v8 = vsel %vm4278_vm13, %v4597_v34, 0.0 }
 0x783   : > { %4608 = vadd.xlane.f32.xlu2 %v4607_v8 }
 0x784   : > { %v4497_v23 = vpop.permute.xlu1 %4496 }
 0x785   : > { %v4521_v63 = vpop.permute.xlu0 %4520  ;;  %v4567_v57 = vperm.slane %v4497_v23, %v10424_v39 }
 0x786   : > { %v4579_v19 = vperm.slane %v4521_v63, %v10424_v39 }
 0x787   : > { %v4518_v42 = vpop.permute.xlu2 %4517  ;;  %v4569_v4 = vsel %vm4208_vm5, %v4568_v27, %v4567_v57 }
 0x788   : > { %v4577_v51 = vperm.slane %v4518_v42, %v10429_v26 }
 0x78b   : > { %5003 = vmax.xlane.f32.xlu2 %v5002_v54  ;;  %v4575_v54 = vsel %vm4208_vm5, %v4574_v30, %v4573_v25 }
 0x78c   : > { %v4506_v20 = vpop.permute.xlu1 %4505 }
 0x78d   : > { %v4571_v43 = vperm.slane %v4506_v20, %v10429_v26  ;;  %v4530_v6 = vpop.permute.xlu0 %4529 }
 0x78f   : > { %v4527_v59 = vpop.permute.xlu2 %4526  ;;  %v4572_v34 = vsel %vm4208_vm5, %v4571_v43, %v4570_v21 }
 0x790   : > { %v4598_v23 = vsel %vm4255_vm6, %v4572_v34, %v4569_v4  ;;  %v4582_v43 = vperm.slane %v4527_v59, %v10424_v39 }
 0x791   : > { %v4599_v42 = vsel %vm4257_vm7, %v4575_v54, %v4598_v23 }
 0x794   : > { %v4515_v3 = vpop.permute.xlu1 %4514 }
 0x795   : > { %v4576_v5 = vperm.slane %v4515_v3, %v10424_v39  ;;  %v4583_v3 = vperm.slane %v4530_v6, %v10429_v26  ;;  %v4539_v63 = vpop.permute.xlu0 %4538 }
 0x797   : > { %v4536_v60 = vpop.permute.xlu2 %4535  ;;  %v4578_v40 = vsel %vm4208_vm5, %v4577_v51, %v4576_v5  ;;  %v4584_v34 = vsel %vm4208_vm5, %v4583_v3, %v4582_v43  ;;  %v4588_v5 = vperm.slane %v4539_v63, %v10424_v39 }
 0x798   : > { %v4600_v2 = vsel %vm4259_vm8, %v4578_v40, %v4599_v42 }
 0x79c   : > { %v4524_v38 = vpop.permute.xlu1 %4523 }
 0x79d   : > { %v4580_v8 = vperm.slane %v4524_v38, %v10429_v26  ;;  %v4586_v38 = vperm.slane %v4536_v60, %v10429_v26 }
 0x79f   : > { %v4581_v44 = vsel %vm4208_vm5, %v4580_v8, %v4579_v19 }
 0x7a0   : > { %v4601_v21 = vsel %vm4261_vm9, %v4581_v44, %v4600_v2 }
 0x7a1   : > { %v4602_v30 = vsel %vm4263_vm10, %v4584_v34, %v4601_v21 }
 0x7a4   : > { %v4533_v29 = vpop.permute.xlu1 %4532 }
 0x7a5   : > { %v4585_v20 = vperm.slane %v4533_v29, %v10424_v39 }
 0x7a7   : > { %v4587_v57 = vsel %vm4208_vm5, %v4586_v38, %v4585_v20 }
 0x7a8   : > { %v4603_v29 = vsel %vm4265_vm11, %v4587_v57, %v4602_v30 }
 0x7ac   : > { %v4542_v27 = vpop.permute.xlu1 %4541 }
 0x7ad   : > { %v4589_v6 = vperm.slane %v4542_v27, %v10429_v26 }
 0x7af   : > { %v4590_v8 = vsel %vm4208_vm5, %v4589_v6, %v4588_v5 }
 0x7b0   : > { %v4604_v51 = vsel %vm4267_vm12, %v4590_v8, %v4603_v29 }
 0x7b1   : > { %v4610_v59 = vsel %vm4278_vm13, %v4604_v51, 0.0 }
 0x7b2   : > { %4611 = vadd.xlane.f32.xlu0 %v4610_v59 }
 0x7d7   : > { %v10983_v4 = vpop.xlane.xlu1 %5000 }
 0x7d8   : > { %v5007_v25 = vperm.slane %v10983_v4, 0  ;;  %v5008_v19 = vperm.slane %v10983_v4, 1  ;;  %v5009_v54 = vperm.slane %v10983_v4, 2  ;;  %v5010_v44 = vperm.slane %v10983_v4, 3 }
 0x7d9   : > { %v5012_v5 = vperm.slane %v10983_v4, 5  ;;  %v5013_v8 = vperm.slane %v10983_v4, 6 }
 0x7da   : > { %v5039_v23 = vsub.f32 %v10603_v28, %v5007_v25  ;;  %v5040_v60 = vsub.f32 %v10674_v48, %v5007_v25  ;;  %v5041_v40 = vsub.f32 %v10601_v58, %v5008_v19  ;;  %v5042_v38 = vsub.f32 %v10609_v11, %v5008_v19 }
 0x7db   : > { %v5043_v2 = vsub.f32 %v10695_v47, %v5009_v54  ;;  %v5045_v63 = vsub.f32 %v10613_v32, %v5010_v44  ;;  %v5011_v58 = vperm.slane %v10983_v4, 4  ;;  %v5044_v11 = vsub.f32 %v10605_v7, %v5009_v54 }
 0x7dc   : > { %v5071_v20 = vmul.f32 1.442695, %v5039_v23  ;;  %v5073_v3 = vmul.f32 1.442695, %v5040_v60  ;;  %v5075_v42 = vmul.f32 1.442695, %v5041_v40  ;;  %v5046_v32 = vsub.f32 %v10718_v14, %v5010_v44 }
 0x7dd   : > { %v5077_v28 = vmul.f32 1.442695, %v5042_v38  ;;  %v5079_v48 = vmul.f32 1.442695, %v5043_v2  ;;  %v5083_v21 = vmul.f32 1.442695, %v5045_v63  ;;  %v5048_v47 = vsub.f32 %v10617_v55, %v5011_v58 }
 0x7de   : > { %7430 = vpow2.f32 %v5071_v20  ;;  %v5081_v34 = vmul.f32 1.442695, %v5044_v11  ;;  %v5085_v6 = vmul.f32 1.442695, %v5046_v32  ;;  %v5047_v51 = vsub.f32 %v10607_v53, %v5011_v58 }
 0x7df   : > { %7432 = vpow2.f32 %v5073_v3  ;;  %v5089_v7 = vmul.f32 1.442695, %v5048_v47  ;;  %v5049_v55 = vsub.f32 %v10735_v31, %v5012_v5  ;;  %v5051_v59 = vsub.f32 %v10621_v9, %v5013_v8 }
 0x7e0   : > { %7434 = vpow2.f32 %v5075_v42  ;;  %v5087_v25 = vmul.f32 1.442695, %v5047_v51  ;;  %v5014_v60 = vperm.slane %v10983_v4, 7  ;;  %v5050_v44 = vsub.f32 %v10611_v17, %v5012_v5 }
 0x7e1   : > { %7436 = vpow2.f32 %v5077_v28  ;;  %v5091_v19 = vmul.f32 1.442695, %v5049_v55  ;;  %v5095_v40 = vmul.f32 1.442695, %v5051_v59  ;;  %v5052_v9 = vsub.f32 %v10753_v36, %v5013_v8 }
 0x7e2   : > { %7438 = vpow2.f32 %v5079_v48  ;;  %v5054_v4 = vsub.f32 %v10627_v16, %v5014_v60  ;;  %v5093_v20 = vmul.f32 1.442695, %v5050_v44  ;;  %v5053_v16 = vsub.f32 %v10615_v12, %v5014_v60 }
 0x7e3   : > { %7440 = vpow2.f32 %v5083_v21  ;;  %v5097_v3 = vmul.f32 1.442695, %v5052_v9 }
 0x7e4   : > { %v10995_v43 = vpop.eup %7430  ;;  %7442 = vpow2.f32 %v5081_v34  ;;  %v5101_v38 = vmul.f32 1.442695, %v5054_v4  ;;  %v5099_v21 = vmul.f32 1.442695, %v5053_v16 }
 0x7e5   : > { %v10998_v57 = vpop.eup %7432  ;;  %5168 = vperm.xlu0 %7363, %v10995_v43   ;;  %7444 = vpow2.f32 %v5085_v6 }
 0x7e6   : > { %v11001_v27 = vpop.eup %7434  ;;  %5171 = vperm.xlu1 %7361, %v10998_v57   ;;  %7446 = vpow2.f32 %v5089_v7 }
 0x7e7   : > { %5174 = vperm.xlu2 %7362, %v11001_v27   ;;  %v11009_v30 = vpop.eup %7436  ;;  %7448 = vpow2.f32 %v5087_v25 }
 0x7e8   : > { %v11012_v29 = vpop.eup %7438  ;;  %7450 = vpow2.f32 %v5091_v19 }
 0x7e9   : > { %v11015_v14 = vpop.eup %7440  ;;  %7452 = vpow2.f32 %v5095_v40 }
 0x7ea   : > { %v11022_v23 = vpop.eup %7442  ;;  %7454 = vpow2.f32 %v5093_v20 }
 0x7eb   : > { %v11027_v53 = vpop.eup %7444  ;;  %7456 = vpow2.f32 %v5097_v3 }
 0x7ec   : > { %v11030_v31 = vpop.eup %7446  ;;  %7458 = vpow2.f32 %v5101_v38 }
 0x7ed   : > { %5177 = vperm.xlu0 %7363, %v11009_v30   ;;  %v11037_v42 = vpop.eup %7448 }
 0x7ee   : > { %5180 = vperm.xlu1 %7361, %v11012_v29   ;;  %v11041_v63 = vpop.eup %7450 }
 0x7ef   : > { %5186 = vperm.xlu2 %7362, %v11015_v14   ;;  %v11046_v28 = vpop.eup %7452 }
 0x7f0   : > { %v11053_v32 = vpop.eup %7454 }
 0x7f1   : > { %v11056_v5 = vpop.eup %7456 }
 0x7f2   : > { %v11059_v12 = vpop.eup %7458 }
 0x7f5   : > { %5183 = vperm.xlu0 %7363, %v11022_v23  }
 0x7f6   : > { %v11025_v54 = vpop.xlane.xlu2 %4608  ;;  %5189 = vperm.xlu1 %7361, %v11027_v53  }
 0x7f7   : > { %5195 = vperm.xlu2 %7362, %v11030_v31  }
 0x7fd   : > { %5192 = vperm.xlu0 %7363, %v11037_v42  }
 0x7fe   : > { %v11039_v2 = vpop.xlane.xlu2 %5003  ;;  %5198 = vperm.xlu1 %7361, %v11041_v63  }
 0x7ff   : > { %v5015_v17 = vperm.slane %v11039_v2, 0  ;;  %v5016_v36 = vperm.slane %v11039_v2, 1  ;;  %5204 = vperm.xlu2 %7362, %v11046_v28   ;;  %v5017_v47 = vperm.slane %v11039_v2, 2  ;;  %v5018_v51 = vperm.slane %v11039_v2, 3 }
 0x800   : > { %v5019_v25 = vperm.slane %v11039_v2, 4  ;;  %v5020_v4 = vperm.slane %v11039_v2, 5 }
 0x801   : > { %v5055_v48 = vsub.f32 %v10773_v61, %v5015_v17  ;;  %v5057_v58 = vsub.f32 %v10631_v1, %v5016_v36  ;;  %v5056_v61 = vsub.f32 %v10619_v15, %v5015_v17  ;;  %v5058_v1 = vsub.f32 %v10791_v22, %v5016_v36 }
 0x802   : > { %v5060_v6 = vsub.f32 %v12078_v35, %v5017_v47  ;;  %v5059_v22 = vsub.f32 %v10623_v10, %v5017_v47  ;;  %v5061_v35 = vsub.f32 %v10800_v62, %v5018_v51  ;;  %v5063_v60 = vsub.f32 %v10646_v13, %v5019_v25 }
 0x803   : > { %v5103_v11 = vmul.f32 1.442695, %v5055_v48  ;;  %v5107_v34 = vmul.f32 1.442695, %v5057_v58  ;;  %v5105_v8 = vmul.f32 1.442695, %v5056_v61  ;;  %v5062_v62 = vsub.f32 %v12079_v33, %v5018_v51 }
 0x804   : > { %v5109_v55 = vmul.f32 1.442695, %v5058_v1  ;;  %v5113_v15 = vmul.f32 1.442695, %v5060_v6  ;;  %v5111_v40 = vmul.f32 1.442695, %v5059_v22  ;;  %v5064_v13 = vsub.f32 %v10808_v49, %v5019_v25 }
 0x805   : > { %7460 = vpow2.f32 %v5103_v11  ;;  %5201 = vperm.xlu0 %7363, %v11053_v32   ;;  %v5115_v44 = vmul.f32 1.442695, %v5061_v35  ;;  %v5119_v20 = vmul.f32 1.442695, %v5063_v60  ;;  %v5066_v38 = vsub.f32 %v10660_v41, %v5020_v4 }
 0x806   : > { %7462 = vpow2.f32 %v5099_v21  ;;  %5207 = vperm.xlu1 %7361, %v11056_v5   ;;  %v5117_v17 = vmul.f32 1.442695, %v5062_v62  ;;  %v5021_v36 = vperm.slane %v11039_v2, 6  ;;  %v5121_v16 = vmul.f32 1.442695, %v5064_v13 }
 0x807   : > { %7464 = vpow2.f32 %v5107_v34  ;;  %5213 = vperm.xlu2 %7362, %v11059_v12   ;;  %v5125_v58 = vmul.f32 1.442695, %v5066_v38  ;;  %v5065_v49 = vsub.f32 %v12080_v56, %v5020_v4  ;;  %v4615_v11 = vperm.slane %v11025_v54, 0 }
 0x808   : > { %7466 = vpow2.f32 %v5105_v8  ;;  %v5067_v41 = vsub.f32 %v10813_v52, %v5021_v36  ;;  %v5022_v34 = vperm.slane %v11039_v2, 7  ;;  %v5068_v52 = vsub.f32 %v12081_v45, %v5021_v36 }
 0x809   : > { %7468 = vpow2.f32 %v5109_v55  ;;  %v5123_v47 = vmul.f32 1.442695, %v5065_v49  ;;  %vm4652_vm15 = vweird.f32 %v4615_v11 }
 0x80a   : > { %7470 = vpow2.f32 %v5113_v15  ;;  %v5127_v61 = vmul.f32 1.442695, %v5067_v41  ;;  %v5069_v8 = vsub.f32 %v10683_v24, %v5022_v34  ;;  %v5129_v51 = vmul.f32 1.442695, %v5068_v52 }
 0x80b   : > { %v11066_v7 = vpop.eup %7460  ;;  %7472 = vpow2.f32 %v5111_v40  ;;  %v5070_v45 = vsub.f32 %v10817_v0, %v5022_v34  ;;  %v4656_v0 = vand.u32 2147483647, %v4615_v11 }
 0x80c   : > { %v11069_v59 = vpop.eup %7462  ;;  %7474 = vpow2.f32 %v5115_v44  ;;  %v5131_v55 = vmul.f32 1.442695, %v5069_v8 }
 0x80d   : > { %v11072_v19 = vpop.eup %7464  ;;  %5210 = vperm.xlu0 %7363, %v11069_v59   ;;  %7476 = vpow2.f32 %v5119_v20  ;;  %v5133_v35 = vmul.f32 1.442695, %v5070_v45  ;;  %v4658_v20 = vand.u32 2147483648, %v4615_v11  ;;  %vm4657_vm2 = vcmp.eq.f32.partialorder %v4656_v0, 8.507059e+37 }
 0x80e   : > { %5216 = vperm.xlu1 %7361, %v11066_v7   ;;  %v11080_v9 = vpop.eup %7466  ;;  %7478 = vpow2.f32 %v5117_v17 }
 0x80f   : > { %5222 = vperm.xlu2 %7362, %v11072_v19   ;;  %v11083_v3 = vpop.eup %7468  ;;  %7480 = vpow2.f32 %v5121_v16  ;;  %v4659_v38 = vor.u32 1.1754944e-38, %v4658_v20 }
 0x810   : > { %v11086_v10 = vpop.eup %7470  ;;  %7482 = vpow2.f32 %v5125_v58 }
 0x811   : > { %12082 = vst [vmem:[#allocation5_spill] sm:$0xff] %v11086_v10  ;;  %v11094_v48 = vpop.eup %7472  ;;  %7484 = vrcp.f32 %v4615_v11 }
 0x812   : > { %v11096_v21 = vpop.eup %7474  ;;  %7486 = vpow2.f32 %v5123_v47 }
 0x813   : > { %12083 = vst [vmem:[#allocation4_spill] sm:$0xff] %v11096_v21  ;;  %v11099_v33 = vpop.eup %7476  ;;  %7488 = vpow2.f32 %v5127_v61 }
 0x814   : > { %12084 = vst [vmem:[#allocation9_spill] sm:$0xff] %v11099_v33  ;;  %v11107_v1 = vpop.eup %7478  ;;  %7490 = vpow2.f32 %v5129_v51 }
 0x815   : > { %5219 = vperm.xlu0 %7363, %v11080_v9   ;;  %12085 = vst [vmem:[#allocation14_spill] sm:$0xff] %v11107_v1  ;;  %v11109_v6 = vpop.eup %7480  ;;  %7492 = vpow2.f32 %v5131_v55 }
 0x816   : > { %5225 = vperm.xlu1 %7361, %v11083_v3   ;;  %12086 = vst [vmem:[#allocation67_spill] sm:$0xff] %v11109_v6  ;;  %v11112_v56 = vpop.eup %7482  ;;  %7494 = vpow2.f32 %v5133_v35 }
 0x817   : > { %5231 = vperm.xlu2 %7362, %v11086_v10   ;;  %12087 = vst [vmem:[#allocation68_spill] sm:$0xff] %v11112_v56  ;;  %v7485_v2 = vpop.eup %7484 }
 0x818   : > { %v11118_v25 = vpop.eup %7486  ;;  %v4648_v22 = vmul.f32 %v7485_v2, %v4615_v11  ;;  %vm4653_vm14 = vweird.f32 %v7485_v2 }
 0x819   : > { %12088 = vst [vmem:[#allocation69_spill] sm:$0xff] %v11118_v25  ;;  %v11120_v15 = vpop.eup %7488  ;;  %vm4654_vm1 = vmor %vm4652_vm15, %vm4653_vm14 }
 0x81a   : > { %12089 = vst [vmem:[#allocation70_spill] sm:$0xff] %v11120_v15  ;;  %v4649_v24 = vsub.f32 1.0, %v4648_v22  ;;  %v11125_v60 = vpop.eup %7490 }
 0x81b   : > { %12090 = vst [vmem:[#allocation71_spill] sm:$0xff] %v11125_v60  ;;  %v11127_v40 = vpop.eup %7492 }
 0x81c   : > { %12091 = vst [vmem:[#allocation72_spill] sm:$0xff] %v11127_v40  ;;  %v4650_v44 = vmul.f32 %v7485_v2, %v4649_v24  ;;  %v11131_v62 = vpop.eup %7494 }
 0x81d   : > { %5228 = vperm.xlu0 %7363, %v11094_v48   ;;  %12092 = vst [vmem:[#allocation73_spill] sm:$0xff] %v11131_v62 }
 0x81e   : > { %5234 = vperm.xlu1 %7361, %v11096_v21   ;;  %v4651_v4 = vadd.f32 %v7485_v2, %v4650_v44 }
 0x81f   : > { %5240 = vperm.xlu2 %7362, %v11099_v33  }
 0x820   : > { %v4655_v13 = vsel %vm4654_vm1, %v7485_v2, %v4651_v4 }
 0x821   : > { %v11134_v17 = vsel %vm4657_vm2, %v4659_v38, %v4655_v13 }
 0x822   : > { %v4661_v36 = vmul.f32 %v10658_v37, %v11134_v17 }
 0x825   : > { %5237 = vperm.xlu0 %7363, %v11107_v1   ;;  %v11138_v16 = vpop.xlane.xlu0 %4611 }
 0x826   : > { %5243 = vperm.xlu1 %7361, %v11109_v6  }
 0x827   : > { %5249 = vperm.xlu2 %7362, %v11112_v56  }
 0x82d   : > { %5246 = vperm.xlu0 %7363, %v11118_v25  }
 0x82e   : > { %5252 = vperm.xlu1 %7361, %v11120_v15  }
 0x835   : > { %5255 = vperm.xlu0 %7363, %v11125_v60  }
 0x836   : > { %5258 = vperm.xlu1 %7361, %v11127_v40  }
 0x83d   : > { %5261 = vperm.xlu0 %7363, %v11131_v62  }
 0x841   : > { %v5175_v58 = vpop.permute.xlu2 %5174 }
 0x842   : > { %v5266_v37 = vperm.slane %v5175_v58, %v10424_v39 }
 0x845   : > { %5625 = vperm.xlu0 %7363, %v4661_v36  }
 0x849   : > { %v5187_v11 = vpop.permute.xlu2 %5186 }
 0x84a   : > { %v5272_v36 = vperm.slane %v5187_v11, %v10424_v39 }
 0x851   : > { %v5196_v8 = vpop.permute.xlu2 %5195 }
 0x857   : > { %v5169_v49 = vpop.permute.xlu0 %5168 }
 0x858   : > { %v5172_v41 = vpop.permute.xlu1 %5171  ;;  %v5263_v35 = vperm.slane %v5169_v49, %v10424_v39  ;;  %v5276_v49 = vperm.slane %v5196_v8, %v10429_v26 }
 0x859   : > { %v5205_v22 = vpop.permute.xlu2 %5204  ;;  %v5264_v24 = vperm.slane %v5172_v41, %v10429_v26 }
 0x85f   : > { %v5178_v47 = vpop.permute.xlu0 %5177 }
 0x860   : > { %v5181_v34 = vpop.permute.xlu1 %5180  ;;  %v5267_v55 = vperm.slane %v5178_v47, %v10429_v26  ;;  %v5265_v47 = vsel %vm4208_vm5, %v5264_v24, %v5263_v35 }
 0x861   : > { %v5269_v44 = vperm.slane %v5181_v34, %v10424_v39  ;;  %v5214_v24 = vpop.permute.xlu2 %5213 }
 0x862   : > { %v5268_v4 = vsel %vm4208_vm5, %v5267_v55, %v5266_v37  ;;  %v5281_v37 = vperm.slane %v5205_v22, %v10424_v39 }
 0x863   : > { %v5311_v34 = vsel %vm4255_vm6, %v5268_v4, %v5265_v47 }
 0x867   : > { %v5184_v61 = vpop.permute.xlu0 %5183 }
 0x868   : > { %v5190_v52 = vpop.permute.xlu1 %5189  ;;  %v5270_v45 = vperm.slane %v5184_v61, %v10429_v26 }
 0x869   : > { %v5273_v20 = vperm.slane %v5190_v52, %v10429_v26 }
 0x86a   : > { %v5271_v0 = vsel %vm4208_vm5, %v5270_v45, %v5269_v44 }
 0x86b   : > { %v5274_v61 = vsel %vm4208_vm5, %v5273_v20, %v5272_v36  ;;  %v5312_v52 = vsel %vm4257_vm7, %v5271_v0, %v5311_v34 }
 0x86c   : > { %v5313_v35 = vsel %vm4259_vm8, %v5274_v61, %v5312_v52 }
 0x86f   : > { %v5193_v2 = vpop.permute.xlu0 %5192 }
 0x870   : > { %v5199_v51 = vpop.permute.xlu1 %5198  ;;  %v5275_v13 = vperm.slane %v5193_v2, %v10424_v39 }
 0x871   : > { %v5278_v55 = vperm.slane %v5199_v51, %v10424_v39  ;;  %v5285_v51 = vperm.slane %v5214_v24, %v10429_v26 }
 0x872   : > { %v5277_v2 = vsel %vm4208_vm5, %v5276_v49, %v5275_v13  ;;  %v5223_v49 = vpop.permute.xlu2 %5222 }
 0x873   : > { %v5314_v8 = vsel %vm4261_vm9, %v5277_v2, %v5313_v35 }
 0x877   : > { %v5202_v38 = vpop.permute.xlu0 %5201 }
 0x878   : > { %v5208_v58 = vpop.permute.xlu1 %5207  ;;  %v5279_v41 = vperm.slane %v5202_v38, %v10429_v26 }
 0x879   : > { %v5282_v45 = vperm.slane %v5208_v58, %v10429_v26 }
 0x87a   : > { %v5280_v11 = vsel %vm4208_vm5, %v5279_v41, %v5278_v55  ;;  %v5232_v52 = vpop.permute.xlu2 %5231  ;;  %v6008_v55 = vld [vmem:[%s11868_s3 + $0x8] sm:$0xff] }
 0x87b   : > { %v5283_v44 = vsel %vm4208_vm5, %v5282_v45, %v5281_v37  ;;  %v5315_v20 = vsel %vm4263_vm10, %v5280_v11, %v5314_v8  ;;  %6394 = vmatpush.msrb.mxu2 %v6008_v55  ;;  %v6007_v45 = vld [vmem:[%s11868_s3] sm:$0xff]  ;;  %v4662_v37 = vmul.f32 %v10655_v46, %v11134_v17 }
 0x87c   : > { %v5316_v36 = vsel %vm4265_vm11, %v5283_v44, %v5315_v20 }
 0x87d   : > { %6395 = vmatpush.msrb.mxu2 %v6007_v45 }
 0x87f   : > { %v5211_v4 = vpop.permute.xlu0 %5210 }
 0x880   : > { %v5217_v0 = vpop.permute.xlu1 %5216  ;;  %v5284_v13 = vperm.slane %v5211_v4, %v10424_v39 }
 0x882   : > { %v5286_v38 = vsel %vm4208_vm5, %v5285_v51, %v5284_v13  ;;  %v5241_v24 = vpop.permute.xlu2 %5240  ;;  %v5290_v51 = vperm.slane %v5223_v49, %v10424_v39  ;;  %v5287_v13 = vperm.slane %v5217_v0, %v10424_v39 }
 0x883   : > { %v5317_v22 = vsel %vm4267_vm12, %v5286_v38, %v5316_v36  ;;  %v5294_v36 = vperm.slane %v5232_v52, %v10429_v26  ;;  %v5299_v55 = vperm.slane %v5241_v24, %v10424_v39 }
 0x884   : > { %v5327_v47 = vsel %vm4278_vm13, %v5317_v22, 0.0 }
 0x885   : > { %5328 = vadd.xlane.f32.xlu2 %v5327_v47 }
 0x887   : > { %v5220_v58 = vpop.permute.xlu0 %5219 }
 0x888   : > { %v5226_v41 = vpop.permute.xlu1 %5225  ;;  %v5288_v4 = vperm.slane %v5220_v58, %v10429_v26 }
 0x889   : > { %v5291_v44 = vperm.slane %v5226_v41, %v10429_v26 }
 0x88a   : > { %v5289_v17 = vsel %vm4208_vm5, %v5288_v4, %v5287_v13  ;;  %v5250_v41 = vpop.permute.xlu2 %5249 }
 0x88b   : > { %v5292_v46 = vsel %vm4208_vm5, %v5291_v44, %v5290_v51  ;;  %v5303_v45 = vperm.slane %v5250_v41, %v10429_v26  ;;  %v12093_v41 = vld [vmem:[#allocation17_spill] sm:$0xff] }
 0x88c   : > { %v5318_v52 = vsel %vm4255_vm6, %v5292_v46, %v5289_v17 }
 0x88f   : > { %v5229_v34 = vpop.permute.xlu0 %5228 }
 0x890   : > { %v5235_v61 = vpop.permute.xlu1 %5234  ;;  %v5293_v20 = vperm.slane %v5229_v34, %v10424_v39 }
 0x891   : > { %v5296_v47 = vperm.slane %v5235_v61, %v10424_v39 }
 0x892   : > { %v5295_v58 = vsel %vm4208_vm5, %v5294_v36, %v5293_v20 }
 0x897   : > { %v5238_v2 = vpop.permute.xlu0 %5237 }
 0x898   : > { %v5244_v11 = vpop.permute.xlu1 %5243  ;;  %v5297_v38 = vperm.slane %v5238_v2, %v10429_v26 }
 0x899   : > { %v5300_v34 = vperm.slane %v5244_v11, %v10429_v26 }
 0x89a   : > { %v5298_v49 = vsel %vm4208_vm5, %v5297_v38, %v5296_v47 }
 0x89b   : > { %v5301_v61 = vsel %vm4208_vm5, %v5300_v34, %v5299_v55 }
 0x89d   : > { %5630 = vperm.xlu2 %7362, %v4662_v37   ;;  %v5319_v37 = vsel %vm4257_vm7, %v5295_v58, %v5318_v52 }
 0x89e   : > { %v5320_v44 = vsel %vm4259_vm8, %v5298_v49, %v5319_v37 }
 0x89f   : > { %v5247_v35 = vpop.permute.xlu0 %5246  ;;  %v5321_v38 = vsel %vm4261_vm9, %v5301_v61, %v5320_v44 }
 0x8a0   : > { %v5253_v8 = vpop.permute.xlu1 %5252  ;;  %v5302_v0 = vperm.slane %v5247_v35, %v10424_v39 }
 0x8a1   : > { %v5305_v11 = vperm.slane %v5253_v8, %v10424_v39 }
 0x8a2   : > { %v5304_v20 = vsel %vm4208_vm5, %v5303_v45, %v5302_v0 }
 0x8a3   : > { %v5322_v36 = vsel %vm4263_vm10, %v5304_v20, %v5321_v38 }
 0x8a7   : > { %v5256_v22 = vpop.permute.xlu0 %5255 }
 0x8a8   : > { %v5306_v2 = vperm.slane %v5256_v22, %v10429_v26  ;;  %v5259_v4 = vpop.permute.xlu1 %5258 }
 0x8a9   : > { %v5308_v51 = vperm.slane %v5259_v4, %v10424_v39  ;;  %v11215_v39 = vperm.slane %v11025_v54, 1 }
 0x8aa   : > { %v5307_v35 = vsel %vm4208_vm5, %v5306_v2, %v5305_v11 }
 0x8ab   : > { %v5323_v46 = vsel %vm4265_vm11, %v5307_v35, %v5322_v36  ;;  %7496 = vrcp.f32 %v11215_v39  ;;  %v12094_v35 = vld [vmem:[#allocation18_spill] sm:$0xff]  ;;  %v11246_v36 = vperm.slane %v11025_v54, 3 }
 0x8af   : > { %v5262_v24 = vpop.permute.xlu0 %5261 }
 0x8b0   : > { %v5309_v13 = vperm.slane %v5262_v24, %v10429_v26  ;;  %v11219_v26 = vperm.slane %v11025_v54, 2 }
 0x8b1   : > { %v11221_v34 = vpop.eup %7496 }
 0x8b2   : > { %v5310_v22 = vsel %vm4208_vm5, %v5309_v13, %v5308_v51  ;;  %7498 = vrcp.f32 %v11219_v26  ;;  %v4664_v0 = vmul.f32 %v11221_v34, %v11215_v39  ;;  %vm4669_vm3 = vweird.f32 %v11221_v34 }
 0x8b3   : > { %v5324_v8 = vsel %vm4267_vm12, %v5310_v22, %v5323_v46  ;;  %vm4668_vm5 = vweird.f32 %v11215_v39 }
 0x8b4   : > { %v5330_v17 = vsel %vm4278_vm13, %v5324_v8, 0.0  ;;  %v4665_v37 = vsub.f32 1.0, %v4664_v0 }
 0x8b5   : > { %5331 = vadd.xlane.f32.xlu1 %v5330_v17 }
 0x8b6   : > { %v4666_v11 = vmul.f32 %v11221_v34, %v4665_v37 }
 0x8b7   : > { %v5626_v47 = vpop.permute.xlu0 %5625 }
 0x8b8   : > { %v5783_v58 = vmul.f32 %v5626_v47, %v12093_v41  ;;  %v11235_v61 = vpop.eup %7498  ;;  %v4667_v17 = vadd.f32 %v11221_v34, %v4666_v11 }
 0x8b9   : > { %v11240_v4 = vmul.f32 %v11235_v61, %v11219_v26 }
 0x8ba   : > { %7232 = vmatmul.msk.f32.vlgmr.msrb.gmra.mxu2 %vm4278_vm13, %v5783_v58 }
 0x8bb   : > { %v4681_v47 = vsub.f32 1.0, %v11240_v4 }
 0x8f8   : > { %v11224_v49 = vpop.xlane.xlu2 %5328 }
 0x8f9   : > { %v5335_v55 = vperm.slane %v11224_v49, 0  ;;  %v11230_v52 = vperm.slane %v11224_v49, 1  ;;  %v5337_v2 = vperm.slane %v11224_v49, 2  ;;  %v5338_v45 = vperm.slane %v11224_v49, 3 }
 0x8fb   : > { %7500 = vrcp.f32 %v5335_v55  ;;  %v5424_v0 = vand.u32 2147483647, %v5338_v45  ;;  %v5376_v37 = vand.u32 2147483647, %v5335_v55  ;;  %v5426_v60 = vand.u32 2147483648, %v5338_v45 }
 0x8fc   : > { %7502 = vrcp.f32 %v11230_v52  ;;  %vm5372_vm6 = vweird.f32 %v5335_v55  ;;  %v5410_v11 = vand.u32 2147483648, %v5337_v2  ;;  %v5408_v4 = vand.u32 2147483647, %v5337_v2 }
 0x8fd   : > { %7504 = vrcp.f32 %v5337_v2  ;;  %vm5404_vm10 = vweird.f32 %v5337_v2  ;;  %vm5377_vm11 = vcmp.eq.f32.partialorder %v5376_v37, 8.507059e+37  ;;  %vm5420_vm12 = vweird.f32 %v5338_v45 }
 0x8fe   : > { %7506 = vrcp.f32 %v5338_v45  ;;  %vm5409_vm1 = vcmp.eq.f32.partialorder %v5408_v4, 8.507059e+37  ;;  %vm5425_vm2 = vcmp.eq.f32.partialorder %v5424_v0, 8.507059e+37 }
 0x8ff   : > { %7508 = vrcp.f32 %v11246_v36 }
 0x900   : > { %v5631_v44 = vpop.permute.xlu2 %5630 }
 0x901   : > { %v7501_v20 = vpop.eup %7500  ;;  %v5784_v24 = vmul.f32 %v5631_v44, %v12094_v35  ;;  %v5378_v44 = vand.u32 2147483648, %v5335_v55 }
 0x902   : > { %v11243_v51 = vpop.eup %7502  ;;  %v5368_v13 = vmul.f32 %v7501_v20, %v5335_v55  ;;  %vm5373_vm4 = vweird.f32 %v7501_v20  ;;  %v5427_v55 = vor.u32 1.1754944e-38, %v5426_v60  ;;  %v4682_v60 = vmul.f32 %v11235_v61, %v4681_v47 }
 0x903   : > { %v7505_v38 = vpop.eup %7504  ;;  %7233 = vmatmul.msk.f32.gmra.mxu2 %vm4278_vm13, %v5784_v24  ;;  %v5384_v24 = vmul.f32 %v11243_v51, %v11230_v52  ;;  %vm5374_vm9 = vmor %vm5372_vm6, %vm5373_vm4  ;;  %v5379_v6 = vor.u32 1.1754944e-38, %v5378_v44 }
 0x904   : > { %v7507_v22 = vpop.eup %7506  ;;  %v5369_v46 = vsub.f32 1.0, %v5368_v13  ;;  %v5400_v8 = vmul.f32 %v7505_v38, %v5337_v2  ;;  %vm5405_vm7 = vweird.f32 %v7505_v38  ;;  %vm4670_vm4 = vmor %vm4668_vm5, %vm4669_vm3  ;;  %vm5388_vm3 = vweird.f32 %v11230_v52 }
 0x905   : > { %v5416_v58 = vmul.f32 %v7507_v22, %v5338_v45  ;;  %vm5421_vm8 = vweird.f32 %v7507_v22  ;;  %v5385_v33 = vsub.f32 1.0, %v5384_v24  ;;  %vm5406_vm14 = vmor %vm5404_vm10, %vm5405_vm7  ;;  %vm5389_vm7 = vweird.f32 %v11243_v51 }
 0x906   : > { %v5370_v62 = vmul.f32 %v7501_v20, %v5369_v46  ;;  %v5401_v40 = vsub.f32 1.0, %v5400_v8  ;;  %vm5422_vm15 = vmor %vm5420_vm12, %vm5421_vm8  ;;  %vm4685_vm8 = vweird.f32 %v11235_v61  ;;  %v4619_v24 = vperm.slane %v11025_v54, 4 }
 0x907   : > { %v5417_v13 = vsub.f32 1.0, %v5416_v58  ;;  %v5411_v58 = vor.u32 1.1754944e-38, %v5410_v11  ;;  %vm5390_vm5 = vmor %vm5388_vm3, %vm5389_vm7 }
 0x908   : > { %v5371_v15 = vadd.f32 %v7501_v20, %v5370_v62  ;;  %v5402_v56 = vmul.f32 %v7505_v38, %v5401_v40  ;;  %7510 = vrcp.f32 %v4619_v24 }
 0x909   : > { %v5418_v25 = vmul.f32 %v7507_v22, %v5417_v13 }
 0x90a   : > { %v5375_v46 = vsel %vm5374_vm9, %v7501_v20, %v5371_v15  ;;  %v5403_v8 = vadd.f32 %v7505_v38, %v5402_v56  ;;  %v4674_v15 = vand.u32 2147483648, %v11215_v39  ;;  %v4672_v56 = vand.u32 2147483647, %v11215_v39 }
 0x90b   : > { %v5419_v1 = vadd.f32 %v7507_v22, %v5418_v25  ;;  %v5380_v21 = vsel %vm5377_vm11, %v5379_v6, %v5375_v46  ;;  %v5386_v25 = vmul.f32 %v11243_v51, %v5385_v33  ;;  %v4683_v20 = vadd.f32 %v11235_v61, %v4682_v60 }
 0x90c   : > { %v5381_v40 = vmul.f32 %v10995_v43, %v5380_v21  ;;  %v5407_v62 = vsel %vm5406_vm14, %v7505_v38, %v5403_v8  ;;  %vm4673_vm6 = vcmp.eq.f32.partialorder %v4672_v56, 8.507059e+37  ;;  %v5382_v39 = vmul.f32 %v10998_v57, %v5380_v21  ;;  %v7509_v38 = vpop.eup %7508 }
 0x90d   : > { %v5423_v13 = vsel %vm5422_vm15, %v7507_v22, %v5419_v1  ;;  %v11256_v10 = vsel %vm5409_vm1, %v5411_v58, %v5407_v62  ;;  %v4671_v1 = vsel %vm4670_vm4, %v11221_v34, %v4667_v17  ;;  %v5387_v33 = vadd.f32 %v11243_v51, %v5386_v25  ;;  %v12096_v25 = vld [vmem:[#allocation11_spill] sm:$0xff] }
 0x90e   : > { %v11259_v2 = vsel %vm5425_vm2, %v5427_v55, %v5423_v13  ;;  %5817 = vperm.xlu0 %7363, %v5381_v40   ;;  %v5414_v6 = vmul.f32 %v11022_v23, %v11256_v10  ;;  %v4675_v23 = vor.u32 1.1754944e-38, %v4674_v15  ;;  %v5392_v34 = vand.u32 2147483647, %v11230_v52  ;;  %v7511_v8 = vpop.eup %7510  ;;  %v12095_v55 = vld [vmem:[#allocation16_spill] sm:$0xff] }
 0x90f   : > { %v5429_v43 = vmul.f32 %v11015_v14, %v11259_v2  ;;  %v5394_v14 = vand.u32 2147483648, %v11230_v52  ;;  %v4690_v22 = vand.u32 2147483648, %v11219_v26  ;;  %v5391_v47 = vsel %vm5390_vm5, %v11243_v51, %v5387_v33  ;;  %v12097_v33 = vld [vmem:[#allocation46_spill] sm:$0xff] }
 0x910   : > { %5842 = vperm.xlu1 %7361, %v5414_v6   ;;  %v11276_v45 = vsel %vm4673_vm6, %v4675_v23, %v4671_v1  ;;  %vm4684_vm9 = vweird.f32 %v11219_v26  ;;  %v4688_v57 = vand.u32 2147483647, %v11219_v26  ;;  %vm5393_vm11 = vcmp.eq.f32.partialorder %v5392_v34, 8.507059e+37 }
 0x911   : > { %5847 = vperm.xlu2 %7362, %v5429_v43   ;;  %v4678_v17 = vmul.f32 %v10677_v50, %v11276_v45  ;;  %v5395_v21 = vor.u32 1.1754944e-38, %v5394_v14  ;;  %vm4686_vm10 = vmor %vm4684_vm9, %vm4685_vm8  ;;  %v4696_v0 = vmul.f32 %v7509_v38, %v11246_v36  ;;  %v4691_v44 = vor.u32 1.1754944e-38, %v4690_v22 }
 0x912   : > { %v4687_v52 = vsel %vm4686_vm10, %v11235_v61, %v4683_v20  ;;  %vm4689_vm12 = vcmp.eq.f32.partialorder %v4688_v57, 8.507059e+37  ;;  %vm4701_vm14 = vweird.f32 %v7509_v38  ;;  %v4706_v58 = vand.u32 2147483648, %v11246_v36 }
 0x913   : > { %v5396_v37 = vsel %vm5393_vm11, %v5395_v21, %v5391_v47  ;;  %v4692_v50 = vsel %vm4689_vm12, %v4691_v44, %v4687_v52  ;;  %v4697_v11 = vsub.f32 1.0, %v4696_v0  ;;  %vm4700_vm15 = vweird.f32 %v11246_v36 }
 0x914   : > { %v5397_v51 = vmul.f32 %v11001_v27, %v5396_v37  ;;  %v4693_v26 = vmul.f32 %v10672_v18, %v4692_v50  ;;  %v5398_v46 = vmul.f32 %v11009_v30, %v5396_v37  ;;  %v4694_v40 = vmul.f32 %v12095_v55, %v4692_v50  ;;  %vm4702_vm1 = vmor %vm4700_vm15, %vm4701_vm14  ;;  %v12099_v37 = vld [vmem:[#allocation15_spill] sm:$0xff] }
 0x915   : > { %v4698_v4 = vmul.f32 %v7509_v38, %v4697_v11  ;;  %v4704_v27 = vand.u32 2147483647, %v11246_v36  ;;  %v4712_v62 = vmul.f32 %v7511_v8, %v4619_v24  ;;  %v4707_v13 = vor.u32 1.1754944e-38, %v4706_v58 }
 0x916   : > { %5822 = vperm.xlu0 %7363, %v5382_v39   ;;  %v4620_v30 = vperm.slane %v11025_v54, 5  ;;  %v5413_v6 = vmul.f32 %v11012_v29, %v11256_v10  ;;  %vm4717_vm4 = vweird.f32 %v7511_v8  ;;  %v4722_v23 = vand.u32 2147483648, %v4619_v24 }
 0x917   : > { %v4699_v61 = vadd.f32 %v7509_v38, %v4698_v4  ;;  %vm4705_vm2 = vcmp.eq.f32.partialorder %v4704_v27, 8.507059e+37  ;;  %v4713_v56 = vsub.f32 1.0, %v4712_v62  ;;  %vm4716_vm6 = vweird.f32 %v4619_v24 }
 0x918   : > { %5640 = vperm.xlu1 %7361, %v4678_v17   ;;  %7512 = vrcp.f32 %v4620_v30  ;;  %v4720_v39 = vand.u32 2147483647, %v4619_v24  ;;  %vm4718_vm7 = vmor %vm4716_vm6, %vm4717_vm4  ;;  %v4723_v29 = vor.u32 1.1754944e-38, %v4722_v23  ;;  %v4621_v10 = vperm.slane %v11025_v54, 6  ;;  %v12098_v17 = vld [vmem:[#allocation45_spill] sm:$0xff] }
 0x919   : > { %v4703_v18 = vsel %vm4702_vm1, %v7509_v38, %v4699_v61  ;;  %v4714_v1 = vmul.f32 %v7511_v8, %v4713_v56  ;;  %v4738_v0 = vand.u32 2147483648, %v4620_v30  ;;  %vm4732_vm5 = vweird.f32 %v4620_v30  ;;  %v12100_v61 = vld [vmem:[#allocation48_spill] sm:$0xff] }
 0x91a   : > { %v4708_v15 = vsel %vm4705_vm2, %v4707_v13, %v4703_v18  ;;  %vm4721_vm8 = vcmp.eq.f32.partialorder %v4720_v39, 8.507059e+37  ;;  %7514 = vrcp.f32 %v4621_v10  ;;  %v4736_v24 = vand.u32 2147483647, %v4620_v30  ;;  %v12101_v18 = vld [vmem:[#allocation47_spill] sm:$0xff] }
 0x91b   : > { %v4709_v43 = vmul.f32 %v12096_v25, %v4708_v15  ;;  %v4715_v36 = vadd.f32 %v7511_v8, %v4714_v1  ;;  %v4710_v14 = vmul.f32 %v12097_v33, %v4708_v15  ;;  %v4739_v11 = vor.u32 1.1754944e-38, %v4738_v0  ;;  %v12103_v39 = vld [vmem:[#allocation51_spill] sm:$0xff] }
 0x91c   : > { %vm4737_vm10 = vcmp.eq.f32.partialorder %v4736_v24, 8.507059e+37  ;;  %v4754_v27 = vand.u32 2147483648, %v4621_v10  ;;  %vm4748_vm12 = vweird.f32 %v4621_v10  ;;  %v4752_v13 = vand.u32 2147483647, %v4621_v10 }
 0x91d   : > { %v4719_v34 = vsel %vm4718_vm7, %v7511_v8, %v4715_v36  ;;  %v11320_v24 = vperm.slane %v11224_v49, 4 }
 0x91e   : > { %5827 = vperm.xlu0 %7363, %v5397_v51   ;;  %v7513_v60 = vpop.eup %7512  ;;  %v4724_v38 = vsel %vm4721_vm8, %v4723_v29, %v4719_v34  ;;  %vm4753_vm15 = vcmp.eq.f32.partialorder %v4752_v13, 8.507059e+37 }
 0x91f   : > { %v4728_v20 = vmul.f32 %v7513_v60, %v4620_v30  ;;  %v4725_v47 = vmul.f32 %v12098_v17, %v4724_v38  ;;  %vm4733_vm3 = vweird.f32 %v7513_v60  ;;  %v4726_v44 = vmul.f32 %v12099_v37, %v4724_v38 }
 0x920   : > { %5645 = vperm.xlu1 %7361, %v4693_v26   ;;  %v7515_v52 = vpop.eup %7514  ;;  %vm4734_vm9 = vmor %vm4732_vm5, %vm4733_vm3  ;;  %v4622_v26 = vperm.slane %v11025_v54, 7  ;;  %v4755_v54 = vor.u32 1.1754944e-38, %v4754_v27 }
 0x921   : > { %v4729_v22 = vsub.f32 1.0, %v4728_v20  ;;  %v4744_v51 = vmul.f32 %v7515_v52, %v4621_v10  ;;  %vm4749_vm11 = vweird.f32 %v7515_v52 }
 0x922   : > { %7516 = vrcp.f32 %v4622_v26  ;;  %vm4750_vm14 = vmor %vm4748_vm12, %vm4749_vm11  ;;  %vm4764_vm2 = vweird.f32 %v4622_v26  ;;  %v4768_v20 = vand.u32 2147483647, %v4622_v26 }
 0x923   : > { %v4730_v57 = vmul.f32 %v7513_v60, %v4729_v22  ;;  %v4624_v22 = vperm.slane %v11138_v16, 1 }
 0x924   : > { %vm4769_vm6 = vcmp.eq.f32.partialorder %v4768_v20, 8.507059e+37  ;;  %v11345_v20 = vperm.slane %v11138_v16, 3 }
 0x925   : > { %v4731_v21 = vadd.f32 %v7513_v60, %v4730_v57  ;;  %v12104_v57 = vld [vmem:[#allocation50_spill] sm:$0xff] }
 0x926   : > { %5832 = vperm.xlu0 %7363, %v5398_v46   ;;  %v4745_v46 = vsub.f32 1.0, %v4744_v51 }
 0x927   : > { %v4735_v50 = vsel %vm4734_vm9, %v7513_v60, %v4731_v21  ;;  %v6010_v60 = vld [vmem:[%s11868_s3 + $0x18] sm:$0xff] }
 0x928   : > { %5650 = vperm.xlu1 %7361, %v4694_v40   ;;  %v4740_v4 = vsel %vm4737_vm10, %v4739_v11, %v4735_v50  ;;  %v4746_v58 = vmul.f32 %v7515_v52, %v4745_v46  ;;  %v7517_v40 = vpop.eup %7516  ;;  %6185 = vmatpush.msrb.mxu1 %v6010_v60  ;;  %v12105_v50 = vld [vmem:[#allocation44_spill] sm:$0xff]  ;;  %vm4796_vm10 = vweird.f32 %v4624_v22 }
 0x929   : > { %v4741_v8 = vmul.f32 %v12100_v61, %v4740_v4  ;;  %v4742_v62 = vmul.f32 %v12101_v18, %v4740_v4  ;;  %v4760_v15 = vmul.f32 %v7517_v40, %v4622_v26  ;;  %vm4765_vm1 = vweird.f32 %v7517_v40 }
 0x92a   : > { %v4747_v55 = vadd.f32 %v7515_v52, %v4746_v58  ;;  %vm4766_vm4 = vmor %vm4764_vm2, %vm4765_vm1  ;;  %v11325_v61 = vperm.slane %v11138_v16, 2 }
 0x92b   : > { %v4761_v25 = vsub.f32 1.0, %v4760_v15 }
 0x92c   : > { %v4751_v30 = vsel %vm4750_vm14, %v7515_v52, %v4747_v55  ;;  %v12106_v55 = vld [vmem:[#allocation54_spill] sm:$0xff] }
 0x92d   : > { %v4756_v56 = vsel %vm4753_vm15, %v4755_v54, %v4751_v30  ;;  %v4762_v36 = vmul.f32 %v7517_v40, %v4761_v25  ;;  %v12107_v25 = vld [vmem:[#allocation53_spill] sm:$0xff]  ;;  %vm5436_vm15 = vweird.f32 %v11320_v24 }
 0x92e   : > { %5837 = vperm.xlu0 %7363, %v5413_v6   ;;  %v4623_v6 = vperm.slane %v11138_v16, 0  ;;  %v4758_v34 = vmul.f32 %v12103_v39, %v4756_v56 }
 0x92f   : > { %v4763_v23 = vadd.f32 %v7517_v40, %v4762_v36 }
 0x930   : > { %5655 = vperm.xlu1 %7361, %v4709_v43   ;;  %v12102_v43 = vld [vmem:[#allocation6_spill] sm:$0xff]  ;;  %7518 = vrcp.f32 %v4623_v6  ;;  %vm4780_vm8 = vweird.f32 %v4623_v6  ;;  %v4784_v11 = vand.u32 2147483647, %v4623_v6 }
 0x931   : > { %v4757_v1 = vmul.f32 %v12102_v43, %v4756_v56  ;;  %v4767_v29 = vsel %vm4766_vm4, %v7517_v40, %v4763_v23  ;;  %7520 = vrcp.f32 %v4624_v22  ;;  %v11335_v56 = vperm.slane %v11224_v49, 5 }
 0x932   : > { %7522 = vrcp.f32 %v11320_v24  ;;  %vm4785_vm5 = vcmp.eq.f32.partialorder %v4784_v11, 8.507059e+37 }
 0x933   : > { %7524 = vrcp.f32 %v11325_v61 }
 0x934   : > { %7526 = vrcp.f32 %v11335_v56 }
 0x935   : > { %7528 = vrcp.f32 %v11345_v20 }
 0x936   : > { %v7519_v33 = vpop.eup %7518 }
 0x937   : > { %v4776_v10 = vmul.f32 %v7519_v33, %v4623_v6  ;;  %vm4781_vm7 = vweird.f32 %v7519_v33  ;;  %v7521_v37 = vpop.eup %7520 }
 0x938   : > { %5660 = vperm.xlu1 %7361, %v4710_v14   ;;  %v4770_v14 = vand.u32 2147483648, %v4622_v26  ;;  %vm4782_vm3 = vmor %vm4780_vm8, %vm4781_vm7  ;;  %v4792_v4 = vmul.f32 %v7521_v37, %v4624_v22  ;;  %v7523_v27 = vpop.eup %7522  ;;  %vm4797_vm9 = vweird.f32 %v7521_v37 }
 0x939   : > { %v5432_v30 = vmul.f32 %v7523_v27, %v11320_v24  ;;  %v11332_v54 = vpop.eup %7524  ;;  %vm4798_vm11 = vmor %vm4796_vm10, %vm4797_vm9  ;;  %vm5437_vm14 = vweird.f32 %v7523_v27 }
 0x93a   : > { %v4771_v38 = vor.u32 1.1754944e-38, %v4770_v14  ;;  %v4793_v58 = vsub.f32 1.0, %v4792_v4  ;;  %v4808_v23 = vmul.f32 %v11332_v54, %v11325_v61  ;;  %v12108_v14 = vld [vmem:[#allocation10_spill] sm:$0xff]  ;;  %vm5438_vm1 = vmor %vm5436_vm15, %vm5437_vm14  ;;  %vm4813_vm2 = vweird.f32 %v11332_v54 }
 0x93b   : > { %v5433_v36 = vsub.f32 1.0, %v5432_v30  ;;  %v4677_v39 = vmul.f32 %v12108_v14, %v11276_v45  ;;  %v11350_v45 = vpop.eup %7526  ;;  %v12114_v14 = vld [vmem:[#allocation21_spill] sm:$0xff] }
 0x93c   : > { %v4772_v17 = vsel %vm4769_vm6, %v4771_v38, %v4767_v29  ;;  %v4809_v38 = vsub.f32 1.0, %v4808_v23  ;;  %v11364_v4 = vpop.eup %7528  ;;  %vm4812_vm6 = vweird.f32 %v11325_v61  ;;  %v5458_v23 = vand.u32 2147483648, %v11335_v56 }
 0x93d   : > { %v4773_v21 = vmul.f32 %v12104_v57, %v4772_v17  ;;  %v4774_v51 = vmul.f32 %v12105_v50, %v4772_v17  ;;  %v5442_v57 = vand.u32 2147483648, %v11320_v24  ;;  %vm4814_vm7 = vmor %vm4812_vm6, %vm4813_vm2  ;;  %vm4829_vm10 = vweird.f32 %v11364_v4 }
 0x93f   : > { %v5443_v11 = vor.u32 1.1754944e-38, %v5442_v57 }
 0x940   : > { %5665 = vperm.xlu1 %7361, %v4725_v47   ;;  %v4777_v47 = vsub.f32 1.0, %v4776_v10  ;;  %v5434_v10 = vmul.f32 %v7523_v27, %v5433_v36 }
 0x942   : > { %v4778_v52 = vmul.f32 %v7519_v33, %v4777_v47 }
 0x944   : > { %v4779_v0 = vadd.f32 %v7519_v33, %v4778_v52  ;;  %v12110_v52 = vld [vmem:[#allocation19_spill] sm:$0xff] }
 0x946   : > { %v4783_v26 = vsel %vm4782_vm3, %v7519_v33, %v4779_v0  ;;  %vm5453_vm3 = vweird.f32 %v11350_v45 }
 0x948   : > { %5670 = vperm.xlu1 %7361, %v4726_v44   ;;  %v4786_v44 = vand.u32 2147483648, %v4623_v6  ;;  %v4802_v6 = vand.u32 2147483648, %v4624_v22 }
 0x94a   : > { %v4787_v46 = vor.u32 1.1754944e-38, %v4786_v44  ;;  %v5440_v44 = vand.u32 2147483647, %v11320_v24  ;;  %v12111_v24 = vld [vmem:[#allocation57_spill] sm:$0xff] }
 0x94c   : > { %vm5441_vm4 = vcmp.eq.f32.partialorder %v5440_v44, 8.507059e+37 }
 0x950   : > { %5675 = vperm.xlu1 %7361, %v4741_v8   ;;  %v4788_v8 = vsel %vm4785_vm5, %v4787_v46, %v4783_v26  ;;  %vm5452_vm5 = vweird.f32 %v11335_v56 }
 0x951   : > { %v4789_v40 = vmul.f32 %v12106_v55, %v4788_v8  ;;  %v4790_v43 = vmul.f32 %v12107_v25, %v4788_v8  ;;  %vm11398_vm9 = vmor %vm5452_vm5, %vm5453_vm3 }
 0x958   : > { %5680 = vperm.xlu1 %7361, %v4742_v62   ;;  %v4794_v62 = vmul.f32 %v7521_v37, %v4793_v58  ;;  %v4816_v58 = vand.u32 2147483647, %v11325_v61 }
 0x95a   : > { %v4795_v15 = vadd.f32 %v7521_v37, %v4794_v62  ;;  %v12112_v62 = vld [vmem:[#allocation20_spill] sm:$0xff]  ;;  %vm4817_vm8 = vcmp.eq.f32.partialorder %v4816_v58, 8.507059e+37 }
 0x95b   : > { %v12119_v58 = vld [vmem:[#allocation60_spill] sm:$0xff] }
 0x95c   : > { %v4799_v60 = vsel %vm4798_vm11, %v7521_v37, %v4795_v15  ;;  %v5430_v37 = vmul.f32 %v11027_v53, %v11259_v2  ;;  %v4818_v53 = vand.u32 2147483648, %v11325_v61  ;;  %v11369_v2 = vperm.slane %v11224_v49, 6 }
 0x95e   : > { %v4819_v15 = vor.u32 1.1754944e-38, %v4818_v53  ;;  %7530 = vrcp.f32 %v11369_v2  ;;  %vm5468_vm2 = vweird.f32 %v11369_v2 }
 0x960   : > { %5685 = vperm.xlu1 %7361, %v4757_v1   ;;  %v4800_v1 = vand.u32 2147483647, %v4624_v22  ;;  %v12109_v22 = vld [vmem:[#allocation49_spill] sm:$0xff] }
 0x962   : > { %vm4801_vm12 = vcmp.eq.f32.partialorder %v4800_v1, 8.507059e+37  ;;  %v12113_v1 = vld [vmem:[#allocation56_spill] sm:$0xff] }
 0x968   : > { %5690 = vperm.xlu1 %7361, %v4758_v34   ;;  %v4803_v34 = vor.u32 1.1754944e-38, %v4802_v6  ;;  %v11380_v6 = vperm.slane %v11138_v16, 4 }
 0x96a   : > { %v4804_v29 = vsel %vm4801_vm12, %v4803_v34, %v4799_v60  ;;  %7532 = vrcp.f32 %v11380_v6  ;;  %vm4828_vm12 = vweird.f32 %v11345_v20 }
 0x96b   : > { %v4805_v17 = vmul.f32 %v12109_v22, %v4804_v29  ;;  %v4806_v46 = vmul.f32 %v12111_v24, %v4804_v29  ;;  %v5456_v29 = vand.u32 2147483647, %v11335_v56  ;;  %vm4830_vm14 = vmor %vm4828_vm12, %vm4829_vm10  ;;  %v11426_v24 = vperm.slane %v11138_v16, 5 }
 0x96d   : > { %vm5457_vm11 = vcmp.eq.f32.partialorder %v5456_v29, 8.507059e+37 }
 0x970   : > { %5695 = vperm.xlu1 %7361, %v4773_v21   ;;  %v4810_v21 = vmul.f32 %v11332_v54, %v4809_v38 }
 0x972   : > { %v4811_v26 = vadd.f32 %v11332_v54, %v4810_v21 }
 0x978   : > { %5700 = vperm.xlu1 %7361, %v4774_v51   ;;  %v5448_v51 = vmul.f32 %v11350_v45, %v11335_v56 }
 0x97a   : > { %v5449_v55 = vsub.f32 1.0, %v5448_v51 }
 0x980   : > { %5705 = vperm.xlu1 %7361, %v4789_v40   ;;  %v5818_v18 = vpop.permute.xlu0 %5817 }
 0x981   : > { %v5975_v13 = vmul.f32 %v5818_v18, %v12093_v41  ;;  %v4824_v18 = vmul.f32 %v11364_v4, %v11345_v20 }
 0x983   : > { %6043 = vrot.lane.b32.xlu0 %v5975_v13, %s7570_s16  ;;  %v4825_v25 = vsub.f32 1.0, %v4824_v18 }
 0x988   : > { %5710 = vperm.xlu1 %7361, %v4790_v43   ;;  %v5823_v41 = vpop.permute.xlu0 %5822  ;;  %v11384_v43 = vpop.xlane.xlu1 %5331 }
 0x989   : > { %v5976_v33 = vmul.f32 %v5823_v41, %v12094_v35  ;;  %v5435_v35 = vadd.f32 %v7523_v27, %v5434_v10  ;;  %v11390_v41 = vpop.eup %7530 }
 0x98a   : > { %v5464_v22 = vmul.f32 %v11390_v41, %v11369_v2  ;;  %v11410_v56 = vpop.eup %7532 }
 0x98b   : > { %5635 = vperm.xlu0 %7363, %v4677_v39   ;;  %6045 = vrot.lane.b32.xlu2 %v5976_v33, %s7570_s16  ;;  %v5439_v50 = vsel %vm5438_vm1, %v7523_v27, %v5435_v35  ;;  %v4815_v27 = vsel %vm4814_vm7, %v11332_v54, %v4811_v26  ;;  %v5450_v54 = vmul.f32 %v11350_v45, %v5449_v55  ;;  %v4834_v35 = vand.u32 2147483648, %v11345_v20 }
 0x98c   : > { %v5444_v8 = vsel %vm5441_vm4, %v5443_v11, %v5439_v50  ;;  %v4820_v61 = vsel %vm4817_vm8, %v4819_v15, %v4815_v27  ;;  %v4826_v33 = vmul.f32 %v11364_v4, %v4825_v25  ;;  %v5465_v44 = vsub.f32 1.0, %v5464_v22  ;;  %v12118_v11 = vld [vmem:[#allocation22_spill] sm:$0xff] }
 0x98d   : > { %v5445_v30 = vmul.f32 %v11037_v42, %v5444_v8  ;;  %v4821_v36 = vmul.f32 %v12113_v1, %v4820_v61  ;;  %v5451_v42 = vadd.f32 %v11350_v45, %v5450_v54  ;;  %v5446_v34 = vmul.f32 %v11030_v31, %v5444_v8  ;;  %v5848_v8 = vpop.permute.xlu2 %5847 }
 0x98e   : > { %v4827_v31 = vadd.f32 %v11364_v4, %v4826_v33  ;;  %v4840_v51 = vmul.f32 %v11410_v56, %v11380_v6  ;;  %vm5469_vm1 = vweird.f32 %v11390_v41  ;;  %v5474_v27 = vand.u32 2147483648, %v11369_v2 }
 0x98f   : > { %v5455_v38 = vsel %vm11398_vm9, %v11350_v45, %v5451_v42  ;;  %v12117_v45 = vld [vmem:[#allocation52_spill] sm:$0xff]  ;;  %vm5470_vm4 = vmor %vm5468_vm2, %vm5469_vm1  ;;  %vm4845_vm6 = vweird.f32 %v11410_v56  ;;  %vm4844_vm8 = vweird.f32 %v11380_v6  ;;  %v4848_v33 = vand.u32 2147483647, %v11380_v6 }
 0x990   : > { %5715 = vperm.xlu1 %7361, %v4805_v17   ;;  %v5828_v47 = vpop.permute.xlu0 %5827  ;;  %v5459_v17 = vor.u32 1.1754944e-38, %v5458_v23  ;;  %v5843_v57 = vpop.permute.xlu1 %5842  ;;  %v4822_v21 = vmul.f32 %v12117_v45, %v4820_v61  ;;  %v4831_v50 = vsel %vm4830_vm14, %v11364_v4, %v4827_v31  ;;  %v5466_v4 = vmul.f32 %v11390_v41, %v5465_v44  ;;  %vm4846_vm3 = vmor %vm4844_vm8, %vm4845_vm6 }
 0x991   : > { %v5977_v0 = vmul.f32 %v5828_v47, %v12110_v52  ;;  %v11415_v47 = vperm.slane %v11224_v49, 7  ;;  %v5980_v26 = vmul.f32 %v5843_v57, %v12118_v11  ;;  %v4835_v49 = vor.u32 1.1754944e-38, %v4834_v35  ;;  %v12122_v35 = vld [vmem:[#allocation55_spill] sm:$0xff] }
 0x992   : > { %v5472_v61 = vand.u32 2147483647, %v11369_v2  ;;  %v5475_v1 = vor.u32 1.1754944e-38, %v5474_v27  ;;  %v11451_v2 = vperm.slane %v11384_v43, 0  ;;  %vm4849_vm5 = vcmp.eq.f32.partialorder %v4848_v33, 8.507059e+37  ;;  %v12124_v27 = vld [vmem:[#allocation62_spill] sm:$0xff] }
 0x993   : > { %5852 = vperm.xlu0 %7363, %v5430_v37   ;;  %6047 = vrot.lane.b32.xlu2 %v5977_v0, %s7570_s16  ;;  %v5460_v0 = vsel %vm5457_vm11, %v5459_v17, %v5455_v38  ;;  %v4832_v37 = vand.u32 2147483647, %v11345_v20  ;;  %7534 = vrcp.f32 %v11415_v47  ;;  %v5490_v45 = vand.u32 2147483648, %v11415_v47 }
 0x994   : > { %v5461_v53 = vmul.f32 %v11041_v63, %v5460_v0  ;;  %7536 = vrcp.f32 %v11426_v24  ;;  %v5467_v63 = vadd.f32 %v11390_v41, %v5466_v4  ;;  %v5462_v15 = vmul.f32 %v11053_v32, %v5460_v0 }
 0x995   : > { %vm4833_vm15 = vcmp.eq.f32.partialorder %v4832_v37, 8.507059e+37  ;;  %vm5473_vm7 = vcmp.eq.f32.partialorder %v5472_v61, 8.507059e+37  ;;  %v4850_v32 = vand.u32 2147483648, %v11380_v6  ;;  %7538 = vrcp.f32 %v11451_v2 }
 0x996   : > { %v4836_v20 = vsel %vm4833_vm15, %v4835_v49, %v4831_v50  ;;  %v5471_v54 = vsel %vm5470_vm4, %v11390_v41, %v5467_v63  ;;  %vm5484_vm10 = vweird.f32 %v11415_v47  ;;  %v5488_v0 = vand.u32 2147483647, %v11415_v47  ;;  %v6009_v50 = vld [vmem:[%s11868_s3 + $0x10] sm:$0xff] }
 0x997   : > { %v4837_v55 = vmul.f32 %v12119_v58, %v4836_v20  ;;  %v5476_v41 = vsel %vm5473_vm7, %v5475_v1, %v5471_v54  ;;  %v4851_v38 = vor.u32 1.1754944e-38, %v4850_v32  ;;  %6186 = vmatpush.msrb.mxu1 %v6009_v50  ;;  %vm4860_vm15 = vweird.f32 %v11426_v24  ;;  %v12125_v32 = vld [vmem:[#allocation58_spill] sm:$0xff] }
 0x998   : > { %5720 = vperm.xlu1 %7361, %v4806_v46   ;;  %v5833_v40 = vpop.permute.xlu0 %5832  ;;  %v4841_v46 = vsub.f32 1.0, %v4840_v51  ;;  %v5477_v10 = vmul.f32 %v11046_v28, %v5476_v41  ;;  %v5491_v51 = vor.u32 1.1754944e-38, %v5490_v45  ;;  %vm5489_vm14 = vcmp.eq.f32.partialorder %v5488_v0, 8.507059e+37  ;;  %v11483_v54 = vpop.permute.xlu1 %5640 }
 0x999   : > { %v5978_v13 = vmul.f32 %v5833_v40, %v12112_v62  ;;  %v11434_v40 = vpop.eup %7534  ;;  %v4864_v4 = vand.u32 2147483647, %v11426_v24  ;;  %vm5500_vm6 = vweird.f32 %v11451_v2 }
 0x99a   : > { %v4842_v18 = vmul.f32 %v11410_v56, %v4841_v46  ;;  %v5480_v25 = vmul.f32 %v11434_v40, %v11415_v47  ;;  %v7537_v42 = vpop.eup %7536  ;;  %vm5485_vm9 = vweird.f32 %v11434_v40  ;;  %v5344_v47 = vperm.slane %v11384_v43, 1 }
 0x99b   : > { %5857 = vperm.xlu0 %7363, %v5445_v30   ;;  %6049 = vrot.lane.b32.xlu2 %v5978_v13, %s7570_s16  ;;  %v12120_v13 = vld [vmem:[#allocation23_spill] sm:$0xff]  ;;  %v4856_v29 = vmul.f32 %v7537_v42, %v11426_v24  ;;  %vm5486_vm11 = vmor %vm5484_vm10, %vm5485_vm9  ;;  %vm4861_vm12 = vweird.f32 %v7537_v42  ;;  %vm4865_vm2 = vcmp.eq.f32.partialorder %v4864_v4, 8.507059e+37 }
 0x99c   : > { %v5981_v30 = vmul.f32 %v5848_v8, %v12120_v13  ;;  %vm4862_vm1 = vmor %vm4860_vm15, %vm4861_vm12  ;;  %7540 = vrcp.f32 %v5344_v47 }
 0x99d   : > { %v4857_v31 = vsub.f32 1.0, %v4856_v29  ;;  %v5522_v29 = vand.u32 2147483648, %v5344_v47 }
 0x99f   : > { %v4858_v28 = vmul.f32 %v7537_v42, %v4857_v31  ;;  %v5523_v31 = vor.u32 1.1754944e-38, %v5522_v29 }
 0x9a0   : > { %5725 = vperm.xlu1 %7361, %v4821_v36   ;;  %v5838_v60 = vpop.permute.xlu0 %5837  ;;  %v4843_v36 = vadd.f32 %v11410_v56, %v4842_v18  ;;  %v11488_v33 = vpop.permute.xlu1 %5645 }
 0x9a1   : > { %v5979_v39 = vmul.f32 %v5838_v60, %v12114_v14  ;;  %v12121_v60 = vld [vmem:[#allocation59_spill] sm:$0xff] }
 0x9a2   : > { %v4838_v23 = vmul.f32 %v12121_v60, %v4836_v20 }
 0x9a3   : > { %5862 = vperm.xlu0 %7363, %v5446_v34   ;;  %6051 = vrot.lane.b32.xlu2 %v5979_v39, %s7570_s16  ;;  %v5481_v39 = vsub.f32 1.0, %v5480_v25  ;;  %v4847_v34 = vsel %vm4846_vm3, %v11410_v56, %v4843_v36  ;;  %v7539_v56 = vpop.eup %7538 }
 0x9a4   : > { %v4852_v22 = vsel %vm4849_vm5, %v4851_v38, %v4847_v34  ;;  %v5496_v44 = vmul.f32 %v7539_v56, %v11451_v2  ;;  %vm5501_vm4 = vweird.f32 %v7539_v56  ;;  %vm5516_vm5 = vweird.f32 %v5344_v47 }
 0x9a5   : > { %v5482_v17 = vmul.f32 %v11434_v40, %v5481_v39  ;;  %v4853_v6 = vmul.f32 %v12122_v35, %v4852_v22  ;;  %vm5502_vm7 = vmor %vm5500_vm6, %vm5501_vm4  ;;  %v5520_v38 = vand.u32 2147483647, %v5344_v47 }
 0x9a6   : > { %v5497_v46 = vsub.f32 1.0, %v5496_v44 }
 0x9a7   : > { %v5483_v57 = vadd.f32 %v11434_v40, %v5482_v17  ;;  %vm5521_vm10 = vcmp.eq.f32.partialorder %v5520_v38, 8.507059e+37 }
 0x9a8   : > { %5730 = vperm.xlu1 %7361, %v4822_v21   ;;  %v5478_v21 = vmul.f32 %v11056_v5, %v5476_v41  ;;  %v4866_v5 = vand.u32 2147483648, %v11426_v24  ;;  %v5506_v24 = vand.u32 2147483648, %v11451_v2  ;;  %v11492_v35 = vpop.permute.xlu1 %5650 }
 0x9a9   : > { %v5487_v37 = vsel %vm5486_vm11, %v11434_v40, %v5483_v57  ;;  %v5498_v40 = vmul.f32 %v7539_v56, %v5497_v46 }
 0x9aa   : > { %v5492_v20 = vsel %vm5489_vm14, %v5491_v51, %v5487_v37  ;;  %v5507_v36 = vor.u32 1.1754944e-38, %v5506_v24 }
 0x9ab   : > { %5867 = vperm.xlu0 %7363, %v5461_v53   ;;  %6053 = vrot.lane.b32.xlu2 %v5980_v26, %s7570_s16  ;;  %v4859_v26 = vadd.f32 %v7537_v42, %v4858_v28  ;;  %v12123_v53 = vld [vmem:[#allocation63_spill] sm:$0xff]  ;;  %v5493_v58 = vmul.f32 %v11069_v59, %v5492_v20  ;;  %v5494_v61 = vmul.f32 %v11059_v12, %v5492_v20  ;;  %v5504_v59 = vand.u32 2147483647, %v11451_v2 }
 0x9ac   : > { %v4854_v49 = vmul.f32 %v12123_v53, %v4852_v22 }
 0x9ad   : > { %v4863_v8 = vsel %vm4862_vm1, %v7537_v42, %v4859_v26  ;;  %vm5505_vm8 = vcmp.eq.f32.partialorder %v5504_v59, 8.507059e+37  ;;  %v5345_v42 = vperm.slane %v11384_v43, 2  ;;  %v11514_v59 = vperm.slane %v11384_v43, 5 }
 0x9af   : > { %7542 = vrcp.f32 %v5345_v42  ;;  %v5538_v0 = vand.u32 2147483648, %v5345_v42  ;;  %vm5532_vm12 = vweird.f32 %v5345_v42  ;;  %v5536_v44 = vand.u32 2147483647, %v5345_v42 }
 0x9b0   : > { %5735 = vperm.xlu1 %7361, %v4837_v55   ;;  %v4867_v55 = vor.u32 1.1754944e-38, %v4866_v5 }
 0x9b1   : > { %v5539_v5 = vor.u32 1.1754944e-38, %v5538_v0  ;;  %vm5537_vm15 = vcmp.eq.f32.partialorder %v5536_v44, 8.507059e+37 }
 0x9b2   : > { %v4868_v63 = vsel %vm4865_vm2, %v4867_v55, %v4863_v8 }
 0x9b3   : > { %5872 = vperm.xlu0 %7363, %v5462_v15   ;;  %6055 = vrot.lane.b32.xlu2 %v5981_v30, %s7570_s16  ;;  %v4869_v18 = vmul.f32 %v12124_v27, %v4868_v63  ;;  %v5499_v30 = vadd.f32 %v7539_v56, %v5498_v40  ;;  %v7541_v15 = vpop.eup %7540  ;;  %v4870_v60 = vmul.f32 %v12125_v32, %v4868_v63  ;;  %v12126_v27 = vld [vmem:[#allocation5_spill] sm:$0xff] }
 0x9b4   : > { %v5512_v1 = vmul.f32 %v7541_v15, %v5344_v47  ;;  %vm5517_vm3 = vweird.f32 %v7541_v15  ;;  %v11499_v47 = vperm.slane %v11384_v43, 4 }
 0x9b5   : > { %v5503_v25 = vsel %vm5502_vm7, %v7539_v56, %v5499_v30  ;;  %v7543_v34 = vpop.eup %7542  ;;  %vm5518_vm9 = vmor %vm5516_vm5, %vm5517_vm3 }
 0x9b6   : > { %v5513_v41 = vsub.f32 1.0, %v5512_v1  ;;  %v5528_v17 = vmul.f32 %v7543_v34, %v5345_v42  ;;  %vm5533_vm11 = vweird.f32 %v7543_v34  ;;  %v12127_v1 = vld [vmem:[#allocation24_spill] sm:$0xff]  ;;  %v5570_v38 = vand.u32 2147483648, %v11499_v47 }
 0x9b7   : > { %vm5534_vm14 = vmor %vm5532_vm12, %vm5533_vm11 }
 0x9b8   : > { %5740 = vperm.xlu1 %7361, %v4838_v23   ;;  %v5508_v23 = vsel %vm5505_vm8, %v5507_v36, %v5503_v25  ;;  %v5514_v2 = vmul.f32 %v7541_v15, %v5513_v41  ;;  %v5529_v57 = vsub.f32 1.0, %v5528_v17  ;;  %v5786_v25 = vmul.f32 %v11483_v54, %v12112_v62  ;;  %v12130_v17 = vld [vmem:[#allocation14_spill] sm:$0xff] }
 0x9b9   : > { %v5509_v12 = vmul.f32 %v11066_v7, %v5508_v23  ;;  %v5346_v7 = vperm.slane %v11384_v43, 3  ;;  %v5787_v62 = vmul.f32 %v11488_v33, %v12114_v14  ;;  %vm5564_vm8 = vweird.f32 %v11499_v47 }
 0x9ba   : > { %v5515_v39 = vadd.f32 %v7541_v15, %v5514_v2  ;;  %v5530_v45 = vmul.f32 %v7543_v34, %v5529_v57  ;;  %v5568_v14 = vand.u32 2147483647, %v11499_v47 }
 0x9bb   : > { %5877 = vperm.xlu0 %7363, %v5477_v10   ;;  %v5510_v10 = vmul.f32 %v11080_v9, %v5508_v23  ;;  %7544 = vrcp.f32 %v5346_v7  ;;  %v5554_v40 = vand.u32 2147483648, %v5346_v7  ;;  %vm5548_vm2 = vweird.f32 %v5346_v7  ;;  %v12128_v23 = vld [vmem:[#allocation4_spill] sm:$0xff] }
 0x9bc   : > { %v5519_v22 = vsel %vm5518_vm9, %v7541_v15, %v5515_v39  ;;  %v5531_v9 = vadd.f32 %v7543_v34, %v5530_v45  ;;  %7546 = vrcp.f32 %v11499_v47  ;;  %v12129_v39 = vld [vmem:[#allocation25_spill] sm:$0xff]  ;;  %vm5569_vm5 = vcmp.eq.f32.partialorder %v5568_v14, 8.507059e+37 }
 0x9bd   : > { %7548 = vrcp.f32 %v11514_v59  ;;  %v5788_v45 = vmul.f32 %v11492_v35, %v12118_v11 }
 0x9be   : > { %v5535_v51 = vsel %vm5534_vm14, %v7543_v34, %v5531_v9  ;;  %v12131_v9 = vld [vmem:[#allocation26_spill] sm:$0xff] }
 0x9bf   : > { %v5540_v53 = vsel %vm5537_vm15, %v5539_v5, %v5535_v51 }
 0x9c0   : > { %5745 = vperm.xlu1 %7361, %v4853_v6   ;;  %v5524_v6 = vsel %vm5521_vm10, %v5523_v31, %v5519_v22  ;;  %v5541_v20 = vmul.f32 %v11094_v48, %v5540_v53  ;;  %v5542_v48 = vmul.f32 %v12126_v27, %v5540_v53  ;;  %vm5580_vm10 = vweird.f32 %v11514_v59 }
 0x9c1   : > { %v5525_v56 = vmul.f32 %v11072_v19, %v5524_v6  ;;  %v7545_v28 = vpop.eup %7544  ;;  %v5526_v37 = vmul.f32 %v11083_v3, %v5524_v6  ;;  %v5571_v6 = vor.u32 1.1754944e-38, %v5570_v38  ;;  %v11564_v27 = vperm.slane %v11384_v43, 7 }
 0x9c2   : > { %v5544_v26 = vmul.f32 %v7545_v28, %v5346_v7  ;;  %vm5549_vm1 = vweird.f32 %v7545_v28  ;;  %v7547_v63 = vpop.eup %7546 }
 0x9c3   : > { %5882 = vperm.xlu0 %7363, %v5478_v21   ;;  %v11495_v21 = vpop.permute.xlu1 %5655  ;;  %vm5550_vm4 = vmor %vm5548_vm2, %vm5549_vm1  ;;  %v5560_v15 = vmul.f32 %v7547_v63, %v11499_v47  ;;  %vm5565_vm7 = vweird.f32 %v7547_v63 }
 0x9c4   : > { %vm5566_vm3 = vmor %vm5564_vm8, %vm5565_vm7  ;;  %v5789_v35 = vmul.f32 %v11495_v21, %v12120_v13 }
 0x9c8   : > { %5750 = vperm.xlu1 %7361, %v4854_v49   ;;  %v5545_v49 = vsub.f32 1.0, %v5544_v26 }
 0x9ca   : > { %v5546_v4 = vmul.f32 %v7545_v28, %v5545_v49 }
 0x9cb   : > { %5887 = vperm.xlu0 %7363, %v5493_v58   ;;  %v11504_v3 = vpop.permute.xlu1 %5660 }
 0x9cc   : > { %v5547_v55 = vadd.f32 %v7545_v28, %v5546_v4  ;;  %v12134_v4 = vld [vmem:[#allocation67_spill] sm:$0xff] }
 0x9ce   : > { %v5551_v30 = vsel %vm5550_vm4, %v7545_v28, %v5547_v55 }
 0x9d0   : > { %5755 = vperm.xlu1 %7361, %v4869_v18   ;;  %v5552_v18 = vand.u32 2147483647, %v5346_v7 }
 0x9d2   : > { %vm5553_vm6 = vcmp.eq.f32.partialorder %v5552_v18, 8.507059e+37  ;;  %v12135_v18 = vld [vmem:[#allocation28_spill] sm:$0xff] }
 0x9d3   : > { %5892 = vperm.xlu0 %7363, %v5494_v61   ;;  %v11511_v24 = vpop.permute.xlu1 %5665 }
 0x9d8   : > { %5760 = vperm.xlu1 %7361, %v4870_v60   ;;  %v5561_v60 = vsub.f32 1.0, %v5560_v15 }
 0x9db   : > { %5897 = vperm.xlu0 %7363, %v5509_v12   ;;  %v5562_v12 = vmul.f32 %v7547_v63, %v5561_v60  ;;  %v11526_v54 = vpop.permute.xlu1 %5670 }
 0x9dd   : > { %v5563_v29 = vadd.f32 %v7547_v63, %v5562_v12 }
 0x9df   : > { %v5567_v33 = vsel %vm5566_vm3, %v7547_v63, %v5563_v29  ;;  %v4629_v29 = vperm.slane %v11138_v16, 6 }
 0x9e0   : > { %v5572_v0 = vsel %vm5569_vm5, %v5571_v6, %v5567_v33  ;;  %v12140_v33 = vld [vmem:[#allocation70_spill] sm:$0xff] }
 0x9e1   : > { %vm4876_vm5 = vweird.f32 %v4629_v29 }
 0x9e3   : > { %5902 = vperm.xlu0 %7363, %v5510_v10   ;;  %v7549_v10 = vpop.eup %7548  ;;  %v11544_v44 = vpop.permute.xlu1 %5675 }
 0x9e4   : > { %v5576_v7 = vmul.f32 %v7549_v10, %v11514_v59  ;;  %vm5581_vm9 = vweird.f32 %v7549_v10 }
 0x9e5   : > { %v6046_v50 = vpop.permute.xlu2 %6045  ;;  %vm5582_vm11 = vmor %vm5580_vm10, %vm5581_vm9 }
 0x9eb   : > { %5907 = vperm.xlu0 %7363, %v5525_v56   ;;  %v11538_v56 = vperm.slane %v11384_v43, 6  ;;  %v11560_v13 = vpop.permute.xlu1 %5680 }
 0x9ed   : > { %v6048_v46 = vpop.permute.xlu2 %6047  ;;  %7550 = vrcp.f32 %v11538_v56  ;;  %vm5596_vm15 = vweird.f32 %v11538_v56 }
 0x9ee   : > { %7552 = vrcp.f32 %v11564_v27 }
 0x9ef   : > { %7554 = vrcp.f32 %v4629_v29 }
 0x9f3   : > { %5912 = vperm.xlu0 %7363, %v5526_v37   ;;  %v5577_v37 = vsub.f32 1.0, %v5576_v7  ;;  %v7551_v49 = vpop.eup %7550 }
 0x9f4   : > { %vm5597_vm14 = vweird.f32 %v7551_v49  ;;  %v7553_v60 = vpop.eup %7552 }
 0x9f5   : > { %v6044_v19 = vpop.permute.xlu0 %6043  ;;  %v6050_v32 = vpop.permute.xlu2 %6049  ;;  %v5578_v5 = vmul.f32 %v7549_v10, %v5577_v37  ;;  %vm5598_vm1 = vmor %vm5596_vm15, %vm5597_vm14  ;;  %vm5613_vm4 = vweird.f32 %v7553_v60  ;;  %v5618_v37 = vand.u32 2147483648, %v11564_v27 }
 0x9f6   : > { %7200 = vmatmul.msk.f32.vlgmr.msrb.gmra.mxu1 %vm4278_vm13, %v6044_v19  ;;  %v12133_v19 = vld [vmem:[#allocation27_spill] sm:$0xff] }
 0x9f7   : > { %v5579_v53 = vadd.f32 %v7549_v10, %v5578_v5 }
 0x9f9   : > { %v5583_v21 = vsel %vm5582_vm11, %v7549_v10, %v5579_v53  ;;  %v5792_v10 = vmul.f32 %v11526_v54, %v12131_v9 }
 0x9fb   : > { %5917 = vperm.xlu0 %7363, %v5541_v20   ;;  %v5586_v20 = vand.u32 2147483648, %v11514_v59 }
 0x9fd   : > { %v5636_v8 = vpop.permute.xlu0 %5635  ;;  %v6052_v22 = vpop.permute.xlu2 %6051  ;;  %v5587_v55 = vor.u32 1.1754944e-38, %v5586_v20 }
 0x9fe   : > { %v5785_v58 = vmul.f32 %v5636_v8, %v12110_v52  ;;  %7201 = vmatmul.msk.f32.gmra.mxu1 %vm4278_vm13, %v6046_v50  ;;  %v5555_v52 = vor.u32 1.1754944e-38, %v5554_v40  ;;  %v12132_v50 = vld [vmem:[#allocation9_spill] sm:$0xff]  ;;  %v5584_v8 = vand.u32 2147483647, %v11514_v59 }
 0x9ff   : > { %v5573_v51 = vmul.f32 %v12132_v50, %v5572_v0  ;;  %v12142_v50 = vld [vmem:[#allocation71_spill] sm:$0xff] }
 0xa00   : > { %7234 = vmatmul.msk.f32.gmra.mxu2 %vm4278_vm13, %v5785_v58  ;;  %v5556_v42 = vsel %vm5553_vm6, %v5555_v52, %v5551_v30  ;;  %v5592_v58 = vmul.f32 %v7551_v49, %v11538_v56  ;;  %vm5585_vm12 = vcmp.eq.f32.partialorder %v5584_v8, 8.507059e+37  ;;  %vm5612_vm6 = vweird.f32 %v11564_v27 }
 0xa01   : > { %v5557_v41 = vmul.f32 %v12128_v23, %v5556_v42  ;;  %v5558_v31 = vmul.f32 %v12130_v17, %v5556_v42  ;;  %v5588_v15 = vsel %vm5585_vm12, %v5587_v55, %v5583_v21  ;;  %v5602_v23 = vand.u32 2147483648, %v11538_v56  ;;  %vm5614_vm7 = vmor %vm5612_vm6, %vm5613_vm4 }
 0xa02   : > { %v5593_v52 = vsub.f32 1.0, %v5592_v58 }
 0xa03   : > { %5922 = vperm.xlu0 %7363, %v5542_v48   ;;  %v5790_v48 = vmul.f32 %v11504_v3, %v12127_v1  ;;  %v5791_v3 = vmul.f32 %v11511_v24, %v12129_v39 }
 0xa04   : > { %v5594_v43 = vmul.f32 %v7551_v49, %v5593_v52 }
 0xa05   : > { %v5853_v61 = vpop.permute.xlu0 %5852  ;;  %v6054_v26 = vpop.permute.xlu2 %6053 }
 0xa06   : > { %v5982_v36 = vmul.f32 %v5853_v61, %v12127_v1  ;;  %7202 = vmatmul.msk.f32.gmra.mxu1 %vm4278_vm13, %v6048_v46  ;;  %v5574_v46 = vmul.f32 %v12134_v4, %v5572_v0  ;;  %v12136_v61 = vld [vmem:[#allocation69_spill] sm:$0xff]  ;;  %v12144_v4 = vld [vmem:[#allocation72_spill] sm:$0xff] }
 0xa07   : > { %v5589_v59 = vmul.f32 %v12136_v61, %v5588_v15  ;;  %v12137_v1 = vld [vmem:[#allocation29_spill] sm:$0xff] }
 0xa08   : > { %7235 = vmatmul.msk.f32.gmra.mxu2 %vm4278_vm13, %v5786_v25  ;;  %6057 = vrot.lane.b32.xlu2 %v5982_v36, %s7570_s16  ;;  %v11574_v25 = vpop.permute.xlu1 %5685 }
 0xa09   : > { %v5795_v55 = vmul.f32 %v11574_v25, %v12137_v1  ;;  %v12147_v25 = vld [vmem:[#allocation34_spill] sm:$0xff] }
 0xa0b   : > { %5927 = vperm.xlu0 %7363, %v5557_v41   ;;  %v12138_v41 = vld [vmem:[#allocation68_spill] sm:$0xff] }
 0xa0c   : > { %v5590_v12 = vmul.f32 %v12138_v41, %v5588_v15  ;;  %v12149_v41 = vld [vmem:[#allocation35_spill] sm:$0xff] }
 0xa0d   : > { %v5858_v2 = vpop.permute.xlu0 %5857  ;;  %v6056_v63 = vpop.permute.xlu2 %6055 }
 0xa0e   : > { %v5983_v34 = vmul.f32 %v5858_v2, %v12129_v39  ;;  %7203 = vmatmul.msk.f32.gmra.mxu1 %vm4278_vm13, %v6050_v32  ;;  %v5595_v32 = vadd.f32 %v7551_v49, %v5594_v43  ;;  %v5600_v2 = vand.u32 2147483647, %v11538_v56  ;;  %v5603_v39 = vor.u32 1.1754944e-38, %v5602_v23 }
 0xa0f   : > { %v5793_v56 = vmul.f32 %v11544_v44, %v12133_v19 }
 0xa10   : > { %7236 = vmatmul.msk.f32.gmra.mxu2 %vm4278_vm13, %v5787_v62  ;;  %6059 = vrot.lane.b32.xlu2 %v5983_v34, %s7570_s16  ;;  %v5599_v24 = vsel %vm5598_vm1, %v7551_v49, %v5595_v32  ;;  %v5608_v62 = vmul.f32 %v7553_v60, %v11564_v27  ;;  %vm5601_vm2 = vcmp.eq.f32.partialorder %v5600_v2, 8.507059e+37  ;;  %v5691_v38 = vpop.permute.xlu1 %5690 }
 0xa12   : > { %v5609_v14 = vsub.f32 1.0, %v5608_v62 }
 0xa13   : > { %5932 = vperm.xlu0 %7363, %v5558_v31   ;;  %v5604_v31 = vsel %vm5601_vm2, %v5603_v39, %v5599_v24  ;;  %v12150_v39 = vld [vmem:[#allocation36_spill] sm:$0xff] }
 0xa14   : > { %v5605_v7 = vmul.f32 %v12140_v33, %v5604_v31  ;;  %v5610_v6 = vmul.f32 %v7553_v60, %v5609_v14 }
 0xa15   : > { %v5863_v57 = vpop.permute.xlu0 %5862 }
 0xa16   : > { %v5984_v28 = vmul.f32 %v5863_v57, %v12131_v9  ;;  %7204 = vmatmul.msk.f32.gmra.mxu1 %vm4278_vm13, %v6052_v22  ;;  %v12139_v22 = vld [vmem:[#allocation30_spill] sm:$0xff]  ;;  %v5611_v9 = vadd.f32 %v7553_v60, %v5610_v6  ;;  %v6397_v6 = vpop.f32.mrf.mxu2 }
 0xa17   : > { %v5796_v43 = vmul.f32 %v5691_v38, %v12139_v22 }
 0xa18   : > { %7237 = vmatmul.msk.f32.gmra.mxu2 %vm4278_vm13, %v5788_v45  ;;  %6061 = vrot.lane.b32.xlu2 %v5984_v28, %s7570_s16  ;;  %v12141_v45 = vld [vmem:[#allocation31_spill] sm:$0xff]  ;;  %v7555_v28 = vpop.eup %7554  ;;  %v5696_v0 = vpop.permute.xlu1 %5695  ;;  %v5615_v44 = vsel %vm5614_vm7, %v7553_v60, %v5611_v9 }
 0xa19   : > { %v4872_v5 = vmul.f32 %v7555_v28, %v4629_v29  ;;  %vm4877_vm3 = vweird.f32 %v7555_v28  ;;  %v5797_v60 = vmul.f32 %v5696_v0, %v12141_v45  ;;  %v12152_v0 = vld [vmem:[#allocation38_spill] sm:$0xff] }
 0xa1a   : > { %vm4878_vm9 = vmor %vm4876_vm5, %vm4877_vm3 }
 0xa1b   : > { %5937 = vperm.xlu0 %7363, %v5573_v51   ;;  %v5606_v51 = vmul.f32 %v12142_v50, %v5604_v31  ;;  %v4873_v20 = vsub.f32 1.0, %v4872_v5 }
 0xa1d   : > { %v5868_v11 = vpop.permute.xlu0 %5867  ;;  %v4874_v21 = vmul.f32 %v7555_v28, %v4873_v20 }
 0xa1e   : > { %v5985_v47 = vmul.f32 %v5868_v11, %v12133_v19  ;;  %7205 = vmatmul.msk.f32.gmra.mxu1 %vm4278_vm13, %v6054_v26  ;;  %v5616_v26 = vand.u32 2147483647, %v11564_v27  ;;  %v5619_v11 = vor.u32 1.1754944e-38, %v5618_v37  ;;  %v5794_v19 = vmul.f32 %v11560_v13, %v12135_v18 }
 0xa1f   : > { %v4875_v13 = vadd.f32 %v7555_v28, %v4874_v21  ;;  %v4882_v27 = vand.u32 2147483648, %v4629_v29 }
 0xa20   : > { %7238 = vmatmul.msk.f32.gmra.mxu2 %vm4278_vm13, %v5789_v35  ;;  %6063 = vrot.lane.b32.xlu2 %v5985_v47, %s7570_s16  ;;  %vm5617_vm8 = vcmp.eq.f32.partialorder %v5616_v26, 8.507059e+37  ;;  %v12143_v47 = vld [vmem:[#allocation32_spill] sm:$0xff]  ;;  %v5701_v8 = vpop.permute.xlu1 %5700  ;;  %v6400_v26 = vpop.f32.mrf.mxu2 }
 0xa21   : > { %v5620_v49 = vsel %vm5617_vm8, %v5619_v11, %v5615_v44  ;;  %v4879_v15 = vsel %vm4878_vm9, %v7555_v28, %v4875_v13  ;;  %v4883_v61 = vor.u32 1.1754944e-38, %v4882_v27  ;;  %v5798_v62 = vmul.f32 %v5701_v8, %v12143_v47 }
 0xa23   : > { %5942 = vperm.xlu0 %7363, %v5574_v46   ;;  %v5621_v46 = vmul.f32 %v12144_v4, %v5620_v49 }
 0xa25   : > { %v5873_v40 = vpop.permute.xlu0 %5872 }
 0xa26   : > { %v5986_v30 = vmul.f32 %v5873_v40, %v12135_v18  ;;  %7206 = vmatmul.msk.f32.gmra.mxu1 %vm4278_vm13, %v6056_v63  ;;  %v12145_v63 = vld [vmem:[#allocation33_spill] sm:$0xff] }
 0xa28   : > { %7239 = vmatmul.msk.f32.gmra.mxu2 %vm4278_vm13, %v5790_v48  ;;  %6065 = vrot.lane.b32.xlu2 %v5986_v30, %s7570_s16  ;;  %v12146_v48 = vld [vmem:[#allocation73_spill] sm:$0xff]  ;;  %v4880_v30 = vand.u32 2147483647, %v4629_v29  ;;  %v5706_v52 = vpop.permute.xlu1 %5705 }
 0xa29   : > { %v5622_v18 = vmul.f32 %v12146_v48, %v5620_v49  ;;  %v12153_v49 = vld [vmem:[#allocation39_spill] sm:$0xff]  ;;  %v12154_v48 = vld [vmem:[#allocation40_spill] sm:$0xff] }
 0xa2a   : > { %vm4881_vm10 = vcmp.eq.f32.partialorder %v4880_v30, 8.507059e+37 }
 0xa2b   : > { %5947 = vperm.xlu0 %7363, %v5589_v59  }
 0xa2d   : > { %v5878_v36 = vpop.permute.xlu0 %5877 }
 0xa2e   : > { %v5987_v42 = vmul.f32 %v5878_v36, %v12137_v1  ;;  %v12148_v1 = vld [vmem:[#allocation65_spill] sm:$0xff] }
 0xa30   : > { %7240 = vmatmul.msk.f32.gmra.mxu2 %vm4278_vm13, %v5791_v3  ;;  %6067 = vrot.lane.b32.xlu2 %v5987_v42, %s7570_s16  ;;  %v11616_v3 = vsel %vm4881_vm10, %v4883_v61, %v4879_v15  ;;  %v5711_v23 = vpop.permute.xlu1 %5710 }
 0xa31   : > { %v4885_v42 = vmul.f32 %v12148_v1, %v11616_v3  ;;  %v5800_v9 = vmul.f32 %v5711_v23, %v12147_v25 }
 0xa33   : > { %5952 = vperm.xlu0 %7363, %v5590_v12  }
 0xa35   : > { %v5883_v34 = vpop.permute.xlu0 %5882 }
 0xa36   : > { %v5988_v17 = vmul.f32 %v5883_v34, %v12139_v22  ;;  %v5799_v22 = vmul.f32 %v5706_v52, %v12145_v63 }
 0xa38   : > { %7241 = vmatmul.msk.f32.gmra.mxu2 %vm4278_vm13, %v5792_v10  ;;  %6069 = vrot.lane.b32.xlu2 %v5988_v17, %s7570_s16  ;;  %v5716_v29 = vpop.permute.xlu1 %5715  ;;  %v12151_v17 = vld [vmem:[#allocation37_spill] sm:$0xff] }
 0xa3b   : > { %5957 = vperm.xlu0 %7363, %v5605_v7   ;;  %v11639_v7 = vld [vmem:[%s11869_s4] ss:$0 sm:$0xff] }
 0xa3d   : > { %v5888_v57 = vpop.permute.xlu0 %5887 }
 0xa3e   : > { %v5989_v54 = vmul.f32 %v5888_v57, %v12141_v45  ;;  %v7264_v45 = vld [vmem:[%s7615_s23 + $0x4b] sm:$0xff] }
 0xa40   : > { %7242 = vmatmul.msk.f32.gmra.mxu2 %vm4278_vm13, %v5793_v56  ;;  %6071 = vrot.lane.b32.xlu2 %v5989_v54, %s7570_s16  ;;  %v5721_v14 = vpop.permute.xlu1 %5720 }
 0xa43   : > { %5962 = vperm.xlu0 %7363, %v5606_v51  }
 0xa45   : > { %v5893_v35 = vpop.permute.xlu0 %5892 }
 0xa46   : > { %v5990_v53 = vmul.f32 %v5893_v35, %v12143_v47  ;;  %v7265_v35 = vld [vmem:[%s7615_s23 + $0x53] sm:$0xff]  ;;  %v5801_v47 = vmul.f32 %v5716_v29, %v12149_v41 }
 0xa48   : > { %7243 = vmatmul.msk.f32.gmra.mxu2 %vm4278_vm13, %v5794_v19  ;;  %6073 = vrot.lane.b32.xlu2 %v5990_v53, %s7570_s16  ;;  %v5726_v5 = vpop.permute.xlu1 %5725 }
 0xa49   : > { %v5803_v1 = vmul.f32 %v5726_v5, %v12151_v17 }
 0xa4b   : > { %5967 = vperm.xlu0 %7363, %v5621_v46  }
 0xa4d   : > { %v5898_v58 = vpop.permute.xlu0 %5897 }
 0xa4e   : > { %v5991_v40 = vmul.f32 %v5898_v58, %v12145_v63 }
 0xa50   : > { %7244 = vmatmul.msk.f32.gmra.mxu2 %vm4278_vm13, %v5795_v55  ;;  %6075 = vrot.lane.b32.xlu2 %v5991_v40, %s7570_s16  ;;  %v7266_v55 = vld [vmem:[%s7615_s23 + $0x63] sm:$0xff]  ;;  %v5802_v40 = vmul.f32 %v5721_v14, %v12150_v39  ;;  %v5731_v13 = vpop.permute.xlu1 %5730 }
 0xa51   : > { %v5804_v29 = vmul.f32 %v5731_v13, %v12152_v0 }
 0xa53   : > { %5972 = vperm.xlu0 %7363, %v5622_v18  }
 0xa55   : > { %v5903_v59 = vpop.permute.xlu0 %5902 }
 0xa56   : > { %v5992_v36 = vmul.f32 %v5903_v59, %v12147_v25  ;;  %v11676_v59 = vperm.slane %v11138_v16, 7  ;;  %v7267_v25 = vld [vmem:[%s7615_s23 + $0x6b] sm:$0xff] }
 0xa58   : > { %7245 = vmatmul.msk.f32.gmra.mxu2 %vm4278_vm13, %v5796_v43  ;;  %6077 = vrot.lane.b32.xlu2 %v5992_v36, %s7570_s16  ;;  %7556 = vrcp.f32 %v11676_v59  ;;  %v5736_v23 = vpop.permute.xlu1 %5735  ;;  %vm4892_vm12 = vweird.f32 %v11676_v59 }
 0xa5b   : > { %5765 = vperm.xlu0 %7363, %v4885_v42  }
 0xa5d   : > { %v5908_v32 = vpop.permute.xlu0 %5907 }
 0xa5e   : > { %v5993_v12 = vmul.f32 %v5908_v32, %v12149_v41  ;;  %v12155_v32 = vld [vmem:[#allocation41_spill] sm:$0xff] }
 0xa60   : > { %7246 = vmatmul.msk.f32.gmra.mxu2 %vm4278_vm13, %v5797_v60  ;;  %6079 = vrot.lane.b32.xlu2 %v5993_v12, %s7570_s16  ;;  %v5741_v14 = vpop.permute.xlu1 %5740 }
 0xa62   : > { %v6058_v2 = vpop.permute.xlu2 %6057 }
 0xa63   : > { %7207 = vmatmul.msk.f32.gmra.mxu1 %vm4278_vm13, %v6058_v2 }
 0xa65   : > { %v5913_v24 = vpop.permute.xlu0 %5912 }
 0xa66   : > { %v5994_v34 = vmul.f32 %v5913_v24, %v12150_v39 }
 0xa68   : > { %7247 = vmatmul.msk.f32.gmra.mxu2 %vm4278_vm13, %v5798_v62  ;;  %6081 = vrot.lane.b32.xlu2 %v5994_v34, %s7570_s16  ;;  %v7268_v62 = vld [vmem:[%s7615_s23 + $0x7b] sm:$0xff]  ;;  %v7557_v34 = vpop.eup %7556 }
 0xa69   : > { %vm4893_vm11 = vweird.f32 %v7557_v34 }
 0xa6a   : > { %v6060_v10 = vpop.permute.xlu2 %6059  ;;  %vm4894_vm14 = vmor %vm4892_vm12, %vm4893_vm11 }
 0xa6b   : > { %7208 = vmatmul.msk.f32.gmra.mxu1 %vm4278_vm13, %v6060_v10 }
 0xa6d   : > { %v5918_v38 = vpop.permute.xlu0 %5917 }
 0xa6e   : > { %v5995_v31 = vmul.f32 %v5918_v38, %v12151_v17  ;;  %v12156_v38 = vld [vmem:[#allocation42_spill] sm:$0xff] }
 0xa70   : > { %7248 = vmatmul.msk.f32.gmra.mxu2 %vm4278_vm13, %v5799_v22  ;;  %6083 = vrot.lane.b32.xlu2 %v5995_v31, %s7570_s16  ;;  %v4888_v31 = vmul.f32 %v7557_v34, %v11676_v59 }
 0xa72   : > { %v6062_v33 = vpop.permute.xlu2 %6061 }
 0xa73   : > { %v6188_v57 = vpop.f32.mrf.mxu1  ;;  %7209 = vmatmul.msk.f32.gmra.mxu1 %vm4278_vm13, %v6062_v33 }
 0xa74   : > { %v6398_v56 = vadd.f32 %v6397_v6, %v6188_v57 }
 0xa75   : > { %v5923_v54 = vpop.permute.xlu0 %5922 }
 0xa76   : > { %v6497_v28 = vadd.f32 %v11639_v7, %v6398_v56  ;;  %v5996_v37 = vmul.f32 %v5923_v54, %v12152_v0 }
 0xa78   : > { %v6561_v50 = vmul.f32 %v7264_v45, %v6497_v28  ;;  %7249 = vmatmul.msk.f32.gmra.mxu2 %vm4278_vm13, %v5800_v9  ;;  %6085 = vrot.lane.b32.xlu2 %v5996_v37, %s7570_s16  ;;  %v7269_v45 = vld [vmem:[%s7615_s23 + $0x83] sm:$0xff]  ;;  %v4889_v9 = vsub.f32 1.0, %v4888_v31  ;;  %v5805_v28 = vmul.f32 %v5736_v23, %v12153_v49  ;;  %v12163_v23 = vld [vmem:[#allocation66_spill] sm:$0xff] }
 0xa79   : > { %v12157_v37 = vld [vmem:[#allocation43_spill] sm:$0xff] }
 0xa7a   : > { %6593 = vst.msk [vmem:[%s11650_s26] sm:$0xff] %vm257_vm0, %v6561_v50  ;;  %v6064_v51 = vpop.permute.xlu2 %6063 }
 0xa7b   : > { %v6191_v44 = vpop.f32.mrf.mxu1  ;;  %7210 = vmatmul.msk.f32.gmra.mxu1 %vm4278_vm13, %v6064_v51 }
 0xa7c   : > { %v6401_v11 = vadd.f32 %v6400_v26, %v6191_v44  ;;  %v4890_v26 = vmul.f32 %v7557_v34, %v4889_v9 }
 0xa7d   : > { %v5928_v19 = vpop.permute.xlu0 %5927 }
 0xa7e   : > { %v6498_v53 = vadd.f32 %v11639_v7, %v6401_v11  ;;  %v5997_v20 = vmul.f32 %v5928_v19, %v12153_v49  ;;  %v5746_v19 = vpop.permute.xlu1 %5745  ;;  %v4891_v49 = vadd.f32 %v7557_v34, %v4890_v26 }
 0xa80   : > { %v6562_v4 = vmul.f32 %v7265_v35, %v6498_v53  ;;  %7250 = vmatmul.msk.f32.gmra.mxu2 %vm4278_vm13, %v5801_v47  ;;  %6087 = vrot.lane.b32.xlu2 %v5997_v20, %s7570_s16  ;;  %v7270_v47 = vld [vmem:[%s7615_s23 + $0x93] sm:$0xff]  ;;  %v4898_v20 = vand.u32 2147483648, %v11676_v59  ;;  %v4895_v13 = vsel %vm4894_vm14, %v7557_v34, %v4891_v49 }
 0xa82   : > { %6594 = vst.msk [vmem:[%s11650_s26 + $0x8] sm:$0xff] %vm257_vm0, %v6562_v4  ;;  %v6066_v46 = vpop.permute.xlu2 %6065  ;;  %v5806_v4 = vmul.f32 %v5741_v14, %v12154_v48 }
 0xa83   : > { %v6194_v8 = vpop.f32.mrf.mxu1  ;;  %7211 = vmatmul.msk.f32.gmra.mxu1 %vm4278_vm13, %v6066_v46  ;;  %v6403_v21 = vpop.f32.mrf.mxu2 }
 0xa84   : > { %v6404_v58 = vadd.f32 %v6403_v21, %v6194_v8  ;;  %v12158_v8 = vld [vmem:[#allocation7_spill] sm:$0xff] }
 0xa85   : > { %v5933_v63 = vpop.permute.xlu0 %5932 }
 0xa86   : > { %v6499_v27 = vadd.f32 %v11639_v7, %v6404_v58  ;;  %v5998_v18 = vmul.f32 %v5933_v63, %v12154_v48  ;;  %v12159_v58 = vld [vmem:[#allocation64_spill] sm:$0xff]  ;;  %v4896_v63 = vand.u32 2147483647, %v11676_v59  ;;  %v4899_v48 = vor.u32 1.1754944e-38, %v4898_v20  ;;  %v12161_v59 = vld [vmem:[#allocation61_spill] sm:$0xff] }
 0xa88   : > { %v6563_v30 = vmul.f32 %v7266_v55, %v6499_v27  ;;  %7251 = vmatmul.msk.f32.gmra.mxu2 %vm4278_vm13, %v5802_v40  ;;  %6089 = vrot.lane.b32.xlu2 %v5998_v18, %s7570_s16  ;;  %v4886_v55 = vmul.f32 %v12159_v58, %v11616_v3  ;;  %vm4897_vm15 = vcmp.eq.f32.partialorder %v4896_v63, 8.507059e+37 }
 0xa89   : > { %v4900_v3 = vsel %vm4897_vm15, %v4899_v48, %v4895_v13 }
 0xa8a   : > { %6595 = vst.msk [vmem:[%s11650_s26 + $0x10] sm:$0xff] %vm257_vm0, %v6563_v30  ;;  %v6068_v15 = vpop.permute.xlu2 %6067  ;;  %v5807_v30 = vmul.f32 %v5746_v19, %v12155_v32 }
 0xa8b   : > { %v6197_v52 = vpop.f32.mrf.mxu1  ;;  %7212 = vmatmul.msk.f32.gmra.mxu1 %vm4278_vm13, %v6068_v15  ;;  %v6406_v61 = vpop.f32.mrf.mxu2  ;;  %v12160_v15 = vld [vmem:[#allocation12_spill] sm:$0xff] }
 0xa8c   : > { %v6407_v43 = vadd.f32 %v6406_v61, %v6197_v52  ;;  %v5751_v61 = vpop.permute.xlu1 %5750 }
 0xa8d   : > { %v5938_v36 = vpop.permute.xlu0 %5937 }
 0xa8e   : > { %v6500_v42 = vadd.f32 %v11639_v7, %v6407_v43  ;;  %v5999_v60 = vmul.f32 %v5938_v36, %v12155_v32  ;;  %v4901_v43 = vmul.f32 %v12161_v59, %v4900_v3  ;;  %v4902_v32 = vmul.f32 %v12163_v23, %v4900_v3 }
 0xa90   : > { %v6564_v41 = vmul.f32 %v7267_v25, %v6500_v42  ;;  %7252 = vmatmul.msk.f32.gmra.mxu2 %vm4278_vm13, %v5803_v1  ;;  %6091 = vrot.lane.b32.xlu2 %v5999_v60, %s7570_s16  ;;  %v5808_v1 = vmul.f32 %v5751_v61, %v12156_v38  ;;  %v12162_v42 = vld [vmem:[#allocation3_spill] sm:$0xff] }
 0xa92   : > { %6596 = vst.msk [vmem:[%s11650_s26 + $0x18] sm:$0xff] %vm257_vm0, %v6564_v41  ;;  %v6070_v16 = vpop.permute.xlu2 %6069 }
 0xa93   : > { %v6200_v12 = vpop.f32.mrf.mxu1  ;;  %7213 = vmatmul.msk.f32.gmra.mxu1 %vm4278_vm13, %v6070_v16  ;;  %v6409_v2 = vpop.f32.mrf.mxu2 }
 0xa94   : > { %v6410_v24 = vadd.f32 %v6409_v2, %v6200_v12  ;;  %v5756_v41 = vpop.permute.xlu1 %5755 }
 0xa95   : > { %v5943_v39 = vpop.permute.xlu0 %5942 }
 0xa96   : > { %v6501_v10 = vadd.f32 %v11639_v7, %v6410_v24  ;;  %v6000_v22 = vmul.f32 %v5943_v39, %v12156_v38  ;;  %v5809_v24 = vmul.f32 %v5756_v41, %v12157_v37 }
 0xa98   : > { %v6565_v17 = vmul.f32 %v7268_v62, %v6501_v10  ;;  %7253 = vmatmul.msk.f32.gmra.mxu2 %vm4278_vm13, %v5804_v29  ;;  %6093 = vrot.lane.b32.xlu2 %v6000_v22, %s7570_s16  ;;  %v12164_v62 = vld [vmem:[#allocation8_spill] sm:$0xff] }
 0xa9a   : > { %6597 = vst.msk [vmem:[%s11650_s26 + $0x20] sm:$0xff] %vm257_vm0, %v6565_v17  ;;  %v6072_v33 = vpop.permute.xlu2 %6071  ;;  %v12165_v17 = vld [vmem:[#allocation13_spill] sm:$0xff] }
 0xa9b   : > { %v6203_v6 = vpop.f32.mrf.mxu1  ;;  %7214 = vmatmul.msk.f32.gmra.mxu1 %vm4278_vm13, %v6072_v33  ;;  %v6412_v57 = vpop.f32.mrf.mxu2 }
 0xa9c   : > { %v6413_v56 = vadd.f32 %v6412_v57, %v6203_v6  ;;  %v5761_v29 = vpop.permute.xlu1 %5760 }
 0xa9d   : > { %v5948_v54 = vpop.permute.xlu0 %5947  ;;  %v5810_v22 = vmul.f32 %v5761_v29, %v12158_v8  ;;  %v7278_v29 = vld [vmem:[%s7615_s23 + $0xf3] sm:$0xff] }
 0xa9e   : > { %v6502_v0 = vadd.f32 %v11639_v7, %v6413_v56  ;;  %v6001_v50 = vmul.f32 %v5948_v54, %v12157_v37  ;;  %v7271_v37 = vld [vmem:[%s7615_s23 + $0x9b] sm:$0xff] }
 0xaa0   : > { %v6566_v51 = vmul.f32 %v7269_v45, %v6502_v0  ;;  %7254 = vmatmul.msk.f32.gmra.mxu2 %vm4278_vm13, %v5805_v28  ;;  %6095 = vrot.lane.b32.xlu2 %v6001_v50, %s7570_s16 }
 0xaa2   : > { %6598 = vst.msk [vmem:[%s11650_s26 + $0x28] sm:$0xff] %vm257_vm0, %v6566_v51  ;;  %v6074_v44 = vpop.permute.xlu2 %6073 }
 0xaa3   : > { %v6206_v5 = vpop.f32.mrf.mxu1  ;;  %7215 = vmatmul.msk.f32.gmra.mxu1 %vm4278_vm13, %v6074_v44  ;;  %v6415_v11 = vpop.f32.mrf.mxu2 }
 0xaa4   : > { %v6416_v35 = vadd.f32 %v6415_v11, %v6206_v5  ;;  %v7272_v11 = vld [vmem:[%s7615_s23 + $0xab] sm:$0xff] }
 0xaa5   : > { %v5953_v53 = vpop.permute.xlu0 %5952 }
 0xaa6   : > { %v6503_v46 = vadd.f32 %v11639_v7, %v6416_v35  ;;  %v6002_v21 = vmul.f32 %v5953_v53, %v12158_v8 }
 0xaa8   : > { %v6567_v40 = vmul.f32 %v7270_v47, %v6503_v46  ;;  %7255 = vmatmul.msk.f32.gmra.mxu2 %vm4278_vm13, %v5806_v4  ;;  %5770 = vperm.xlu2 %7362, %v4886_v55   ;;  %v7273_v4 = vld [vmem:[%s7615_s23 + $0xb3] sm:$0xff] }
 0xaa9   : > { %6097 = vrot.lane.b32.xlu1 %v6002_v21, %s7570_s16 }
 0xaaa   : > { %6599 = vst.msk [vmem:[%s11650_s26 + $0x30] sm:$0xff] %vm257_vm0, %v6567_v40  ;;  %v6076_v27 = vpop.permute.xlu2 %6075  ;;  %v7274_v40 = vld [vmem:[%s7615_s23 + $0xc3] sm:$0xff] }
 0xaab   : > { %7216 = vmatmul.msk.f32.gmra.mxu1 %vm4278_vm13, %v6076_v27  ;;  %v6418_v16 = vpop.f32.mrf.mxu2 }
 0xaad   : > { %v5958_v18 = vpop.permute.xlu0 %5957 }
 0xaae   : > { %v6003_v52 = vmul.f32 %v5958_v18, %v12160_v15 }
 0xab0   : > { %7256 = vmatmul.msk.f32.gmra.mxu2 %vm4278_vm13, %v5807_v30  ;;  %6099 = vrot.lane.b32.xlu0 %v6003_v52, %s7570_s16 }
 0xab1   : > { %5775 = vperm.xlu1 %7361, %v4901_v43  }
 0xab2   : > { %v6078_v25 = vpop.permute.xlu2 %6077 }
 0xab3   : > { %7217 = vmatmul.msk.f32.gmra.mxu1 %vm4278_vm13, %v6078_v25  ;;  %v6421_v10 = vpop.f32.mrf.mxu2 }
 0xab5   : > { %v5963_v36 = vpop.permute.xlu0 %5962 }
 0xab6   : > { %v6004_v60 = vmul.f32 %v5963_v36, %v12162_v42 }
 0xab8   : > { %7257 = vmatmul.msk.f32.gmra.mxu2 %vm4278_vm13, %v5808_v1  ;;  %5780 = vperm.xlu0 %7363, %v4902_v32  }
 0xab9   : > { %6101 = vrot.lane.b32.xlu2 %v6004_v60, %s7570_s16  ;;  %v7276_v60 = vld [vmem:[%s7615_s23 + $0xdb] sm:$0xff] }
 0xaba   : > { %v6080_v12 = vpop.permute.xlu2 %6079 }
 0xabb   : > { %7218 = vmatmul.msk.f32.gmra.mxu1 %vm4278_vm13, %v6080_v12  ;;  %v6424_v6 = vpop.f32.mrf.mxu2 }
 0xabd   : > { %v5968_v2 = vpop.permute.xlu0 %5967 }
 0xabe   : > { %v6005_v39 = vmul.f32 %v5968_v2, %v12164_v62 }
 0xac0   : > { %7258 = vmatmul.msk.f32.gmra.mxu2 %vm4278_vm13, %v5809_v24  ;;  %6103 = vrot.lane.b32.xlu1 %v6005_v39, %s7570_s16 }
 0xac2   : > { %v6082_v34 = vpop.permute.xlu2 %6081 }
 0xac3   : > { %7219 = vmatmul.msk.f32.gmra.mxu1 %vm4278_vm13, %v6082_v34  ;;  %v6427_v45 = vpop.f32.mrf.mxu2 }
 0xac5   : > { %v5973_v38 = vpop.permute.xlu0 %5972 }
 0xac6   : > { %v6006_v31 = vmul.f32 %v5973_v38, %v12165_v17 }
 0xac8   : > { %7259 = vmatmul.msk.f32.gmra.mxu2 %vm4278_vm13, %v5810_v22  ;;  %6105 = vrot.lane.b32.xlu2 %v6006_v31, %s7570_s16 }
 0xaca   : > { %v6084_v14 = vpop.permute.xlu2 %6083 }
 0xacb   : > { %7220 = vmatmul.msk.f32.gmra.mxu1 %vm4278_vm13, %v6084_v14  ;;  %v6430_v0 = vpop.f32.mrf.mxu2 }
 0xacd   : > { %v5766_v33 = vpop.permute.xlu0 %5765 }
 0xace   : > { %v5811_v57 = vmul.f32 %v5766_v33, %v12160_v15  ;;  %v7275_v15 = vld [vmem:[%s7615_s23 + $0xcb] sm:$0xff] }
 0xad0   : > { %7260 = vmatmul.msk.f32.gmra.mxu2 %vm4278_vm13, %v5811_v57 }
 0xad2   : > { %v6086_v56 = vpop.permute.xlu2 %6085 }
 0xad3   : > { %7221 = vmatmul.msk.f32.gmra.mxu1 %vm4278_vm13, %v6086_v56  ;;  %v6433_v47 = vpop.f32.mrf.mxu2 }
 0xada   : > { %v6088_v54 = vpop.permute.xlu2 %6087 }
 0xadb   : > { %7222 = vmatmul.msk.f32.gmra.mxu1 %vm4278_vm13, %v6088_v54  ;;  %v6436_v58 = vpop.f32.mrf.mxu2 }
 0xae0   : > { %v6209_v9 = vpop.f32.mrf.mxu1 }
 0xae1   : > { %v6419_v28 = vadd.f32 %v6418_v16, %v6209_v9 }
 0xae2   : > { %v6090_v50 = vpop.permute.xlu2 %6089 }
 0xae3   : > { %v6504_v51 = vadd.f32 %v11639_v7, %v6419_v28  ;;  %7223 = vmatmul.msk.f32.gmra.mxu1 %vm4278_vm13, %v6090_v50  ;;  %v6439_v3 = vpop.f32.mrf.mxu2  ;;  %v7280_v50 = vld [vmem:[%s7615_s23 + $0x10b] sm:$0xff] }
 0xae5   : > { %v6568_v26 = vmul.f32 %v7271_v37, %v6504_v51 }
 0xae7   : > { %6600 = vst.msk [vmem:[%s11650_s26 + $0x38] sm:$0xff] %vm257_vm0, %v6568_v26 }
 0xae8   : > { %v6212_v44 = vpop.f32.mrf.mxu1 }
 0xae9   : > { %v6422_v5 = vadd.f32 %v6421_v10, %v6212_v44 }
 0xaea   : > { %v6092_v35 = vpop.permute.xlu2 %6091 }
 0xaeb   : > { %v6505_v19 = vadd.f32 %v11639_v7, %v6422_v5  ;;  %7224 = vmatmul.msk.f32.gmra.mxu1 %vm4278_vm13, %v6092_v35  ;;  %v6442_v1 = vpop.f32.mrf.mxu2 }
 0xaed   : > { %v6569_v53 = vmul.f32 %v7272_v11, %v6505_v19 }
 0xaef   : > { %6601 = vst.msk [vmem:[%s11650_s26 + $0x40] sm:$0xff] %vm257_vm0, %v6569_v53 }
 0xaf0   : > { %v6215_v49 = vpop.f32.mrf.mxu1 }
 0xaf1   : > { %v6425_v20 = vadd.f32 %v6424_v6, %v6215_v49  ;;  %v7279_v6 = vld [vmem:[%s7615_s23 + $0xfb] sm:$0xff] }
 0xaf2   : > { %v6094_v46 = vpop.permute.xlu2 %6093 }
 0xaf3   : > { %v6506_v8 = vadd.f32 %v11639_v7, %v6425_v20  ;;  %7225 = vmatmul.msk.f32.gmra.mxu1 %vm4278_vm13, %v6094_v46  ;;  %v6445_v2 = vpop.f32.mrf.mxu2  ;;  %v7282_v46 = vld [vmem:[%s7615_s23 + $0x123] sm:$0xff] }
 0xaf5   : > { %v6570_v21 = vmul.f32 %v7273_v4, %v6506_v8 }
 0xaf7   : > { %6602 = vst.msk [vmem:[%s11650_s26 + $0x48] sm:$0xff] %vm257_vm0, %v6570_v21 }
 0xaf8   : > { %v6218_v55 = vpop.f32.mrf.mxu1 }
 0xaf9   : > { %v6428_v63 = vadd.f32 %v6427_v45, %v6218_v55 }
 0xafa   : > { %v6096_v13 = vpop.permute.xlu2 %6095 }
 0xafb   : > { %v6507_v27 = vadd.f32 %v11639_v7, %v6428_v63  ;;  %7226 = vmatmul.msk.f32.gmra.mxu1 %vm4278_vm13, %v6096_v13  ;;  %v6448_v31 = vpop.f32.mrf.mxu2  ;;  %v7283_v13 = vld [vmem:[%s7615_s23 + $0x12b] sm:$0xff] }
 0xafd   : > { %v6571_v48 = vmul.f32 %v7274_v40, %v6507_v27 }
 0xaff   : > { %6603 = vst.msk [vmem:[%s11650_s26 + $0x50] sm:$0xff] %vm257_vm0, %v6571_v48 }
 0xb00   : > { %v6221_v18 = vpop.f32.mrf.mxu1 }
 0xb01   : > { %v6431_v30 = vadd.f32 %v6430_v0, %v6221_v18 }
 0xb02   : > { %v5771_v52 = vpop.permute.xlu2 %5770 }
 0xb03   : > { %v6508_v61 = vadd.f32 %v11639_v7, %v6431_v30  ;;  %v5812_v59 = vmul.f32 %v5771_v52, %v12162_v42  ;;  %v7277_v42 = vld [vmem:[%s7615_s23 + $0xe3] sm:$0xff]  ;;  %v6451_v28 = vpop.f32.mrf.mxu2 }
 0xb05   : > { %v6572_v43 = vmul.f32 %v7275_v15, %v6508_v61  ;;  %7261 = vmatmul.msk.f32.gmra.mxu2 %vm4278_vm13, %v5812_v59  ;;  %v7284_v15 = vld [vmem:[%s7615_s23 + $0x13b] sm:$0xff] }
 0xb07   : > { %6604 = vst.msk [vmem:[%s11650_s26 + $0x58] sm:$0xff] %vm257_vm0, %v6572_v43 }
 0xb08   : > { %v6224_v25 = vpop.f32.mrf.mxu1 }
 0xb09   : > { %v6434_v36 = vadd.f32 %v6433_v47, %v6224_v25  ;;  %v7281_v47 = vld [vmem:[%s7615_s23 + $0x113] sm:$0xff] }
 0xb0b   : > { %v6509_v23 = vadd.f32 %v11639_v7, %v6434_v36  ;;  %v6454_v19 = vpop.f32.mrf.mxu2  ;;  %v7285_v36 = vld [vmem:[%s7615_s23 + $0x143] sm:$0xff] }
 0xb0d   : > { %v6573_v32 = vmul.f32 %v7276_v60, %v6509_v23 }
 0xb0f   : > { %6605 = vst.msk [vmem:[%s11650_s26 + $0x60] sm:$0xff] %vm257_vm0, %v6573_v32 }
 0xb10   : > { %v6227_v41 = vpop.f32.mrf.mxu1 }
 0xb11   : > { %v6437_v16 = vadd.f32 %v6436_v58, %v6227_v41 }
 0xb13   : > { %v6510_v12 = vadd.f32 %v11639_v7, %v6437_v16  ;;  %v6102_v26 = vpop.permute.xlu2 %6101  ;;  %v6457_v58 = vpop.f32.mrf.mxu2  ;;  %v7286_v16 = vld [vmem:[%s7615_s23 + $0x153] sm:$0xff] }
 0xb15   : > { %v6574_v24 = vmul.f32 %v7277_v42, %v6510_v12 }
 0xb17   : > { %6606 = vst.msk [vmem:[%s11650_s26 + $0x68] sm:$0xff] %vm257_vm0, %v6574_v24 }
 0xb18   : > { %v6230_v39 = vpop.f32.mrf.mxu1 }
 0xb19   : > { %v6440_v34 = vadd.f32 %v6439_v3, %v6230_v39  ;;  %v7287_v39 = vld [vmem:[%s7615_s23 + $0x15b] sm:$0xff] }
 0xb1b   : > { %v6511_v10 = vadd.f32 %v11639_v7, %v6440_v34  ;;  %v6098_v38 = vpop.permute.xlu1 %6097  ;;  %v6460_v3 = vpop.f32.mrf.mxu2 }
 0xb1c   : > { %7227 = vmatmul.msk.f32.gmra.mxu1 %vm4278_vm13, %v6098_v38 }
 0xb1d   : > { %v6575_v22 = vmul.f32 %v7278_v29, %v6511_v10 }
 0xb1f   : > { %6607 = vst.msk [vmem:[%s11650_s26 + $0x70] sm:$0xff] %vm257_vm0, %v6575_v22 }
 0xb20   : > { %v6233_v14 = vpop.f32.mrf.mxu1 }
 0xb21   : > { %v6443_v33 = vadd.f32 %v6442_v1, %v6233_v14 }
 0xb22   : > { %v6100_v57 = vpop.permute.xlu0 %6099  ;;  %v6106_v8 = vpop.permute.xlu2 %6105 }
 0xb23   : > { %v6512_v56 = vadd.f32 %v11639_v7, %v6443_v33  ;;  %v5776_v45 = vpop.permute.xlu1 %5775  ;;  %v6463_v59 = vpop.f32.mrf.mxu2 }
 0xb24   : > { %v5813_v54 = vmul.f32 %v5776_v45, %v12164_v62  ;;  %7228 = vmatmul.msk.f32.gmra.mxu1 %vm4278_vm13, %v6100_v57  ;;  %v7289_v45 = vld [vmem:[%s7615_s23 + $0x173] sm:$0xff] }
 0xb25   : > { %v6576_v9 = vmul.f32 %v7279_v6, %v6512_v56 }
 0xb26   : > { %7262 = vmatmul.msk.f32.gmra.mxu2 %vm4278_vm13, %v5813_v54 }
 0xb27   : > { %6608 = vst.msk [vmem:[%s11650_s26 + $0x78] sm:$0xff] %vm257_vm0, %v6576_v9 }
 0xb28   : > { %v6236_v0 = vpop.f32.mrf.mxu1 }
 0xb29   : > { %v6446_v37 = vadd.f32 %v6445_v2, %v6236_v0 }
 0xb2a   : > { %v5781_v51 = vpop.permute.xlu0 %5780 }
 0xb2b   : > { %v6513_v44 = vadd.f32 %v11639_v7, %v6446_v37  ;;  %v5814_v62 = vmul.f32 %v5781_v51, %v12165_v17  ;;  %v6466_v41 = vpop.f32.mrf.mxu2 }
 0xb2c   : > { %7229 = vmatmul.msk.f32.gmra.mxu1 %vm4278_vm13, %v6102_v26 }
 0xb2d   : > { %v6577_v5 = vmul.f32 %v7280_v50, %v6513_v44  ;;  %v7290_v50 = vld [vmem:[%s7615_s23 + $0x183] sm:$0xff] }
 0xb2e   : > { %7263 = vmatmul.msk.f32.gmra.mxu2 %vm4278_vm13, %v5814_v62 }
 0xb2f   : > { %6609 = vst.msk [vmem:[%s11650_s26 + $0x80] sm:$0xff] %vm257_vm0, %v6577_v5 }
 0xb30   : > { %v6239_v11 = vpop.f32.mrf.mxu1 }
 0xb31   : > { %v6449_v35 = vadd.f32 %v6448_v31, %v6239_v11  ;;  %v7288_v31 = vld [vmem:[%s7615_s23 + $0x16b] sm:$0xff] }
 0xb32   : > { %v6104_v53 = vpop.permute.xlu1 %6103  ;;  %v7291_v11 = vld [vmem:[%s7615_s23 + $0x18b] sm:$0xff] }
 0xb33   : > { %v6514_v49 = vadd.f32 %v11639_v7, %v6449_v35  ;;  %v6469_v29 = vpop.f32.mrf.mxu2 }
 0xb34   : > { %7230 = vmatmul.msk.f32.gmra.mxu1 %vm4278_vm13, %v6104_v53 }
 0xb35   : > { %v6578_v17 = vmul.f32 %v7281_v47, %v6514_v49 }
 0xb37   : > { %6610 = vst.msk [vmem:[%s11650_s26 + $0x88] sm:$0xff] %vm257_vm0, %v6578_v17  ;;  %v7292_v17 = vld [vmem:[%s7615_s23 + $0x19b] sm:$0xff] }
 0xb38   : > { %v6242_v20 = vpop.f32.mrf.mxu1 }
 0xb39   : > { %v6452_v4 = vadd.f32 %v6451_v28, %v6242_v20 }
 0xb3b   : > { %v6515_v21 = vadd.f32 %v11639_v7, %v6452_v4  ;;  %v6472_v6 = vpop.f32.mrf.mxu2 }
 0xb3c   : > { %7231 = vmatmul.msk.f32.gmra.mxu1 %vm4278_vm13, %v6106_v8 }
 0xb3d   : > { %v6579_v55 = vmul.f32 %v7282_v46, %v6515_v21 }
 0xb3f   : > { %6611 = vst.msk [vmem:[%s11650_s26 + $0x90] sm:$0xff] %vm257_vm0, %v6579_v55 }
 0xb40   : > { %v6245_v63 = vpop.f32.mrf.mxu1 }
 0xb41   : > { %v6455_v40 = vadd.f32 %v6454_v19, %v6245_v63 }
 0xb43   : > { %v6516_v27 = vadd.f32 %v11639_v7, %v6455_v40  ;;  %v6475_v28 = vpop.f32.mrf.mxu2 }
 0xb45   : > { %v6580_v48 = vmul.f32 %v7283_v13, %v6516_v27 }
 0xb47   : > { %6612 = vst.msk [vmem:[%s11650_s26 + $0x98] sm:$0xff] %vm257_vm0, %v6580_v48  ;;  %v7294_v48 = vld [vmem:[%s7615_s23 + $0x1b3] sm:$0xff] }
 0xb48   : > { %v6248_v18 = vpop.f32.mrf.mxu1 }
 0xb49   : > { %v6458_v30 = vadd.f32 %v6457_v58, %v6248_v18  ;;  %v7293_v58 = vld [vmem:[%s7615_s23 + $0x1a3] sm:$0xff] }
 0xb4b   : > { %v6517_v52 = vadd.f32 %v11639_v7, %v6458_v30  ;;  %v6478_v44 = vpop.f32.mrf.mxu2 }
 0xb4d   : > { %v6581_v61 = vmul.f32 %v7284_v15, %v6517_v52 }
 0xb4f   : > { %6613 = vst.msk [vmem:[%s11650_s26 + $0xa0] sm:$0xff] %vm257_vm0, %v6581_v61  ;;  %v7295_v61 = vld [vmem:[%s7615_s23 + $0x1bb] sm:$0xff] }
 0xb50   : > { %v6251_v43 = vpop.f32.mrf.mxu1 }
 0xb51   : > { %v6461_v25 = vadd.f32 %v6460_v3, %v6251_v43 }
 0xb53   : > { %v6518_v1 = vadd.f32 %v11639_v7, %v6461_v25  ;;  %v6481_v47 = vpop.f32.mrf.mxu2 }
 0xb55   : > { %v6582_v60 = vmul.f32 %v7285_v36, %v6518_v1 }
 0xb57   : > { %6614 = vst.msk [vmem:[%s11650_s26 + $0xa8] sm:$0xff] %vm257_vm0, %v6582_v60 }
 0xb58   : > { %v6254_v23 = vpop.f32.mrf.mxu1 }
 0xb59   : > { %v6464_v32 = vadd.f32 %v6463_v59, %v6254_v23 }
 0xb5b   : > { %v6519_v42 = vadd.f32 %v11639_v7, %v6464_v32 }
 0xb5d   : > { %v6583_v12 = vmul.f32 %v7286_v16, %v6519_v42 }
 0xb5f   : > { %6615 = vst.msk [vmem:[%s11650_s26 + $0xb0] sm:$0xff] %vm257_vm0, %v6583_v12 }
 0xb60   : > { %v6257_v2 = vpop.f32.mrf.mxu1 }
 0xb61   : > { %v6467_v24 = vadd.f32 %v6466_v41, %v6257_v2 }
 0xb63   : > { %v6520_v34 = vadd.f32 %v11639_v7, %v6467_v24 }
 0xb65   : > { %v6584_v10 = vmul.f32 %v7287_v39, %v6520_v34 }
 0xb67   : > { %6616 = vst.msk [vmem:[%s11650_s26 + $0xb8] sm:$0xff] %vm257_vm0, %v6584_v10 }
 0xb68   : > { %v6260_v38 = vpop.f32.mrf.mxu1 }
 0xb69   : > { %v6470_v22 = vadd.f32 %v6469_v29, %v6260_v38 }
 0xb6b   : > { %v6521_v14 = vadd.f32 %v11639_v7, %v6470_v22 }
 0xb6d   : > { %v6585_v33 = vmul.f32 %v7288_v31, %v6521_v14 }
 0xb6f   : > { %6617 = vst.msk [vmem:[%s11650_s26 + $0xc0] sm:$0xff] %vm257_vm0, %v6585_v33 }
 0xb70   : > { %v6263_v57 = vpop.f32.mrf.mxu1 }
 0xb71   : > { %v6473_v56 = vadd.f32 %v6472_v6, %v6263_v57 }
 0xb73   : > { %v6522_v54 = vadd.f32 %v11639_v7, %v6473_v56 }
 0xb75   : > { %v6586_v9 = vmul.f32 %v7289_v45, %v6522_v54 }
 0xb77   : > { %6618 = vst.msk [vmem:[%s11650_s26 + $0xc8] sm:$0xff] %vm257_vm0, %v6586_v9 }
 0xb78   : > { %v6266_v0 = vpop.f32.mrf.mxu1 }
 0xb79   : > { %v6476_v37 = vadd.f32 %v6475_v28, %v6266_v0 }
 0xb7b   : > { %v6523_v51 = vadd.f32 %v11639_v7, %v6476_v37 }
 0xb7d   : > { %v6587_v26 = vmul.f32 %v7290_v50, %v6523_v51 }
 0xb7f   : > { %6619 = vst.msk [vmem:[%s11650_s26 + $0xd0] sm:$0xff] %vm257_vm0, %v6587_v26 }
 0xb88   : > { %v6484_v46 = vpop.f32.mrf.mxu2 }
 0xb99   : > { %v6269_v62 = vpop.f32.mrf.mxu1 }
 0xb9a   : > { %v6479_v5 = vadd.f32 %v6478_v44, %v6269_v62 }
 0xb9c   : > { %v6524_v35 = vadd.f32 %v11639_v7, %v6479_v5 }
 0xb9e   : > { %v6588_v19 = vmul.f32 %v7291_v11, %v6524_v35 }
 0xba0   : > { %6620 = vst.msk [vmem:[%s11650_s26 + $0xd8] sm:$0xff] %vm257_vm0, %v6588_v19 }
 0xba1   : > { %v6272_v53 = vpop.f32.mrf.mxu1 }
 0xba2   : > { %v6482_v49 = vadd.f32 %v6481_v47, %v6272_v53 }
 0xba4   : > { %v6525_v20 = vadd.f32 %v11639_v7, %v6482_v49 }
 0xba6   : > { %v6589_v4 = vmul.f32 %v7292_v17, %v6525_v20 }
 0xba8   : > { %6621 = vst.msk [vmem:[%s11650_s26 + $0xe0] sm:$0xff] %vm257_vm0, %v6589_v4 }
 0xba9   : > { %v6275_v8 = vpop.f32.mrf.mxu1  ;;  %v6487_v40 = vpop.f32.mrf.mxu2 }
 0xbaa   : > { %v6485_v21 = vadd.f32 %v6484_v46, %v6275_v8 }
 0xbac   : > { %v6526_v55 = vadd.f32 %v11639_v7, %v6485_v21 }
 0xbae   : > { %v6590_v63 = vmul.f32 %v7293_v58, %v6526_v55 }
 0xbb0   : > { %6622 = vst.msk [vmem:[%s11650_s26 + $0xe8] sm:$0xff] %vm257_vm0, %v6590_v63 }
 0xbb1   : > { %v6278_v13 = vpop.f32.mrf.mxu1  ;;  %v6490_v30 = vpop.f32.mrf.mxu2 }
 0xbb2   : > { %v6488_v27 = vadd.f32 %v6487_v40, %v6278_v13 }
 0xbb4   : > { %v6527_v3 = vadd.f32 %v11639_v7, %v6488_v27 }
 0xbb6   : > { %v6591_v18 = vmul.f32 %v7294_v48, %v6527_v3 }
 0xbb8   : > { %6623 = vst.msk [vmem:[%s11650_s26 + $0xf0] sm:$0xff] %vm257_vm0, %v6591_v18 }
 0xbb9   : > { %v6281_v15 = vpop.f32.mrf.mxu1 }
 0xbba   : > { %v6491_v52 = vadd.f32 %v6490_v30, %v6281_v15 }
 0xbbc   : > { %v6528_v59 = vadd.f32 %v11639_v7, %v6491_v52 }
 0xbbe   : > { %v6592_v43 = vmul.f32 %v7295_v61, %v6528_v59 }
 0xbc0   : > { %6624 = vst.msk [vmem:[%s11650_s26 + $0xf8] sm:$0xff] %vm257_vm0, %v6592_v43 }
 0xbc1 PF: > { %s15_s18 = sadd.s32 1, %s7564_s18  }
 0xbc2   : > { %p12_p4 = scmp.ge.s32.totalorder %s15_s18, 4  }
 0xbc4   :  { %14 = sbr.rel (!%p12_p4) target bundleno = 1 (0x1), region = 74 }

</bundles_post_ra>
